<compile_context>
chip_gen: v7x
topology: tpu7x:2x2x1
jax: 0.10.0
libtpu: 0.0.40
codegen_flags: <defaults>
</compile_context>

<pallas_src>
import math

import jax
import jax.numpy as jnp
from jax.experimental import pallas as pl
from jax.experimental.pallas import tpu as pltpu


def _up_kernel(x_ref, lhp_ref, lwp_ref, w1_ref, b1_ref, w2_ref, b2_ref,
               o_ref, pad1_ref, pad2_ref):
    # x_ref   : (1, C_in*H, W)       VMEM (host-side free reshape of NCHW block)
    # lhp_ref : (H2+4, H)            VMEM, whole-array resident (not pipelined)
    # lwp_ref : (W, W2+4)            VMEM, whole-array resident (not pipelined)
    # w*_ref, b*_ref : folded conv weights / biases (flattened scalars, SMEM)
    # o_ref   : (1, C_out, H2, W2)   VMEM
    # pad1_ref: (C_in, H2+4, W2+4)   scratch: 2-pixel zero-padded upsample
    # pad2_ref: (C_mid, H2+2, W2+2)  scratch: 1-pixel zero-padded conv1 output
    _, c_out, h2, w2 = o_ref.shape
    c_in = pad1_ref.shape[0]
    c_mid = pad2_ref.shape[0]
    h_in = x_ref.shape[1] // c_in

    lwp = lwp_ref[...]                                   # (W,    W2+4)
    lhp = lhp_ref[...]                                   # (H2+4, H)

    # ---- bilinear x2 upsample (align_corners=True), fused with zero padding --
    # One batched matmul for the W-direction interp over all channels (channel
    # axis folded into the matmul M dim), then a small per-channel matmul for
    # the H-direction interp.  The interp matrices carry a 2-row/col zero
    # border, so the matmul result is directly the padded conv1 input plane.
    t_all = jnp.dot(x_ref[0], lwp, preferred_element_type=jnp.float32)  # (C_in*H, W2+4)
    for ci in range(c_in):
        t_c = t_all[ci * h_in:(ci + 1) * h_in, :]        # (H, W2+4) sublane slice
        pad1_ref[ci] = jnp.dot(lhp, t_c, preferred_element_type=jnp.float32)

    # ---- conv1 3x3 (BN folded) + ReLU : unrolled VPU broadcast-MAC ----------
    # Evaluated on the extended (H2+2, W2+2) grid so that, after masking the
    # 1-pixel border to zero, the result is exactly the zero-padded conv2
    # input.  This replaces the former identity-matrix re-pad matmuls and
    # keeps every scratch store a full-window (aligned) store.
    acc1 = [jnp.zeros((h2 + 2, w2 + 2), jnp.float32) for _ in range(c_mid)]
    for ci in range(c_in):
        for dy in range(3):
            for dx in range(3):
                patch = pad1_ref[ci, dy:dy + h2 + 2, dx:dx + w2 + 2]
                for co in range(c_mid):
                    wv = w1_ref[((co * c_in + ci) * 3 + dy) * 3 + dx]
                    acc1[co] = acc1[co] + wv * patch

    rr = jax.lax.broadcasted_iota(jnp.int32, (h2 + 2, w2 + 2), 0)
    qq = jax.lax.broadcasted_iota(jnp.int32, (h2 + 2, w2 + 2), 1)
    interior = (rr >= 1) & (rr <= h2) & (qq >= 1) & (qq <= w2)
    for co in range(c_mid):
        y = jnp.maximum(acc1[co] + b1_ref[co], 0.0)
        pad2_ref[co] = jnp.where(interior, y, 0.0)       # zero border every step

    # ---- conv2 3x3 (BN folded) + ReLU ---------------------------------------
    acc2 = [jnp.zeros((h2, w2), jnp.float32) for _ in range(c_out)]
    for ci in range(c_mid):
        for dy in range(3):
            for dx in range(3):
                patch = pad2_ref[ci, dy:dy + h2, dx:dx + w2]
                for co in range(c_out):
                    wv = w2_ref[((co * c_mid + ci) * 3 + dy) * 3 + dx]
                    acc2[co] = acc2[co] + wv * patch

    # TODO(synk): output stores are (H2, W2)-shaped (32-lane masked vst); a
    #             lane-dense (C_out, H2*W2) store needs an in-kernel relayout
    #             of the W2(<128) minor dim, deferred with the MXU rewrite.
    for co in range(c_out):
        o_ref[0, co] = jnp.maximum(acc2[co] + b2_ref[co], 0.0).astype(o_ref.dtype)


def _bilinear_matrix(n_in, n_out, dtype=jnp.float32):
    """(n_out, n_in) matrix M with y = M @ x == 1-D bilinear resize,
    matching nn.Upsample(mode='bilinear', align_corners=True)."""
    if n_out > 1:
        src = jnp.arange(n_out, dtype=jnp.float32) * ((n_in - 1) / (n_out - 1))
    else:
        src = jnp.zeros((1,), jnp.float32)
    lo = jnp.clip(jnp.floor(src), 0, n_in - 1).astype(jnp.int32)
    hi = jnp.clip(lo + 1, 0, n_in - 1)
    frac = src - lo.astype(jnp.float32)
    rows = jnp.arange(n_out)
    m = jnp.zeros((n_out, n_in), dtype)
    m = m.at[rows, lo].add((1.0 - frac).astype(dtype))
    m = m.at[rows, hi].add(frac.astype(dtype))
    return m


def up_forward(x, params, *, eps=1e-5):
    """Forward pass of Up(in_channels, out_channels, bilinear=True) in NCHW."""
    (w1, b1, g1, be1, m1, v1, w2, b2, g2, be2, m2, v2) = params
    N, C_in, H, W = x.shape
    C_mid = w1.shape[0]          # = out_channels (conv1 output)
    C_out = w2.shape[0]          # = out_channels
    H2, W2 = 2 * H, 2 * W

    # Fold eval-mode BatchNorm into the conv weights / biases.
    s1 = g1 / jnp.sqrt(v1 + eps)
    w1f = (w1 * s1[:, None, None, None]).astype(jnp.float32)
    b1f = ((b1 - m1) * s1 + be1).astype(jnp.float32)
    s2 = g2 / jnp.sqrt(v2 + eps)
    w2f = (w2 * s2[:, None, None, None]).astype(jnp.float32)
    b2f = ((b2 - m2) * s2 + be2).astype(jnp.float32)

    # Bilinear interpolation matrices with a 2-pixel zero border folded in, so
    # the upsample matmuls directly emit the padded conv1 input plane.
    lh = _bilinear_matrix(H, H2)                       # (H2, H)
    lw_t = _bilinear_matrix(W, W2).T                   # (W, W2)
    lh_pad = jnp.zeros((H2 + 4, H), jnp.float32).at[2:H2 + 2, :].set(lh)
    lw_pad = jnp.zeros((W, W2 + 4), jnp.float32).at[:, 2:W2 + 2].set(lw_t)

    # Free host-side reshape: the kernel's W-interp becomes one batched matmul.
    x2 = x.reshape(N, C_in * H, W)

    flops = int(
        2 * N * C_in * (H * W * (W2 + 4) + (H2 + 4) * H * (W2 + 4))      # upsample
        + 2 * N * C_mid * C_in * 9 * (H2 + 2) * (W2 + 2)                 # conv1
        + 2 * N * C_out * C_mid * 9 * H2 * W2)                           # conv2
    bytes_accessed = int(4 * (x.size + N * C_out * H2 * W2
                              + lh_pad.size + lw_pad.size
                              + w1f.size + b1f.size + w2f.size + b2f.size))

    out = pl.pallas_call(
        _up_kernel,
        out_shape=jax.ShapeDtypeStruct((N, C_out, H2, W2), x.dtype),
        grid_spec=pltpu.PrefetchScalarGridSpec(
            num_scalar_prefetch=0,
            grid=(N,),
            in_specs=[
                pl.BlockSpec((1, C_in * H, W), lambda n: (n, 0, 0)),
                # Grid-invariant interp matrices: whole-array resident in VMEM
                # (single copy, no per-step double-buffered pipeline).
                pl.BlockSpec(memory_space=pltpu.MemorySpace.VMEM),
                pl.BlockSpec(memory_space=pltpu.MemorySpace.VMEM),
                pl.BlockSpec(memory_space=pltpu.MemorySpace.SMEM),  # w1 (flat)
                pl.BlockSpec(memory_space=pltpu.MemorySpace.SMEM),  # b1
                pl.BlockSpec(memory_space=pltpu.MemorySpace.SMEM),  # w2 (flat)
                pl.BlockSpec(memory_space=pltpu.MemorySpace.SMEM),  # b2
            ],
            out_specs=pl.BlockSpec((1, C_out, H2, W2), lambda n: (n, 0, 0, 0)),
            scratch_shapes=[
                pltpu.VMEM((C_in, H2 + 4, W2 + 4), jnp.float32),   # padded upsample
                pltpu.VMEM((C_mid, H2 + 2, W2 + 2), jnp.float32),  # padded conv1 act
            ],
        ),
        # TODO(synk): when N == 1, add a second "parallel" grid axis (e.g. over
        #             output-row blocks) so both v7x TensorCores get work, and
        #             add channel/row tiling + vmem_limit_bytes for real U-Net
        #             sizes so the fused per-image scratch fits 64 MiB VMEM.
        compiler_params=pltpu.CompilerParams(
            dimension_semantics=("parallel",)),
        cost_estimate=pl.CostEstimate(
            flops=flops, transcendentals=0, bytes_accessed=bytes_accessed),
    )(x2, lh_pad, lw_pad,
      w1f.reshape(-1), b1f, w2f.reshape(-1), b2f)
    return out


def up_reference(x, params, *, eps=1e-5):
    """Pure-JAX reference: bilinear x2 (align_corners=True) + 2x(conv3x3+BN+ReLU)."""
    (w1, b1, g1, be1, m1, v1, w2, b2, g2, be2, m2, v2) = params
    hp = jax.lax.Precision.HIGHEST
    N, C_in, H, W = x.shape
    lh = _bilinear_matrix(H, 2 * H)
    lw_t = _bilinear_matrix(W, 2 * W).T
    up = jnp.einsum('ph,nchw->ncpw', lh, x, precision=hp)
    up = jnp.einsum('ncpw,wq->ncpq', up, lw_t, precision=hp)

    def conv_bn_relu(z, w, b, g, be, m, v):
        y = jax.lax.conv_general_dilated(
            z, w, window_strides=(1, 1), padding=((1, 1), (1, 1)),
            dimension_numbers=('NCHW', 'OIHW', 'NCHW'), precision=hp)
        y = y + b[None, :, None, None]
        y = (y - m[None, :, None, None]) / jnp.sqrt(v + eps)[None, :, None, None]
        y = y * g[None, :, None, None] + be[None, :, None, None]
        return jnp.maximum(y, 0.0)

    y = conv_bn_relu(up, w1, b1, g1, be1, m1, v1)
    return conv_bn_relu(y, w2, b2, g2, be2, m2, v2)


def init_up_params(key, in_channels, out_channels):
    """Conv params like PyTorch defaults; BN in eval mode with non-trivial stats."""
    ks = jax.random.split(key, 12)

    def u(k, shape, bound):
        return jax.random.uniform(k, shape, minval=-bound, maxval=bound,
                                  dtype=jnp.float32)

    bound1 = 1.0 / math.sqrt(in_channels * 9)
    w1 = u(ks[0], (out_channels, in_channels, 3, 3), bound1)
    b1 = u(ks[1], (out_channels,), bound1)
    bound2 = 1.0 / math.sqrt(out_channels * 9)
    w2 = u(ks[2], (out_channels, out_channels, 3, 3), bound2)
    b2 = u(ks[3], (out_channels,), bound2)

    g1 = jax.random.uniform(ks[4], (out_channels,), minval=0.5, maxval=1.5,
                            dtype=jnp.float32)
    be1 = u(ks[5], (out_channels,), 0.5)
    m1 = u(ks[6], (out_channels,), 0.5)
    v1 = jax.random.uniform(ks[7], (out_channels,), minval=0.5, maxval=1.5,
                            dtype=jnp.float32)
    g2 = jax.random.uniform(ks[8], (out_channels,), minval=0.5, maxval=1.5,
                            dtype=jnp.float32)
    be2 = u(ks[9], (out_channels,), 0.5)
    m2 = u(ks[10], (out_channels,), 0.5)
    v2 = jax.random.uniform(ks[11], (out_channels,), minval=0.5, maxval=1.5,
                            dtype=jnp.float32)
    return (w1, b1, g1, be1, m1, v1, w2, b2, g2, be2, m2, v2)


if __name__ == "__main__":
    key = jax.random.PRNGKey(0)
    kx, kp = jax.random.split(key)

    N, C_in, H, W = 2, 4, 16, 16
    C_out = 3

    x = jax.random.normal(kx, (N, C_in, H, W), dtype=jnp.float32)
    params = init_up_params(kp, C_in, C_out)

    out = up_forward(x, params)
    out = jax.block_until_ready(out)

    ref = up_reference(x, params)
    assert out.shape == (N, C_out, 2 * H, 2 * W)
    max_diff = float(jnp.max(jnp.abs(out - ref)))
    assert jnp.allclose(out, ref, atol=1e-3, rtol=1e-3), f"max abs diff {max_diff}"

    print("KERNEL_OK")
</pallas_src>

<mosaic_0001>
module attributes {stable_mosaic.version = 11 : i64} {
  func.func @_up_kernel(%arg0: i32, %arg1: memref<1x64x16xf32, #tpu.memory_space<vmem>>, %arg2: memref<36x16xf32, #tpu.memory_space<vmem>>, %arg3: memref<16x36xf32, #tpu.memory_space<vmem>>, %arg4: memref<108xf32, #tpu.memory_space<smem>>, %arg5: memref<3xf32, #tpu.memory_space<smem>>, %arg6: memref<81xf32, #tpu.memory_space<smem>>, %arg7: memref<3xf32, #tpu.memory_space<smem>>, %arg8: memref<1x3x32x32xf32, #tpu.memory_space<vmem>>, %arg9: memref<4x36x36xf32, #tpu.memory_space<vmem>>, %arg10: memref<3x34x34xf32, #tpu.memory_space<vmem>>) attributes {dimension_semantics = [#tpu.dimension_semantics<parallel>], iteration_bounds = array<i64: 2>, scalar_prefetch = 0 : i64, scratch_operands = 2 : i64, tpu.core_type = #tpu.core_type<tc>, window_params = [{transform_indices = @transform_0, window_bounds = array<i64: 1, 64, 16>}, {pipeline_mode = #tpu.pipeline_mode<synchronous>, transform_indices = @transform_1, window_bounds = array<i64: 36, 16>}, {pipeline_mode = #tpu.pipeline_mode<synchronous>, transform_indices = @transform_2, window_bounds = array<i64: 16, 36>}, {transform_indices = @transform_3, window_bounds = array<i64: 108>}, {transform_indices = @transform_4, window_bounds = array<i64: 3>}, {transform_indices = @transform_5, window_bounds = array<i64: 81>}, {transform_indices = @transform_6, window_bounds = array<i64: 3>}, {transform_indices = @transform_7, window_bounds = array<i64: 1, 3, 32, 32>}]} {
    %c0 = arith.constant 0 : index
    %c0_0 = arith.constant 0 : index
    %0 = vector.load %arg3[%c0, %c0_0] : memref<16x36xf32, #tpu.memory_space<vmem>>, vector<16x36xf32>
    %c0_1 = arith.constant 0 : index
    %c0_2 = arith.constant 0 : index
    %1 = vector.load %arg2[%c0_1, %c0_2] : memref<36x16xf32, #tpu.memory_space<vmem>>, vector<36x16xf32>
    %c0_3 = arith.constant 0 : index
    %c0_4 = arith.constant 0 : index
    %c0_5 = arith.constant 0 : index
    %2 = vector.load %arg1[%c0_3, %c0_4, %c0_5] : memref<1x64x16xf32, #tpu.memory_space<vmem>>, vector<1x64x16xf32>
    %3 = vector.shape_cast %2 : vector<1x64x16xf32> to vector<64x16xf32>
    %cst = arith.constant dense<0.000000e+00> : vector<64x36xf32>
    %4 = tpu.matmul %3, %0, %cst {dimension_numbers = #tpu.dot_dimension_numbers<[1], [0], [0], [1], [0, 0, 1, 1], [], []>} : vector<64x16xf32>, vector<16x36xf32>, vector<64x36xf32> -> vector<64x36xf32>
    %5 = vector.extract_strided_slice %4 {offsets = [0, 0], sizes = [16, 36], strides = [1, 1]} : vector<64x36xf32> to vector<16x36xf32>
    %cst_6 = arith.constant dense<0.000000e+00> : vector<36x36xf32>
    %6 = tpu.matmul %1, %5, %cst_6 {dimension_numbers = #tpu.dot_dimension_numbers<[1], [0], [0], [1], [0, 0, 1, 1], [], []>} : vector<36x16xf32>, vector<16x36xf32>, vector<36x36xf32> -> vector<36x36xf32>
    %c0_7 = arith.constant 0 : index
    %c0_8 = arith.constant 0 : index
    %c0_9 = arith.constant 0 : index
    %7 = vector.load %arg9[%c0_7, %c0_8, %c0_9] : memref<4x36x36xf32, #tpu.memory_space<vmem>>, vector<1x36x36xf32>
    %8 = vector.shape_cast %7 : vector<1x36x36xf32> to vector<36x36xf32>
    %9 = vector.shape_cast %6 : vector<36x36xf32> to vector<1x36x36xf32>
    tpu.vector_store %arg9[%c0_7, %c0_8, %c0_9], %9 {strides = array<i32>} : memref<4x36x36xf32, #tpu.memory_space<vmem>>, vector<1x36x36xf32>,
    %10 = vector.extract_strided_slice %4 {offsets = [16, 0], sizes = [16, 36], strides = [1, 1]} : vector<64x36xf32> to vector<16x36xf32>
    %cst_10 = arith.constant dense<0.000000e+00> : vector<36x36xf32>
    %11 = tpu.matmul %1, %10, %cst_10 {dimension_numbers = #tpu.dot_dimension_numbers<[1], [0], [0], [1], [0, 0, 1, 1], [], []>} : vector<36x16xf32>, vector<16x36xf32>, vector<36x36xf32> -> vector<36x36xf32>
    %c1 = arith.constant 1 : index
    %c0_11 = arith.constant 0 : index
    %c0_12 = arith.constant 0 : index
    %12 = vector.load %arg9[%c1, %c0_11, %c0_12] : memref<4x36x36xf32, #tpu.memory_space<vmem>>, vector<1x36x36xf32>
    %13 = vector.shape_cast %12 : vector<1x36x36xf32> to vector<36x36xf32>
    %14 = vector.shape_cast %11 : vector<36x36xf32> to vector<1x36x36xf32>
    tpu.vector_store %arg9[%c1, %c0_11, %c0_12], %14 {strides = array<i32>} : memref<4x36x36xf32, #tpu.memory_space<vmem>>, vector<1x36x36xf32>,
    %15 = vector.extract_strided_slice %4 {offsets = [32, 0], sizes = [16, 36], strides = [1, 1]} : vector<64x36xf32> to vector<16x36xf32>
    %cst_13 = arith.constant dense<0.000000e+00> : vector<36x36xf32>
    %16 = tpu.matmul %1, %15, %cst_13 {dimension_numbers = #tpu.dot_dimension_numbers<[1], [0], [0], [1], [0, 0, 1, 1], [], []>} : vector<36x16xf32>, vector<16x36xf32>, vector<36x36xf32> -> vector<36x36xf32>
    %c2 = arith.constant 2 : index
    %c0_14 = arith.constant 0 : index
    %c0_15 = arith.constant 0 : index
    %17 = vector.load %arg9[%c2, %c0_14, %c0_15] : memref<4x36x36xf32, #tpu.memory_space<vmem>>, vector<1x36x36xf32>
    %18 = vector.shape_cast %17 : vector<1x36x36xf32> to vector<36x36xf32>
    %19 = vector.shape_cast %16 : vector<36x36xf32> to vector<1x36x36xf32>
    tpu.vector_store %arg9[%c2, %c0_14, %c0_15], %19 {strides = array<i32>} : memref<4x36x36xf32, #tpu.memory_space<vmem>>, vector<1x36x36xf32>,
    %20 = vector.extract_strided_slice %4 {offsets = [48, 0], sizes = [16, 36], strides = [1, 1]} : vector<64x36xf32> to vector<16x36xf32>
    %cst_16 = arith.constant dense<0.000000e+00> : vector<36x36xf32>
    %21 = tpu.matmul %1, %20, %cst_16 {dimension_numbers = #tpu.dot_dimension_numbers<[1], [0], [0], [1], [0, 0, 1, 1], [], []>} : vector<36x16xf32>, vector<16x36xf32>, vector<36x36xf32> -> vector<36x36xf32>
    %c3 = arith.constant 3 : index
    %c0_17 = arith.constant 0 : index
    %c0_18 = arith.constant 0 : index
    %22 = vector.load %arg9[%c3, %c0_17, %c0_18] : memref<4x36x36xf32, #tpu.memory_space<vmem>>, vector<1x36x36xf32>
    %23 = vector.shape_cast %22 : vector<1x36x36xf32> to vector<36x36xf32>
    %24 = vector.shape_cast %21 : vector<36x36xf32> to vector<1x36x36xf32>
    tpu.vector_store %arg9[%c3, %c0_17, %c0_18], %24 {strides = array<i32>} : memref<4x36x36xf32, #tpu.memory_space<vmem>>, vector<1x36x36xf32>,
    %cst_19 = arith.constant 0.000000e+00 : f32
    %25 = vector.broadcast %cst_19 : f32 to vector<34x34xf32>
    %cst_20 = arith.constant 0.000000e+00 : f32
    %26 = vector.broadcast %cst_20 : f32 to vector<34x34xf32>
    %cst_21 = arith.constant 0.000000e+00 : f32
    %27 = vector.broadcast %cst_21 : f32 to vector<34x34xf32>
    %c0_22 = arith.constant 0 : index
    %c0_23 = arith.constant 0 : index
    %c0_24 = arith.constant 0 : index
    %28 = vector.load %arg9[%c0_22, %c0_23, %c0_24] : memref<4x36x36xf32, #tpu.memory_space<vmem>>, vector<1x34x34xf32>
    %29 = vector.shape_cast %28 : vector<1x34x34xf32> to vector<34x34xf32>
    %c0_25 = arith.constant 0 : index
    %30 = memref.load %arg4[%c0_25] : memref<108xf32, #tpu.memory_space<smem>>
    %31 = vector.broadcast %30 : f32 to vector<34x34xf32>
    %32 = arith.mulf %31, %29 : vector<34x34xf32>
    %33 = arith.addf %25, %32 : vector<34x34xf32>
    %c36 = arith.constant 36 : index
    %34 = memref.load %arg4[%c36] : memref<108xf32, #tpu.memory_space<smem>>
    %35 = vector.broadcast %34 : f32 to vector<34x34xf32>
    %36 = arith.mulf %35, %29 : vector<34x34xf32>
    %37 = arith.addf %26, %36 : vector<34x34xf32>
    %c72 = arith.constant 72 : index
    %38 = memref.load %arg4[%c72] : memref<108xf32, #tpu.memory_space<smem>>
    %39 = vector.broadcast %38 : f32 to vector<34x34xf32>
    %40 = arith.mulf %39, %29 : vector<34x34xf32>
    %41 = arith.addf %27, %40 : vector<34x34xf32>
    %c0_26 = arith.constant 0 : index
    %c0_27 = arith.constant 0 : index
    %c1_28 = arith.constant 1 : index
    %42 = vector.load %arg9[%c0_26, %c0_27, %c1_28] : memref<4x36x36xf32, #tpu.memory_space<vmem>>, vector<1x34x34xf32>
    %43 = vector.shape_cast %42 : vector<1x34x34xf32> to vector<34x34xf32>
    %c1_29 = arith.constant 1 : index
    %44 = memref.load %arg4[%c1_29] : memref<108xf32, #tpu.memory_space<smem>>
    %45 = vector.broadcast %44 : f32 to vector<34x34xf32>
    %46 = arith.mulf %45, %43 : vector<34x34xf32>
    %47 = arith.addf %33, %46 : vector<34x34xf32>
    %c37 = arith.constant 37 : index
    %48 = memref.load %arg4[%c37] : memref<108xf32, #tpu.memory_space<smem>>
    %49 = vector.broadcast %48 : f32 to vector<34x34xf32>
    %50 = arith.mulf %49, %43 : vector<34x34xf32>
    %51 = arith.addf %37, %50 : vector<34x34xf32>
    %c73 = arith.constant 73 : index
    %52 = memref.load %arg4[%c73] : memref<108xf32, #tpu.memory_space<smem>>
    %53 = vector.broadcast %52 : f32 to vector<34x34xf32>
    %54 = arith.mulf %53, %43 : vector<34x34xf32>
    %55 = arith.addf %41, %54 : vector<34x34xf32>
    %c0_30 = arith.constant 0 : index
    %c0_31 = arith.constant 0 : index
    %c2_32 = arith.constant 2 : index
    %56 = vector.load %arg9[%c0_30, %c0_31, %c2_32] : memref<4x36x36xf32, #tpu.memory_space<vmem>>, vector<1x34x34xf32>
    %57 = vector.shape_cast %56 : vector<1x34x34xf32> to vector<34x34xf32>
    %c2_33 = arith.constant 2 : index
    %58 = memref.load %arg4[%c2_33] : memref<108xf32, #tpu.memory_space<smem>>
    %59 = vector.broadcast %58 : f32 to vector<34x34xf32>
    %60 = arith.mulf %59, %57 : vector<34x34xf32>
    %61 = arith.addf %47, %60 : vector<34x34xf32>
    %c38 = arith.constant 38 : index
    %62 = memref.load %arg4[%c38] : memref<108xf32, #tpu.memory_space<smem>>
    %63 = vector.broadcast %62 : f32 to vector<34x34xf32>
    %64 = arith.mulf %63, %57 : vector<34x34xf32>
    %65 = arith.addf %51, %64 : vector<34x34xf32>
    %c74 = arith.constant 74 : index
    %66 = memref.load %arg4[%c74] : memref<108xf32, #tpu.memory_space<smem>>
    %67 = vector.broadcast %66 : f32 to vector<34x34xf32>
    %68 = arith.mulf %67, %57 : vector<34x34xf32>
    %69 = arith.addf %55, %68 : vector<34x34xf32>
    %c0_34 = arith.constant 0 : index
    %c1_35 = arith.constant 1 : index
    %c0_36 = arith.constant 0 : index
    %70 = vector.load %arg9[%c0_34, %c1_35, %c0_36] : memref<4x36x36xf32, #tpu.memory_space<vmem>>, vector<1x34x34xf32>
    %71 = vector.shape_cast %70 : vector<1x34x34xf32> to vector<34x34xf32>
    %c3_37 = arith.constant 3 : index
    %72 = memref.load %arg4[%c3_37] : memref<108xf32, #tpu.memory_space<smem>>
    %73 = vector.broadcast %72 : f32 to vector<34x34xf32>
    %74 = arith.mulf %73, %71 : vector<34x34xf32>
    %75 = arith.addf %61, %74 : vector<34x34xf32>
    %c39 = arith.constant 39 : index
    %76 = memref.load %arg4[%c39] : memref<108xf32, #tpu.memory_space<smem>>
    %77 = vector.broadcast %76 : f32 to vector<34x34xf32>
    %78 = arith.mulf %77, %71 : vector<34x34xf32>
    %79 = arith.addf %65, %78 : vector<34x34xf32>
    %c75 = arith.constant 75 : index
    %80 = memref.load %arg4[%c75] : memref<108xf32, #tpu.memory_space<smem>>
    %81 = vector.broadcast %80 : f32 to vector<34x34xf32>
    %82 = arith.mulf %81, %71 : vector<34x34xf32>
    %83 = arith.addf %69, %82 : vector<34x34xf32>
    %c0_38 = arith.constant 0 : index
    %c1_39 = arith.constant 1 : index
    %c1_40 = arith.constant 1 : index
    %84 = vector.load %arg9[%c0_38, %c1_39, %c1_40] : memref<4x36x36xf32, #tpu.memory_space<vmem>>, vector<1x34x34xf32>
    %85 = vector.shape_cast %84 : vector<1x34x34xf32> to vector<34x34xf32>
    %c4 = arith.constant 4 : index
    %86 = memref.load %arg4[%c4] : memref<108xf32, #tpu.memory_space<smem>>
    %87 = vector.broadcast %86 : f32 to vector<34x34xf32>
    %88 = arith.mulf %87, %85 : vector<34x34xf32>
    %89 = arith.addf %75, %88 : vector<34x34xf32>
    %c40 = arith.constant 40 : index
    %90 = memref.load %arg4[%c40] : memref<108xf32, #tpu.memory_space<smem>>
    %91 = vector.broadcast %90 : f32 to vector<34x34xf32>
    %92 = arith.mulf %91, %85 : vector<34x34xf32>
    %93 = arith.addf %79, %92 : vector<34x34xf32>
    %c76 = arith.constant 76 : index
    %94 = memref.load %arg4[%c76] : memref<108xf32, #tpu.memory_space<smem>>
    %95 = vector.broadcast %94 : f32 to vector<34x34xf32>
    %96 = arith.mulf %95, %85 : vector<34x34xf32>
    %97 = arith.addf %83, %96 : vector<34x34xf32>
    %c0_41 = arith.constant 0 : index
    %c1_42 = arith.constant 1 : index
    %c2_43 = arith.constant 2 : index
    %98 = vector.load %arg9[%c0_41, %c1_42, %c2_43] : memref<4x36x36xf32, #tpu.memory_space<vmem>>, vector<1x34x34xf32>
    %99 = vector.shape_cast %98 : vector<1x34x34xf32> to vector<34x34xf32>
    %c5 = arith.constant 5 : index
    %100 = memref.load %arg4[%c5] : memref<108xf32, #tpu.memory_space<smem>>
    %101 = vector.broadcast %100 : f32 to vector<34x34xf32>
    %102 = arith.mulf %101, %99 : vector<34x34xf32>
    %103 = arith.addf %89, %102 : vector<34x34xf32>
    %c41 = arith.constant 41 : index
    %104 = memref.load %arg4[%c41] : memref<108xf32, #tpu.memory_space<smem>>
    %105 = vector.broadcast %104 : f32 to vector<34x34xf32>
    %106 = arith.mulf %105, %99 : vector<34x34xf32>
    %107 = arith.addf %93, %106 : vector<34x34xf32>
    %c77 = arith.constant 77 : index
    %108 = memref.load %arg4[%c77] : memref<108xf32, #tpu.memory_space<smem>>
    %109 = vector.broadcast %108 : f32 to vector<34x34xf32>
    %110 = arith.mulf %109, %99 : vector<34x34xf32>
    %111 = arith.addf %97, %110 : vector<34x34xf32>
    %c0_44 = arith.constant 0 : index
    %c2_45 = arith.constant 2 : index
    %c0_46 = arith.constant 0 : index
    %112 = vector.load %arg9[%c0_44, %c2_45, %c0_46] : memref<4x36x36xf32, #tpu.memory_space<vmem>>, vector<1x34x34xf32>
    %113 = vector.shape_cast %112 : vector<1x34x34xf32> to vector<34x34xf32>
    %c6 = arith.constant 6 : index
    %114 = memref.load %arg4[%c6] : memref<108xf32, #tpu.memory_space<smem>>
    %115 = vector.broadcast %114 : f32 to vector<34x34xf32>
    %116 = arith.mulf %115, %113 : vector<34x34xf32>
    %117 = arith.addf %103, %116 : vector<34x34xf32>
    %c42 = arith.constant 42 : index
    %118 = memref.load %arg4[%c42] : memref<108xf32, #tpu.memory_space<smem>>
    %119 = vector.broadcast %118 : f32 to vector<34x34xf32>
    %120 = arith.mulf %119, %113 : vector<34x34xf32>
    %121 = arith.addf %107, %120 : vector<34x34xf32>
    %c78 = arith.constant 78 : index
    %122 = memref.load %arg4[%c78] : memref<108xf32, #tpu.memory_space<smem>>
    %123 = vector.broadcast %122 : f32 to vector<34x34xf32>
    %124 = arith.mulf %123, %113 : vector<34x34xf32>
    %125 = arith.addf %111, %124 : vector<34x34xf32>
    %c0_47 = arith.constant 0 : index
    %c2_48 = arith.constant 2 : index
    %c1_49 = arith.constant 1 : index
    %126 = vector.load %arg9[%c0_47, %c2_48, %c1_49] : memref<4x36x36xf32, #tpu.memory_space<vmem>>, vector<1x34x34xf32>
    %127 = vector.shape_cast %126 : vector<1x34x34xf32> to vector<34x34xf32>
    %c7 = arith.constant 7 : index
    %128 = memref.load %arg4[%c7] : memref<108xf32, #tpu.memory_space<smem>>
    %129 = vector.broadcast %128 : f32 to vector<34x34xf32>
    %130 = arith.mulf %129, %127 : vector<34x34xf32>
    %131 = arith.addf %117, %130 : vector<34x34xf32>
    %c43 = arith.constant 43 : index
    %132 = memref.load %arg4[%c43] : memref<108xf32, #tpu.memory_space<smem>>
    %133 = vector.broadcast %132 : f32 to vector<34x34xf32>
    %134 = arith.mulf %133, %127 : vector<34x34xf32>
    %135 = arith.addf %121, %134 : vector<34x34xf32>
    %c79 = arith.constant 79 : index
    %136 = memref.load %arg4[%c79] : memref<108xf32, #tpu.memory_space<smem>>
    %137 = vector.broadcast %136 : f32 to vector<34x34xf32>
    %138 = arith.mulf %137, %127 : vector<34x34xf32>
    %139 = arith.addf %125, %138 : vector<34x34xf32>
    %c0_50 = arith.constant 0 : index
    %c2_51 = arith.constant 2 : index
    %c2_52 = arith.constant 2 : index
    %140 = vector.load %arg9[%c0_50, %c2_51, %c2_52] : memref<4x36x36xf32, #tpu.memory_space<vmem>>, vector<1x34x34xf32>
    %141 = vector.shape_cast %140 : vector<1x34x34xf32> to vector<34x34xf32>
    %c8 = arith.constant 8 : index
    %142 = memref.load %arg4[%c8] : memref<108xf32, #tpu.memory_space<smem>>
    %143 = vector.broadcast %142 : f32 to vector<34x34xf32>
    %144 = arith.mulf %143, %141 : vector<34x34xf32>
    %145 = arith.addf %131, %144 : vector<34x34xf32>
    %c44 = arith.constant 44 : index
    %146 = memref.load %arg4[%c44] : memref<108xf32, #tpu.memory_space<smem>>
    %147 = vector.broadcast %146 : f32 to vector<34x34xf32>
    %148 = arith.mulf %147, %141 : vector<34x34xf32>
    %149 = arith.addf %135, %148 : vector<34x34xf32>
    %c80 = arith.constant 80 : index
    %150 = memref.load %arg4[%c80] : memref<108xf32, #tpu.memory_space<smem>>
    %151 = vector.broadcast %150 : f32 to vector<34x34xf32>
    %152 = arith.mulf %151, %141 : vector<34x34xf32>
    %153 = arith.addf %139, %152 : vector<34x34xf32>
    %c1_53 = arith.constant 1 : index
    %c0_54 = arith.constant 0 : index
    %c0_55 = arith.constant 0 : index
    %154 = vector.load %arg9[%c1_53, %c0_54, %c0_55] : memref<4x36x36xf32, #tpu.memory_space<vmem>>, vector<1x34x34xf32>
    %155 = vector.shape_cast %154 : vector<1x34x34xf32> to vector<34x34xf32>
    %c9 = arith.constant 9 : index
    %156 = memref.load %arg4[%c9] : memref<108xf32, #tpu.memory_space<smem>>
    %157 = vector.broadcast %156 : f32 to vector<34x34xf32>
    %158 = arith.mulf %157, %155 : vector<34x34xf32>
    %159 = arith.addf %145, %158 : vector<34x34xf32>
    %c45 = arith.constant 45 : index
    %160 = memref.load %arg4[%c45] : memref<108xf32, #tpu.memory_space<smem>>
    %161 = vector.broadcast %160 : f32 to vector<34x34xf32>
    %162 = arith.mulf %161, %155 : vector<34x34xf32>
    %163 = arith.addf %149, %162 : vector<34x34xf32>
    %c81 = arith.constant 81 : index
    %164 = memref.load %arg4[%c81] : memref<108xf32, #tpu.memory_space<smem>>
    %165 = vector.broadcast %164 : f32 to vector<34x34xf32>
    %166 = arith.mulf %165, %155 : vector<34x34xf32>
    %167 = arith.addf %153, %166 : vector<34x34xf32>
    %c1_56 = arith.constant 1 : index
    %c0_57 = arith.constant 0 : index
    %c1_58 = arith.constant 1 : index
    %168 = vector.load %arg9[%c1_56, %c0_57, %c1_58] : memref<4x36x36xf32, #tpu.memory_space<vmem>>, vector<1x34x34xf32>
    %169 = vector.shape_cast %168 : vector<1x34x34xf32> to vector<34x34xf32>
    %c10 = arith.constant 10 : index
    %170 = memref.load %arg4[%c10] : memref<108xf32, #tpu.memory_space<smem>>
    %171 = vector.broadcast %170 : f32 to vector<34x34xf32>
    %172 = arith.mulf %171, %169 : vector<34x34xf32>
    %173 = arith.addf %159, %172 : vector<34x34xf32>
    %c46 = arith.constant 46 : index
    %174 = memref.load %arg4[%c46] : memref<108xf32, #tpu.memory_space<smem>>
    %175 = vector.broadcast %174 : f32 to vector<34x34xf32>
    %176 = arith.mulf %175, %169 : vector<34x34xf32>
    %177 = arith.addf %163, %176 : vector<34x34xf32>
    %c82 = arith.constant 82 : index
    %178 = memref.load %arg4[%c82] : memref<108xf32, #tpu.memory_space<smem>>
    %179 = vector.broadcast %178 : f32 to vector<34x34xf32>
    %180 = arith.mulf %179, %169 : vector<34x34xf32>
    %181 = arith.addf %167, %180 : vector<34x34xf32>
    %c1_59 = arith.constant 1 : index
    %c0_60 = arith.constant 0 : index
    %c2_61 = arith.constant 2 : index
    %182 = vector.load %arg9[%c1_59, %c0_60, %c2_61] : memref<4x36x36xf32, #tpu.memory_space<vmem>>, vector<1x34x34xf32>
    %183 = vector.shape_cast %182 : vector<1x34x34xf32> to vector<34x34xf32>
    %c11 = arith.constant 11 : index
    %184 = memref.load %arg4[%c11] : memref<108xf32, #tpu.memory_space<smem>>
    %185 = vector.broadcast %184 : f32 to vector<34x34xf32>
    %186 = arith.mulf %185, %183 : vector<34x34xf32>
    %187 = arith.addf %173, %186 : vector<34x34xf32>
    %c47 = arith.constant 47 : index
    %188 = memref.load %arg4[%c47] : memref<108xf32, #tpu.memory_space<smem>>
    %189 = vector.broadcast %188 : f32 to vector<34x34xf32>
    %190 = arith.mulf %189, %183 : vector<34x34xf32>
    %191 = arith.addf %177, %190 : vector<34x34xf32>
    %c83 = arith.constant 83 : index
    %192 = memref.load %arg4[%c83] : memref<108xf32, #tpu.memory_space<smem>>
    %193 = vector.broadcast %192 : f32 to vector<34x34xf32>
    %194 = arith.mulf %193, %183 : vector<34x34xf32>
    %195 = arith.addf %181, %194 : vector<34x34xf32>
    %c1_62 = arith.constant 1 : index
    %c1_63 = arith.constant 1 : index
    %c0_64 = arith.constant 0 : index
    %196 = vector.load %arg9[%c1_62, %c1_63, %c0_64] : memref<4x36x36xf32, #tpu.memory_space<vmem>>, vector<1x34x34xf32>
    %197 = vector.shape_cast %196 : vector<1x34x34xf32> to vector<34x34xf32>
    %c12 = arith.constant 12 : index
    %198 = memref.load %arg4[%c12] : memref<108xf32, #tpu.memory_space<smem>>
    %199 = vector.broadcast %198 : f32 to vector<34x34xf32>
    %200 = arith.mulf %199, %197 : vector<34x34xf32>
    %201 = arith.addf %187, %200 : vector<34x34xf32>
    %c48 = arith.constant 48 : index
    %202 = memref.load %arg4[%c48] : memref<108xf32, #tpu.memory_space<smem>>
    %203 = vector.broadcast %202 : f32 to vector<34x34xf32>
    %204 = arith.mulf %203, %197 : vector<34x34xf32>
    %205 = arith.addf %191, %204 : vector<34x34xf32>
    %c84 = arith.constant 84 : index
    %206 = memref.load %arg4[%c84] : memref<108xf32, #tpu.memory_space<smem>>
    %207 = vector.broadcast %206 : f32 to vector<34x34xf32>
    %208 = arith.mulf %207, %197 : vector<34x34xf32>
    %209 = arith.addf %195, %208 : vector<34x34xf32>
    %c1_65 = arith.constant 1 : index
    %c1_66 = arith.constant 1 : index
    %c1_67 = arith.constant 1 : index
    %210 = vector.load %arg9[%c1_65, %c1_66, %c1_67] : memref<4x36x36xf32, #tpu.memory_space<vmem>>, vector<1x34x34xf32>
    %211 = vector.shape_cast %210 : vector<1x34x34xf32> to vector<34x34xf32>
    %c13 = arith.constant 13 : index
    %212 = memref.load %arg4[%c13] : memref<108xf32, #tpu.memory_space<smem>>
    %213 = vector.broadcast %212 : f32 to vector<34x34xf32>
    %214 = arith.mulf %213, %211 : vector<34x34xf32>
    %215 = arith.addf %201, %214 : vector<34x34xf32>
    %c49 = arith.constant 49 : index
    %216 = memref.load %arg4[%c49] : memref<108xf32, #tpu.memory_space<smem>>
    %217 = vector.broadcast %216 : f32 to vector<34x34xf32>
    %218 = arith.mulf %217, %211 : vector<34x34xf32>
    %219 = arith.addf %205, %218 : vector<34x34xf32>
    %c85 = arith.constant 85 : index
    %220 = memref.load %arg4[%c85] : memref<108xf32, #tpu.memory_space<smem>>
    %221 = vector.broadcast %220 : f32 to vector<34x34xf32>
    %222 = arith.mulf %221, %211 : vector<34x34xf32>
    %223 = arith.addf %209, %222 : vector<34x34xf32>
    %c1_68 = arith.constant 1 : index
    %c1_69 = arith.constant 1 : index
    %c2_70 = arith.constant 2 : index
    %224 = vector.load %arg9[%c1_68, %c1_69, %c2_70] : memref<4x36x36xf32, #tpu.memory_space<vmem>>, vector<1x34x34xf32>
    %225 = vector.shape_cast %224 : vector<1x34x34xf32> to vector<34x34xf32>
    %c14 = arith.constant 14 : index
    %226 = memref.load %arg4[%c14] : memref<108xf32, #tpu.memory_space<smem>>
    %227 = vector.broadcast %226 : f32 to vector<34x34xf32>
    %228 = arith.mulf %227, %225 : vector<34x34xf32>
    %229 = arith.addf %215, %228 : vector<34x34xf32>
    %c50 = arith.constant 50 : index
    %230 = memref.load %arg4[%c50] : memref<108xf32, #tpu.memory_space<smem>>
    %231 = vector.broadcast %230 : f32 to vector<34x34xf32>
    %232 = arith.mulf %231, %225 : vector<34x34xf32>
    %233 = arith.addf %219, %232 : vector<34x34xf32>
    %c86 = arith.constant 86 : index
    %234 = memref.load %arg4[%c86] : memref<108xf32, #tpu.memory_space<smem>>
    %235 = vector.broadcast %234 : f32 to vector<34x34xf32>
    %236 = arith.mulf %235, %225 : vector<34x34xf32>
    %237 = arith.addf %223, %236 : vector<34x34xf32>
    %c1_71 = arith.constant 1 : index
    %c2_72 = arith.constant 2 : index
    %c0_73 = arith.constant 0 : index
    %238 = vector.load %arg9[%c1_71, %c2_72, %c0_73] : memref<4x36x36xf32, #tpu.memory_space<vmem>>, vector<1x34x34xf32>
    %239 = vector.shape_cast %238 : vector<1x34x34xf32> to vector<34x34xf32>
    %c15 = arith.constant 15 : index
    %240 = memref.load %arg4[%c15] : memref<108xf32, #tpu.memory_space<smem>>
    %241 = vector.broadcast %240 : f32 to vector<34x34xf32>
    %242 = arith.mulf %241, %239 : vector<34x34xf32>
    %243 = arith.addf %229, %242 : vector<34x34xf32>
    %c51 = arith.constant 51 : index
    %244 = memref.load %arg4[%c51] : memref<108xf32, #tpu.memory_space<smem>>
    %245 = vector.broadcast %244 : f32 to vector<34x34xf32>
    %246 = arith.mulf %245, %239 : vector<34x34xf32>
    %247 = arith.addf %233, %246 : vector<34x34xf32>
    %c87 = arith.constant 87 : index
    %248 = memref.load %arg4[%c87] : memref<108xf32, #tpu.memory_space<smem>>
    %249 = vector.broadcast %248 : f32 to vector<34x34xf32>
    %250 = arith.mulf %249, %239 : vector<34x34xf32>
    %251 = arith.addf %237, %250 : vector<34x34xf32>
    %c1_74 = arith.constant 1 : index
    %c2_75 = arith.constant 2 : index
    %c1_76 = arith.constant 1 : index
    %252 = vector.load %arg9[%c1_74, %c2_75, %c1_76] : memref<4x36x36xf32, #tpu.memory_space<vmem>>, vector<1x34x34xf32>
    %253 = vector.shape_cast %252 : vector<1x34x34xf32> to vector<34x34xf32>
    %c16 = arith.constant 16 : index
    %254 = memref.load %arg4[%c16] : memref<108xf32, #tpu.memory_space<smem>>
    %255 = vector.broadcast %254 : f32 to vector<34x34xf32>
    %256 = arith.mulf %255, %253 : vector<34x34xf32>
    %257 = arith.addf %243, %256 : vector<34x34xf32>
    %c52 = arith.constant 52 : index
    %258 = memref.load %arg4[%c52] : memref<108xf32, #tpu.memory_space<smem>>
    %259 = vector.broadcast %258 : f32 to vector<34x34xf32>
    %260 = arith.mulf %259, %253 : vector<34x34xf32>
    %261 = arith.addf %247, %260 : vector<34x34xf32>
    %c88 = arith.constant 88 : index
    %262 = memref.load %arg4[%c88] : memref<108xf32, #tpu.memory_space<smem>>
    %263 = vector.broadcast %262 : f32 to vector<34x34xf32>
    %264 = arith.mulf %263, %253 : vector<34x34xf32>
    %265 = arith.addf %251, %264 : vector<34x34xf32>
    %c1_77 = arith.constant 1 : index
    %c2_78 = arith.constant 2 : index
    %c2_79 = arith.constant 2 : index
    %266 = vector.load %arg9[%c1_77, %c2_78, %c2_79] : memref<4x36x36xf32, #tpu.memory_space<vmem>>, vector<1x34x34xf32>
    %267 = vector.shape_cast %266 : vector<1x34x34xf32> to vector<34x34xf32>
    %c17 = arith.constant 17 : index
    %268 = memref.load %arg4[%c17] : memref<108xf32, #tpu.memory_space<smem>>
    %269 = vector.broadcast %268 : f32 to vector<34x34xf32>
    %270 = arith.mulf %269, %267 : vector<34x34xf32>
    %271 = arith.addf %257, %270 : vector<34x34xf32>
    %c53 = arith.constant 53 : index
    %272 = memref.load %arg4[%c53] : memref<108xf32, #tpu.memory_space<smem>>
    %273 = vector.broadcast %272 : f32 to vector<34x34xf32>
    %274 = arith.mulf %273, %267 : vector<34x34xf32>
    %275 = arith.addf %261, %274 : vector<34x34xf32>
    %c89 = arith.constant 89 : index
    %276 = memref.load %arg4[%c89] : memref<108xf32, #tpu.memory_space<smem>>
    %277 = vector.broadcast %276 : f32 to vector<34x34xf32>
    %278 = arith.mulf %277, %267 : vector<34x34xf32>
    %279 = arith.addf %265, %278 : vector<34x34xf32>
    %c2_80 = arith.constant 2 : index
    %c0_81 = arith.constant 0 : index
    %c0_82 = arith.constant 0 : index
    %280 = vector.load %arg9[%c2_80, %c0_81, %c0_82] : memref<4x36x36xf32, #tpu.memory_space<vmem>>, vector<1x34x34xf32>
    %281 = vector.shape_cast %280 : vector<1x34x34xf32> to vector<34x34xf32>
    %c18 = arith.constant 18 : index
    %282 = memref.load %arg4[%c18] : memref<108xf32, #tpu.memory_space<smem>>
    %283 = vector.broadcast %282 : f32 to vector<34x34xf32>
    %284 = arith.mulf %283, %281 : vector<34x34xf32>
    %285 = arith.addf %271, %284 : vector<34x34xf32>
    %c54 = arith.constant 54 : index
    %286 = memref.load %arg4[%c54] : memref<108xf32, #tpu.memory_space<smem>>
    %287 = vector.broadcast %286 : f32 to vector<34x34xf32>
    %288 = arith.mulf %287, %281 : vector<34x34xf32>
    %289 = arith.addf %275, %288 : vector<34x34xf32>
    %c90 = arith.constant 90 : index
    %290 = memref.load %arg4[%c90] : memref<108xf32, #tpu.memory_space<smem>>
    %291 = vector.broadcast %290 : f32 to vector<34x34xf32>
    %292 = arith.mulf %291, %281 : vector<34x34xf32>
    %293 = arith.addf %279, %292 : vector<34x34xf32>
    %c2_83 = arith.constant 2 : index
    %c0_84 = arith.constant 0 : index
    %c1_85 = arith.constant 1 : index
    %294 = vector.load %arg9[%c2_83, %c0_84, %c1_85] : memref<4x36x36xf32, #tpu.memory_space<vmem>>, vector<1x34x34xf32>
    %295 = vector.shape_cast %294 : vector<1x34x34xf32> to vector<34x34xf32>
    %c19 = arith.constant 19 : index
    %296 = memref.load %arg4[%c19] : memref<108xf32, #tpu.memory_space<smem>>
    %297 = vector.broadcast %296 : f32 to vector<34x34xf32>
    %298 = arith.mulf %297, %295 : vector<34x34xf32>
    %299 = arith.addf %285, %298 : vector<34x34xf32>
    %c55 = arith.constant 55 : index
    %300 = memref.load %arg4[%c55] : memref<108xf32, #tpu.memory_space<smem>>
    %301 = vector.broadcast %300 : f32 to vector<34x34xf32>
    %302 = arith.mulf %301, %295 : vector<34x34xf32>
    %303 = arith.addf %289, %302 : vector<34x34xf32>
    %c91 = arith.constant 91 : index
    %304 = memref.load %arg4[%c91] : memref<108xf32, #tpu.memory_space<smem>>
    %305 = vector.broadcast %304 : f32 to vector<34x34xf32>
    %306 = arith.mulf %305, %295 : vector<34x34xf32>
    %307 = arith.addf %293, %306 : vector<34x34xf32>
    %c2_86 = arith.constant 2 : index
    %c0_87 = arith.constant 0 : index
    %c2_88 = arith.constant 2 : index
    %308 = vector.load %arg9[%c2_86, %c0_87, %c2_88] : memref<4x36x36xf32, #tpu.memory_space<vmem>>, vector<1x34x34xf32>
    %309 = vector.shape_cast %308 : vector<1x34x34xf32> to vector<34x34xf32>
    %c20 = arith.constant 20 : index
    %310 = memref.load %arg4[%c20] : memref<108xf32, #tpu.memory_space<smem>>
    %311 = vector.broadcast %310 : f32 to vector<34x34xf32>
    %312 = arith.mulf %311, %309 : vector<34x34xf32>
    %313 = arith.addf %299, %312 : vector<34x34xf32>
    %c56 = arith.constant 56 : index
    %314 = memref.load %arg4[%c56] : memref<108xf32, #tpu.memory_space<smem>>
    %315 = vector.broadcast %314 : f32 to vector<34x34xf32>
    %316 = arith.mulf %315, %309 : vector<34x34xf32>
    %317 = arith.addf %303, %316 : vector<34x34xf32>
    %c92 = arith.constant 92 : index
    %318 = memref.load %arg4[%c92] : memref<108xf32, #tpu.memory_space<smem>>
    %319 = vector.broadcast %318 : f32 to vector<34x34xf32>
    %320 = arith.mulf %319, %309 : vector<34x34xf32>
    %321 = arith.addf %307, %320 : vector<34x34xf32>
    %c2_89 = arith.constant 2 : index
    %c1_90 = arith.constant 1 : index
    %c0_91 = arith.constant 0 : index
    %322 = vector.load %arg9[%c2_89, %c1_90, %c0_91] : memref<4x36x36xf32, #tpu.memory_space<vmem>>, vector<1x34x34xf32>
    %323 = vector.shape_cast %322 : vector<1x34x34xf32> to vector<34x34xf32>
    %c21 = arith.constant 21 : index
    %324 = memref.load %arg4[%c21] : memref<108xf32, #tpu.memory_space<smem>>
    %325 = vector.broadcast %324 : f32 to vector<34x34xf32>
    %326 = arith.mulf %325, %323 : vector<34x34xf32>
    %327 = arith.addf %313, %326 : vector<34x34xf32>
    %c57 = arith.constant 57 : index
    %328 = memref.load %arg4[%c57] : memref<108xf32, #tpu.memory_space<smem>>
    %329 = vector.broadcast %328 : f32 to vector<34x34xf32>
    %330 = arith.mulf %329, %323 : vector<34x34xf32>
    %331 = arith.addf %317, %330 : vector<34x34xf32>
    %c93 = arith.constant 93 : index
    %332 = memref.load %arg4[%c93] : memref<108xf32, #tpu.memory_space<smem>>
    %333 = vector.broadcast %332 : f32 to vector<34x34xf32>
    %334 = arith.mulf %333, %323 : vector<34x34xf32>
    %335 = arith.addf %321, %334 : vector<34x34xf32>
    %c2_92 = arith.constant 2 : index
    %c1_93 = arith.constant 1 : index
    %c1_94 = arith.constant 1 : index
    %336 = vector.load %arg9[%c2_92, %c1_93, %c1_94] : memref<4x36x36xf32, #tpu.memory_space<vmem>>, vector<1x34x34xf32>
    %337 = vector.shape_cast %336 : vector<1x34x34xf32> to vector<34x34xf32>
    %c22 = arith.constant 22 : index
    %338 = memref.load %arg4[%c22] : memref<108xf32, #tpu.memory_space<smem>>
    %339 = vector.broadcast %338 : f32 to vector<34x34xf32>
    %340 = arith.mulf %339, %337 : vector<34x34xf32>
    %341 = arith.addf %327, %340 : vector<34x34xf32>
    %c58 = arith.constant 58 : index
    %342 = memref.load %arg4[%c58] : memref<108xf32, #tpu.memory_space<smem>>
    %343 = vector.broadcast %342 : f32 to vector<34x34xf32>
    %344 = arith.mulf %343, %337 : vector<34x34xf32>
    %345 = arith.addf %331, %344 : vector<34x34xf32>
    %c94 = arith.constant 94 : index
    %346 = memref.load %arg4[%c94] : memref<108xf32, #tpu.memory_space<smem>>
    %347 = vector.broadcast %346 : f32 to vector<34x34xf32>
    %348 = arith.mulf %347, %337 : vector<34x34xf32>
    %349 = arith.addf %335, %348 : vector<34x34xf32>
    %c2_95 = arith.constant 2 : index
    %c1_96 = arith.constant 1 : index
    %c2_97 = arith.constant 2 : index
    %350 = vector.load %arg9[%c2_95, %c1_96, %c2_97] : memref<4x36x36xf32, #tpu.memory_space<vmem>>, vector<1x34x34xf32>
    %351 = vector.shape_cast %350 : vector<1x34x34xf32> to vector<34x34xf32>
    %c23 = arith.constant 23 : index
    %352 = memref.load %arg4[%c23] : memref<108xf32, #tpu.memory_space<smem>>
    %353 = vector.broadcast %352 : f32 to vector<34x34xf32>
    %354 = arith.mulf %353, %351 : vector<34x34xf32>
    %355 = arith.addf %341, %354 : vector<34x34xf32>
    %c59 = arith.constant 59 : index
    %356 = memref.load %arg4[%c59] : memref<108xf32, #tpu.memory_space<smem>>
    %357 = vector.broadcast %356 : f32 to vector<34x34xf32>
    %358 = arith.mulf %357, %351 : vector<34x34xf32>
    %359 = arith.addf %345, %358 : vector<34x34xf32>
    %c95 = arith.constant 95 : index
    %360 = memref.load %arg4[%c95] : memref<108xf32, #tpu.memory_space<smem>>
    %361 = vector.broadcast %360 : f32 to vector<34x34xf32>
    %362 = arith.mulf %361, %351 : vector<34x34xf32>
    %363 = arith.addf %349, %362 : vector<34x34xf32>
    %c2_98 = arith.constant 2 : index
    %c2_99 = arith.constant 2 : index
    %c0_100 = arith.constant 0 : index
    %364 = vector.load %arg9[%c2_98, %c2_99, %c0_100] : memref<4x36x36xf32, #tpu.memory_space<vmem>>, vector<1x34x34xf32>
    %365 = vector.shape_cast %364 : vector<1x34x34xf32> to vector<34x34xf32>
    %c24 = arith.constant 24 : index
    %366 = memref.load %arg4[%c24] : memref<108xf32, #tpu.memory_space<smem>>
    %367 = vector.broadcast %366 : f32 to vector<34x34xf32>
    %368 = arith.mulf %367, %365 : vector<34x34xf32>
    %369 = arith.addf %355, %368 : vector<34x34xf32>
    %c60 = arith.constant 60 : index
    %370 = memref.load %arg4[%c60] : memref<108xf32, #tpu.memory_space<smem>>
    %371 = vector.broadcast %370 : f32 to vector<34x34xf32>
    %372 = arith.mulf %371, %365 : vector<34x34xf32>
    %373 = arith.addf %359, %372 : vector<34x34xf32>
    %c96 = arith.constant 96 : index
    %374 = memref.load %arg4[%c96] : memref<108xf32, #tpu.memory_space<smem>>
    %375 = vector.broadcast %374 : f32 to vector<34x34xf32>
    %376 = arith.mulf %375, %365 : vector<34x34xf32>
    %377 = arith.addf %363, %376 : vector<34x34xf32>
    %c2_101 = arith.constant 2 : index
    %c2_102 = arith.constant 2 : index
    %c1_103 = arith.constant 1 : index
    %378 = vector.load %arg9[%c2_101, %c2_102, %c1_103] : memref<4x36x36xf32, #tpu.memory_space<vmem>>, vector<1x34x34xf32>
    %379 = vector.shape_cast %378 : vector<1x34x34xf32> to vector<34x34xf32>
    %c25 = arith.constant 25 : index
    %380 = memref.load %arg4[%c25] : memref<108xf32, #tpu.memory_space<smem>>
    %381 = vector.broadcast %380 : f32 to vector<34x34xf32>
    %382 = arith.mulf %381, %379 : vector<34x34xf32>
    %383 = arith.addf %369, %382 : vector<34x34xf32>
    %c61 = arith.constant 61 : index
    %384 = memref.load %arg4[%c61] : memref<108xf32, #tpu.memory_space<smem>>
    %385 = vector.broadcast %384 : f32 to vector<34x34xf32>
    %386 = arith.mulf %385, %379 : vector<34x34xf32>
    %387 = arith.addf %373, %386 : vector<34x34xf32>
    %c97 = arith.constant 97 : index
    %388 = memref.load %arg4[%c97] : memref<108xf32, #tpu.memory_space<smem>>
    %389 = vector.broadcast %388 : f32 to vector<34x34xf32>
    %390 = arith.mulf %389, %379 : vector<34x34xf32>
    %391 = arith.addf %377, %390 : vector<34x34xf32>
    %c2_104 = arith.constant 2 : index
    %c2_105 = arith.constant 2 : index
    %c2_106 = arith.constant 2 : index
    %392 = vector.load %arg9[%c2_104, %c2_105, %c2_106] : memref<4x36x36xf32, #tpu.memory_space<vmem>>, vector<1x34x34xf32>
    %393 = vector.shape_cast %392 : vector<1x34x34xf32> to vector<34x34xf32>
    %c26 = arith.constant 26 : index
    %394 = memref.load %arg4[%c26] : memref<108xf32, #tpu.memory_space<smem>>
    %395 = vector.broadcast %394 : f32 to vector<34x34xf32>
    %396 = arith.mulf %395, %393 : vector<34x34xf32>
    %397 = arith.addf %383, %396 : vector<34x34xf32>
    %c62 = arith.constant 62 : index
    %398 = memref.load %arg4[%c62] : memref<108xf32, #tpu.memory_space<smem>>
    %399 = vector.broadcast %398 : f32 to vector<34x34xf32>
    %400 = arith.mulf %399, %393 : vector<34x34xf32>
    %401 = arith.addf %387, %400 : vector<34x34xf32>
    %c98 = arith.constant 98 : index
    %402 = memref.load %arg4[%c98] : memref<108xf32, #tpu.memory_space<smem>>
    %403 = vector.broadcast %402 : f32 to vector<34x34xf32>
    %404 = arith.mulf %403, %393 : vector<34x34xf32>
    %405 = arith.addf %391, %404 : vector<34x34xf32>
    %c3_107 = arith.constant 3 : index
    %c0_108 = arith.constant 0 : index
    %c0_109 = arith.constant 0 : index
    %406 = vector.load %arg9[%c3_107, %c0_108, %c0_109] : memref<4x36x36xf32, #tpu.memory_space<vmem>>, vector<1x34x34xf32>
    %407 = vector.shape_cast %406 : vector<1x34x34xf32> to vector<34x34xf32>
    %c27 = arith.constant 27 : index
    %408 = memref.load %arg4[%c27] : memref<108xf32, #tpu.memory_space<smem>>
    %409 = vector.broadcast %408 : f32 to vector<34x34xf32>
    %410 = arith.mulf %409, %407 : vector<34x34xf32>
    %411 = arith.addf %397, %410 : vector<34x34xf32>
    %c63 = arith.constant 63 : index
    %412 = memref.load %arg4[%c63] : memref<108xf32, #tpu.memory_space<smem>>
    %413 = vector.broadcast %412 : f32 to vector<34x34xf32>
    %414 = arith.mulf %413, %407 : vector<34x34xf32>
    %415 = arith.addf %401, %414 : vector<34x34xf32>
    %c99 = arith.constant 99 : index
    %416 = memref.load %arg4[%c99] : memref<108xf32, #tpu.memory_space<smem>>
    %417 = vector.broadcast %416 : f32 to vector<34x34xf32>
    %418 = arith.mulf %417, %407 : vector<34x34xf32>
    %419 = arith.addf %405, %418 : vector<34x34xf32>
    %c3_110 = arith.constant 3 : index
    %c0_111 = arith.constant 0 : index
    %c1_112 = arith.constant 1 : index
    %420 = vector.load %arg9[%c3_110, %c0_111, %c1_112] : memref<4x36x36xf32, #tpu.memory_space<vmem>>, vector<1x34x34xf32>
    %421 = vector.shape_cast %420 : vector<1x34x34xf32> to vector<34x34xf32>
    %c28 = arith.constant 28 : index
    %422 = memref.load %arg4[%c28] : memref<108xf32, #tpu.memory_space<smem>>
    %423 = vector.broadcast %422 : f32 to vector<34x34xf32>
    %424 = arith.mulf %423, %421 : vector<34x34xf32>
    %425 = arith.addf %411, %424 : vector<34x34xf32>
    %c64 = arith.constant 64 : index
    %426 = memref.load %arg4[%c64] : memref<108xf32, #tpu.memory_space<smem>>
    %427 = vector.broadcast %426 : f32 to vector<34x34xf32>
    %428 = arith.mulf %427, %421 : vector<34x34xf32>
    %429 = arith.addf %415, %428 : vector<34x34xf32>
    %c100 = arith.constant 100 : index
    %430 = memref.load %arg4[%c100] : memref<108xf32, #tpu.memory_space<smem>>
    %431 = vector.broadcast %430 : f32 to vector<34x34xf32>
    %432 = arith.mulf %431, %421 : vector<34x34xf32>
    %433 = arith.addf %419, %432 : vector<34x34xf32>
    %c3_113 = arith.constant 3 : index
    %c0_114 = arith.constant 0 : index
    %c2_115 = arith.constant 2 : index
    %434 = vector.load %arg9[%c3_113, %c0_114, %c2_115] : memref<4x36x36xf32, #tpu.memory_space<vmem>>, vector<1x34x34xf32>
    %435 = vector.shape_cast %434 : vector<1x34x34xf32> to vector<34x34xf32>
    %c29 = arith.constant 29 : index
    %436 = memref.load %arg4[%c29] : memref<108xf32, #tpu.memory_space<smem>>
    %437 = vector.broadcast %436 : f32 to vector<34x34xf32>
    %438 = arith.mulf %437, %435 : vector<34x34xf32>
    %439 = arith.addf %425, %438 : vector<34x34xf32>
    %c65 = arith.constant 65 : index
    %440 = memref.load %arg4[%c65] : memref<108xf32, #tpu.memory_space<smem>>
    %441 = vector.broadcast %440 : f32 to vector<34x34xf32>
    %442 = arith.mulf %441, %435 : vector<34x34xf32>
    %443 = arith.addf %429, %442 : vector<34x34xf32>
    %c101 = arith.constant 101 : index
    %444 = memref.load %arg4[%c101] : memref<108xf32, #tpu.memory_space<smem>>
    %445 = vector.broadcast %444 : f32 to vector<34x34xf32>
    %446 = arith.mulf %445, %435 : vector<34x34xf32>
    %447 = arith.addf %433, %446 : vector<34x34xf32>
    %c3_116 = arith.constant 3 : index
    %c1_117 = arith.constant 1 : index
    %c0_118 = arith.constant 0 : index
    %448 = vector.load %arg9[%c3_116, %c1_117, %c0_118] : memref<4x36x36xf32, #tpu.memory_space<vmem>>, vector<1x34x34xf32>
    %449 = vector.shape_cast %448 : vector<1x34x34xf32> to vector<34x34xf32>
    %c30 = arith.constant 30 : index
    %450 = memref.load %arg4[%c30] : memref<108xf32, #tpu.memory_space<smem>>
    %451 = vector.broadcast %450 : f32 to vector<34x34xf32>
    %452 = arith.mulf %451, %449 : vector<34x34xf32>
    %453 = arith.addf %439, %452 : vector<34x34xf32>
    %c66 = arith.constant 66 : index
    %454 = memref.load %arg4[%c66] : memref<108xf32, #tpu.memory_space<smem>>
    %455 = vector.broadcast %454 : f32 to vector<34x34xf32>
    %456 = arith.mulf %455, %449 : vector<34x34xf32>
    %457 = arith.addf %443, %456 : vector<34x34xf32>
    %c102 = arith.constant 102 : index
    %458 = memref.load %arg4[%c102] : memref<108xf32, #tpu.memory_space<smem>>
    %459 = vector.broadcast %458 : f32 to vector<34x34xf32>
    %460 = arith.mulf %459, %449 : vector<34x34xf32>
    %461 = arith.addf %447, %460 : vector<34x34xf32>
    %c3_119 = arith.constant 3 : index
    %c1_120 = arith.constant 1 : index
    %c1_121 = arith.constant 1 : index
    %462 = vector.load %arg9[%c3_119, %c1_120, %c1_121] : memref<4x36x36xf32, #tpu.memory_space<vmem>>, vector<1x34x34xf32>
    %463 = vector.shape_cast %462 : vector<1x34x34xf32> to vector<34x34xf32>
    %c31 = arith.constant 31 : index
    %464 = memref.load %arg4[%c31] : memref<108xf32, #tpu.memory_space<smem>>
    %465 = vector.broadcast %464 : f32 to vector<34x34xf32>
    %466 = arith.mulf %465, %463 : vector<34x34xf32>
    %467 = arith.addf %453, %466 : vector<34x34xf32>
    %c67 = arith.constant 67 : index
    %468 = memref.load %arg4[%c67] : memref<108xf32, #tpu.memory_space<smem>>
    %469 = vector.broadcast %468 : f32 to vector<34x34xf32>
    %470 = arith.mulf %469, %463 : vector<34x34xf32>
    %471 = arith.addf %457, %470 : vector<34x34xf32>
    %c103 = arith.constant 103 : index
    %472 = memref.load %arg4[%c103] : memref<108xf32, #tpu.memory_space<smem>>
    %473 = vector.broadcast %472 : f32 to vector<34x34xf32>
    %474 = arith.mulf %473, %463 : vector<34x34xf32>
    %475 = arith.addf %461, %474 : vector<34x34xf32>
    %c3_122 = arith.constant 3 : index
    %c1_123 = arith.constant 1 : index
    %c2_124 = arith.constant 2 : index
    %476 = vector.load %arg9[%c3_122, %c1_123, %c2_124] : memref<4x36x36xf32, #tpu.memory_space<vmem>>, vector<1x34x34xf32>
    %477 = vector.shape_cast %476 : vector<1x34x34xf32> to vector<34x34xf32>
    %c32 = arith.constant 32 : index
    %478 = memref.load %arg4[%c32] : memref<108xf32, #tpu.memory_space<smem>>
    %479 = vector.broadcast %478 : f32 to vector<34x34xf32>
    %480 = arith.mulf %479, %477 : vector<34x34xf32>
    %481 = arith.addf %467, %480 : vector<34x34xf32>
    %c68 = arith.constant 68 : index
    %482 = memref.load %arg4[%c68] : memref<108xf32, #tpu.memory_space<smem>>
    %483 = vector.broadcast %482 : f32 to vector<34x34xf32>
    %484 = arith.mulf %483, %477 : vector<34x34xf32>
    %485 = arith.addf %471, %484 : vector<34x34xf32>
    %c104 = arith.constant 104 : index
    %486 = memref.load %arg4[%c104] : memref<108xf32, #tpu.memory_space<smem>>
    %487 = vector.broadcast %486 : f32 to vector<34x34xf32>
    %488 = arith.mulf %487, %477 : vector<34x34xf32>
    %489 = arith.addf %475, %488 : vector<34x34xf32>
    %c3_125 = arith.constant 3 : index
    %c2_126 = arith.constant 2 : index
    %c0_127 = arith.constant 0 : index
    %490 = vector.load %arg9[%c3_125, %c2_126, %c0_127] : memref<4x36x36xf32, #tpu.memory_space<vmem>>, vector<1x34x34xf32>
    %491 = vector.shape_cast %490 : vector<1x34x34xf32> to vector<34x34xf32>
    %c33 = arith.constant 33 : index
    %492 = memref.load %arg4[%c33] : memref<108xf32, #tpu.memory_space<smem>>
    %493 = vector.broadcast %492 : f32 to vector<34x34xf32>
    %494 = arith.mulf %493, %491 : vector<34x34xf32>
    %495 = arith.addf %481, %494 : vector<34x34xf32>
    %c69 = arith.constant 69 : index
    %496 = memref.load %arg4[%c69] : memref<108xf32, #tpu.memory_space<smem>>
    %497 = vector.broadcast %496 : f32 to vector<34x34xf32>
    %498 = arith.mulf %497, %491 : vector<34x34xf32>
    %499 = arith.addf %485, %498 : vector<34x34xf32>
    %c105 = arith.constant 105 : index
    %500 = memref.load %arg4[%c105] : memref<108xf32, #tpu.memory_space<smem>>
    %501 = vector.broadcast %500 : f32 to vector<34x34xf32>
    %502 = arith.mulf %501, %491 : vector<34x34xf32>
    %503 = arith.addf %489, %502 : vector<34x34xf32>
    %c3_128 = arith.constant 3 : index
    %c2_129 = arith.constant 2 : index
    %c1_130 = arith.constant 1 : index
    %504 = vector.load %arg9[%c3_128, %c2_129, %c1_130] : memref<4x36x36xf32, #tpu.memory_space<vmem>>, vector<1x34x34xf32>
    %505 = vector.shape_cast %504 : vector<1x34x34xf32> to vector<34x34xf32>
    %c34 = arith.constant 34 : index
    %506 = memref.load %arg4[%c34] : memref<108xf32, #tpu.memory_space<smem>>
    %507 = vector.broadcast %506 : f32 to vector<34x34xf32>
    %508 = arith.mulf %507, %505 : vector<34x34xf32>
    %509 = arith.addf %495, %508 : vector<34x34xf32>
    %c70 = arith.constant 70 : index
    %510 = memref.load %arg4[%c70] : memref<108xf32, #tpu.memory_space<smem>>
    %511 = vector.broadcast %510 : f32 to vector<34x34xf32>
    %512 = arith.mulf %511, %505 : vector<34x34xf32>
    %513 = arith.addf %499, %512 : vector<34x34xf32>
    %c106 = arith.constant 106 : index
    %514 = memref.load %arg4[%c106] : memref<108xf32, #tpu.memory_space<smem>>
    %515 = vector.broadcast %514 : f32 to vector<34x34xf32>
    %516 = arith.mulf %515, %505 : vector<34x34xf32>
    %517 = arith.addf %503, %516 : vector<34x34xf32>
    %c3_131 = arith.constant 3 : index
    %c2_132 = arith.constant 2 : index
    %c2_133 = arith.constant 2 : index
    %518 = vector.load %arg9[%c3_131, %c2_132, %c2_133] : memref<4x36x36xf32, #tpu.memory_space<vmem>>, vector<1x34x34xf32>
    %519 = vector.shape_cast %518 : vector<1x34x34xf32> to vector<34x34xf32>
    %c35 = arith.constant 35 : index
    %520 = memref.load %arg4[%c35] : memref<108xf32, #tpu.memory_space<smem>>
    %521 = vector.broadcast %520 : f32 to vector<34x34xf32>
    %522 = arith.mulf %521, %519 : vector<34x34xf32>
    %523 = arith.addf %509, %522 : vector<34x34xf32>
    %c71 = arith.constant 71 : index
    %524 = memref.load %arg4[%c71] : memref<108xf32, #tpu.memory_space<smem>>
    %525 = vector.broadcast %524 : f32 to vector<34x34xf32>
    %526 = arith.mulf %525, %519 : vector<34x34xf32>
    %527 = arith.addf %513, %526 : vector<34x34xf32>
    %c107 = arith.constant 107 : index
    %528 = memref.load %arg4[%c107] : memref<108xf32, #tpu.memory_space<smem>>
    %529 = vector.broadcast %528 : f32 to vector<34x34xf32>
    %530 = arith.mulf %529, %519 : vector<34x34xf32>
    %531 = arith.addf %517, %530 : vector<34x34xf32>
    %532 = tpu.iota {dimensions = array<i32: 0>} : vector<34x34xi32>
    %533 = tpu.iota {dimensions = array<i32: 1>} : vector<34x34xi32>
    %c1_i32 = arith.constant 1 : i32
    %534 = vector.broadcast %c1_i32 : i32 to vector<34x34xi32>
    %535 = arith.cmpi sge, %532, %534 : vector<34x34xi32>
    %c32_i32 = arith.constant 32 : i32
    %536 = vector.broadcast %c32_i32 : i32 to vector<34x34xi32>
    %537 = arith.cmpi sle, %532, %536 : vector<34x34xi32>
    %538 = arith.andi %535, %537 : vector<34x34xi1>
    %c1_i32_134 = arith.constant 1 : i32
    %539 = vector.broadcast %c1_i32_134 : i32 to vector<34x34xi32>
    %540 = arith.cmpi sge, %533, %539 : vector<34x34xi32>
    %541 = arith.andi %538, %540 : vector<34x34xi1>
    %c32_i32_135 = arith.constant 32 : i32
    %542 = vector.broadcast %c32_i32_135 : i32 to vector<34x34xi32>
    %543 = arith.cmpi sle, %533, %542 : vector<34x34xi32>
    %544 = arith.andi %541, %543 : vector<34x34xi1>
    %c0_136 = arith.constant 0 : index
    %545 = memref.load %arg5[%c0_136] : memref<3xf32, #tpu.memory_space<smem>>
    %546 = vector.broadcast %545 : f32 to vector<34x34xf32>
    %547 = arith.addf %523, %546 : vector<34x34xf32>
    %cst_137 = arith.constant 0.000000e+00 : f32
    %548 = vector.broadcast %cst_137 : f32 to vector<34x34xf32>
    %549 = arith.maximumf %547, %548 : vector<34x34xf32>
    %cst_138 = arith.constant 0.000000e+00 : f32
    %550 = vector.broadcast %cst_138 : f32 to vector<34x34xf32>
    %551 = arith.select %544, %549, %550 : vector<34x34xi1>, vector<34x34xf32>
    %c0_139 = arith.constant 0 : index
    %c0_140 = arith.constant 0 : index
    %c0_141 = arith.constant 0 : index
    %552 = vector.load %arg10[%c0_139, %c0_140, %c0_141] : memref<3x34x34xf32, #tpu.memory_space<vmem>>, vector<1x34x34xf32>
    %553 = vector.shape_cast %552 : vector<1x34x34xf32> to vector<34x34xf32>
    %554 = vector.shape_cast %551 : vector<34x34xf32> to vector<1x34x34xf32>
    tpu.vector_store %arg10[%c0_139, %c0_140, %c0_141], %554 {strides = array<i32>} : memref<3x34x34xf32, #tpu.memory_space<vmem>>, vector<1x34x34xf32>,
    %c1_142 = arith.constant 1 : index
    %555 = memref.load %arg5[%c1_142] : memref<3xf32, #tpu.memory_space<smem>>
    %556 = vector.broadcast %555 : f32 to vector<34x34xf32>
    %557 = arith.addf %527, %556 : vector<34x34xf32>
    %cst_143 = arith.constant 0.000000e+00 : f32
    %558 = vector.broadcast %cst_143 : f32 to vector<34x34xf32>
    %559 = arith.maximumf %557, %558 : vector<34x34xf32>
    %cst_144 = arith.constant 0.000000e+00 : f32
    %560 = vector.broadcast %cst_144 : f32 to vector<34x34xf32>
    %561 = arith.select %544, %559, %560 : vector<34x34xi1>, vector<34x34xf32>
    %c1_145 = arith.constant 1 : index
    %c0_146 = arith.constant 0 : index
    %c0_147 = arith.constant 0 : index
    %562 = vector.load %arg10[%c1_145, %c0_146, %c0_147] : memref<3x34x34xf32, #tpu.memory_space<vmem>>, vector<1x34x34xf32>
    %563 = vector.shape_cast %562 : vector<1x34x34xf32> to vector<34x34xf32>
    %564 = vector.shape_cast %561 : vector<34x34xf32> to vector<1x34x34xf32>
    tpu.vector_store %arg10[%c1_145, %c0_146, %c0_147], %564 {strides = array<i32>} : memref<3x34x34xf32, #tpu.memory_space<vmem>>, vector<1x34x34xf32>,
    %c2_148 = arith.constant 2 : index
    %565 = memref.load %arg5[%c2_148] : memref<3xf32, #tpu.memory_space<smem>>
    %566 = vector.broadcast %565 : f32 to vector<34x34xf32>
    %567 = arith.addf %531, %566 : vector<34x34xf32>
    %cst_149 = arith.constant 0.000000e+00 : f32
    %568 = vector.broadcast %cst_149 : f32 to vector<34x34xf32>
    %569 = arith.maximumf %567, %568 : vector<34x34xf32>
    %cst_150 = arith.constant 0.000000e+00 : f32
    %570 = vector.broadcast %cst_150 : f32 to vector<34x34xf32>
    %571 = arith.select %544, %569, %570 : vector<34x34xi1>, vector<34x34xf32>
    %c2_151 = arith.constant 2 : index
    %c0_152 = arith.constant 0 : index
    %c0_153 = arith.constant 0 : index
    %572 = vector.load %arg10[%c2_151, %c0_152, %c0_153] : memref<3x34x34xf32, #tpu.memory_space<vmem>>, vector<1x34x34xf32>
    %573 = vector.shape_cast %572 : vector<1x34x34xf32> to vector<34x34xf32>
    %574 = vector.shape_cast %571 : vector<34x34xf32> to vector<1x34x34xf32>
    tpu.vector_store %arg10[%c2_151, %c0_152, %c0_153], %574 {strides = array<i32>} : memref<3x34x34xf32, #tpu.memory_space<vmem>>, vector<1x34x34xf32>,
    %cst_154 = arith.constant 0.000000e+00 : f32
    %575 = vector.broadcast %cst_154 : f32 to vector<32x32xf32>
    %cst_155 = arith.constant 0.000000e+00 : f32
    %576 = vector.broadcast %cst_155 : f32 to vector<32x32xf32>
    %cst_156 = arith.constant 0.000000e+00 : f32
    %577 = vector.broadcast %cst_156 : f32 to vector<32x32xf32>
    %c0_157 = arith.constant 0 : index
    %c0_158 = arith.constant 0 : index
    %c0_159 = arith.constant 0 : index
    %578 = vector.load %arg10[%c0_157, %c0_158, %c0_159] : memref<3x34x34xf32, #tpu.memory_space<vmem>>, vector<1x32x32xf32>
    %579 = vector.shape_cast %578 : vector<1x32x32xf32> to vector<32x32xf32>
    %c0_160 = arith.constant 0 : index
    %580 = memref.load %arg6[%c0_160] : memref<81xf32, #tpu.memory_space<smem>>
    %581 = vector.broadcast %580 : f32 to vector<32x32xf32>
    %582 = arith.mulf %581, %579 : vector<32x32xf32>
    %583 = arith.addf %575, %582 : vector<32x32xf32>
    %c27_161 = arith.constant 27 : index
    %584 = memref.load %arg6[%c27_161] : memref<81xf32, #tpu.memory_space<smem>>
    %585 = vector.broadcast %584 : f32 to vector<32x32xf32>
    %586 = arith.mulf %585, %579 : vector<32x32xf32>
    %587 = arith.addf %576, %586 : vector<32x32xf32>
    %c54_162 = arith.constant 54 : index
    %588 = memref.load %arg6[%c54_162] : memref<81xf32, #tpu.memory_space<smem>>
    %589 = vector.broadcast %588 : f32 to vector<32x32xf32>
    %590 = arith.mulf %589, %579 : vector<32x32xf32>
    %591 = arith.addf %577, %590 : vector<32x32xf32>
    %c0_163 = arith.constant 0 : index
    %c0_164 = arith.constant 0 : index
    %c1_165 = arith.constant 1 : index
    %592 = vector.load %arg10[%c0_163, %c0_164, %c1_165] : memref<3x34x34xf32, #tpu.memory_space<vmem>>, vector<1x32x32xf32>
    %593 = vector.shape_cast %592 : vector<1x32x32xf32> to vector<32x32xf32>
    %c1_166 = arith.constant 1 : index
    %594 = memref.load %arg6[%c1_166] : memref<81xf32, #tpu.memory_space<smem>>
    %595 = vector.broadcast %594 : f32 to vector<32x32xf32>
    %596 = arith.mulf %595, %593 : vector<32x32xf32>
    %597 = arith.addf %583, %596 : vector<32x32xf32>
    %c28_167 = arith.constant 28 : index
    %598 = memref.load %arg6[%c28_167] : memref<81xf32, #tpu.memory_space<smem>>
    %599 = vector.broadcast %598 : f32 to vector<32x32xf32>
    %600 = arith.mulf %599, %593 : vector<32x32xf32>
    %601 = arith.addf %587, %600 : vector<32x32xf32>
    %c55_168 = arith.constant 55 : index
    %602 = memref.load %arg6[%c55_168] : memref<81xf32, #tpu.memory_space<smem>>
    %603 = vector.broadcast %602 : f32 to vector<32x32xf32>
    %604 = arith.mulf %603, %593 : vector<32x32xf32>
    %605 = arith.addf %591, %604 : vector<32x32xf32>
    %c0_169 = arith.constant 0 : index
    %c0_170 = arith.constant 0 : index
    %c2_171 = arith.constant 2 : index
    %606 = vector.load %arg10[%c0_169, %c0_170, %c2_171] : memref<3x34x34xf32, #tpu.memory_space<vmem>>, vector<1x32x32xf32>
    %607 = vector.shape_cast %606 : vector<1x32x32xf32> to vector<32x32xf32>
    %c2_172 = arith.constant 2 : index
    %608 = memref.load %arg6[%c2_172] : memref<81xf32, #tpu.memory_space<smem>>
    %609 = vector.broadcast %608 : f32 to vector<32x32xf32>
    %610 = arith.mulf %609, %607 : vector<32x32xf32>
    %611 = arith.addf %597, %610 : vector<32x32xf32>
    %c29_173 = arith.constant 29 : index
    %612 = memref.load %arg6[%c29_173] : memref<81xf32, #tpu.memory_space<smem>>
    %613 = vector.broadcast %612 : f32 to vector<32x32xf32>
    %614 = arith.mulf %613, %607 : vector<32x32xf32>
    %615 = arith.addf %601, %614 : vector<32x32xf32>
    %c56_174 = arith.constant 56 : index
    %616 = memref.load %arg6[%c56_174] : memref<81xf32, #tpu.memory_space<smem>>
    %617 = vector.broadcast %616 : f32 to vector<32x32xf32>
    %618 = arith.mulf %617, %607 : vector<32x32xf32>
    %619 = arith.addf %605, %618 : vector<32x32xf32>
    %c0_175 = arith.constant 0 : index
    %c1_176 = arith.constant 1 : index
    %c0_177 = arith.constant 0 : index
    %620 = vector.load %arg10[%c0_175, %c1_176, %c0_177] : memref<3x34x34xf32, #tpu.memory_space<vmem>>, vector<1x32x32xf32>
    %621 = vector.shape_cast %620 : vector<1x32x32xf32> to vector<32x32xf32>
    %c3_178 = arith.constant 3 : index
    %622 = memref.load %arg6[%c3_178] : memref<81xf32, #tpu.memory_space<smem>>
    %623 = vector.broadcast %622 : f32 to vector<32x32xf32>
    %624 = arith.mulf %623, %621 : vector<32x32xf32>
    %625 = arith.addf %611, %624 : vector<32x32xf32>
    %c30_179 = arith.constant 30 : index
    %626 = memref.load %arg6[%c30_179] : memref<81xf32, #tpu.memory_space<smem>>
    %627 = vector.broadcast %626 : f32 to vector<32x32xf32>
    %628 = arith.mulf %627, %621 : vector<32x32xf32>
    %629 = arith.addf %615, %628 : vector<32x32xf32>
    %c57_180 = arith.constant 57 : index
    %630 = memref.load %arg6[%c57_180] : memref<81xf32, #tpu.memory_space<smem>>
    %631 = vector.broadcast %630 : f32 to vector<32x32xf32>
    %632 = arith.mulf %631, %621 : vector<32x32xf32>
    %633 = arith.addf %619, %632 : vector<32x32xf32>
    %c0_181 = arith.constant 0 : index
    %c1_182 = arith.constant 1 : index
    %c1_183 = arith.constant 1 : index
    %634 = vector.load %arg10[%c0_181, %c1_182, %c1_183] : memref<3x34x34xf32, #tpu.memory_space<vmem>>, vector<1x32x32xf32>
    %635 = vector.shape_cast %634 : vector<1x32x32xf32> to vector<32x32xf32>
    %c4_184 = arith.constant 4 : index
    %636 = memref.load %arg6[%c4_184] : memref<81xf32, #tpu.memory_space<smem>>
    %637 = vector.broadcast %636 : f32 to vector<32x32xf32>
    %638 = arith.mulf %637, %635 : vector<32x32xf32>
    %639 = arith.addf %625, %638 : vector<32x32xf32>
    %c31_185 = arith.constant 31 : index
    %640 = memref.load %arg6[%c31_185] : memref<81xf32, #tpu.memory_space<smem>>
    %641 = vector.broadcast %640 : f32 to vector<32x32xf32>
    %642 = arith.mulf %641, %635 : vector<32x32xf32>
    %643 = arith.addf %629, %642 : vector<32x32xf32>
    %c58_186 = arith.constant 58 : index
    %644 = memref.load %arg6[%c58_186] : memref<81xf32, #tpu.memory_space<smem>>
    %645 = vector.broadcast %644 : f32 to vector<32x32xf32>
    %646 = arith.mulf %645, %635 : vector<32x32xf32>
    %647 = arith.addf %633, %646 : vector<32x32xf32>
    %c0_187 = arith.constant 0 : index
    %c1_188 = arith.constant 1 : index
    %c2_189 = arith.constant 2 : index
    %648 = vector.load %arg10[%c0_187, %c1_188, %c2_189] : memref<3x34x34xf32, #tpu.memory_space<vmem>>, vector<1x32x32xf32>
    %649 = vector.shape_cast %648 : vector<1x32x32xf32> to vector<32x32xf32>
    %c5_190 = arith.constant 5 : index
    %650 = memref.load %arg6[%c5_190] : memref<81xf32, #tpu.memory_space<smem>>
    %651 = vector.broadcast %650 : f32 to vector<32x32xf32>
    %652 = arith.mulf %651, %649 : vector<32x32xf32>
    %653 = arith.addf %639, %652 : vector<32x32xf32>
    %c32_191 = arith.constant 32 : index
    %654 = memref.load %arg6[%c32_191] : memref<81xf32, #tpu.memory_space<smem>>
    %655 = vector.broadcast %654 : f32 to vector<32x32xf32>
    %656 = arith.mulf %655, %649 : vector<32x32xf32>
    %657 = arith.addf %643, %656 : vector<32x32xf32>
    %c59_192 = arith.constant 59 : index
    %658 = memref.load %arg6[%c59_192] : memref<81xf32, #tpu.memory_space<smem>>
    %659 = vector.broadcast %658 : f32 to vector<32x32xf32>
    %660 = arith.mulf %659, %649 : vector<32x32xf32>
    %661 = arith.addf %647, %660 : vector<32x32xf32>
    %c0_193 = arith.constant 0 : index
    %c2_194 = arith.constant 2 : index
    %c0_195 = arith.constant 0 : index
    %662 = vector.load %arg10[%c0_193, %c2_194, %c0_195] : memref<3x34x34xf32, #tpu.memory_space<vmem>>, vector<1x32x32xf32>
    %663 = vector.shape_cast %662 : vector<1x32x32xf32> to vector<32x32xf32>
    %c6_196 = arith.constant 6 : index
    %664 = memref.load %arg6[%c6_196] : memref<81xf32, #tpu.memory_space<smem>>
    %665 = vector.broadcast %664 : f32 to vector<32x32xf32>
    %666 = arith.mulf %665, %663 : vector<32x32xf32>
    %667 = arith.addf %653, %666 : vector<32x32xf32>
    %c33_197 = arith.constant 33 : index
    %668 = memref.load %arg6[%c33_197] : memref<81xf32, #tpu.memory_space<smem>>
    %669 = vector.broadcast %668 : f32 to vector<32x32xf32>
    %670 = arith.mulf %669, %663 : vector<32x32xf32>
    %671 = arith.addf %657, %670 : vector<32x32xf32>
    %c60_198 = arith.constant 60 : index
    %672 = memref.load %arg6[%c60_198] : memref<81xf32, #tpu.memory_space<smem>>
    %673 = vector.broadcast %672 : f32 to vector<32x32xf32>
    %674 = arith.mulf %673, %663 : vector<32x32xf32>
    %675 = arith.addf %661, %674 : vector<32x32xf32>
    %c0_199 = arith.constant 0 : index
    %c2_200 = arith.constant 2 : index
    %c1_201 = arith.constant 1 : index
    %676 = vector.load %arg10[%c0_199, %c2_200, %c1_201] : memref<3x34x34xf32, #tpu.memory_space<vmem>>, vector<1x32x32xf32>
    %677 = vector.shape_cast %676 : vector<1x32x32xf32> to vector<32x32xf32>
    %c7_202 = arith.constant 7 : index
    %678 = memref.load %arg6[%c7_202] : memref<81xf32, #tpu.memory_space<smem>>
    %679 = vector.broadcast %678 : f32 to vector<32x32xf32>
    %680 = arith.mulf %679, %677 : vector<32x32xf32>
    %681 = arith.addf %667, %680 : vector<32x32xf32>
    %c34_203 = arith.constant 34 : index
    %682 = memref.load %arg6[%c34_203] : memref<81xf32, #tpu.memory_space<smem>>
    %683 = vector.broadcast %682 : f32 to vector<32x32xf32>
    %684 = arith.mulf %683, %677 : vector<32x32xf32>
    %685 = arith.addf %671, %684 : vector<32x32xf32>
    %c61_204 = arith.constant 61 : index
    %686 = memref.load %arg6[%c61_204] : memref<81xf32, #tpu.memory_space<smem>>
    %687 = vector.broadcast %686 : f32 to vector<32x32xf32>
    %688 = arith.mulf %687, %677 : vector<32x32xf32>
    %689 = arith.addf %675, %688 : vector<32x32xf32>
    %c0_205 = arith.constant 0 : index
    %c2_206 = arith.constant 2 : index
    %c2_207 = arith.constant 2 : index
    %690 = vector.load %arg10[%c0_205, %c2_206, %c2_207] : memref<3x34x34xf32, #tpu.memory_space<vmem>>, vector<1x32x32xf32>
    %691 = vector.shape_cast %690 : vector<1x32x32xf32> to vector<32x32xf32>
    %c8_208 = arith.constant 8 : index
    %692 = memref.load %arg6[%c8_208] : memref<81xf32, #tpu.memory_space<smem>>
    %693 = vector.broadcast %692 : f32 to vector<32x32xf32>
    %694 = arith.mulf %693, %691 : vector<32x32xf32>
    %695 = arith.addf %681, %694 : vector<32x32xf32>
    %c35_209 = arith.constant 35 : index
    %696 = memref.load %arg6[%c35_209] : memref<81xf32, #tpu.memory_space<smem>>
    %697 = vector.broadcast %696 : f32 to vector<32x32xf32>
    %698 = arith.mulf %697, %691 : vector<32x32xf32>
    %699 = arith.addf %685, %698 : vector<32x32xf32>
    %c62_210 = arith.constant 62 : index
    %700 = memref.load %arg6[%c62_210] : memref<81xf32, #tpu.memory_space<smem>>
    %701 = vector.broadcast %700 : f32 to vector<32x32xf32>
    %702 = arith.mulf %701, %691 : vector<32x32xf32>
    %703 = arith.addf %689, %702 : vector<32x32xf32>
    %c1_211 = arith.constant 1 : index
    %c0_212 = arith.constant 0 : index
    %c0_213 = arith.constant 0 : index
    %704 = vector.load %arg10[%c1_211, %c0_212, %c0_213] : memref<3x34x34xf32, #tpu.memory_space<vmem>>, vector<1x32x32xf32>
    %705 = vector.shape_cast %704 : vector<1x32x32xf32> to vector<32x32xf32>
    %c9_214 = arith.constant 9 : index
    %706 = memref.load %arg6[%c9_214] : memref<81xf32, #tpu.memory_space<smem>>
    %707 = vector.broadcast %706 : f32 to vector<32x32xf32>
    %708 = arith.mulf %707, %705 : vector<32x32xf32>
    %709 = arith.addf %695, %708 : vector<32x32xf32>
    %c36_215 = arith.constant 36 : index
    %710 = memref.load %arg6[%c36_215] : memref<81xf32, #tpu.memory_space<smem>>
    %711 = vector.broadcast %710 : f32 to vector<32x32xf32>
    %712 = arith.mulf %711, %705 : vector<32x32xf32>
    %713 = arith.addf %699, %712 : vector<32x32xf32>
    %c63_216 = arith.constant 63 : index
    %714 = memref.load %arg6[%c63_216] : memref<81xf32, #tpu.memory_space<smem>>
    %715 = vector.broadcast %714 : f32 to vector<32x32xf32>
    %716 = arith.mulf %715, %705 : vector<32x32xf32>
    %717 = arith.addf %703, %716 : vector<32x32xf32>
    %c1_217 = arith.constant 1 : index
    %c0_218 = arith.constant 0 : index
    %c1_219 = arith.constant 1 : index
    %718 = vector.load %arg10[%c1_217, %c0_218, %c1_219] : memref<3x34x34xf32, #tpu.memory_space<vmem>>, vector<1x32x32xf32>
    %719 = vector.shape_cast %718 : vector<1x32x32xf32> to vector<32x32xf32>
    %c10_220 = arith.constant 10 : index
    %720 = memref.load %arg6[%c10_220] : memref<81xf32, #tpu.memory_space<smem>>
    %721 = vector.broadcast %720 : f32 to vector<32x32xf32>
    %722 = arith.mulf %721, %719 : vector<32x32xf32>
    %723 = arith.addf %709, %722 : vector<32x32xf32>
    %c37_221 = arith.constant 37 : index
    %724 = memref.load %arg6[%c37_221] : memref<81xf32, #tpu.memory_space<smem>>
    %725 = vector.broadcast %724 : f32 to vector<32x32xf32>
    %726 = arith.mulf %725, %719 : vector<32x32xf32>
    %727 = arith.addf %713, %726 : vector<32x32xf32>
    %c64_222 = arith.constant 64 : index
    %728 = memref.load %arg6[%c64_222] : memref<81xf32, #tpu.memory_space<smem>>
    %729 = vector.broadcast %728 : f32 to vector<32x32xf32>
    %730 = arith.mulf %729, %719 : vector<32x32xf32>
    %731 = arith.addf %717, %730 : vector<32x32xf32>
    %c1_223 = arith.constant 1 : index
    %c0_224 = arith.constant 0 : index
    %c2_225 = arith.constant 2 : index
    %732 = vector.load %arg10[%c1_223, %c0_224, %c2_225] : memref<3x34x34xf32, #tpu.memory_space<vmem>>, vector<1x32x32xf32>
    %733 = vector.shape_cast %732 : vector<1x32x32xf32> to vector<32x32xf32>
    %c11_226 = arith.constant 11 : index
    %734 = memref.load %arg6[%c11_226] : memref<81xf32, #tpu.memory_space<smem>>
    %735 = vector.broadcast %734 : f32 to vector<32x32xf32>
    %736 = arith.mulf %735, %733 : vector<32x32xf32>
    %737 = arith.addf %723, %736 : vector<32x32xf32>
    %c38_227 = arith.constant 38 : index
    %738 = memref.load %arg6[%c38_227] : memref<81xf32, #tpu.memory_space<smem>>
    %739 = vector.broadcast %738 : f32 to vector<32x32xf32>
    %740 = arith.mulf %739, %733 : vector<32x32xf32>
    %741 = arith.addf %727, %740 : vector<32x32xf32>
    %c65_228 = arith.constant 65 : index
    %742 = memref.load %arg6[%c65_228] : memref<81xf32, #tpu.memory_space<smem>>
    %743 = vector.broadcast %742 : f32 to vector<32x32xf32>
    %744 = arith.mulf %743, %733 : vector<32x32xf32>
    %745 = arith.addf %731, %744 : vector<32x32xf32>
    %c1_229 = arith.constant 1 : index
    %c1_230 = arith.constant 1 : index
    %c0_231 = arith.constant 0 : index
    %746 = vector.load %arg10[%c1_229, %c1_230, %c0_231] : memref<3x34x34xf32, #tpu.memory_space<vmem>>, vector<1x32x32xf32>
    %747 = vector.shape_cast %746 : vector<1x32x32xf32> to vector<32x32xf32>
    %c12_232 = arith.constant 12 : index
    %748 = memref.load %arg6[%c12_232] : memref<81xf32, #tpu.memory_space<smem>>
    %749 = vector.broadcast %748 : f32 to vector<32x32xf32>
    %750 = arith.mulf %749, %747 : vector<32x32xf32>
    %751 = arith.addf %737, %750 : vector<32x32xf32>
    %c39_233 = arith.constant 39 : index
    %752 = memref.load %arg6[%c39_233] : memref<81xf32, #tpu.memory_space<smem>>
    %753 = vector.broadcast %752 : f32 to vector<32x32xf32>
    %754 = arith.mulf %753, %747 : vector<32x32xf32>
    %755 = arith.addf %741, %754 : vector<32x32xf32>
    %c66_234 = arith.constant 66 : index
    %756 = memref.load %arg6[%c66_234] : memref<81xf32, #tpu.memory_space<smem>>
    %757 = vector.broadcast %756 : f32 to vector<32x32xf32>
    %758 = arith.mulf %757, %747 : vector<32x32xf32>
    %759 = arith.addf %745, %758 : vector<32x32xf32>
    %c1_235 = arith.constant 1 : index
    %c1_236 = arith.constant 1 : index
    %c1_237 = arith.constant 1 : index
    %760 = vector.load %arg10[%c1_235, %c1_236, %c1_237] : memref<3x34x34xf32, #tpu.memory_space<vmem>>, vector<1x32x32xf32>
    %761 = vector.shape_cast %760 : vector<1x32x32xf32> to vector<32x32xf32>
    %c13_238 = arith.constant 13 : index
    %762 = memref.load %arg6[%c13_238] : memref<81xf32, #tpu.memory_space<smem>>
    %763 = vector.broadcast %762 : f32 to vector<32x32xf32>
    %764 = arith.mulf %763, %761 : vector<32x32xf32>
    %765 = arith.addf %751, %764 : vector<32x32xf32>
    %c40_239 = arith.constant 40 : index
    %766 = memref.load %arg6[%c40_239] : memref<81xf32, #tpu.memory_space<smem>>
    %767 = vector.broadcast %766 : f32 to vector<32x32xf32>
    %768 = arith.mulf %767, %761 : vector<32x32xf32>
    %769 = arith.addf %755, %768 : vector<32x32xf32>
    %c67_240 = arith.constant 67 : index
    %770 = memref.load %arg6[%c67_240] : memref<81xf32, #tpu.memory_space<smem>>
    %771 = vector.broadcast %770 : f32 to vector<32x32xf32>
    %772 = arith.mulf %771, %761 : vector<32x32xf32>
    %773 = arith.addf %759, %772 : vector<32x32xf32>
    %c1_241 = arith.constant 1 : index
    %c1_242 = arith.constant 1 : index
    %c2_243 = arith.constant 2 : index
    %774 = vector.load %arg10[%c1_241, %c1_242, %c2_243] : memref<3x34x34xf32, #tpu.memory_space<vmem>>, vector<1x32x32xf32>
    %775 = vector.shape_cast %774 : vector<1x32x32xf32> to vector<32x32xf32>
    %c14_244 = arith.constant 14 : index
    %776 = memref.load %arg6[%c14_244] : memref<81xf32, #tpu.memory_space<smem>>
    %777 = vector.broadcast %776 : f32 to vector<32x32xf32>
    %778 = arith.mulf %777, %775 : vector<32x32xf32>
    %779 = arith.addf %765, %778 : vector<32x32xf32>
    %c41_245 = arith.constant 41 : index
    %780 = memref.load %arg6[%c41_245] : memref<81xf32, #tpu.memory_space<smem>>
    %781 = vector.broadcast %780 : f32 to vector<32x32xf32>
    %782 = arith.mulf %781, %775 : vector<32x32xf32>
    %783 = arith.addf %769, %782 : vector<32x32xf32>
    %c68_246 = arith.constant 68 : index
    %784 = memref.load %arg6[%c68_246] : memref<81xf32, #tpu.memory_space<smem>>
    %785 = vector.broadcast %784 : f32 to vector<32x32xf32>
    %786 = arith.mulf %785, %775 : vector<32x32xf32>
    %787 = arith.addf %773, %786 : vector<32x32xf32>
    %c1_247 = arith.constant 1 : index
    %c2_248 = arith.constant 2 : index
    %c0_249 = arith.constant 0 : index
    %788 = vector.load %arg10[%c1_247, %c2_248, %c0_249] : memref<3x34x34xf32, #tpu.memory_space<vmem>>, vector<1x32x32xf32>
    %789 = vector.shape_cast %788 : vector<1x32x32xf32> to vector<32x32xf32>
    %c15_250 = arith.constant 15 : index
    %790 = memref.load %arg6[%c15_250] : memref<81xf32, #tpu.memory_space<smem>>
    %791 = vector.broadcast %790 : f32 to vector<32x32xf32>
    %792 = arith.mulf %791, %789 : vector<32x32xf32>
    %793 = arith.addf %779, %792 : vector<32x32xf32>
    %c42_251 = arith.constant 42 : index
    %794 = memref.load %arg6[%c42_251] : memref<81xf32, #tpu.memory_space<smem>>
    %795 = vector.broadcast %794 : f32 to vector<32x32xf32>
    %796 = arith.mulf %795, %789 : vector<32x32xf32>
    %797 = arith.addf %783, %796 : vector<32x32xf32>
    %c69_252 = arith.constant 69 : index
    %798 = memref.load %arg6[%c69_252] : memref<81xf32, #tpu.memory_space<smem>>
    %799 = vector.broadcast %798 : f32 to vector<32x32xf32>
    %800 = arith.mulf %799, %789 : vector<32x32xf32>
    %801 = arith.addf %787, %800 : vector<32x32xf32>
    %c1_253 = arith.constant 1 : index
    %c2_254 = arith.constant 2 : index
    %c1_255 = arith.constant 1 : index
    %802 = vector.load %arg10[%c1_253, %c2_254, %c1_255] : memref<3x34x34xf32, #tpu.memory_space<vmem>>, vector<1x32x32xf32>
    %803 = vector.shape_cast %802 : vector<1x32x32xf32> to vector<32x32xf32>
    %c16_256 = arith.constant 16 : index
    %804 = memref.load %arg6[%c16_256] : memref<81xf32, #tpu.memory_space<smem>>
    %805 = vector.broadcast %804 : f32 to vector<32x32xf32>
    %806 = arith.mulf %805, %803 : vector<32x32xf32>
    %807 = arith.addf %793, %806 : vector<32x32xf32>
    %c43_257 = arith.constant 43 : index
    %808 = memref.load %arg6[%c43_257] : memref<81xf32, #tpu.memory_space<smem>>
    %809 = vector.broadcast %808 : f32 to vector<32x32xf32>
    %810 = arith.mulf %809, %803 : vector<32x32xf32>
    %811 = arith.addf %797, %810 : vector<32x32xf32>
    %c70_258 = arith.constant 70 : index
    %812 = memref.load %arg6[%c70_258] : memref<81xf32, #tpu.memory_space<smem>>
    %813 = vector.broadcast %812 : f32 to vector<32x32xf32>
    %814 = arith.mulf %813, %803 : vector<32x32xf32>
    %815 = arith.addf %801, %814 : vector<32x32xf32>
    %c1_259 = arith.constant 1 : index
    %c2_260 = arith.constant 2 : index
    %c2_261 = arith.constant 2 : index
    %816 = vector.load %arg10[%c1_259, %c2_260, %c2_261] : memref<3x34x34xf32, #tpu.memory_space<vmem>>, vector<1x32x32xf32>
    %817 = vector.shape_cast %816 : vector<1x32x32xf32> to vector<32x32xf32>
    %c17_262 = arith.constant 17 : index
    %818 = memref.load %arg6[%c17_262] : memref<81xf32, #tpu.memory_space<smem>>
    %819 = vector.broadcast %818 : f32 to vector<32x32xf32>
    %820 = arith.mulf %819, %817 : vector<32x32xf32>
    %821 = arith.addf %807, %820 : vector<32x32xf32>
    %c44_263 = arith.constant 44 : index
    %822 = memref.load %arg6[%c44_263] : memref<81xf32, #tpu.memory_space<smem>>
    %823 = vector.broadcast %822 : f32 to vector<32x32xf32>
    %824 = arith.mulf %823, %817 : vector<32x32xf32>
    %825 = arith.addf %811, %824 : vector<32x32xf32>
    %c71_264 = arith.constant 71 : index
    %826 = memref.load %arg6[%c71_264] : memref<81xf32, #tpu.memory_space<smem>>
    %827 = vector.broadcast %826 : f32 to vector<32x32xf32>
    %828 = arith.mulf %827, %817 : vector<32x32xf32>
    %829 = arith.addf %815, %828 : vector<32x32xf32>
    %c2_265 = arith.constant 2 : index
    %c0_266 = arith.constant 0 : index
    %c0_267 = arith.constant 0 : index
    %830 = vector.load %arg10[%c2_265, %c0_266, %c0_267] : memref<3x34x34xf32, #tpu.memory_space<vmem>>, vector<1x32x32xf32>
    %831 = vector.shape_cast %830 : vector<1x32x32xf32> to vector<32x32xf32>
    %c18_268 = arith.constant 18 : index
    %832 = memref.load %arg6[%c18_268] : memref<81xf32, #tpu.memory_space<smem>>
    %833 = vector.broadcast %832 : f32 to vector<32x32xf32>
    %834 = arith.mulf %833, %831 : vector<32x32xf32>
    %835 = arith.addf %821, %834 : vector<32x32xf32>
    %c45_269 = arith.constant 45 : index
    %836 = memref.load %arg6[%c45_269] : memref<81xf32, #tpu.memory_space<smem>>
    %837 = vector.broadcast %836 : f32 to vector<32x32xf32>
    %838 = arith.mulf %837, %831 : vector<32x32xf32>
    %839 = arith.addf %825, %838 : vector<32x32xf32>
    %c72_270 = arith.constant 72 : index
    %840 = memref.load %arg6[%c72_270] : memref<81xf32, #tpu.memory_space<smem>>
    %841 = vector.broadcast %840 : f32 to vector<32x32xf32>
    %842 = arith.mulf %841, %831 : vector<32x32xf32>
    %843 = arith.addf %829, %842 : vector<32x32xf32>
    %c2_271 = arith.constant 2 : index
    %c0_272 = arith.constant 0 : index
    %c1_273 = arith.constant 1 : index
    %844 = vector.load %arg10[%c2_271, %c0_272, %c1_273] : memref<3x34x34xf32, #tpu.memory_space<vmem>>, vector<1x32x32xf32>
    %845 = vector.shape_cast %844 : vector<1x32x32xf32> to vector<32x32xf32>
    %c19_274 = arith.constant 19 : index
    %846 = memref.load %arg6[%c19_274] : memref<81xf32, #tpu.memory_space<smem>>
    %847 = vector.broadcast %846 : f32 to vector<32x32xf32>
    %848 = arith.mulf %847, %845 : vector<32x32xf32>
    %849 = arith.addf %835, %848 : vector<32x32xf32>
    %c46_275 = arith.constant 46 : index
    %850 = memref.load %arg6[%c46_275] : memref<81xf32, #tpu.memory_space<smem>>
    %851 = vector.broadcast %850 : f32 to vector<32x32xf32>
    %852 = arith.mulf %851, %845 : vector<32x32xf32>
    %853 = arith.addf %839, %852 : vector<32x32xf32>
    %c73_276 = arith.constant 73 : index
    %854 = memref.load %arg6[%c73_276] : memref<81xf32, #tpu.memory_space<smem>>
    %855 = vector.broadcast %854 : f32 to vector<32x32xf32>
    %856 = arith.mulf %855, %845 : vector<32x32xf32>
    %857 = arith.addf %843, %856 : vector<32x32xf32>
    %c2_277 = arith.constant 2 : index
    %c0_278 = arith.constant 0 : index
    %c2_279 = arith.constant 2 : index
    %858 = vector.load %arg10[%c2_277, %c0_278, %c2_279] : memref<3x34x34xf32, #tpu.memory_space<vmem>>, vector<1x32x32xf32>
    %859 = vector.shape_cast %858 : vector<1x32x32xf32> to vector<32x32xf32>
    %c20_280 = arith.constant 20 : index
    %860 = memref.load %arg6[%c20_280] : memref<81xf32, #tpu.memory_space<smem>>
    %861 = vector.broadcast %860 : f32 to vector<32x32xf32>
    %862 = arith.mulf %861, %859 : vector<32x32xf32>
    %863 = arith.addf %849, %862 : vector<32x32xf32>
    %c47_281 = arith.constant 47 : index
    %864 = memref.load %arg6[%c47_281] : memref<81xf32, #tpu.memory_space<smem>>
    %865 = vector.broadcast %864 : f32 to vector<32x32xf32>
    %866 = arith.mulf %865, %859 : vector<32x32xf32>
    %867 = arith.addf %853, %866 : vector<32x32xf32>
    %c74_282 = arith.constant 74 : index
    %868 = memref.load %arg6[%c74_282] : memref<81xf32, #tpu.memory_space<smem>>
    %869 = vector.broadcast %868 : f32 to vector<32x32xf32>
    %870 = arith.mulf %869, %859 : vector<32x32xf32>
    %871 = arith.addf %857, %870 : vector<32x32xf32>
    %c2_283 = arith.constant 2 : index
    %c1_284 = arith.constant 1 : index
    %c0_285 = arith.constant 0 : index
    %872 = vector.load %arg10[%c2_283, %c1_284, %c0_285] : memref<3x34x34xf32, #tpu.memory_space<vmem>>, vector<1x32x32xf32>
    %873 = vector.shape_cast %872 : vector<1x32x32xf32> to vector<32x32xf32>
    %c21_286 = arith.constant 21 : index
    %874 = memref.load %arg6[%c21_286] : memref<81xf32, #tpu.memory_space<smem>>
    %875 = vector.broadcast %874 : f32 to vector<32x32xf32>
    %876 = arith.mulf %875, %873 : vector<32x32xf32>
    %877 = arith.addf %863, %876 : vector<32x32xf32>
    %c48_287 = arith.constant 48 : index
    %878 = memref.load %arg6[%c48_287] : memref<81xf32, #tpu.memory_space<smem>>
    %879 = vector.broadcast %878 : f32 to vector<32x32xf32>
    %880 = arith.mulf %879, %873 : vector<32x32xf32>
    %881 = arith.addf %867, %880 : vector<32x32xf32>
    %c75_288 = arith.constant 75 : index
    %882 = memref.load %arg6[%c75_288] : memref<81xf32, #tpu.memory_space<smem>>
    %883 = vector.broadcast %882 : f32 to vector<32x32xf32>
    %884 = arith.mulf %883, %873 : vector<32x32xf32>
    %885 = arith.addf %871, %884 : vector<32x32xf32>
    %c2_289 = arith.constant 2 : index
    %c1_290 = arith.constant 1 : index
    %c1_291 = arith.constant 1 : index
    %886 = vector.load %arg10[%c2_289, %c1_290, %c1_291] : memref<3x34x34xf32, #tpu.memory_space<vmem>>, vector<1x32x32xf32>
    %887 = vector.shape_cast %886 : vector<1x32x32xf32> to vector<32x32xf32>
    %c22_292 = arith.constant 22 : index
    %888 = memref.load %arg6[%c22_292] : memref<81xf32, #tpu.memory_space<smem>>
    %889 = vector.broadcast %888 : f32 to vector<32x32xf32>
    %890 = arith.mulf %889, %887 : vector<32x32xf32>
    %891 = arith.addf %877, %890 : vector<32x32xf32>
    %c49_293 = arith.constant 49 : index
    %892 = memref.load %arg6[%c49_293] : memref<81xf32, #tpu.memory_space<smem>>
    %893 = vector.broadcast %892 : f32 to vector<32x32xf32>
    %894 = arith.mulf %893, %887 : vector<32x32xf32>
    %895 = arith.addf %881, %894 : vector<32x32xf32>
    %c76_294 = arith.constant 76 : index
    %896 = memref.load %arg6[%c76_294] : memref<81xf32, #tpu.memory_space<smem>>
    %897 = vector.broadcast %896 : f32 to vector<32x32xf32>
    %898 = arith.mulf %897, %887 : vector<32x32xf32>
    %899 = arith.addf %885, %898 : vector<32x32xf32>
    %c2_295 = arith.constant 2 : index
    %c1_296 = arith.constant 1 : index
    %c2_297 = arith.constant 2 : index
    %900 = vector.load %arg10[%c2_295, %c1_296, %c2_297] : memref<3x34x34xf32, #tpu.memory_space<vmem>>, vector<1x32x32xf32>
    %901 = vector.shape_cast %900 : vector<1x32x32xf32> to vector<32x32xf32>
    %c23_298 = arith.constant 23 : index
    %902 = memref.load %arg6[%c23_298] : memref<81xf32, #tpu.memory_space<smem>>
    %903 = vector.broadcast %902 : f32 to vector<32x32xf32>
    %904 = arith.mulf %903, %901 : vector<32x32xf32>
    %905 = arith.addf %891, %904 : vector<32x32xf32>
    %c50_299 = arith.constant 50 : index
    %906 = memref.load %arg6[%c50_299] : memref<81xf32, #tpu.memory_space<smem>>
    %907 = vector.broadcast %906 : f32 to vector<32x32xf32>
    %908 = arith.mulf %907, %901 : vector<32x32xf32>
    %909 = arith.addf %895, %908 : vector<32x32xf32>
    %c77_300 = arith.constant 77 : index
    %910 = memref.load %arg6[%c77_300] : memref<81xf32, #tpu.memory_space<smem>>
    %911 = vector.broadcast %910 : f32 to vector<32x32xf32>
    %912 = arith.mulf %911, %901 : vector<32x32xf32>
    %913 = arith.addf %899, %912 : vector<32x32xf32>
    %c2_301 = arith.constant 2 : index
    %c2_302 = arith.constant 2 : index
    %c0_303 = arith.constant 0 : index
    %914 = vector.load %arg10[%c2_301, %c2_302, %c0_303] : memref<3x34x34xf32, #tpu.memory_space<vmem>>, vector<1x32x32xf32>
    %915 = vector.shape_cast %914 : vector<1x32x32xf32> to vector<32x32xf32>
    %c24_304 = arith.constant 24 : index
    %916 = memref.load %arg6[%c24_304] : memref<81xf32, #tpu.memory_space<smem>>
    %917 = vector.broadcast %916 : f32 to vector<32x32xf32>
    %918 = arith.mulf %917, %915 : vector<32x32xf32>
    %919 = arith.addf %905, %918 : vector<32x32xf32>
    %c51_305 = arith.constant 51 : index
    %920 = memref.load %arg6[%c51_305] : memref<81xf32, #tpu.memory_space<smem>>
    %921 = vector.broadcast %920 : f32 to vector<32x32xf32>
    %922 = arith.mulf %921, %915 : vector<32x32xf32>
    %923 = arith.addf %909, %922 : vector<32x32xf32>
    %c78_306 = arith.constant 78 : index
    %924 = memref.load %arg6[%c78_306] : memref<81xf32, #tpu.memory_space<smem>>
    %925 = vector.broadcast %924 : f32 to vector<32x32xf32>
    %926 = arith.mulf %925, %915 : vector<32x32xf32>
    %927 = arith.addf %913, %926 : vector<32x32xf32>
    %c2_307 = arith.constant 2 : index
    %c2_308 = arith.constant 2 : index
    %c1_309 = arith.constant 1 : index
    %928 = vector.load %arg10[%c2_307, %c2_308, %c1_309] : memref<3x34x34xf32, #tpu.memory_space<vmem>>, vector<1x32x32xf32>
    %929 = vector.shape_cast %928 : vector<1x32x32xf32> to vector<32x32xf32>
    %c25_310 = arith.constant 25 : index
    %930 = memref.load %arg6[%c25_310] : memref<81xf32, #tpu.memory_space<smem>>
    %931 = vector.broadcast %930 : f32 to vector<32x32xf32>
    %932 = arith.mulf %931, %929 : vector<32x32xf32>
    %933 = arith.addf %919, %932 : vector<32x32xf32>
    %c52_311 = arith.constant 52 : index
    %934 = memref.load %arg6[%c52_311] : memref<81xf32, #tpu.memory_space<smem>>
    %935 = vector.broadcast %934 : f32 to vector<32x32xf32>
    %936 = arith.mulf %935, %929 : vector<32x32xf32>
    %937 = arith.addf %923, %936 : vector<32x32xf32>
    %c79_312 = arith.constant 79 : index
    %938 = memref.load %arg6[%c79_312] : memref<81xf32, #tpu.memory_space<smem>>
    %939 = vector.broadcast %938 : f32 to vector<32x32xf32>
    %940 = arith.mulf %939, %929 : vector<32x32xf32>
    %941 = arith.addf %927, %940 : vector<32x32xf32>
    %c2_313 = arith.constant 2 : index
    %c2_314 = arith.constant 2 : index
    %c2_315 = arith.constant 2 : index
    %942 = vector.load %arg10[%c2_313, %c2_314, %c2_315] : memref<3x34x34xf32, #tpu.memory_space<vmem>>, vector<1x32x32xf32>
    %943 = vector.shape_cast %942 : vector<1x32x32xf32> to vector<32x32xf32>
    %c26_316 = arith.constant 26 : index
    %944 = memref.load %arg6[%c26_316] : memref<81xf32, #tpu.memory_space<smem>>
    %945 = vector.broadcast %944 : f32 to vector<32x32xf32>
    %946 = arith.mulf %945, %943 : vector<32x32xf32>
    %947 = arith.addf %933, %946 : vector<32x32xf32>
    %c53_317 = arith.constant 53 : index
    %948 = memref.load %arg6[%c53_317] : memref<81xf32, #tpu.memory_space<smem>>
    %949 = vector.broadcast %948 : f32 to vector<32x32xf32>
    %950 = arith.mulf %949, %943 : vector<32x32xf32>
    %951 = arith.addf %937, %950 : vector<32x32xf32>
    %c80_318 = arith.constant 80 : index
    %952 = memref.load %arg6[%c80_318] : memref<81xf32, #tpu.memory_space<smem>>
    %953 = vector.broadcast %952 : f32 to vector<32x32xf32>
    %954 = arith.mulf %953, %943 : vector<32x32xf32>
    %955 = arith.addf %941, %954 : vector<32x32xf32>
    %c0_319 = arith.constant 0 : index
    %956 = memref.load %arg7[%c0_319] : memref<3xf32, #tpu.memory_space<smem>>
    %957 = vector.broadcast %956 : f32 to vector<32x32xf32>
    %958 = arith.addf %947, %957 : vector<32x32xf32>
    %cst_320 = arith.constant 0.000000e+00 : f32
    %959 = vector.broadcast %cst_320 : f32 to vector<32x32xf32>
    %960 = arith.maximumf %958, %959 : vector<32x32xf32>
    %c0_321 = arith.constant 0 : index
    %c0_322 = arith.constant 0 : index
    %c0_323 = arith.constant 0 : index
    %c0_324 = arith.constant 0 : index
    %961 = vector.load %arg8[%c0_321, %c0_322, %c0_323, %c0_324] : memref<1x3x32x32xf32, #tpu.memory_space<vmem>>, vector<1x1x32x32xf32>
    %962 = vector.shape_cast %961 : vector<1x1x32x32xf32> to vector<32x32xf32>
    %963 = vector.shape_cast %960 : vector<32x32xf32> to vector<1x1x32x32xf32>
    tpu.vector_store %arg8[%c0_321, %c0_322, %c0_323, %c0_324], %963 {strides = array<i32>} : memref<1x3x32x32xf32, #tpu.memory_space<vmem>>, vector<1x1x32x32xf32>,
    %c1_325 = arith.constant 1 : index
    %964 = memref.load %arg7[%c1_325] : memref<3xf32, #tpu.memory_space<smem>>
    %965 = vector.broadcast %964 : f32 to vector<32x32xf32>
    %966 = arith.addf %951, %965 : vector<32x32xf32>
    %cst_326 = arith.constant 0.000000e+00 : f32
    %967 = vector.broadcast %cst_326 : f32 to vector<32x32xf32>
    %968 = arith.maximumf %966, %967 : vector<32x32xf32>
    %c0_327 = arith.constant 0 : index
    %c1_328 = arith.constant 1 : index
    %c0_329 = arith.constant 0 : index
    %c0_330 = arith.constant 0 : index
    %969 = vector.load %arg8[%c0_327, %c1_328, %c0_329, %c0_330] : memref<1x3x32x32xf32, #tpu.memory_space<vmem>>, vector<1x1x32x32xf32>
    %970 = vector.shape_cast %969 : vector<1x1x32x32xf32> to vector<32x32xf32>
    %971 = vector.shape_cast %968 : vector<32x32xf32> to vector<1x1x32x32xf32>
    tpu.vector_store %arg8[%c0_327, %c1_328, %c0_329, %c0_330], %971 {strides = array<i32>} : memref<1x3x32x32xf32, #tpu.memory_space<vmem>>, vector<1x1x32x32xf32>,
    %c2_331 = arith.constant 2 : index
    %972 = memref.load %arg7[%c2_331] : memref<3xf32, #tpu.memory_space<smem>>
    %973 = vector.broadcast %972 : f32 to vector<32x32xf32>
    %974 = arith.addf %955, %973 : vector<32x32xf32>
    %cst_332 = arith.constant 0.000000e+00 : f32
    %975 = vector.broadcast %cst_332 : f32 to vector<32x32xf32>
    %976 = arith.maximumf %974, %975 : vector<32x32xf32>
    %c0_333 = arith.constant 0 : index
    %c2_334 = arith.constant 2 : index
    %c0_335 = arith.constant 0 : index
    %c0_336 = arith.constant 0 : index
    %977 = vector.load %arg8[%c0_333, %c2_334, %c0_335, %c0_336] : memref<1x3x32x32xf32, #tpu.memory_space<vmem>>, vector<1x1x32x32xf32>
    %978 = vector.shape_cast %977 : vector<1x1x32x32xf32> to vector<32x32xf32>
    %979 = vector.shape_cast %976 : vector<32x32xf32> to vector<1x1x32x32xf32>
    tpu.vector_store %arg8[%c0_333, %c2_334, %c0_335, %c0_336], %979 {strides = array<i32>} : memref<1x3x32x32xf32, #tpu.memory_space<vmem>>, vector<1x1x32x32xf32>,
    return
  }
  func.func @transform_0(%arg0: i32) -> (i32, i32, i32) {
    %c0_i32 = arith.constant 0 : i32
    %c0_i32_0 = arith.constant 0 : i32
    %c0_i32_1 = arith.constant 0 : i32
    return %arg0, %c0_i32, %c0_i32_0 : i32, i32, i32
  }
  func.func @transform_1(%arg0: i32) -> (i32, i32) {
    %c0_i32 = arith.constant 0 : i32
    %c0_i32_0 = arith.constant 0 : i32
    %c0_i32_1 = arith.constant 0 : i32
    return %c0_i32, %c0_i32_0 : i32, i32
  }
  func.func @transform_2(%arg0: i32) -> (i32, i32) {
    %c0_i32 = arith.constant 0 : i32
    %c0_i32_0 = arith.constant 0 : i32
    %c0_i32_1 = arith.constant 0 : i32
    return %c0_i32, %c0_i32_0 : i32, i32
  }
  func.func @transform_3(%arg0: i32) -> i32 {
    %c0_i32 = arith.constant 0 : i32
    %c0_i32_0 = arith.constant 0 : i32
    return %c0_i32 : i32
  }
  func.func @transform_4(%arg0: i32) -> i32 {
    %c0_i32 = arith.constant 0 : i32
    %c0_i32_0 = arith.constant 0 : i32
    return %c0_i32 : i32
  }
  func.func @transform_5(%arg0: i32) -> i32 {
    %c0_i32 = arith.constant 0 : i32
    %c0_i32_0 = arith.constant 0 : i32
    return %c0_i32 : i32
  }
  func.func @transform_6(%arg0: i32) -> i32 {
    %c0_i32 = arith.constant 0 : i32
    %c0_i32_0 = arith.constant 0 : i32
    return %c0_i32 : i32
  }
  func.func @transform_7(%arg0: i32) -> (i32, i32, i32, i32) {
    %c0_i32 = arith.constant 0 : i32
    %c0_i32_0 = arith.constant 0 : i32
    %c0_i32_1 = arith.constant 0 : i32
    %c0_i32_2 = arith.constant 0 : i32
    return %arg0, %c0_i32, %c0_i32_0, %c0_i32_1 : i32, i32, i32, i32
  }
}

</mosaic_0001>

<bundles_post_ra>
// kernel: tpu_custom_call.1
= control target key start
LH: loop header
LB: loop body
LE: loop exit
PB: predicated region body
PF: predicated region fallthrough
CT: control target
= control target key end

     0   :  { %12 = vsyncpa [#allocation6], 0  ;;  %s9740_s0 = inlined_call_operand.vmem [shape: f32[2,64,16], index: 0, kind: input, shape index: {}]   ;;  %s9741_s1 = inlined_call_operand.vmem [shape: f32[36,16], index: 1, kind: input, shape index: {}]   ;;  %s9742_s2 = inlined_call_operand.vmem [shape: f32[16,36], index: 2, kind: input, shape index: {}]   ;;  %s9743_s3 = inlined_call_operand.vmem [shape: f32[108], index: 3, kind: input, shape index: {}]   ;;  %s9744_s4 = inlined_call_operand.vmem [shape: f32[3], index: 4, kind: input, shape index: {}]   ;;  %s9745_s5 = inlined_call_operand.vmem [shape: f32[81], index: 5, kind: input, shape index: {}]   ;;  %s9746_s6 = inlined_call_operand.vmem [shape: f32[3], index: 6, kind: input, shape index: {}]   ;;  %s9747_s7 = inlined_call_operand.hbm [shape: f32[2,3,32,32], index: 7, kind: output, shape index: {}]  }
   0x1   :  { %13 = vsyncpa [#allocation8], 0 }
   0x2   :  { %14 = vsyncpa [#allocation11], 0 }
   0x3   :  { %15 = vsyncpa [#allocation5], 0 }
   0x4   :  { %17 = vsyncpa [#allocation5 + $0x1], 0  ;;  %s6317_s24 = smov 0   ;;  %s6319_s25 = smov 0  }
   0x5   :  { %s6321_s26 = smov 0   ;;  %s6323_s27 = smov 0  }
   0x6 LB: > { %s6338_s28 = sadd.s32 4294967295, %s6263_s27   ;;  %s5647_s29 = sadd.s32 4294967294, %s6263_s27   ;;  %s6263_s27 = sphi %s6323_s27, %s9884_s27   ;;  %s6259_s26 = sphi %s6321_s26, %s9883_s26   ;;  %s6255_s25 = sphi %s6319_s25, %s9882_s25   ;;  %s6251_s24 = sphi %s6317_s24, %s9881_s24  }
   0x7   : > { %s6342_s30 = sadd.s32 1, %s6263_s27   ;;  %s182_s8 = sadd.s32 1, %s6259_s26 }
   0x8   : > { %s179_s9 = ssub.s32 %s6263_s27, %s6342_s30  ;;  %p192_p0 = scmp.ne.s32.totalorder %s6259_s26, %s6255_s25 }
   0x9   : > { %p180_p1 = scmp.eq.s32.totalorder %s179_s9, 0  ;;  %p193_p2 = scmp.eq.s32.totalorder %s6338_s28, 1 }
   0xa   : > { %p198_p3 = scmp.ne.s32.totalorder %s6255_s25, %s6251_s24  ;;  %p199_p4 = scmp.eq.s32.totalorder %s5647_s29, 1 }
   0xb   : > { %s6353_s10 = scalar_select %p180_p1, %s6259_s26, %s182_s8  }
   0xc   : > { %p6355_p5 = por %p193_p2, %p192_p0  ;;  %p6359_p6 = por %p199_p4, %p198_p3 }
   0xd   : > { %p5648_p7 = scmp.ge.s32.totalorder %s6263_s27, 1  ;;  %p206_p8 = scmp.lt.s32.totalorder %s6263_s27, 3 }
   0xe   : > { %s9795_s11 = scalar_select %p6355_p5, 1, 0 }
   0xf   : > { %s9796_s12 = scalar_select %p6359_p6, 1, 0 }
  0x10   : > { %p9748_p9 = scmp.eq.s32.totalorder %s6338_s28, 0  ;;  %p6366_p10 = pnand %p5648_p7, %p206_p8 }
  0x11   : > { %s236_s16 = sshll.u32 %s9744_s4, 4  ;;  %s225_s19 = sshll.u32 %s9743_s3, 4  ;;  %s237_s16 = int_to_ptr.vmem [resolvable:$true] %s236_s16  ;;  %s226_s19 = int_to_ptr.vmem [resolvable:$true] %s225_s19 }
  0x12   : > { %s9797_s13 = scalar_select %p6366_p10, 1, 0 }
  0x13   : > { %p6060_p11 = pneg %p6366_p10  ;;  %s247_s23 = sshll.u32 %s9745_s5, 4  ;;  %s6387_s23 = int_to_ptr.vmem [resolvable:$true] %s247_s23 }
  0x14   : > { %s258_s9 = sshll.u32 %s9746_s6, 4  ;;  %s6129_s14 = scalar_lea.vmem %s237_s16, 16  ;;  %s259_s9 = int_to_ptr.vmem [resolvable:$true] %s258_s9 }
  0x15   : > { %p6380_p12 = pnand %p9748_p9, %p6060_p11  ;;  %p6130_p13 = scmp.ne.s32.totalorder %s237_s16, %s6129_s14 }
  0x16   : > { %p6137_p3 = scmp.lt.s32.totalorder %s237_s16, %s237_s16  ;;  %p6138_p4 = scmp.lt.s32.totalorder %s6129_s14, %s6129_s14 }
  0x17   : > { %p6131_p0 = pneg %p6380_p12 }
  0x18   : > { %p6139_p7 = por %p6138_p4, %p6137_p3 }
  0x19   : > { %p6132_p1 = pnand %p6131_p0, %p6130_p13 }
  0x1b   : > { %p6133_p2 = pneg %p6132_p1 }
  0x1d   : > { %p6140_p8 = pnand %p6139_p7, %p6133_p2 }
  0x1f   : > { %6143 = shalt.err (!%p6140_p8)
}
  0x20   : > { %s6265_s15 = smov [#allocation7]   ;;  %s6144_s17 = scalar_lea.vmem %s226_s19, 16 }
  0x21   : > { %6066 = dma.vmem_to_smem (!%p6380_p12), %s237_s16, 16, %s6265_s15, [#allocation8]  }
  0x22   : > { %p6145_p11 = scmp.ne.s32.totalorder %s226_s19, %s6144_s17  ;;  %p6152_p5 = scmp.lt.s32.totalorder %s226_s19, %s226_s19 }
  0x23   : > { %p6153_p10 = scmp.lt.s32.totalorder %s6144_s17, %s6144_s17 }
  0x24   : > { %p6147_p9 = pnand %p6145_p11, %p6131_p0 }
  0x25   : > { %p6154_p13 = por %p6153_p10, %p6152_p5 }
  0x26   : > { %p6148_p6 = pneg %p6147_p9 }
  0x28   : > { %p6155_p1 = pnand %p6154_p13, %p6148_p6 }
  0x2a   : > { %6158 = shalt.err (!%p6155_p1)
}
  0x2b   : > { %s6266_s18 = smov [#allocation4]   ;;  %s6159_s16 = scalar_lea.vmem %s6387_s23, 16 }
  0x2c   : > { %6063 = dma.vmem_to_smem (!%p6380_p12), %s226_s19, 16, %s6266_s18, [#allocation6]  }
  0x2d   : > { %p6160_p2 = scmp.ne.s32.totalorder %s6387_s23, %s6159_s16  ;;  %p6167_p9 = scmp.lt.s32.totalorder %s6387_s23, %s6387_s23 }
  0x2e   : > { %p6168_p7 = scmp.lt.s32.totalorder %s6159_s16, %s6159_s16 }
  0x2f   : > { %p6162_p3 = pnand %p6160_p2, %p6131_p0 }
  0x30   : > { %p6169_p5 = por %p6168_p7, %p6167_p9 }
  0x31   : > { %p6163_p4 = pneg %p6162_p3 }
  0x33   : > { %p6170_p6 = pnand %p6169_p5, %p6163_p4 }
  0x35   : > { %6173 = shalt.err (!%p6170_p6)
}
  0x36   : > { %s6267_s21 = smov [#allocation9]   ;;  %s6174_s29 = scalar_lea.vmem %s259_s9, 16 }
  0x37   : > { %6069 = dma.vmem_to_smem (!%p6380_p12), %s6387_s23, 16, %s6267_s21, [#allocation8]  }
  0x38   : > { %p6175_p10 = scmp.ne.s32.totalorder %s259_s9, %s6174_s29  ;;  %p6182_p13 = scmp.lt.s32.totalorder %s259_s9, %s259_s9 }
  0x39   : > { %p6183_p1 = scmp.lt.s32.totalorder %s6174_s29, %s6174_s29 }
  0x3a   : > { %p6177_p8 = pnand %p6175_p10, %p6131_p0 }
  0x3b   : > { %p6184_p2 = por %p6183_p1, %p6182_p13 }
  0x3c   : > { %p6178_p11 = pneg %p6177_p8 }
  0x3e   : > { %p6185_p3 = pnand %p6184_p2, %p6178_p11 }
  0x40   : > { %6188 = shalt.err (!%p6185_p3)
}
  0x41   : > { %s6268_s8 = smov [#allocation10]   ;;  %p9799_p4 = scmp.ne.s32.totalorder %s9797_s13, 0 }
  0x42   : > { %6072 = dma.vmem_to_smem (!%p6380_p12), %s259_s9, 16, %s6268_s8, [#allocation11]  }
  0x43   : > { %279 = sbr.rel (%p9799_p4) target bundleno = 1924 (0x784), region = 48 }
  0x4a   : > { %p9800_p9 = scmp.eq.s32.totalorder %s6338_s28, 0 }
  0x4c   : > { %6234 = dma.done.wait (%p9800_p9), [#allocation6], 16   ;;  %p9801_p7 = pmov %p9800_p9 }
  0x4e   : > { %6236 = vsyncadd (%p9801_p7), [#allocation6], 4294967280  ;;  %p9802_p0 = pmov %p9801_p7 }
  0x50   : > { %6238 = dma.done.wait (%p9802_p0), [#allocation8], 32   ;;  %p9803_p5 = pmov %p9802_p0 }
  0x51   : > { %p9804_p6 = pmov %p9802_p0 }
  0x52   : > { %6240 = vsyncadd (%p9803_p5), [#allocation8], 4294967264 }
  0x53   : > { %6242 = dma.done.wait (%p9804_p6), [#allocation11], 16   ;;  %p9805_p12 = pmov %p9802_p0 }
  0x55   : > { %6244 = vsyncadd (%p9805_p12), [#allocation11], 4294967280 }
  0x56   : > { %297 = sfence }
  0x57   : > { %v329_v0 = vld [vmem:[%s9742_s2] sm:$0xff]  ;;  %v330_v1 = vld [vmem:[%s9742_s2 + $0x8] sm:$0xff]  ;;  %p324_p10 = scmp.lt.s32.totalorder %s6338_s28, 1  ;;  %vm344_vm0 = vcmask 130048   ;;  %v6269_v11 = vmov 0.0|0.0   ;;  %vm6270_vm1 = vmmov 0  }
  0x58   : > { %v6022_v2 = vpack.c.bf16 %v330_v1, %v329_v0  ;;  %v6271_v12 = vmov 0.0   ;;  %v331_v19 = vld [vmem:[%s9741_s1] sm:$0xff]  ;;  %v332_v23 = vld [vmem:[%s9741_s1 + $0x8] sm:$0xff]  ;;  %v333_v24 = vld [vmem:[%s9741_s1 + $0x10] sm:$0xff]  ;;  %vm579_vm2 = vcmask 293888   ;;  %s5691_s17 = sld [smem:[#allocation4 + $0x1]] }
  0x59   : > { %s325_s14 = scalar_select %p324_p10, %s6338_s28, 1  ;;  %v334_v25 = vld [vmem:[%s9741_s1 + $0x18] sm:$0xff]  ;;  %v335_v26 = vld [vmem:[%s9741_s1 + $0x20] sm:$0xf]  ;;  %vm584_vm3 = vcmask 289792   ;;  %vm3722_vm9 = vcmask 277504  }
  0x5a   : > { %6023 = vmatprep.subr.bf16.mxu0 %v6022_v2  ;;  %6038 = vmatprep.subr.bf16.mxu1 %v6022_v2  ;;  %s5694_s18 = sld [smem:[#allocation4 + $0x2]]  ;;  %s5695_s22 = sld [smem:[#allocation4 + $0x26]]  ;;  %vm3727_vm14 = vcmask 271360   ;;  %vm5495_vm15 = vcmask 261120  }
  0x5b   : > { %6025 = vmatpush3.bf16.msra.mxu0 %v6022_v2  ;;  %s5891_s15 = sshll.u32 %s325_s14, 6  ;;  %6039 = vmatpush3.bf16.msra.mxu1 %v6022_v2  ;;  %s5696_s21 = sld [smem:[#allocation4 + $0x4a]] }
  0x5c   : > { %s328_s16 = scalar_lea.vmem %s9740_s0, %s5891_s15  ;;  %6026 = vmatprep.subr.bf16.mxu1 %v6269_v11  ;;  %6029 = vmatprep.subr.bf16.mxu0 %v6269_v11  ;;  %s5692_s15 = sld [smem:[#allocation4 + $0x25]] }
  0x5d   : > { %v336_v3 = vld [vmem:[%s328_s16] sm:$0xff]  ;;  %v337_v4 = vld [vmem:[%s328_s16 + $0x8] sm:$0xff]  ;;  %v338_v5 = vld [vmem:[%s328_s16 + $0x10] sm:$0xff]  ;;  %s6272_s19 = smov 127   ;;  %s6273_s29 = smov 126  }
  0x5e   : > { %5934 = vmatprep.mubr.msk.f32.mxu0 %vm344_vm0, %v336_v3  ;;  %v340_v6 = vld [vmem:[%s328_s16 + $0x20] sm:$0xff]  ;;  %v341_v7 = vld [vmem:[%s328_s16 + $0x28] sm:$0xff]  ;;  %v339_v8 = vld [vmem:[%s328_s16 + $0x18] sm:$0xff]  ;;  %v6516_v37 = vstv %s5691_s17  ;;  %s5701_s8 = sld [smem:[#allocation4 + $0x28]]  ;;  %s5703_s13 = sld [smem:[#allocation4 + $0x5]] }
  0x5f   : > { %5935 = vmatmul.mubr.msk.f32.vlgmr.msra.gmra.mrb[0].mxu0 %vm344_vm0, %v337_v4  ;;  %5940 = vmatprep.mubr.msk.f32.mxu1 %vm344_vm0, %v340_v6  ;;  %v342_v9 = vld [vmem:[%s328_s16 + $0x30] sm:$0xff]  ;;  %v343_v10 = vld [vmem:[%s328_s16 + $0x38] sm:$0xff]  ;;  %s5693_s16 = sld [smem:[#allocation4 + $0x49]]  ;;  %9807 = vst [vmem:[#allocation18_spill] sm:$0xff] %v6516_v37  ;;  %s5705_s20 = sld [smem:[#allocation4 + $0x4d]] }
  0x60   : > { %5937 = vmatprep.mubr.msk.f32.mxu0 %vm344_vm0, %v338_v5  ;;  %5941 = vmatmul.mubr.msk.f32.vlgmr.msra.gmra.mrb[0].mxu1 %vm344_vm0, %v341_v7  ;;  %v6526_v45 = vstv %s5694_s18  ;;  %v6540_v54 = vstv %s5695_s22  ;;  %s5700_s23 = sld [smem:[#allocation4 + $0x4]]  ;;  %s5710_s9 = sld [smem:[#allocation4 + $0x2b]] }
  0x61   : > { %5943 = vmatprep.mubr.msk.f32.mxu1 %vm344_vm0, %v342_v9  ;;  %v6538_v53 = vstv %s5696_s21  ;;  %s5702_s14 = sld [smem:[#allocation4 + $0x4c]]  ;;  %s5704_s17 = sld [smem:[#allocation4 + $0x29]] }
  0x62   : > { %v6514_v36 = vstv %s5692_s15  ;;  %s5712_s15 = sld [smem:[#allocation4 + $0x8]]  ;;  %s5719_s21 = sld [smem:[#allocation4 + $0x2e]] }
  0x63   : > { %5938 = vmatmul.mubr.msk.f32.gmra.mrb[2].mxu0 %vm344_vm0, %v339_v8  ;;  %9806 = vst [vmem:[#allocation17_spill] sm:$0xff] %v6514_v36  ;;  %s5714_s18 = sld [smem:[#allocation4 + $0x50]]  ;;  %s5711_s22 = sld [smem:[#allocation4 + $0x4f]] }
  0x64   : > { %5944 = vmatmul.mubr.msk.f32.gmra.mrb[2].mxu1 %vm344_vm0, %v343_v10  ;;  %5969 = vmatprep.mubr.msk.f32.mxu0 %vm6270_vm1, %v6271_v12  ;;  %v6565_v1 = vstv %s5701_s8  ;;  %v6573_v4 = vstv %s5703_s13  ;;  %s5721_s8 = sld [smem:[#allocation4 + $0xb]]  ;;  %s5713_s13 = sld [smem:[#allocation4 + $0x2c]] }
  0x65   : > { %5950 = vmatprep.mubr.msk.f32.mxu1 %vm6270_vm1, %v6271_v12  ;;  %v6528_v46 = vstv %s5693_s16  ;;  %9808 = vst [vmem:[#allocation19_spill] sm:$0xff] %v6573_v4  ;;  %v6581_v7 = vstv %s5705_s20  ;;  %s5709_s16 = sld [smem:[#allocation4 + $0x7]]  ;;  %s5723_s20 = sld [smem:[#allocation4 + $0x53]] }
  0x66   : > { %9809 = vst [vmem:[#allocation20_spill] sm:$0xff] %v6581_v7  ;;  %v6583_v8 = vstv %s5700_s23  ;;  %s5718_s23 = sld [smem:[#allocation4 + $0xa]]  ;;  %p9879_p11 = scmp.ne.s32.totalorder %s9795_s11, 0 }
 0x132   : > { %v5936_v13 = vpop.f32.mrb[0].mxu0 }
 0x133   : > { %v435_v14 = vpop.f32.mrb[1].mxu0  ;;  %v5942_v15 = vpop.f32.mrb[0].mxu1 }
 0x134   : > { %v6027_v16 = vpack.c.bf16 %v5936_v13, %v435_v14  ;;  %v455_v17 = vpop.f32.mrb[1].mxu1  ;;  %v6595_v13 = vstv %s5702_s14  ;;  %s5722_s14 = sld [smem:[#allocation4 + $0x2f]] }
 0x135   : > { %v6033_v18 = vpack.c.bf16 %v5942_v15, %v455_v17  ;;  %9811 = vst [vmem:[#allocation22_spill] sm:$0xff] %v6595_v13  ;;  %v6605_v17 = vstv %s5704_s17  ;;  %s5728_s17 = sld [smem:[#allocation4 + $0x31]] }
 0x136   : > { %6028 = vmatpush3.bf16.msra.mxu1 %v6027_v16  ;;  %v5939_v20 = vpop.f32.mrb[2].mxu0  ;;  %v6603_v16 = vstv %s5712_s15  ;;  %s5727_s15 = sld [smem:[#allocation4 + $0xd]] }
 0x137   : > { %v445_v21 = vpop.f32.mrb[3].mxu0  ;;  %6032 = vmatprep.subr.bf16.mxu1 %v6269_v11  ;;  %v5945_v27 = vpop.f32.mrb[2].mxu1  ;;  %9812 = vst [vmem:[#allocation23_spill] sm:$0xff] %v6603_v16 }
 0x138   : > { %v6030_v22 = vpack.c.bf16 %v5939_v20, %v445_v21  ;;  %v465_v28 = vpop.f32.mrb[3].mxu1  ;;  %v6613_v20 = vstv %s5714_s18  ;;  %v6615_v21 = vstv %s5709_s16  ;;  %s5729_s18 = sld [smem:[#allocation4 + $0x55]]  ;;  %s5730_s16 = sld [smem:[#allocation4 + $0xe]] }
 0x139   : > { %5951 = vmatmul.mubr.msk.f32.vlgmr.msra.gmra.mrb[4].mxu1 %vm344_vm0, %v331_v19  ;;  %v6036_v29 = vpack.c.bf16 %v5945_v27, %v465_v28  ;;  %v6628_v28 = vstv %s5711_s22  ;;  %s5732_s22 = sld [smem:[#allocation4 + $0x56]] }
 0x13a   : > { %5953 = vmatprep.mubr.msk.f32.mxu1 %vm6270_vm1, %v6271_v12  ;;  %6031 = vmatpush3.bf16.msra.mxu0 %v6030_v22  ;;  %9813 = vst [vmem:[#allocation24_spill] sm:$0xff] %v6628_v28 }
 0x13b   : > { %6034 = vmatpush3.bf16.msra.mxu1 %v6033_v18  ;;  %6035 = vmatprep.subr.bf16.mxu0 %v6269_v11 }
 0x13d   : > { %5954 = vmatmul.mubr.msk.f32.gmra.mrb[6].mxu1 %vm344_vm0, %v332_v23  ;;  %5970 = vmatmul.mubr.msk.f32.vlgmr.msra.gmra.mrb[4].mxu0 %vm344_vm0, %v331_v19 }
 0x13e   : > { %5956 = vmatprep.mubr.msk.f32.mxu1 %vm6270_vm1, %v6271_v12  ;;  %5972 = vmatprep.mubr.msk.f32.mxu0 %vm6270_vm1, %v6271_v12 }
 0x13f   : > { %6037 = vmatpush3.bf16.msra.mxu0 %v6036_v29 }
 0x141   : > { %5957 = vmatmul.mubr.msk.f32.gmra.mrb[8].mxu1 %vm344_vm0, %v333_v24  ;;  %5973 = vmatmul.mubr.msk.f32.gmra.mrb[6].mxu0 %vm344_vm0, %v332_v23 }
 0x142   : > { %5959 = vmatprep.mubr.msk.f32.mxu1 %vm6270_vm1, %v6271_v12  ;;  %5975 = vmatprep.mubr.msk.f32.mxu0 %vm6270_vm1, %v6271_v12 }
 0x145   : > { %5960 = vmatmul.mubr.msk.f32.gmra.mrb[10].mxu1 %vm344_vm0, %v334_v25  ;;  %5976 = vmatmul.mubr.msk.f32.gmra.mrb[8].mxu0 %vm344_vm0, %v333_v24 }
 0x146   : > { %5962 = vmatprep.mubr.msk.f32.mxu1 %vm6270_vm1, %v6271_v12  ;;  %5978 = vmatprep.mubr.msk.f32.mxu0 %vm6270_vm1, %v6271_v12 }
 0x149   : > { %5963 = vmatmul.mubr.msk.f32.gmra.mrb[12].mxu1 %vm344_vm0, %v335_v26  ;;  %5979 = vmatmul.mubr.msk.f32.gmra.mrb[10].mxu0 %vm344_vm0, %v334_v25 }
 0x14a   : > { %5988 = vmatprep.mubr.msk.f32.mxu1 %vm6270_vm1, %v6271_v12  ;;  %5981 = vmatprep.mubr.msk.f32.mxu0 %vm6270_vm1, %v6271_v12 }
 0x14d   : > { %5989 = vmatmul.mubr.msk.f32.vlgmr.msra.gmra.mrb[14].mxu1 %vm344_vm0, %v331_v19  ;;  %5982 = vmatmul.mubr.msk.f32.gmra.mrb[12].mxu0 %vm344_vm0, %v335_v26 }
 0x14e   : > { %5991 = vmatprep.mubr.msk.f32.mxu1 %vm6270_vm1, %v6271_v12  ;;  %6007 = vmatprep.mubr.msk.f32.mxu0 %vm6270_vm1, %v6271_v12 }
 0x151   : > { %5992 = vmatmul.mubr.msk.f32.gmra.mrb[16].mxu1 %vm344_vm0, %v332_v23  ;;  %6008 = vmatmul.mubr.msk.f32.vlgmr.msra.gmra.mrb[14].mxu0 %vm344_vm0, %v331_v19 }
 0x152   : > { %5994 = vmatprep.mubr.msk.f32.mxu1 %vm6270_vm1, %v6271_v12  ;;  %6010 = vmatprep.mubr.msk.f32.mxu0 %vm6270_vm1, %v6271_v12 }
 0x155   : > { %5995 = vmatmul.mubr.msk.f32.gmra.mrb[18].mxu1 %vm344_vm0, %v333_v24  ;;  %6011 = vmatmul.mubr.msk.f32.gmra.mrb[16].mxu0 %vm344_vm0, %v332_v23  ;;  %v6621_v23 = vstv %s5719_s21  ;;  %s5731_s21 = sld [smem:[#allocation4 + $0x32]] }
 0x156   : > { %5997 = vmatprep.mubr.msk.f32.mxu1 %vm6270_vm1, %v6271_v12  ;;  %6013 = vmatprep.mubr.msk.f32.mxu0 %vm6270_vm1, %v6271_v12 }
 0x159   : > { %5998 = vmatmul.mubr.msk.f32.gmra.mrb[20].mxu1 %vm344_vm0, %v334_v25  ;;  %6014 = vmatmul.mubr.msk.f32.gmra.mrb[18].mxu0 %vm344_vm0, %v333_v24 }
 0x15a   : > { %6000 = vmatprep.mubr.msk.f32.mxu1 %vm6270_vm1, %v6271_v12  ;;  %6016 = vmatprep.mubr.msk.f32.mxu0 %vm6270_vm1, %v6271_v12 }
 0x15d   : > { %6001 = vmatmul.mubr.msk.f32.gmra.mrb[22].mxu1 %vm344_vm0, %v335_v26  ;;  %6017 = vmatmul.mubr.msk.f32.gmra.mrb[20].mxu0 %vm344_vm0, %v334_v25 }
 0x15e   : > { %6019 = vmatprep.mubr.msk.f32.mxu0 %vm6270_vm1, %v6271_v12  ;;  %v6593_v12 = vstv %s5710_s9  ;;  %s5720_s9 = sld [smem:[#allocation4 + $0x52]] }
 0x15f   : > { %9810 = vst [vmem:[#allocation21_spill] sm:$0xff] %v6593_v12 }
 0x161   : > { %6020 = vmatmul.mubr.msk.f32.gmra.mrb[22].mxu0 %vm344_vm0, %v335_v26 }
 0x20c   : > { %v555_v30 = vpop.f32.mrb[4].mxu1 }
 0x20d   : > { %580 = vst.msk [vmem:[#allocation2] sm:$0xff] %vm579_vm2, %v555_v30  ;;  %v5952_v31 = vpop.f32.mrb[5].mxu1  ;;  %v6634_v30 = vstv %s5721_s8  ;;  %s879_s8 = sld [smem:[#allocation4]] }
 0x20e   : > { %9814 = vst [vmem:[#allocation25_spill] sm:$0xff] %v6634_v30 }
 0x210   : > { %v560_v32 = vpop.f32.mrb[6].mxu1  ;;  %v652_v33 = vpop.f32.mrb[4].mxu0 }
 0x211   : > { %581 = vst.msk [vmem:[#allocation2 + $0x8] sm:$0xff] %vm579_vm2, %v560_v32  ;;  %v5955_v34 = vpop.f32.mrb[7].mxu1  ;;  %677 = vst.msk [vmem:[#allocation2 + $0x28] sm:$0xff] %vm579_vm2, %v652_v33  ;;  %v5971_v35 = vpop.f32.mrb[5].mxu0  ;;  %v6638_v32 = vstv %s5713_s13  ;;  %s5689_s13 = sld [smem:[#allocation4 + $0x24]] }
 0x212   : > { %v6646_v35 = vstv %s5723_s20  ;;  %s5736_s20 = sld [smem:[#allocation4 + $0x10]] }
 0x214   : > { %v6518_v38 = vld [vmem:[#allocation2] sm:$0xff]  ;;  %v565_v39 = vpop.f32.mrb[8].mxu1  ;;  %v657_v40 = vpop.f32.mrb[6].mxu0 }
 0x215   : > { %v949_v41 = vmul.f32 %v6514_v36, %v6518_v38  ;;  %v917_v42 = vmul.f32 %v6516_v37, %v6518_v38  ;;  %582 = vst.msk [vmem:[#allocation2 + $0x10] sm:$0xff] %vm579_vm2, %v565_v39  ;;  %678 = vst.msk [vmem:[#allocation2 + $0x30] sm:$0xff] %vm579_vm2, %v657_v40  ;;  %v5958_v43 = vpop.f32.mrb[9].mxu1  ;;  %v5974_v44 = vpop.f32.mrb[7].mxu0  ;;  %v1013_v49 = vmul.f32 %v6526_v45, %v6518_v38  ;;  %v6648_v39 = vstv %s5718_s23  ;;  %s5737_s23 = sld [smem:[#allocation4 + $0x34]] }
 0x216   : > { %v981_v50 = vmul.f32 %v6528_v46, %v6518_v38  ;;  %v1077_v57 = vmul.f32 %v6538_v53, %v6518_v38  ;;  %v1045_v58 = vmul.f32 %v6540_v54, %v6518_v38  ;;  %v6658_v43 = vstv %s5720_s9  ;;  %s5690_s9 = sld [smem:[#allocation4 + $0x48]] }
 0x217   : > { %959 = vrot.lane.b32.xlu1 %v949_v41, %s6272_s19  ;;  %927 = vrot.lane.b32.xlu0 %v917_v42, %s6272_s19  ;;  %9815 = vst [vmem:[#allocation26_spill] sm:$0xff] %v6658_v43 }
 0x218   : > { %v570_v47 = vpop.f32.mrb[10].mxu1  ;;  %v662_v48 = vpop.f32.mrb[8].mxu0  ;;  %v6544_v55 = vld [vmem:[#allocation2 + $0x8] sm:$0xff] }
 0x219   : > { %583 = vst.msk [vmem:[#allocation2 + $0x18] sm:$0xff] %vm579_vm2, %v570_v47  ;;  %679 = vst.msk [vmem:[#allocation2 + $0x38] sm:$0xff] %vm579_vm2, %v662_v48  ;;  %v5961_v51 = vpop.f32.mrb[11].mxu1  ;;  %v5977_v52 = vpop.f32.mrb[9].mxu0  ;;  %v982_v60 = vmul.f32 %v6528_v46, %v6544_v55  ;;  %v918_v61 = vmul.f32 %v6516_v37, %v6544_v55  ;;  %v1046_v62 = vmul.f32 %v6540_v54, %v6544_v55  ;;  %v6563_v0 = vld [vmem:[#allocation2 + $0x1] sm:$0xff]  ;;  %v6666_v48 = vstv %s5722_s14  ;;  %s5697_s14 = sld [smem:[#allocation4 + $0x3]] }
 0x21a   : > { %v950_v63 = vmul.f32 %v6514_v36, %v6544_v55  ;;  %v1182_v2 = vmul.f32 %v6565_v1, %v6563_v0  ;;  %v1014_v3 = vmul.f32 %v6526_v45, %v6544_v55  ;;  %v1246_v5 = vmul.f32 %v6573_v4, %v6563_v0  ;;  %v6591_v11 = vld [vmem:[#allocation2 + $0x2] sm:$0xff] }
 0x21b   : > { %1023 = vrot.lane.b32.xlu1 %v1013_v49, %s6273_s29  ;;  %991 = vrot.lane.b32.xlu0 %v981_v50, %s6272_s19  ;;  %v1078_v6 = vmul.f32 %v6538_v53, %v6544_v55  ;;  %v1310_v9 = vmul.f32 %v6581_v7, %v6563_v0  ;;  %v1150_v10 = vmul.f32 %v6583_v8, %v6563_v0  ;;  %v6619_v22 = vld [vmem:[#allocation2 + $0x28] sm:$0xff] }
 0x21c   : > { %v575_v56 = vpop.f32.mrb[12].mxu1  ;;  %v1415_v14 = vmul.f32 %v6593_v12, %v6591_v11  ;;  %v1214_v15 = vmul.f32 %v6595_v13, %v6563_v0  ;;  %v1479_v18 = vmul.f32 %v6603_v16, %v6591_v11  ;;  %v1278_v19 = vmul.f32 %v6605_v17, %v6563_v0  ;;  %v667_v24 = vpop.f32.mrb[10].mxu0  ;;  %v6652_v40 = vld [vmem:[#allocation2 + $0x10] sm:$0xff] }
 0x21d   : > { %585 = vst.msk [vmem:[#allocation2 + $0x20] sm:$0xf] %vm584_vm3, %v575_v56  ;;  %v5964_v59 = vpop.f32.mrb[13].mxu1  ;;  %v1543_v25 = vmul.f32 %v6613_v20, %v6591_v11  ;;  %v1383_v26 = vmul.f32 %v6615_v21, %v6591_v11  ;;  %v5980_v27 = vpop.f32.mrb[11].mxu0  ;;  %v1648_v29 = vmul.f32 %v6621_v23, %v6619_v22  ;;  %v1447_v31 = vmul.f32 %v6628_v28, %v6591_v11 }
 0x21e   : > { %680 = vst.msk [vmem:[#allocation2 + $0x40] sm:$0xff] %vm579_vm2, %v667_v24  ;;  %v1712_v33 = vmul.f32 %v6634_v30, %v6619_v22  ;;  %v1511_v34 = vmul.f32 %v6638_v32, %v6591_v11  ;;  %v1776_v41 = vmul.f32 %v6646_v35, %v6619_v22  ;;  %v1616_v42 = vmul.f32 %v6648_v39, %v6619_v22 }
 0x21f   : > { %1087 = vrot.lane.b32.xlu1 %v1077_v57, %s6273_s29  ;;  %1055 = vrot.lane.b32.xlu0 %v1045_v58, %s6273_s29  ;;  %v919_v44 = vmul.f32 %v6516_v37, %v6652_v40  ;;  %v1680_v47 = vmul.f32 %v6658_v43, %v6619_v22  ;;  %v951_v49 = vmul.f32 %v6514_v36, %v6652_v40  ;;  %v6686_v58 = vld [vmem:[#allocation2 + $0x9] sm:$0xff] }
 0x220   : > { %v1744_v50 = vmul.f32 %v6666_v48, %v6619_v22  ;;  %v1015_v51 = vmul.f32 %v6526_v45, %v6652_v40  ;;  %v983_v52 = vmul.f32 %v6528_v46, %v6652_v40  ;;  %v1079_v56 = vmul.f32 %v6538_v53, %v6652_v40  ;;  %v748_v27 = vpop.f32.mrb[14].mxu1 }
 0x221   : > { %v1047_v57 = vmul.f32 %v6540_v54, %v6652_v40  ;;  %v1151_v59 = vmul.f32 %v6583_v8, %v6686_v58  ;;  %773 = vst.msk [vmem:[#allocation2 + $0x50] sm:$0xff] %vm579_vm2, %v748_v27 }
 0x223   : > { %993 = vrot.lane.b32.xlu1 %v982_v60, %s6272_s19  ;;  %929 = vrot.lane.b32.xlu0 %v918_v61, %s6272_s19  ;;  %v1183_v60 = vmul.f32 %v6565_v1, %v6686_v58  ;;  %v1215_v61 = vmul.f32 %v6595_v13, %v6686_v58 }
 0x227   : > { %1057 = vrot.lane.b32.xlu1 %v1046_v62, %s6273_s29  ;;  %961 = vrot.lane.b32.xlu0 %v950_v63, %s6272_s19  ;;  %v1247_v62 = vmul.f32 %v6573_v4, %v6686_v58  ;;  %v1279_v63 = vmul.f32 %v6605_v17, %v6686_v58 }
 0x22b   : > { %1192 = vrot.lane.b32.xlu1 %v1182_v2, %s6272_s19  ;;  %1025 = vrot.lane.b32.xlu0 %v1014_v3, %s6273_s29  ;;  %v1311_v2 = vmul.f32 %v6581_v7, %v6686_v58  ;;  %v6706_v3 = vld [vmem:[#allocation2 + $0xa] sm:$0xff] }
 0x22c   : > { %9816 = vst [vmem:[#allocation27_spill] sm:$0xff] %v6706_v3 }
 0x22f   : > { %1256 = vrot.lane.b32.xlu1 %v1246_v5, %s6273_s29  ;;  %1089 = vrot.lane.b32.xlu0 %v1078_v6, %s6273_s29  ;;  %v1384_v5 = vmul.f32 %v6615_v21, %v6706_v3  ;;  %v1416_v6 = vmul.f32 %v6593_v12, %v6706_v3 }
 0x233   : > { %1320 = vrot.lane.b32.xlu1 %v1310_v9, %s6273_s29  ;;  %1160 = vrot.lane.b32.xlu0 %v1150_v10, %s6272_s19  ;;  %v1448_v9 = vmul.f32 %v6628_v28, %v6706_v3  ;;  %v1480_v10 = vmul.f32 %v6603_v16, %v6706_v3 }
 0x237   : > { %1425 = vrot.lane.b32.xlu1 %v1415_v14, %s6272_s19  ;;  %1224 = vrot.lane.b32.xlu0 %v1214_v15, %s6272_s19  ;;  %v6722_v14 = vld [vmem:[#allocation2 + $0x30] sm:$0xff]  ;;  %v1512_v15 = vmul.f32 %v6638_v32, %v6706_v3 }
 0x238   : > { %9817 = vst [vmem:[#allocation28_spill] sm:$0xff] %v6722_v14  ;;  %v1617_v24 = vmul.f32 %v6648_v39, %v6722_v14 }
 0x23b   : > { %1489 = vrot.lane.b32.xlu1 %v1479_v18, %s6273_s29  ;;  %1288 = vrot.lane.b32.xlu0 %v1278_v19, %s6273_s29  ;;  %v1544_v18 = vmul.f32 %v6613_v20, %v6706_v3  ;;  %v1649_v19 = vmul.f32 %v6621_v23, %v6722_v14 }
 0x23f   : > { %1553 = vrot.lane.b32.xlu1 %v1543_v25, %s6273_s29  ;;  %1393 = vrot.lane.b32.xlu0 %v1383_v26, %s6272_s19  ;;  %v1713_v25 = vmul.f32 %v6634_v30, %v6722_v14  ;;  %v1681_v26 = vmul.f32 %v6658_v43, %v6722_v14 }
 0x243   : > { %1457 = vrot.lane.b32.xlu0 %v1447_v31, %s6272_s19  ;;  %1658 = vrot.lane.b32.xlu1 %v1648_v29, %s6272_s19  ;;  %v5990_v29 = vpop.f32.mrb[15].mxu1  ;;  %v1777_v31 = vmul.f32 %v6646_v35, %v6722_v14 }
 0x247   : > { %1521 = vrot.lane.b32.xlu0 %v1511_v34, %s6273_s29  ;;  %1722 = vrot.lane.b32.xlu1 %v1712_v33, %s6273_s29  ;;  %v1745_v33 = vmul.f32 %v6666_v48, %v6722_v14  ;;  %v6747_v34 = vld [vmem:[#allocation2 + $0x29] sm:$0xff] }
 0x24b   : > { %1786 = vrot.lane.b32.xlu1 %v1776_v41, %s6273_s29  ;;  %1626 = vrot.lane.b32.xlu0 %v1616_v42, %s6272_s19  ;;  %v6749_v41 = vstv %s5727_s15  ;;  %v6751_v42 = vstv %s5728_s17  ;;  %s5738_s15 = sld [smem:[#allocation4 + $0x58]]  ;;  %s5739_s17 = sld [smem:[#allocation4 + $0x11]] }
 0x24f   : > { %931 = vrot.lane.b32.xlu1 %v919_v44, %s6272_s19  ;;  %1690 = vrot.lane.b32.xlu0 %v1680_v47, %s6272_s19  ;;  %v1849_v44 = vmul.f32 %v6749_v41, %v6747_v34  ;;  %v1881_v47 = vmul.f32 %v6751_v42, %v6747_v34 }
 0x251   : > { %v6809_v29 = vstv %s5738_s15  ;;  %s5724_s15 = sld [smem:[#allocation4 + $0xc]] }
 0x253   : > { %963 = vrot.lane.b32.xlu1 %v951_v49, %s6272_s19  ;;  %1754 = vrot.lane.b32.xlu0 %v1744_v50, %s6273_s29  ;;  %v6759_v49 = vstv %s5729_s18  ;;  %v6761_v50 = vstv %s5730_s16  ;;  %s6777_s18 = sld [smem:[#allocation4 + $0x27]]  ;;  %s6779_s16 = sld [smem:[#allocation4 + $0x4b]] }
 0x257   : > { %1027 = vrot.lane.b32.xlu1 %v1015_v51, %s6273_s29  ;;  %995 = vrot.lane.b32.xlu0 %v983_v52, %s6272_s19  ;;  %v1913_v51 = vmul.f32 %v6759_v49, %v6747_v34  ;;  %v1945_v52 = vmul.f32 %v6761_v50, %v6747_v34 }
 0x25b   : > { %1091 = vrot.lane.b32.xlu1 %v1079_v56, %s6273_s29  ;;  %1059 = vrot.lane.b32.xlu0 %v1047_v57, %s6273_s29  ;;  %v6769_v56 = vstv %s5731_s21  ;;  %v6771_v57 = vstv %s5732_s22  ;;  %s6785_s21 = sld [smem:[#allocation4 + $0x35]]  ;;  %s6787_s22 = sld [smem:[#allocation4 + $0x59]] }
 0x25f   : > { %1162 = vrot.lane.b32.xlu1 %v1151_v59, %s6272_s19  ;;  %1194 = vrot.lane.b32.xlu0 %v1183_v60, %s6272_s19  ;;  %v6775_v59 = vstv %s879_s8  ;;  %s5706_s8 = sld [smem:[#allocation4 + $0x6]] }
 0x261   : > { %v6834_v3 = vstv %s6785_s21  ;;  %s5734_s21 = sld [smem:[#allocation4 + $0x33]] }
 0x262   : > { %9822 = vst [vmem:[#allocation33_spill] sm:$0xff] %v6834_v3 }
 0x263   : > { %1226 = vrot.lane.b32.xlu1 %v1215_v61, %s6272_s19  ;;  %1258 = vrot.lane.b32.xlu0 %v1247_v62, %s6273_s29  ;;  %v1977_v62 = vmul.f32 %v6769_v56, %v6747_v34 }
 0x267   : > { %1290 = vrot.lane.b32.xlu1 %v1279_v63, %s6273_s29  ;;  %1322 = vrot.lane.b32.xlu0 %v1311_v2, %s6273_s29  ;;  %v2009_v63 = vmul.f32 %v6771_v57, %v6747_v34  ;;  %v6789_v2 = vstv %s5689_s13  ;;  %s5708_s13 = sld [smem:[#allocation4 + $0x4e]] }
 0x26b   : > { %1395 = vrot.lane.b32.xlu1 %v1384_v5, %s6272_s19  ;;  %1427 = vrot.lane.b32.xlu0 %v1416_v6, %s6272_s19  ;;  %v881_v5 = vmul.f32 %v6775_v59, %v6518_v38  ;;  %v6793_v6 = vld [vmem:[#allocation2 + $0x2a] sm:$0xff] }
 0x26c   : > { %9818 = vst [vmem:[#allocation29_spill] sm:$0xff] %v6793_v6 }
 0x26f   : > { %1459 = vrot.lane.b32.xlu1 %v1448_v9, %s6272_s19  ;;  %1491 = vrot.lane.b32.xlu0 %v1480_v10, %s6273_s29  ;;  %v6795_v9 = vstv %s5736_s20  ;;  %v6797_v10 = vstv %s5737_s23  ;;  %s5707_s20 = sld [smem:[#allocation4 + $0x2a]]  ;;  %s5715_s23 = sld [smem:[#allocation4 + $0x9]] }
 0x270   : > { %9819 = vst [vmem:[#allocation30_spill] sm:$0xff] %v6795_v9  ;;  %9820 = vst [vmem:[#allocation31_spill] sm:$0xff] %v6797_v10  ;;  %v2114_v27 = vmul.f32 %v6797_v10, %v6793_v6 }
 0x273   : > { %1523 = vrot.lane.b32.xlu1 %v1512_v15, %s6273_s29  ;;  %1555 = vrot.lane.b32.xlu0 %v1544_v18, %s6273_s29  ;;  %v6801_v15 = vstv %s5690_s9  ;;  %v6803_v18 = vstv %s5697_s14  ;;  %s5717_s9 = sld [smem:[#allocation4 + $0x51]]  ;;  %s5716_s14 = sld [smem:[#allocation4 + $0x2d]] }
 0x277   : > { %1660 = vrot.lane.b32.xlu0 %v1649_v19, %s6272_s19  ;;  %1628 = vrot.lane.b32.xlu1 %v1617_v24, %s6272_s19 }
 0x27b   : > { %1724 = vrot.lane.b32.xlu0 %v1713_v25, %s6273_s29  ;;  %1692 = vrot.lane.b32.xlu1 %v1681_v26, %s6272_s19  ;;  %v2082_v26 = vmul.f32 %v6795_v9, %v6793_v6 }
 0x27f   : > { %1788 = vrot.lane.b32.xlu0 %v1777_v31, %s6273_s29  ;;  %1756 = vrot.lane.b32.xlu1 %v1745_v33, %s6273_s29  ;;  %v6811_v31 = vstv %s5739_s17  ;;  %v893_v33 = vmul.f32 %v6789_v2, %v6518_v38  ;;  %s5726_s17 = sld [smem:[#allocation4 + $0x54]] }
 0x280   : > { %9821 = vst [vmem:[#allocation32_spill] sm:$0xff] %v6811_v31 }
 0x283   : > { %1859 = vrot.lane.b32.xlu0 %v1849_v44, %s6272_s19  ;;  %1891 = vrot.lane.b32.xlu1 %v1881_v47, %s6272_s19  ;;  %v905_v47 = vmul.f32 %v6801_v15, %v6518_v38  ;;  %v2146_v38 = vmul.f32 %v6809_v29, %v6793_v6 }
 0x287   : > { %1923 = vrot.lane.b32.xlu0 %v1913_v51, %s6272_s19  ;;  %1955 = vrot.lane.b32.xlu1 %v1945_v52, %s6273_s29  ;;  %v1114_v51 = vmul.f32 %v6803_v18, %v6563_v0  ;;  %v6822_v52 = vstv %s6777_s18  ;;  %s5725_s18 = sld [smem:[#allocation4 + $0x30]] }
 0x289   : > { %v960_v60 = vpop.permute.xlu1 %959  ;;  %v928_v61 = vpop.permute.xlu0 %927 }
 0x28a   : > { %v942_v19 = vadd.f32 %v928_v61, %v881_v5  ;;  %v6825_v61 = vstv %s6779_s16  ;;  %s5733_s16 = sld [smem:[#allocation4 + $0xf]] }
 0x28b   : > { %1987 = vrot.lane.b32.xlu0 %v1977_v62, %s6273_s29  ;;  %2019 = vrot.lane.b32.xlu1 %v2009_v63, %s6273_s29  ;;  %v974_v62 = vadd.f32 %v960_v60, %v893_v33  ;;  %v1126_v60 = vmul.f32 %v6822_v52, %v6563_v0  ;;  %v6845_v33 = vld [vmem:[#allocation2 + $0x18] sm:$0xff] }
 0x28c   : > { %9824 = vst [vmem:[#allocation35_spill] sm:$0xff] %v6845_v33 }
 0x28d   : > { %v1024_v24 = vpop.permute.xlu1 %1023  ;;  %v992_v25 = vpop.permute.xlu0 %991 }
 0x28e   : > { %v1038_v44 = vadd.f32 %v1024_v24, %v942_v19  ;;  %v1006_v63 = vadd.f32 %v992_v25, %v905_v47  ;;  %v2178_v24 = vmul.f32 %v6811_v31, %v6793_v6  ;;  %v1138_v25 = vmul.f32 %v6825_v61, %v6563_v0 }
 0x28f   : > { %2092 = vrot.lane.b32.xlu0 %v2082_v26, %s6272_s19  ;;  %2124 = vrot.lane.b32.xlu1 %v2114_v27, %s6272_s19  ;;  %v6837_v26 = vstv %s6787_s22  ;;  %v952_v0 = vmul.f32 %v6514_v36, %v6845_v33  ;;  %s5735_s22 = sld [smem:[#allocation4 + $0x57]] }
 0x290   : > { %v6827_v5 = vadd.f32 %v1114_v51, %v1038_v44  ;;  %9823 = vst [vmem:[#allocation34_spill] sm:$0xff] %v6837_v26 }
 0x291   : > { %v1088_v14 = vpop.permute.xlu1 %1087  ;;  %v1056_v19 = vpop.permute.xlu0 %1055 }
 0x292   : > { %v1102_v27 = vadd.f32 %v1088_v14, %v1006_v63  ;;  %v1070_v10 = vadd.f32 %v1056_v19, %v974_v62  ;;  %v2210_v14 = vmul.f32 %v6834_v3, %v6793_v6  ;;  %v2242_v62 = vmul.f32 %v6837_v26, %v6793_v6 }
 0x293   : > { %2156 = vrot.lane.b32.xlu0 %v2146_v38, %s6272_s19  ;;  %2188 = vrot.lane.b32.xlu1 %v2178_v24, %s6273_s29  ;;  %v894_v63 = vmul.f32 %v6789_v2, %v6544_v55  ;;  %v882_v24 = vmul.f32 %v6775_v59, %v6544_v55  ;;  %v1127_v6 = vmul.f32 %v6822_v52, %v6686_v58 }
 0x294   : > { %v6847_v44 = vadd.f32 %v1126_v60, %v1070_v10  ;;  %v6849_v47 = vadd.f32 %v1138_v25, %v1102_v27  ;;  %v920_v10 = vmul.f32 %v6516_v37, %v6845_v33  ;;  %v672_v60 = vpop.f32.mrb[12].mxu0  ;;  %v1016_v26 = vmul.f32 %v6526_v45, %v6845_v33 }
 0x295   : > { %v994_v51 = vpop.permute.xlu1 %993  ;;  %v930_v31 = vpop.permute.xlu0 %929  ;;  %681 = vst.msk [vmem:[#allocation2 + $0x48] sm:$0xf] %vm584_vm3, %v672_v60 }
 0x296   : > { %v5983_v25 = vpop.f32.mrb[13].mxu0 }
 0x297   : > { %2220 = vrot.lane.b32.xlu0 %v2210_v14, %s6273_s29  ;;  %2252 = vrot.lane.b32.xlu1 %v2242_v62, %s6273_s29  ;;  %v943_v14 = vadd.f32 %v930_v31, %v882_v24  ;;  %v1115_v31 = vmul.f32 %v6803_v18, %v6686_v58  ;;  %v1080_v25 = vmul.f32 %v6538_v53, %v6845_v33 }
 0x299   : > { %v1058_v19 = vpop.permute.xlu1 %1057  ;;  %v962_v38 = vpop.permute.xlu0 %961 }
 0x29a   : > { %v975_v27 = vadd.f32 %v962_v38, %v894_v63  ;;  %v984_v63 = vmul.f32 %v6528_v46, %v6845_v33 }
 0x29b   : > { %965 = vrot.lane.b32.xlu0 %v952_v0, %s6272_s19  ;;  %933 = vrot.lane.b32.xlu1 %v920_v10, %s6272_s19  ;;  %v906_v0 = vmul.f32 %v6801_v15, %v6544_v55 }
 0x29c   : > { %v1071_v62 = vadd.f32 %v1058_v19, %v975_v27 }
 0x29d   : > { %v1193_v37 = vpop.permute.xlu1 %1192  ;;  %v1026_v36 = vpop.permute.xlu0 %1025  ;;  %v1007_v38 = vadd.f32 %v994_v51, %v906_v0 }
 0x29e   : > { %v1039_v10 = vadd.f32 %v1026_v36, %v943_v14  ;;  %v6878_v19 = vadd.f32 %v1127_v6, %v1071_v62  ;;  %v1048_v36 = vmul.f32 %v6540_v54, %v6845_v33  ;;  %v6888_v14 = vld [vmem:[#allocation2 + $0x11] sm:$0xff]  ;;  %v1139_v6 = vmul.f32 %v6825_v61, %v6686_v58 }
 0x29f   : > { %1029 = vrot.lane.b32.xlu0 %v1016_v26, %s6273_s29  ;;  %997 = vrot.lane.b32.xlu1 %v984_v63, %s6272_s19  ;;  %v1152_v63 = vmul.f32 %v6583_v8, %v6888_v14  ;;  %v1184_v0 = vmul.f32 %v6565_v1, %v6888_v14 }
 0x2a0   : > { %v6882_v24 = vadd.f32 %v1115_v31, %v1039_v10  ;;  %v6900_v10 = vstv %s5706_s8  ;;  %s5742_s8 = sld [smem:[#allocation4 + $0x12]] }
 0x2a1   : > { %v1257_v27 = vpop.permute.xlu1 %1256  ;;  %v1090_v60 = vpop.permute.xlu0 %1089 }
 0x2a2   : > { %v1103_v55 = vadd.f32 %v1090_v60, %v1007_v38  ;;  %v1347_v38 = vmul.f32 %v6900_v10, %v6591_v11 }
 0x2a3   : > { %1093 = vrot.lane.b32.xlu0 %v1080_v25, %s6273_s29  ;;  %1061 = vrot.lane.b32.xlu1 %v1048_v36, %s6273_s29  ;;  %v1216_v36 = vmul.f32 %v6595_v13, %v6888_v14  ;;  %v1280_v13 = vmul.f32 %v6605_v17, %v6888_v14 }
 0x2a4   : > { %v6894_v26 = vadd.f32 %v1139_v6, %v1103_v55  ;;  %v1248_v55 = vmul.f32 %v6573_v4, %v6888_v14  ;;  %v6911_v6 = vstv %s5708_s13  ;;  %s5743_s13 = sld [smem:[#allocation4 + $0x36]] }
 0x2a5   : > { %v1321_v51 = vpop.permute.xlu1 %1320  ;;  %v1161_v62 = vpop.permute.xlu0 %1160 }
 0x2a6   : > { %v1175_v31 = vadd.f32 %v1161_v62, %v6827_v5 }
 0x2a7   : > { %1164 = vrot.lane.b32.xlu0 %v1152_v63, %s6272_s19  ;;  %1196 = vrot.lane.b32.xlu1 %v1184_v0, %s6272_s19  ;;  %v1207_v63 = vadd.f32 %v1193_v37, %v6847_v44 }
 0x2a8   : > { %v1271_v58 = vadd.f32 %v1257_v27, %v1175_v31  ;;  %v6916_v27 = vstv %s5707_s20  ;;  %v1371_v31 = vmul.f32 %v6911_v6, %v6591_v11  ;;  %s5744_s20 = sld [smem:[#allocation4 + $0x5a]] }
 0x2a9   : > { %v1426_v60 = vpop.permute.xlu1 %1425  ;;  %v1225_v25 = vpop.permute.xlu0 %1224 }
 0x2aa   : > { %v1239_v5 = vadd.f32 %v1225_v25, %v6849_v47  ;;  %v1352_v62 = vadd.f32 %v1347_v38, %v1271_v58  ;;  %v1312_v47 = vmul.f32 %v6581_v7, %v6888_v14  ;;  %v1359_v58 = vmul.f32 %v6916_v27, %v6591_v11  ;;  %v6927_v25 = vld [vmem:[#allocation2 + $0x12] sm:$0xff] }
 0x2ab   : > { %1228 = vrot.lane.b32.xlu0 %v1216_v36, %s6272_s19  ;;  %1260 = vrot.lane.b32.xlu1 %v1248_v55, %s6273_s29  ;;  %9825 = vst [vmem:[#allocation36_spill] sm:$0xff] %v6927_v25  ;;  %v1385_v55 = vmul.f32 %v6615_v21, %v6927_v25  ;;  %v6935_v7 = vstv %s5715_s23  ;;  %s5746_s23 = sld [smem:[#allocation4 + $0x37]] }
 0x2ac   : > { %v1335_v0 = vadd.f32 %v1321_v51, %v1239_v5  ;;  %v1417_v5 = vmul.f32 %v6593_v12, %v6927_v25  ;;  %v1513_v12 = vmul.f32 %v6638_v32, %v6927_v25 }
 0x2ad   : > { %v1490_v33 = vpop.permute.xlu1 %1489  ;;  %v1289_v4 = vpop.permute.xlu0 %1288 }
 0x2ae   : > { %v1303_v38 = vadd.f32 %v1289_v4, %v1207_v63  ;;  %v1376_v37 = vadd.f32 %v1371_v31, %v1335_v0  ;;  %v1449_v31 = vmul.f32 %v6628_v28, %v6927_v25 }
 0x2af   : > { %1292 = vrot.lane.b32.xlu0 %v1280_v13, %s6273_s29  ;;  %1324 = vrot.lane.b32.xlu1 %v1312_v47, %s6273_s29  ;;  %v1580_v13 = vmul.f32 %v6935_v7, %v6619_v22  ;;  %v1481_v47 = vmul.f32 %v6603_v16, %v6927_v25 }
 0x2b0   : > { %v1364_v44 = vadd.f32 %v1359_v58, %v1303_v38  ;;  %v6945_v58 = vstv %s5717_s9  ;;  %s5745_s9 = sld [smem:[#allocation4 + $0x13]] }
 0x2b1   : > { %v1554_v51 = vpop.permute.xlu1 %1553  ;;  %v1394_v36 = vpop.permute.xlu0 %1393 }
 0x2b2   : > { %v1408_v4 = vadd.f32 %v1394_v36, %v1352_v62 }
 0x2b3   : > { %1397 = vrot.lane.b32.xlu0 %v1385_v55, %s6272_s19  ;;  %1429 = vrot.lane.b32.xlu1 %v1417_v5, %s6272_s19  ;;  %v1440_v55 = vadd.f32 %v1426_v60, %v1364_v44  ;;  %v6951_v5 = vld [vmem:[#allocation2 + $0x38] sm:$0xff] }
 0x2b4   : > { %v1504_v11 = vadd.f32 %v1490_v33, %v1408_v4  ;;  %v6949_v33 = vstv %s5716_s14  ;;  %9826 = vst [vmem:[#allocation37_spill] sm:$0xff] %v6951_v5  ;;  %v1604_v4 = vmul.f32 %v6945_v58, %v6619_v22  ;;  %v1650_v60 = vmul.f32 %v6621_v23, %v6951_v5  ;;  %s5748_s14 = sld [smem:[#allocation4 + $0x14]] }
 0x2b5   : > { %v1458_v63 = vpop.permute.xlu0 %1457  ;;  %v1659_v0 = vpop.permute.xlu1 %1658  ;;  %v1618_v44 = vmul.f32 %v6648_v39, %v6951_v5 }
 0x2b6   : > { %v1472_v62 = vadd.f32 %v1458_v63, %v1376_v37  ;;  %v1585_v38 = vadd.f32 %v1580_v13, %v1504_v11  ;;  %v1545_v37 = vmul.f32 %v6613_v20, %v6927_v25  ;;  %v1592_v13 = vmul.f32 %v6949_v33, %v6619_v22 }
 0x2b7   : > { %1461 = vrot.lane.b32.xlu0 %v1449_v31, %s6272_s19  ;;  %1493 = vrot.lane.b32.xlu1 %v1481_v47, %s6273_s29 }
 0x2b8   : > { %v1568_v36 = vadd.f32 %v1554_v51, %v1472_v62  ;;  %v6967_v62 = vstv %s5724_s15  ;;  %s5747_s15 = sld [smem:[#allocation4 + $0x5b]] }
 0x2b9   : > { %v1522_v28 = vpop.permute.xlu0 %1521  ;;  %v1723_v16 = vpop.permute.xlu1 %1722  ;;  %9827 = vst [vmem:[#allocation38_spill] sm:$0xff] %v6967_v62  ;;  %v1813_v22 = vmul.f32 %v6967_v62, %v6747_v34 }
 0x2ba   : > { %v1536_v11 = vadd.f32 %v1522_v28, %v1440_v55  ;;  %v1609_v51 = vadd.f32 %v1604_v4, %v1568_v36  ;;  %v1714_v4 = vmul.f32 %v6634_v30, %v6951_v5 }
 0x2bb   : > { %1525 = vrot.lane.b32.xlu0 %v1513_v12, %s6273_s29  ;;  %1557 = vrot.lane.b32.xlu1 %v1545_v37, %s6273_s29  ;;  %v1682_v37 = vmul.f32 %v6658_v43, %v6951_v5 }
 0x2bc   : > { %v1597_v63 = vadd.f32 %v1592_v13, %v1536_v11  ;;  %v6977_v11 = vstv %s5726_s17  ;;  %s5750_s17 = sld [smem:[#allocation4 + $0x5c]] }
 0x2bd   : > { %v1787_v31 = vpop.permute.xlu1 %1786  ;;  %v1627_v47 = vpop.permute.xlu0 %1626 }
 0x2be   : > { %v1641_v28 = vadd.f32 %v1627_v47, %v1585_v38  ;;  %v1673_v47 = vadd.f32 %v1659_v0, %v1597_v63 }
 0x2bf   : > { %1662 = vrot.lane.b32.xlu1 %v1650_v60, %s6272_s19  ;;  %1630 = vrot.lane.b32.xlu0 %v1618_v44, %s6272_s19  ;;  %v753_v60 = vpop.f32.mrb[16].mxu1 }
 0x2c0   : > { %v1737_v12 = vadd.f32 %v1723_v16, %v1641_v28  ;;  %v6983_v16 = vstv %s5725_s18  ;;  %v1837_v28 = vmul.f32 %v6977_v11, %v6747_v34  ;;  %774 = vst.msk [vmem:[#allocation2 + $0x58] sm:$0xff] %vm579_vm2, %v753_v60  ;;  %v5993_v43 = vpop.f32.mrb[17].mxu1  ;;  %s5749_s18 = sld [smem:[#allocation4 + $0x38]] }
 0x2c1   : > { %v932_v36 = vpop.permute.xlu1 %931  ;;  %v1691_v55 = vpop.permute.xlu0 %1690  ;;  %v1825_v0 = vmul.f32 %v6983_v16, %v6747_v34  ;;  %v895_v34 = vmul.f32 %v6789_v2, %v6652_v40 }
 0x2c2   : > { %v1705_v13 = vadd.f32 %v1691_v55, %v1609_v51  ;;  %v6979_v38 = vadd.f32 %v1813_v22, %v1737_v12  ;;  %v1778_v51 = vmul.f32 %v6646_v35, %v6951_v5  ;;  %v1746_v12 = vmul.f32 %v6666_v48, %v6951_v5 }
 0x2c3   : > { %1726 = vrot.lane.b32.xlu1 %v1714_v4, %s6273_s29  ;;  %1694 = vrot.lane.b32.xlu0 %v1682_v37, %s6272_s19  ;;  %v883_v22 = vmul.f32 %v6775_v59, %v6652_v40  ;;  %v1128_v5 = vmul.f32 %v6822_v52, %v6888_v14 }
 0x2c4   : > { %v1801_v44 = vadd.f32 %v1787_v31, %v1705_v13  ;;  %v6994_v31 = vld [vmem:[#allocation2 + $0x31] sm:$0xff] }
 0x2c5   : > { %v964_v30 = vpop.permute.xlu1 %963  ;;  %v1755_v25 = vpop.permute.xlu0 %1754  ;;  %v944_v43 = vadd.f32 %v932_v36, %v883_v22  ;;  %v1850_v60 = vmul.f32 %v6749_v41, %v6994_v31  ;;  %v1116_v36 = vmul.f32 %v6803_v18, %v6888_v14 }
 0x2c6   : > { %v1769_v55 = vadd.f32 %v1755_v25, %v1673_v47  ;;  %v6998_v63 = vadd.f32 %v1837_v28, %v1801_v44  ;;  %v1882_v25 = vmul.f32 %v6751_v42, %v6994_v31  ;;  %v907_v47 = vmul.f32 %v6801_v15, %v6652_v40 }
 0x2c7   : > { %1790 = vrot.lane.b32.xlu1 %v1778_v51, %s6273_s29  ;;  %1758 = vrot.lane.b32.xlu0 %v1746_v12, %s6273_s29  ;;  %v976_v28 = vadd.f32 %v964_v30, %v895_v34 }
 0x2c8   : > { %v7002_v4 = vadd.f32 %v1825_v0, %v1769_v55  ;;  %v1914_v0 = vmul.f32 %v6759_v49, %v6994_v31 }
 0x2c9   : > { %v1028_v37 = vpop.permute.xlu1 %1027  ;;  %v996_v13 = vpop.permute.xlu0 %995 }
 0x2ca   : > { %v1040_v44 = vadd.f32 %v1028_v37, %v944_v43  ;;  %v1008_v51 = vadd.f32 %v996_v13, %v907_v47  ;;  %v1946_v43 = vmul.f32 %v6761_v50, %v6994_v31  ;;  %v2010_v47 = vmul.f32 %v6771_v57, %v6994_v31 }
 0x2cb   : > { %1861 = vrot.lane.b32.xlu1 %v1850_v60, %s6272_s19  ;;  %1893 = vrot.lane.b32.xlu0 %v1882_v25, %s6272_s19  ;;  %v1140_v60 = vmul.f32 %v6825_v61, %v6888_v14 }
 0x2cc   : > { %v7016_v12 = vadd.f32 %v1116_v36, %v1040_v44  ;;  %v1978_v44 = vmul.f32 %v6769_v56, %v6994_v31  ;;  %v7036_v36 = vld [vmem:[#allocation2 + $0x32] sm:$0xff] }
 0x2cd   : > { %v1092_v22 = vpop.permute.xlu1 %1091  ;;  %v1060_v55 = vpop.permute.xlu0 %1059  ;;  %9828 = vst [vmem:[#allocation39_spill] sm:$0xff] %v7036_v36 }
 0x2ce   : > { %v1104_v40 = vadd.f32 %v1092_v22, %v1008_v51  ;;  %v1072_v37 = vadd.f32 %v1060_v55, %v976_v28  ;;  %v2083_v51 = vmul.f32 %v6795_v9, %v7036_v36  ;;  %v9829_v22 = vld [vmem:[#allocation31_spill] sm:$0xff] }
 0x2cf   : > { %1925 = vrot.lane.b32.xlu1 %v1914_v0, %s6272_s19  ;;  %1957 = vrot.lane.b32.xlu0 %v1946_v43, %s6273_s29  ;;  %v2115_v55 = vmul.f32 %v9829_v22, %v7036_v36  ;;  %v9830_v43 = vld [vmem:[#allocation27_spill] sm:$0xff]  ;;  %v9831_v22 = vld [vmem:[#allocation32_spill] sm:$0xff] }
 0x2d0   : > { %v7028_v30 = vadd.f32 %v1128_v5, %v1072_v37  ;;  %v7030_v13 = vadd.f32 %v1140_v60, %v1104_v40  ;;  %v1348_v40 = vmul.f32 %v6900_v10, %v9830_v43 }
 0x2d1   : > { %v1163_v25 = vpop.permute.xlu1 %1162  ;;  %v1195_v34 = vpop.permute.xlu0 %1194 }
 0x2d2   : > { %v1176_v14 = vadd.f32 %v1163_v25, %v6882_v24  ;;  %v1208_v37 = vadd.f32 %v1195_v34, %v6878_v19  ;;  %v7061_v34 = vld [vmem:[#allocation2 + $0x20] sm:$0x3] }
 0x2d3   : > { %1989 = vrot.lane.b32.xlu1 %v1978_v44, %s6273_s29  ;;  %2021 = vrot.lane.b32.xlu0 %v2010_v47, %s6273_s29  ;;  %v2147_v47 = vmul.f32 %v6809_v29, %v7036_v36 }
 0x2d5   : > { %v1227_v5 = vpop.permute.xlu1 %1226  ;;  %v1259_v28 = vpop.permute.xlu0 %1258 }
 0x2d6   : > { %v1272_v0 = vadd.f32 %v1259_v28, %v1176_v14  ;;  %v1240_v24 = vadd.f32 %v1227_v5, %v6894_v26  ;;  %v2179_v14 = vmul.f32 %v9831_v22, %v7036_v36 }
 0x2d7   : > { %2094 = vrot.lane.b32.xlu1 %v2083_v51, %s6272_s19  ;;  %2126 = vrot.lane.b32.xlu0 %v2115_v55, %s6272_s19  ;;  %v1360_v51 = vmul.f32 %v6916_v27, %v9830_v43  ;;  %v1372_v55 = vmul.f32 %v6911_v6, %v9830_v43  ;;  %v9833_v43 = vld [vmem:[#allocation17_spill] sm:$0xff] }
 0x2d8   : > { %v1353_v60 = vadd.f32 %v1348_v40, %v1272_v0  ;;  %v2211_v40 = vmul.f32 %v6834_v3, %v7036_v36 }
 0x2d9   : > { %v1291_v25 = vpop.permute.xlu1 %1290  ;;  %v1323_v44 = vpop.permute.xlu0 %1322 }
 0x2da   : > { %v1304_v28 = vadd.f32 %v1291_v25, %v1208_v37  ;;  %v1336_v9 = vadd.f32 %v1323_v44, %v1240_v24  ;;  %v9832_v37 = vld [vmem:[#allocation34_spill] sm:$0xff]  ;;  %v953_v25 = vmul.f32 %v9833_v43, %v7061_v34  ;;  %v1017_v43 = vmul.f32 %v6526_v45, %v7061_v34 }
 0x2db   : > { %2158 = vrot.lane.b32.xlu1 %v2147_v47, %s6272_s19  ;;  %2190 = vrot.lane.b32.xlu0 %v2179_v14, %s6273_s29  ;;  %v2243_v24 = vmul.f32 %v9832_v37, %v7036_v36  ;;  %v9834_v44 = vld [vmem:[#allocation18_spill] sm:$0xff]  ;;  %v1081_v45 = vmul.f32 %v6538_v53, %v7061_v34 }
 0x2dc   : > { %v1365_v19 = vadd.f32 %v1360_v51, %v1304_v28  ;;  %v1377_v26 = vadd.f32 %v1372_v55, %v1336_v9  ;;  %v921_v9 = vmul.f32 %v9834_v44, %v7061_v34  ;;  %v9835_v55 = vld [vmem:[#allocation28_spill] sm:$0xff] }
 0x2dd   : > { %v1396_v5 = vpop.permute.xlu1 %1395  ;;  %v1428_v0 = vpop.permute.xlu0 %1427  ;;  %v1581_v3 = vmul.f32 %v6935_v7, %v9835_v55 }
 0x2de   : > { %v1409_v47 = vadd.f32 %v1396_v5, %v1353_v60  ;;  %v985_v60 = vmul.f32 %v6528_v46, %v7061_v34  ;;  %v1049_v46 = vmul.f32 %v6540_v54, %v7061_v34  ;;  %v1814_v54 = vmul.f32 %v6967_v62, %v6994_v31 }
 0x2df   : > { %2222 = vrot.lane.b32.xlu1 %v2211_v40, %s6273_s29  ;;  %2254 = vrot.lane.b32.xlu0 %v2243_v24, %s6273_s29  ;;  %v1441_v40 = vadd.f32 %v1428_v0, %v1365_v19 }
 0x2e1   : > { %v1460_v14 = vpop.permute.xlu1 %1459  ;;  %v1492_v28 = vpop.permute.xlu0 %1491 }
 0x2e2   : > { %v1505_v51 = vadd.f32 %v1492_v28, %v1409_v47  ;;  %v1473_v36 = vadd.f32 %v1460_v14, %v1377_v26  ;;  %v1593_v47 = vmul.f32 %v6949_v33, %v9835_v55 }
 0x2e3   : > { %967 = vrot.lane.b32.xlu1 %v953_v25, %s6272_s19  ;;  %935 = vrot.lane.b32.xlu0 %v921_v9, %s6272_s19  ;;  %v1605_v25 = vmul.f32 %v6945_v58, %v9835_v55 }
 0x2e4   : > { %v1586_v24 = vadd.f32 %v1581_v3, %v1505_v51 }
 0x2e5   : > { %v1524_v37 = vpop.permute.xlu1 %1523  ;;  %v1556_v22 = vpop.permute.xlu0 %1555 }
 0x2e6   : > { %v1537_v5 = vadd.f32 %v1524_v37, %v1441_v40  ;;  %v1569_v44 = vadd.f32 %v1556_v22, %v1473_v36  ;;  %v7091_v36 = vld [vmem:[#allocation2 + $0x19] sm:$0xff]  ;;  %v7093_v22 = vld [vmem:[#allocation2 + $0x21] sm:$0x3] }
 0x2e7   : > { %1031 = vrot.lane.b32.xlu1 %v1017_v43, %s6273_s29  ;;  %999 = vrot.lane.b32.xlu0 %v985_v60, %s6272_s19  ;;  %v1153_v28 = vmul.f32 %v6583_v8, %v7091_v36  ;;  %v1154_v53 = vmul.f32 %v6583_v8, %v7093_v22  ;;  %v1185_v8 = vmul.f32 %v6565_v1, %v7091_v36 }
 0x2e8   : > { %v1598_v3 = vadd.f32 %v1593_v47, %v1537_v5  ;;  %v1610_v19 = vadd.f32 %v1605_v25, %v1569_v44  ;;  %v1186_v5 = vmul.f32 %v6565_v1, %v7093_v22  ;;  %v1826_v25 = vmul.f32 %v6983_v16, %v6994_v31 }
 0x2e9   : > { %v1661_v26 = vpop.permute.xlu0 %1660  ;;  %v1629_v0 = vpop.permute.xlu1 %1628 }
 0x2ea   : > { %v1642_v37 = vadd.f32 %v1629_v0, %v1586_v24  ;;  %v1674_v55 = vadd.f32 %v1661_v26, %v1598_v3  ;;  %v1838_v0 = vmul.f32 %v6977_v11, %v6994_v31  ;;  %v7127_v31 = vstv %s5733_s16  ;;  %s5755_s16 = sld [smem:[#allocation4 + $0x3a]] }
 0x2eb   : > { %1095 = vrot.lane.b32.xlu1 %v1081_v45, %s6273_s29  ;;  %1063 = vrot.lane.b32.xlu0 %v1049_v46, %s6273_s29  ;;  %v9836_v45 = vld [vmem:[#allocation22_spill] sm:$0xff] }
 0x2ec   : > { %v1217_v46 = vmul.f32 %v9836_v45, %v7091_v36 }
 0x2ed   : > { %v1725_v9 = vpop.permute.xlu0 %1724  ;;  %v1693_v14 = vpop.permute.xlu1 %1692 }
 0x2ee   : > { %v1738_v51 = vadd.f32 %v1725_v9, %v1642_v37  ;;  %v1706_v40 = vadd.f32 %v1693_v14, %v1610_v19  ;;  %v1218_v37 = vmul.f32 %v9836_v45, %v7093_v22 }
 0x2ef   : > { %1166 = vrot.lane.b32.xlu1 %v1153_v28, %s6272_s19  ;;  %1168 = vrot.lane.b32.xlu0 %v1154_v53, %s6272_s19  ;;  %v9837_v53 = vld [vmem:[#allocation19_spill] sm:$0xff] }
 0x2f0   : > { %v7105_v24 = vadd.f32 %v1814_v54, %v1738_v51  ;;  %v1250_v51 = vmul.f32 %v9837_v53, %v7093_v22  ;;  %v1249_v54 = vmul.f32 %v9837_v53, %v7091_v36 }
 0x2f1   : > { %v1789_v43 = vpop.permute.xlu0 %1788  ;;  %v1757_v60 = vpop.permute.xlu1 %1756 }
 0x2f2   : > { %v1802_v44 = vadd.f32 %v1789_v43, %v1706_v40  ;;  %v1770_v47 = vadd.f32 %v1757_v60, %v1674_v55  ;;  %v9838_v40 = vld [vmem:[#allocation29_spill] sm:$0xff]  ;;  %v7138_v60 = vstv %s5734_s21  ;;  %s5754_s21 = sld [smem:[#allocation4 + $0x16]] }
 0x2f3   : > { %1200 = vrot.lane.b32.xlu1 %v1186_v5, %s6272_s19  ;;  %1198 = vrot.lane.b32.xlu0 %v1185_v8, %s6272_s19  ;;  %v2046_v43 = vmul.f32 %v7127_v31, %v9838_v40  ;;  %v7140_v5 = vstv %s5735_s22  ;;  %s5757_s22 = sld [smem:[#allocation4 + $0x17]] }
 0x2f4   : > { %v7117_v3 = vadd.f32 %v1826_v25, %v1770_v47  ;;  %v7119_v19 = vadd.f32 %v1838_v0, %v1802_v44  ;;  %v1281_v0 = vmul.f32 %v6605_v17, %v7091_v36 }
 0x2f5   : > { %v1860_v26 = vpop.permute.xlu0 %1859  ;;  %v1892_v1 = vpop.permute.xlu1 %1891 }
 0x2f6   : > { %v1874_v9 = vadd.f32 %v1860_v26, %v6979_v38  ;;  %v1906_v38 = vadd.f32 %v1892_v1, %v7002_v4  ;;  %v1282_v26 = vmul.f32 %v6605_v17, %v7093_v22  ;;  %v2070_v4 = vmul.f32 %v7140_v5, %v9838_v40  ;;  %v9844_v17 = vld [vmem:[#allocation20_spill] sm:$0xff] }
 0x2f7   : > { %1230 = vrot.lane.b32.xlu1 %v1217_v46, %s6272_s19  ;;  %1232 = vrot.lane.b32.xlu0 %v1218_v37, %s6272_s19  ;;  %v2058_v37 = vmul.f32 %v7138_v60, %v9838_v40  ;;  %v1313_v53 = vmul.f32 %v9844_v17, %v7091_v36 }
 0x2f9   : > { %v1924_v14 = vpop.permute.xlu0 %1923  ;;  %v1956_v28 = vpop.permute.xlu1 %1955 }
 0x2fa   : > { %v1970_v55 = vadd.f32 %v1956_v28, %v1874_v9  ;;  %v1938_v8 = vadd.f32 %v1924_v14, %v6998_v63  ;;  %v1314_v28 = vmul.f32 %v9844_v17, %v7093_v22 }
 0x2fb   : > { %1264 = vrot.lane.b32.xlu1 %v1250_v51, %s6273_s29  ;;  %1262 = vrot.lane.b32.xlu0 %v1249_v54, %s6273_s29  ;;  %v7168_v51 = vld [vmem:[#allocation2 + $0x1a] sm:$0xff]  ;;  %v7170_v54 = vld [vmem:[#allocation2 + $0x22] sm:$0x3] }
 0x2fc   : > { %v7144_v44 = vadd.f32 %v2046_v43, %v1970_v55  ;;  %v758_v55 = vpop.f32.mrb[18].mxu1 }
 0x2fd   : > { %v1988_v47 = vpop.permute.xlu0 %1987  ;;  %v2020_v25 = vpop.permute.xlu1 %2019  ;;  %775 = vst.msk [vmem:[#allocation2 + $0x60] sm:$0xff] %vm579_vm2, %v758_v55 }
 0x2fe   : > { %9839 = vst [vmem:[#allocation27_spill] sm:$0xff] %v7144_v44  ;;  %v2002_v45 = vadd.f32 %v1988_v47, %v1906_v38  ;;  %v2034_v46 = vadd.f32 %v2020_v25, %v1938_v8  ;;  %v5996_v40 = vpop.f32.mrb[19].mxu1  ;;  %v1386_v8 = vmul.f32 %v6615_v21, %v7168_v51  ;;  %v1387_v47 = vmul.f32 %v6615_v21, %v7170_v54 }
 0x2ff   : > { %1294 = vrot.lane.b32.xlu1 %v1281_v0, %s6273_s29  ;;  %1296 = vrot.lane.b32.xlu0 %v1282_v26, %s6273_s29  ;;  %v9849_v26 = vld [vmem:[#allocation21_spill] sm:$0xff] }
 0x300   : > { %v7156_v63 = vadd.f32 %v2058_v37, %v2002_v45  ;;  %v7158_v1 = vadd.f32 %v2070_v4, %v2034_v46  ;;  %v1419_v45 = vmul.f32 %v9849_v26, %v7170_v54  ;;  %v1418_v46 = vmul.f32 %v9849_v26, %v7168_v51  ;;  %v9850_v4 = vld [vmem:[#allocation24_spill] sm:$0xff]  ;;  %v9852_v26 = vld [vmem:[#allocation23_spill] sm:$0xff] }
 0x301   : > { %v7160_v9 = vpop.permute.xlu0 %2092  ;;  %v7162_v14 = vpop.permute.xlu1 %2124  ;;  %v1450_v17 = vmul.f32 %v9850_v4, %v7168_v51 }
 0x302   : > { %9840 = vst [vmem:[#allocation17_spill] sm:$0xff] %v7156_v63  ;;  %9841 = vst [vmem:[#allocation18_spill] sm:$0xff] %v7158_v1  ;;  %v1514_v1 = vmul.f32 %v6638_v32, %v7168_v51 }
 0x303   : > { %9842 = vst [vmem:[#allocation28_spill] sm:$0xff] %v7160_v9  ;;  %9843 = vst [vmem:[#allocation22_spill] sm:$0xff] %v7162_v14  ;;  %1328 = vrot.lane.b32.xlu1 %v1314_v28, %s6273_s29  ;;  %1326 = vrot.lane.b32.xlu0 %v1313_v53, %s6273_s29  ;;  %v1451_v28 = vmul.f32 %v9850_v4, %v7170_v54  ;;  %v9851_v53 = vld [vmem:[#allocation35_spill] sm:$0xff]  ;;  %v1129_v14 = vmul.f32 %v6822_v52, %v7091_v36 }
 0x304   : > { %v884_v55 = vmul.f32 %v6775_v59, %v9851_v53 }
 0x305   : > { %v7175_v43 = vpop.permute.xlu0 %2156  ;;  %v7177_v38 = vpop.permute.xlu1 %2188 }
 0x306   : > { %9845 = vst [vmem:[#allocation19_spill] sm:$0xff] %v7175_v43  ;;  %9846 = vst [vmem:[#allocation29_spill] sm:$0xff] %v7177_v38 }
 0x307   : > { %1399 = vrot.lane.b32.xlu1 %v1386_v8, %s6272_s19  ;;  %1401 = vrot.lane.b32.xlu0 %v1387_v47, %s6272_s19 }
 0x309   : > { %v7185_v25 = vpop.permute.xlu0 %2220  ;;  %v7187_v0 = vpop.permute.xlu1 %2252 }
 0x30a   : > { %9847 = vst [vmem:[#allocation20_spill] sm:$0xff] %v7185_v25  ;;  %9848 = vst [vmem:[#allocation40_spill] sm:$0xff] %v7187_v0  ;;  %v896_v0 = vmul.f32 %v6789_v2, %v9851_v53  ;;  %v908_v25 = vmul.f32 %v6801_v15, %v9851_v53 }
 0x30b   : > { %1433 = vrot.lane.b32.xlu1 %v1419_v45, %s6272_s19  ;;  %1431 = vrot.lane.b32.xlu0 %v1418_v46, %s6272_s19  ;;  %v1483_v45 = vmul.f32 %v9852_v26, %v7170_v54  ;;  %v1482_v46 = vmul.f32 %v9852_v26, %v7168_v51 }
 0x30d   : > { %v966_v37 = vpop.permute.xlu0 %965  ;;  %v934_v21 = vpop.permute.xlu1 %933 }
 0x30e   : > { %v945_v40 = vadd.f32 %v934_v21, %v884_v55  ;;  %v977_v21 = vadd.f32 %v966_v37, %v896_v0 }
 0x30f   : > { %1463 = vrot.lane.b32.xlu1 %v1450_v17, %s6272_s19  ;;  %1465 = vrot.lane.b32.xlu0 %v1451_v28, %s6272_s19  ;;  %v1117_v17 = vmul.f32 %v6803_v18, %v7091_v36 }
 0x311   : > { %v1030_v8 = vpop.permute.xlu0 %1029  ;;  %v998_v47 = vpop.permute.xlu1 %997 }
 0x312   : > { %v1041_v4 = vadd.f32 %v1030_v8, %v945_v40  ;;  %v1009_v28 = vadd.f32 %v998_v47, %v908_v25  ;;  %v1515_v40 = vmul.f32 %v6638_v32, %v7170_v54  ;;  %v7227_v25 = vld [vmem:[#allocation2 + $0x40] sm:$0xff] }
 0x313   : > { %1497 = vrot.lane.b32.xlu1 %v1483_v45, %s6273_s29  ;;  %1495 = vrot.lane.b32.xlu0 %v1482_v46, %s6273_s29  ;;  %v1141_v45 = vmul.f32 %v6825_v61, %v7091_v36  ;;  %v1546_v46 = vmul.f32 %v6613_v20, %v7168_v51  ;;  %v1651_v36 = vmul.f32 %v6621_v23, %v7227_v25 }
 0x314   : > { %v7215_v55 = vadd.f32 %v1117_v17, %v1041_v4 }
 0x315   : > { %v1094_v43 = vpop.permute.xlu0 %1093  ;;  %v1062_v26 = vpop.permute.xlu1 %1061 }
 0x316   : > { %v1105_v53 = vadd.f32 %v1094_v43, %v1009_v28  ;;  %v1073_v8 = vadd.f32 %v1062_v26, %v977_v21  ;;  %v1547_v43 = vmul.f32 %v6613_v20, %v7170_v54  ;;  %v9853_v28 = vld [vmem:[#allocation36_spill] sm:$0xff]  ;;  %v763_v20 = vpop.f32.mrb[20].mxu1 }
 0x317   : > { %1527 = vrot.lane.b32.xlu1 %v1514_v1, %s6273_s29  ;;  %1529 = vrot.lane.b32.xlu0 %v1515_v40, %s6273_s29  ;;  %v1619_v1 = vmul.f32 %v6648_v39, %v7227_v25  ;;  %v1349_v26 = vmul.f32 %v6900_v10, %v9853_v28  ;;  %776 = vst.msk [vmem:[#allocation2 + $0x68] sm:$0xff] %vm579_vm2, %v763_v20 }
 0x318   : > { %v7229_v0 = vadd.f32 %v1129_v14, %v1073_v8  ;;  %v7231_v37 = vadd.f32 %v1141_v45, %v1105_v53  ;;  %v5999_v45 = vpop.f32.mrb[21].mxu1  ;;  %v1747_v20 = vmul.f32 %v6666_v48, %v7227_v25 }
 0x319   : > { %v1165_v47 = vpop.permute.xlu0 %1164  ;;  %v1197_v32 = vpop.permute.xlu1 %1196 }
 0x31a   : > { %v1177_v14 = vadd.f32 %v1165_v47, %v7016_v12  ;;  %v1209_v40 = vadd.f32 %v1197_v32, %v7028_v30  ;;  %v1373_v30 = vmul.f32 %v6911_v6, %v9853_v28 }
 0x31b   : > { %1561 = vrot.lane.b32.xlu1 %v1547_v43, %s6273_s29  ;;  %1559 = vrot.lane.b32.xlu0 %v1546_v46, %s6273_s29  ;;  %v9854_v43 = vld [vmem:[#allocation25_spill] sm:$0xff] }
 0x31c   : > { %v1715_v46 = vmul.f32 %v9854_v43, %v7227_v25 }
 0x31d   : > { %v1229_v4 = vpop.permute.xlu0 %1228  ;;  %v1261_v17 = vpop.permute.xlu1 %1260 }
 0x31e   : > { %v1273_v21 = vadd.f32 %v1261_v17, %v1177_v14  ;;  %v1241_v53 = vadd.f32 %v1229_v4, %v7030_v13  ;;  %v9855_v14 = vld [vmem:[#allocation26_spill] sm:$0xff] }
 0x31f   : > { %1664 = vrot.lane.b32.xlu0 %v1651_v36, %s6272_s19  ;;  %1632 = vrot.lane.b32.xlu1 %v1619_v1, %s6272_s19  ;;  %v1683_v17 = vmul.f32 %v9855_v14, %v7227_v25  ;;  %v1361_v1 = vmul.f32 %v6916_v27, %v9853_v28 }
 0x320   : > { %v1354_v8 = vadd.f32 %v1349_v26, %v1273_v21  ;;  %v1779_v26 = vmul.f32 %v6646_v35, %v7227_v25 }
 0x321   : > { %v1293_v12 = vpop.permute.xlu0 %1292  ;;  %v1325_v47 = vpop.permute.xlu1 %1324 }
 0x322   : > { %v1305_v36 = vadd.f32 %v1293_v12, %v1209_v40  ;;  %v1337_v63 = vadd.f32 %v1325_v47, %v1241_v53  ;;  %v1808_v40 = vld [vmem:[#allocation2 + $0x39] sm:$0xff] }
 0x323   : > { %1728 = vrot.lane.b32.xlu0 %v1715_v46, %s6273_s29  ;;  %1696 = vrot.lane.b32.xlu1 %v1683_v17, %s6272_s19  ;;  %v1851_v12 = vmul.f32 %v6749_v41, %v1808_v40  ;;  %v9856_v46 = vld [vmem:[#allocation37_spill] sm:$0xff] }
 0x324   : > { %v1366_v13 = vadd.f32 %v1361_v1, %v1305_v36  ;;  %v1378_v32 = vadd.f32 %v1373_v30, %v1337_v63  ;;  %v1883_v63 = vmul.f32 %v6751_v42, %v1808_v40  ;;  %v1582_v17 = vmul.f32 %v6935_v7, %v9856_v46 }
 0x325   : > { %v1398_v4 = vpop.permute.xlu0 %1397  ;;  %v1430_v21 = vpop.permute.xlu1 %1429 }
 0x326   : > { %v1410_v28 = vadd.f32 %v1398_v4, %v1354_v8  ;;  %v1442_v36 = vadd.f32 %v1430_v21, %v1366_v13  ;;  %v1915_v8 = vmul.f32 %v6759_v49, %v1808_v40  ;;  %v1947_v4 = vmul.f32 %v6761_v50, %v1808_v40 }
 0x327   : > { %1792 = vrot.lane.b32.xlu0 %v1779_v26, %s6273_s29  ;;  %1760 = vrot.lane.b32.xlu1 %v1747_v20, %s6273_s29 }
 0x329   : > { %v1462_v53 = vpop.permute.xlu0 %1461  ;;  %v1494_v45 = vpop.permute.xlu1 %1493 }
 0x32a   : > { %v1506_v47 = vadd.f32 %v1494_v45, %v1410_v28  ;;  %v1474_v1 = vadd.f32 %v1462_v53, %v1378_v32  ;;  %v1594_v28 = vmul.f32 %v6949_v33, %v9856_v46  ;;  %v1606_v45 = vmul.f32 %v6945_v58, %v9856_v46 }
 0x32b   : > { %1863 = vrot.lane.b32.xlu0 %v1851_v12, %s6272_s19  ;;  %1895 = vrot.lane.b32.xlu1 %v1883_v63, %s6272_s19  ;;  %v1979_v12 = vmul.f32 %v6769_v56, %v1808_v40  ;;  %v2011_v63 = vmul.f32 %v6771_v57, %v1808_v40 }
 0x32c   : > { %v1587_v30 = vadd.f32 %v1582_v17, %v1506_v47  ;;  %v7283_v47 = vld [vmem:[#allocation2 + $0x3a] sm:$0xff] }
 0x32d   : > { %v1526_v26 = vpop.permute.xlu0 %1525  ;;  %v1558_v20 = vpop.permute.xlu1 %1557  ;;  %v2148_v44 = vmul.f32 %v6809_v29, %v7283_v47 }
 0x32e   : > { %v1538_v38 = vadd.f32 %v1526_v26, %v1442_v36  ;;  %v1570_v9 = vadd.f32 %v1558_v20, %v1474_v1  ;;  %v9857_v1 = vld [vmem:[#allocation30_spill] sm:$0xff] }
 0x32f   : > { %1927 = vrot.lane.b32.xlu0 %v1915_v8, %s6272_s19  ;;  %1959 = vrot.lane.b32.xlu1 %v1947_v4, %s6273_s29  ;;  %v2084_v26 = vmul.f32 %v9857_v1, %v7283_v47  ;;  %v1815_v8 = vmul.f32 %v6967_v62, %v1808_v40  ;;  %v768_v4 = vpop.f32.mrb[22].mxu1 }
 0x330   : > { %v1599_v13 = vadd.f32 %v1594_v28, %v1538_v38  ;;  %v1611_v32 = vadd.f32 %v1606_v45, %v1570_v9  ;;  %v9858_v9 = vld [vmem:[#allocation31_spill] sm:$0xff]  ;;  %777 = vst.msk [vmem:[#allocation2 + $0x70] sm:$0xf] %vm584_vm3, %v768_v4  ;;  %v9860_v4 = vld [vmem:[#allocation33_spill] sm:$0xff] }
 0x331   : > { %v1663_v21 = vpop.permute.xlu1 %1662  ;;  %v1631_v53 = vpop.permute.xlu0 %1630  ;;  %v2116_v38 = vmul.f32 %v9858_v9, %v7283_v47 }
 0x332   : > { %v1643_v17 = vadd.f32 %v1631_v53, %v1587_v30  ;;  %v1675_v28 = vadd.f32 %v1663_v21, %v1599_v13  ;;  %v6002_v30 = vpop.f32.mrb[23].mxu1  ;;  %v1839_v13 = vmul.f32 %v6977_v11, %v1808_v40 }
 0x333   : > { %1991 = vrot.lane.b32.xlu0 %v1979_v12, %s6273_s29  ;;  %2023 = vrot.lane.b32.xlu1 %v2011_v63, %s6273_s29 }
 0x335   : > { %v1727_v46 = vpop.permute.xlu1 %1726  ;;  %v1695_v36 = vpop.permute.xlu0 %1694 }
 0x336   : > { %v1739_v20 = vadd.f32 %v1727_v46, %v1643_v17  ;;  %v1707_v45 = vadd.f32 %v1695_v36, %v1611_v32  ;;  %v9859_v17 = vld [vmem:[#allocation32_spill] sm:$0xff]  ;;  %v7305_v32 = vld [vmem:[#allocation2 + $0x48] sm:$0x3] }
 0x337   : > { %2096 = vrot.lane.b32.xlu0 %v2084_v26, %s6272_s19  ;;  %2128 = vrot.lane.b32.xlu1 %v2116_v38, %s6272_s19  ;;  %v2180_v46 = vmul.f32 %v9859_v17, %v7283_v47  ;;  %v1827_v38 = vmul.f32 %v6983_v16, %v1808_v40  ;;  %v1620_v40 = vmul.f32 %v6648_v39, %v7305_v32 }
 0x338   : > { %v7294_v12 = vadd.f32 %v1815_v8, %v1739_v20 }
 0x339   : > { %v1791_v53 = vpop.permute.xlu1 %1790  ;;  %v1759_v63 = vpop.permute.xlu0 %1758 }
 0x33a   : > { %v1803_v62 = vadd.f32 %v1791_v53, %v1707_v45  ;;  %v1771_v26 = vadd.f32 %v1759_v63, %v1675_v28  ;;  %v2212_v45 = vmul.f32 %v9860_v4, %v7283_v47  ;;  %v9861_v28 = vld [vmem:[#allocation34_spill] sm:$0xff] }
 0x33b   : > { %2160 = vrot.lane.b32.xlu0 %v2148_v44, %s6272_s19  ;;  %2192 = vrot.lane.b32.xlu1 %v2180_v46, %s6273_s29  ;;  %v2244_v30 = vmul.f32 %v9861_v28, %v7283_v47  ;;  %v1652_v44 = vmul.f32 %v6621_v23, %v7305_v32 }
 0x33c   : > { %v7307_v21 = vadd.f32 %v1827_v38, %v1771_v26  ;;  %v7309_v36 = vadd.f32 %v1839_v13, %v1803_v62  ;;  %v9862_v26 = vld [vmem:[#allocation39_spill] sm:$0xff] }
 0x33d   : > { %v1862_v20 = vpop.permute.xlu1 %1861  ;;  %v1894_v8 = vpop.permute.xlu0 %1893  ;;  %v2047_v38 = vmul.f32 %v7127_v31, %v9862_v26 }
 0x33e   : > { %v1875_v62 = vadd.f32 %v1862_v20, %v7105_v24  ;;  %v1907_v13 = vadd.f32 %v1894_v8, %v7117_v3  ;;  %v1716_v24 = vmul.f32 %v9854_v43, %v7305_v32  ;;  %v1684_v20 = vmul.f32 %v9855_v14, %v7305_v32 }
 0x33f   : > { %2224 = vrot.lane.b32.xlu0 %v2212_v45, %s6273_s29  ;;  %2256 = vrot.lane.b32.xlu1 %v2244_v30, %s6273_s29  ;;  %v1780_v14 = vmul.f32 %v6646_v35, %v7305_v32 }
 0x341   : > { %v1926_v53 = vpop.permute.xlu1 %1925  ;;  %v1958_v63 = vpop.permute.xlu0 %1957 }
 0x342   : > { %v1971_v46 = vadd.f32 %v1958_v63, %v1875_v62  ;;  %v1939_v23 = vadd.f32 %v1926_v53, %v7119_v19  ;;  %v1748_v53 = vmul.f32 %v6666_v48, %v7305_v32 }
 0x343   : > { %1666 = vrot.lane.b32.xlu1 %v1652_v44, %s6272_s19  ;;  %1634 = vrot.lane.b32.xlu0 %v1620_v40, %s6272_s19  ;;  %v2059_v44 = vmul.f32 %v7138_v60, %v9862_v26  ;;  %v2071_v40 = vmul.f32 %v7140_v5, %v9862_v26  ;;  %v7346_v26 = vld [vmem:[#allocation2 + $0x49] sm:$0x3] }
 0x344   : > { %v2052_v45 = vadd.f32 %v2047_v38, %v1971_v46  ;;  %v7342_v46 = vld [vmem:[#allocation2 + $0x58] sm:$0xff]  ;;  %v7344_v38 = vld [vmem:[#allocation2 + $0x41] sm:$0xff] }
 0x345   : > { %v1990_v30 = vpop.permute.xlu1 %1989  ;;  %v2022_v39 = vpop.permute.xlu0 %2021  ;;  %v1852_v48 = vmul.f32 %v6749_v41, %v7344_v38 }
 0x346   : > { %v2003_v62 = vadd.f32 %v1990_v30, %v1907_v13  ;;  %v2035_v63 = vadd.f32 %v2022_v39, %v1939_v23  ;;  %v7350_v13 = vstv %s5742_s8  ;;  %s5756_s8 = sld [smem:[#allocation4 + $0x5e]] }
 0x347   : > { %1730 = vrot.lane.b32.xlu1 %v1716_v24, %s6273_s29  ;;  %1698 = vrot.lane.b32.xlu0 %v1684_v20, %s6272_s19  ;;  %v2280_v30 = vmul.f32 %v7350_v13, %v7342_v46  ;;  %v1853_v24 = vmul.f32 %v6749_v41, %v7346_v26 }
 0x348   : > { %v2064_v3 = vadd.f32 %v2059_v44, %v2003_v62  ;;  %v2076_v19 = vadd.f32 %v2071_v40, %v2035_v63  ;;  %v7358_v62 = vstv %s5743_s13  ;;  %v7362_v63 = vstv %s5744_s20  ;;  %s5759_s13 = sld [smem:[#allocation4 + $0x5f]]  ;;  %s5758_s20 = sld [smem:[#allocation4 + $0x3b]] }
 0x349   : > { %v2095_v43 = vpop.permute.xlu1 %2094  ;;  %v2127_v8 = vpop.permute.xlu0 %2126 }
 0x34a   : > { %v2108_v23 = vadd.f32 %v2095_v43, %v2052_v45  ;;  %v2292_v45 = vmul.f32 %v7358_v62, %v7342_v46  ;;  %v2140_v44 = vadd.f32 %v2127_v8, %v2064_v3 }
 0x34b   : > { %1794 = vrot.lane.b32.xlu1 %v1780_v14, %s6273_s29  ;;  %1762 = vrot.lane.b32.xlu0 %v1748_v53, %s6273_s29  ;;  %v2304_v14 = vmul.f32 %v7362_v63, %v7342_v46 }
 0x34d   : > { %v2159_v35 = vpop.permute.xlu1 %2158  ;;  %v2191_v39 = vpop.permute.xlu0 %2190 }
 0x34e   : > { %v2204_v20 = vadd.f32 %v2191_v39, %v2108_v23  ;;  %v2172_v40 = vadd.f32 %v2159_v35, %v2076_v19  ;;  %v1885_v23 = vmul.f32 %v6751_v42, %v7346_v26  ;;  %v1884_v39 = vmul.f32 %v6751_v42, %v7344_v38 }
 0x34f   : > { %1865 = vrot.lane.b32.xlu1 %v1852_v48, %s6272_s19  ;;  %1867 = vrot.lane.b32.xlu0 %v1853_v24, %s6272_s19  ;;  %v1916_v35 = vmul.f32 %v6759_v49, %v7344_v38  ;;  %v885_v42 = vmul.f32 %v6775_v59, %v7061_v34  ;;  %v909_v59 = vmul.f32 %v6801_v15, %v7061_v34 }
 0x350   : > { %v7366_v43 = vadd.f32 %v2280_v30, %v2204_v20  ;;  %v1917_v20 = vmul.f32 %v6759_v49, %v7346_v26 }
 0x351   : > { %v2223_v41 = vpop.permute.xlu1 %2222  ;;  %v2255_v53 = vpop.permute.xlu0 %2254 }
 0x352   : > { %v2236_v48 = vadd.f32 %v2223_v41, %v2140_v44  ;;  %v2268_v24 = vadd.f32 %v2255_v53, %v2172_v40  ;;  %v1948_v41 = vmul.f32 %v6761_v50, %v7344_v38  ;;  %v897_v53 = vmul.f32 %v6789_v2, %v7061_v34 }
 0x353   : > { %1899 = vrot.lane.b32.xlu1 %v1885_v23, %s6272_s19  ;;  %1897 = vrot.lane.b32.xlu0 %v1884_v39, %s6272_s19  ;;  %v1118_v23 = vmul.f32 %v6803_v18, %v7093_v22  ;;  %v1981_v2 = vmul.f32 %v6769_v56, %v7346_v26  ;;  %v1130_v18 = vmul.f32 %v6822_v52, %v7093_v22  ;;  %v7416_v52 = vld [vmem:[#allocation2 + $0x4a] sm:$0x3] }
 0x354   : > { %v7376_v3 = vadd.f32 %v2292_v45, %v2236_v48  ;;  %v7378_v19 = vadd.f32 %v2304_v14, %v2268_v24  ;;  %v1949_v14 = vmul.f32 %v6761_v50, %v7346_v26  ;;  %v1980_v50 = vmul.f32 %v6769_v56, %v7344_v38 }
 0x355   : > { %v968_v8 = vpop.permute.xlu1 %967  ;;  %v936_v30 = vpop.permute.xlu0 %935  ;;  %v1142_v34 = vmul.f32 %v6825_v61, %v7093_v22  ;;  %v2012_v56 = vmul.f32 %v6771_v57, %v7344_v38 }
 0x356   : > { %v946_v44 = vadd.f32 %v936_v30, %v885_v42  ;;  %v978_v39 = vadd.f32 %v968_v8, %v897_v53  ;;  %v2086_v53 = vmul.f32 %v9857_v1, %v7416_v52 }
 0x357   : > { %1929 = vrot.lane.b32.xlu1 %v1916_v35, %s6272_s19  ;;  %1931 = vrot.lane.b32.xlu0 %v1917_v20, %s6272_s19 }
 0x359   : > { %v1032_v45 = vpop.permute.xlu1 %1031  ;;  %v1000_v40 = vpop.permute.xlu0 %999 }
 0x35a   : > { %v1042_v49 = vadd.f32 %v1032_v45, %v946_v44  ;;  %v1010_v48 = vadd.f32 %v1000_v40, %v909_v59  ;;  %v2013_v40 = vmul.f32 %v6771_v57, %v7346_v26  ;;  %v2118_v59 = vmul.f32 %v9858_v9, %v7416_v52 }
 0x35b   : > { %1963 = vrot.lane.b32.xlu1 %v1949_v14, %s6273_s29  ;;  %1961 = vrot.lane.b32.xlu0 %v1948_v41, %s6273_s29  ;;  %v7414_v14 = vld [vmem:[#allocation2 + $0x42] sm:$0xff] }
 0x35c   : > { %v1123_v24 = vadd.f32 %v1118_v23, %v1042_v49  ;;  %v2085_v41 = vmul.f32 %v9857_v1, %v7414_v14  ;;  %v2117_v23 = vmul.f32 %v9858_v9, %v7414_v14  ;;  %v1350_v9 = vmul.f32 %v6900_v10, %v7168_v51 }
 0x35d   : > { %v1096_v30 = vpop.permute.xlu1 %1095  ;;  %v1064_v35 = vpop.permute.xlu0 %1063 }
 0x35e   : > { %v1106_v20 = vadd.f32 %v1096_v30, %v1010_v48  ;;  %v1074_v15 = vadd.f32 %v1064_v35, %v978_v39  ;;  %v2149_v35 = vmul.f32 %v6809_v29, %v7414_v14 }
 0x35f   : > { %1993 = vrot.lane.b32.xlu1 %v1980_v50, %s6273_s29  ;;  %1995 = vrot.lane.b32.xlu0 %v1981_v2, %s6273_s29  ;;  %v2150_v50 = vmul.f32 %v6809_v29, %v7416_v52 }
 0x360   : > { %v1135_v8 = vadd.f32 %v1130_v18, %v1074_v15  ;;  %v1147_v42 = vadd.f32 %v1142_v34, %v1106_v20  ;;  %v1351_v15 = vmul.f32 %v6900_v10, %v7170_v54 }
 0x361   : > { %v1167_v44 = vpop.permute.xlu1 %1166  ;;  %v1169_v45 = vpop.permute.xlu0 %1168 }
 0x362   : > { %v1178_v39 = vadd.f32 %v1167_v44, %v7215_v55  ;;  %v1179_v48 = vadd.f32 %v1169_v45, %v1123_v24  ;;  %v2182_v45 = vmul.f32 %v9859_v17, %v7416_v52 }
 0x363   : > { %2027 = vrot.lane.b32.xlu1 %v2013_v40, %s6273_s29  ;;  %2025 = vrot.lane.b32.xlu0 %v2012_v56, %s6273_s29  ;;  %v2181_v40 = vmul.f32 %v9859_v17, %v7414_v14  ;;  %v2213_v17 = vmul.f32 %v9860_v4, %v7414_v14 }
 0x365   : > { %v1201_v61 = vpop.permute.xlu1 %1200  ;;  %v1199_v22 = vpop.permute.xlu0 %1198 }
 0x366   : > { %v1211_v55 = vadd.f32 %v1201_v61, %v1135_v8  ;;  %v1210_v24 = vadd.f32 %v1199_v22, %v7229_v0  ;;  %v1362_v0 = vmul.f32 %v6916_v27, %v7168_v51 }
 0x367   : > { %2098 = vrot.lane.b32.xlu1 %v2085_v41, %s6272_s19  ;;  %2100 = vrot.lane.b32.xlu0 %v2086_v53, %s6272_s19  ;;  %v1363_v41 = vmul.f32 %v6916_v27, %v7170_v54  ;;  %v1374_v27 = vmul.f32 %v6911_v6, %v7168_v51  ;;  %v2246_v51 = vmul.f32 %v9861_v28, %v7416_v52 }
 0x369   : > { %v1231_v57 = vpop.permute.xlu1 %1230  ;;  %v1233_v49 = vpop.permute.xlu0 %1232 }
 0x36a   : > { %v1242_v8 = vadd.f32 %v1231_v57, %v7231_v37  ;;  %v1243_v61 = vadd.f32 %v1233_v49, %v1147_v42  ;;  %v7465_v37 = vstv %s5746_s23  ;;  %v7467_v42 = vstv %s5745_s9  ;;  %s5763_s23 = sld [smem:[#allocation4 + $0x19]]  ;;  %s7783_s9 = sld [smem:[#allocation4 + $0x15]] }
 0x36b   : > { %2132 = vrot.lane.b32.xlu1 %v2118_v59, %s6272_s19  ;;  %2130 = vrot.lane.b32.xlu0 %v2117_v23, %s6272_s19 }
 0x36d   : > { %v1265_v1 = vpop.permute.xlu1 %1264  ;;  %v1263_v30 = vpop.permute.xlu0 %1262 }
 0x36e   : > { %v1275_v2 = vadd.f32 %v1265_v1, %v1179_v48  ;;  %v1274_v20 = vadd.f32 %v1263_v30, %v1178_v39  ;;  %v2214_v39 = vmul.f32 %v9860_v4, %v7416_v52  ;;  %v1375_v30 = vmul.f32 %v6911_v6, %v7170_v54  ;;  %v7473_v54 = vld [vmem:[#allocation2 + $0x50] sm:$0xff] }
 0x36f   : > { %2162 = vrot.lane.b32.xlu1 %v2149_v35, %s6272_s19  ;;  %2164 = vrot.lane.b32.xlu0 %v2150_v50, %s6272_s19  ;;  %v2245_v6 = vmul.f32 %v9861_v28, %v7414_v14  ;;  %v2347_v50 = vmul.f32 %v7465_v37, %v7473_v54 }
 0x370   : > { %v1355_v18 = vadd.f32 %v1350_v9, %v1274_v20  ;;  %v1356_v34 = vadd.f32 %v1351_v15, %v1275_v2  ;;  %v2315_v2 = vmul.f32 %v7467_v42, %v7473_v54  ;;  %v7481_v15 = vstv %s5748_s14  ;;  %s7802_s14 = sld [smem:[#allocation4 + $0x39]] }
 0x371   : > { %v1295_v29 = vpop.permute.xlu1 %1294  ;;  %v1297_v44 = vpop.permute.xlu0 %1296 }
 0x372   : > { %v1306_v10 = vadd.f32 %v1295_v29, %v1210_v24  ;;  %v1307_v56 = vadd.f32 %v1297_v44, %v1211_v55  ;;  %v7483_v55 = vstv %s5747_s15  ;;  %v2411_v29 = vmul.f32 %v7481_v15, %v7473_v54  ;;  %s7804_s15 = sld [smem:[#allocation4 + $0x5d]] }
 0x373   : > { %2196 = vrot.lane.b32.xlu1 %v2182_v45, %s6273_s29  ;;  %2194 = vrot.lane.b32.xlu0 %v2181_v40, %s6273_s29  ;;  %v2379_v44 = vmul.f32 %v7483_v55, %v7473_v54  ;;  %v7491_v45 = vstv %s5750_s17  ;;  %v7493_v40 = vstv %s5749_s18  ;;  %s5764_s17 = sld [smem:[#allocation4 + $0x3d]]  ;;  %s5765_s18 = sld [smem:[#allocation4 + $0x61]] }
 0x374   : > { %v1368_v22 = vadd.f32 %v1363_v41, %v1307_v56  ;;  %v1367_v53 = vadd.f32 %v1362_v0, %v1306_v10 }
 0x375   : > { %v1329_v59 = vpop.permute.xlu1 %1328  ;;  %v1327_v23 = vpop.permute.xlu0 %1326 }
 0x376   : > { %v1339_v48 = vadd.f32 %v1329_v59, %v1243_v61  ;;  %v1338_v1 = vadd.f32 %v1327_v23, %v1242_v8  ;;  %v2475_v8 = vmul.f32 %v7491_v45, %v7473_v54  ;;  %v2443_v61 = vmul.f32 %v7493_v40, %v7473_v54 }
 0x377   : > { %2226 = vrot.lane.b32.xlu1 %v2213_v17, %s6273_s29  ;;  %2228 = vrot.lane.b32.xlu0 %v2214_v39, %s6273_s29  ;;  %v1583_v17 = vmul.f32 %v6935_v7, %v7227_v25  ;;  %v1584_v39 = vmul.f32 %v6935_v7, %v7305_v32  ;;  %v1595_v7 = vmul.f32 %v6949_v33, %v7227_v25 }
 0x378   : > { %v1379_v57 = vadd.f32 %v1374_v27, %v1338_v1  ;;  %v1380_v4 = vadd.f32 %v1375_v30, %v1339_v48 }
 0x379   : > { %v1400_v49 = vpop.permute.xlu1 %1399  ;;  %v1402_v35 = vpop.permute.xlu0 %1401 }
 0x37a   : > { %v1411_v10 = vadd.f32 %v1400_v49, %v1355_v18  ;;  %v1412_v56 = vadd.f32 %v1402_v35, %v1356_v34  ;;  %v2316_v18 = vmul.f32 %v7467_v42, %v7342_v46  ;;  %v2348_v34 = vmul.f32 %v7465_v37, %v7342_v46 }
 0x37b   : > { %2260 = vrot.lane.b32.xlu1 %v2246_v51, %s6273_s29  ;;  %2258 = vrot.lane.b32.xlu0 %v2245_v6, %s6273_s29 }
 0x37d   : > { %v1434_v20 = vpop.permute.xlu1 %1433  ;;  %v1432_v9 = vpop.permute.xlu0 %1431 }
 0x37e   : > { %v1444_v48 = vadd.f32 %v1434_v20, %v1368_v22  ;;  %v1443_v1 = vadd.f32 %v1432_v9, %v1367_v53 }
 0x37f   : > { %2357 = vrot.lane.b32.xlu1 %v2347_v50, %s6272_s19  ;;  %2325 = vrot.lane.b32.xlu0 %v2315_v2, %s6272_s19  ;;  %v1596_v50 = vmul.f32 %v6949_v33, %v7305_v32  ;;  %v1607_v33 = vmul.f32 %v6945_v58, %v7227_v25  ;;  %v2476_v25 = vmul.f32 %v7491_v45, %v7342_v46 }
 0x381   : > { %v1464_v28 = vpop.permute.xlu1 %1463  ;;  %v1466_v24 = vpop.permute.xlu0 %1465 }
 0x382   : > { %v1475_v22 = vadd.f32 %v1464_v28, %v1379_v57  ;;  %v1476_v53 = vadd.f32 %v1466_v24, %v1380_v4  ;;  %v1608_v57 = vmul.f32 %v6945_v58, %v7305_v32  ;;  %v7541_v58 = vstv %s5754_s21  ;;  %s5766_s21 = sld [smem:[#allocation4 + $0x1a]] }
 0x383   : > { %2421 = vrot.lane.b32.xlu1 %v2411_v29, %s6273_s29  ;;  %2389 = vrot.lane.b32.xlu0 %v2379_v44, %s6272_s19  ;;  %v2380_v44 = vmul.f32 %v7483_v55, %v7342_v46 }
 0x385   : > { %v1498_v41 = vpop.permute.xlu1 %1497  ;;  %v1496_v0 = vpop.permute.xlu0 %1495 }
 0x386   : > { %v1508_v59 = vadd.f32 %v1498_v41, %v1412_v56  ;;  %v1507_v23 = vadd.f32 %v1496_v0, %v1411_v10  ;;  %v2412_v10 = vmul.f32 %v7481_v15, %v7342_v46 }
 0x387   : > { %2485 = vrot.lane.b32.xlu1 %v2475_v8, %s6273_s29  ;;  %2453 = vrot.lane.b32.xlu0 %v2443_v61, %s6273_s29  ;;  %v2444_v8 = vmul.f32 %v7493_v40, %v7342_v46  ;;  %v7537_v61 = vld [vmem:[#allocation2 + $0x51] sm:$0xff] }
 0x388   : > { %v1588_v27 = vadd.f32 %v1583_v17, %v1507_v23  ;;  %v7511_v30 = vadd.f32 %v1584_v39, %v1508_v59  ;;  %v7539_v59 = vstv %s5755_s16  ;;  %v2548_v46 = vmul.f32 %v7541_v58, %v7537_v61  ;;  %s5760_s16 = sld [smem:[#allocation4 + $0x18]] }
 0x389   : > { %v1528_v49 = vpop.permute.xlu1 %1527  ;;  %v1530_v35 = vpop.permute.xlu0 %1529  ;;  %v2580_v39 = vmul.f32 %v7539_v59, %v7537_v61 }
 0x38a   : > { %v1539_v51 = vadd.f32 %v1528_v49, %v1443_v1  ;;  %v1540_v6 = vadd.f32 %v1530_v35, %v1444_v48  ;;  %v7551_v48 = vstv %s5756_s8  ;;  %v9863_v1 = vld [vmem:[#allocation38_spill] sm:$0xff]  ;;  %s5762_s8 = sld [smem:[#allocation4 + $0x60]] }
 0x38b   : > { %2327 = vrot.lane.b32.xlu1 %v2316_v18, %s6272_s19  ;;  %2359 = vrot.lane.b32.xlu0 %v2348_v34, %s6272_s19  ;;  %v7549_v34 = vstv %s5757_s22  ;;  %v1816_v49 = vmul.f32 %v9863_v1, %v7344_v38  ;;  %s5761_s22 = sld [smem:[#allocation4 + $0x3c]] }
 0x38c   : > { %v1600_v2 = vadd.f32 %v1595_v7, %v1539_v51  ;;  %v7519_v20 = vadd.f32 %v1596_v50, %v1540_v6  ;;  %v2644_v50 = vmul.f32 %v7549_v34, %v7537_v61 }
 0x38d   : > { %v1562_v9 = vpop.permute.xlu1 %1561  ;;  %v1560_v29 = vpop.permute.xlu0 %1559 }
 0x38e   : > { %v1572_v56 = vadd.f32 %v1562_v9, %v1476_v53  ;;  %v1571_v41 = vadd.f32 %v1560_v29, %v1475_v22  ;;  %v2612_v22 = vmul.f32 %v7551_v48, %v7537_v61  ;;  %v1828_v53 = vmul.f32 %v6983_v16, %v7344_v38 }
 0x38f   : > { %2391 = vrot.lane.b32.xlu1 %v2380_v44, %s6272_s19  ;;  %2423 = vrot.lane.b32.xlu0 %v2412_v10, %s6273_s29  ;;  %v1840_v9 = vmul.f32 %v6977_v11, %v7344_v38  ;;  %v7569_v10 = vstv %s5758_s20  ;;  %s5768_s20 = sld [smem:[#allocation4 + $0x62]] }
 0x390   : > { %v1612_v4 = vadd.f32 %v1607_v33, %v1571_v41  ;;  %v7531_v28 = vadd.f32 %v1608_v57, %v1572_v56  ;;  %v7573_v56 = vld [vmem:[#allocation2 + $0x60] sm:$0xff] }
 0x391   : > { %v1665_v24 = vpop.permute.xlu0 %1664  ;;  %v1633_v0 = vpop.permute.xlu1 %1632 }
 0x392   : > { %v1644_v32 = vadd.f32 %v1633_v0, %v1588_v27  ;;  %v1676_v27 = vadd.f32 %v1665_v24, %v1600_v2  ;;  %v7567_v2 = vstv %s5759_s13  ;;  %v2676_v24 = vmul.f32 %v7569_v10, %v7537_v61  ;;  %v7583_v0 = vld [vmem:[#allocation2 + $0x52] sm:$0xff]  ;;  %s5767_s13 = sld [smem:[#allocation4 + $0x3e]] }
 0x393   : > { %2455 = vrot.lane.b32.xlu1 %v2444_v8, %s6273_s29  ;;  %2487 = vrot.lane.b32.xlu0 %v2476_v25, %s6273_s29  ;;  %v2708_v38 = vmul.f32 %v7567_v2, %v7537_v61  ;;  %v7585_v8 = vstv %s5763_s23  ;;  %v2349_v25 = vmul.f32 %v7465_v37, %v7573_v56  ;;  %s5772_s23 = sld [smem:[#allocation4 + $0x1c]] }
 0x395   : > { %v1729_v23 = vpop.permute.xlu0 %1728  ;;  %v1697_v17 = vpop.permute.xlu1 %1696 }
 0x396   : > { %v1740_v18 = vadd.f32 %v1729_v23, %v1644_v32  ;;  %v1708_v35 = vadd.f32 %v1697_v17, %v1612_v4 }
 0x397   : > { %2590 = vrot.lane.b32.xlu1 %v2580_v39, %s6272_s19  ;;  %2558 = vrot.lane.b32.xlu0 %v2548_v46, %s6272_s19  ;;  %v2781_v39 = vmul.f32 %v7585_v8, %v7583_v0 }
 0x398   : > { %v7557_v51 = vadd.f32 %v1816_v49, %v1740_v18  ;;  %v2048_v18 = vmul.f32 %v7127_v31, %v7283_v47  ;;  %v2413_v49 = vmul.f32 %v7481_v15, %v7573_v56 }
 0x399   : > { %v1793_v6 = vpop.permute.xlu0 %1792  ;;  %v1761_v7 = vpop.permute.xlu1 %1760 }
 0x39a   : > { %v1804_v29 = vadd.f32 %v1793_v6, %v1708_v35  ;;  %v1772_v44 = vadd.f32 %v1761_v7, %v1676_v27  ;;  %v2317_v27 = vmul.f32 %v7467_v42, %v7573_v56 }
 0x39b   : > { %2654 = vrot.lane.b32.xlu1 %v2644_v50, %s6273_s29  ;;  %2622 = vrot.lane.b32.xlu0 %v2612_v22, %s6272_s19 }
 0x39c   : > { %v7575_v41 = vadd.f32 %v1828_v53, %v1772_v44  ;;  %v7577_v33 = vadd.f32 %v1840_v9, %v1804_v29  ;;  %v2060_v44 = vmul.f32 %v7138_v60, %v7283_v47 }
 0x39d   : > { %v1864_v57 = vpop.permute.xlu0 %1863  ;;  %v1896_v4 = vpop.permute.xlu1 %1895 }
 0x39e   : > { %v1876_v32 = vadd.f32 %v1864_v57, %v7294_v12  ;;  %v844_v12 = vpop.f32.mrb[14].mxu0  ;;  %v1908_v35 = vadd.f32 %v1896_v4, %v7307_v21  ;;  %v2072_v57 = vmul.f32 %v7140_v5, %v7283_v47 }
 0x39f   : > { %2718 = vrot.lane.b32.xlu1 %v2708_v38, %s6273_s29  ;;  %2686 = vrot.lane.b32.xlu0 %v2676_v24, %s6273_s29  ;;  %869 = vst.msk [vmem:[#allocation2 + $0x78] sm:$0xff] %vm579_vm2, %v844_v12  ;;  %v6009_v50 = vpop.f32.mrb[15].mxu0 }
 0x3a0   : > { %v849_v38 = vpop.f32.mrb[16].mxu0  ;;  %v2281_v50 = vmul.f32 %v7350_v13, %v7573_v56 }
 0x3a1   : > { %v1928_v23 = vpop.permute.xlu0 %1927  ;;  %v1960_v17 = vpop.permute.xlu1 %1959  ;;  %870 = vst.msk [vmem:[#allocation2 + $0x80] sm:$0xff] %vm579_vm2, %v849_v38 }
 0x3a2   : > { %v1972_v46 = vadd.f32 %v1960_v17, %v1876_v32  ;;  %v1940_v6 = vadd.f32 %v1928_v23, %v7309_v36  ;;  %v6012_v21 = vpop.f32.mrb[17].mxu0  ;;  %v2477_v32 = vmul.f32 %v7491_v45, %v7573_v56  ;;  %v2381_v23 = vmul.f32 %v7483_v55, %v7573_v56  ;;  %v7616_v17 = vld [vmem:[#allocation2 + $0x59] sm:$0xff] }
 0x3a3   : > { %2361 = vrot.lane.b32.xlu1 %v2349_v25, %s6272_s19  ;;  %2791 = vrot.lane.b32.xlu0 %v2781_v39, %s6272_s19  ;;  %v854_v47 = vpop.f32.mrb[18].mxu0  ;;  %v2549_v12 = vmul.f32 %v7541_v58, %v7616_v17  ;;  %v2613_v21 = vmul.f32 %v7551_v48, %v7616_v17 }
 0x3a4   : > { %v2053_v7 = vadd.f32 %v2048_v18, %v1972_v46  ;;  %871 = vst.msk [vmem:[#allocation2 + $0x88] sm:$0xff] %vm579_vm2, %v854_v47  ;;  %v6015_v39 = vpop.f32.mrb[19].mxu0  ;;  %v2293_v47 = vmul.f32 %v7358_v62, %v7573_v56 }
 0x3a5   : > { %v1992_v22 = vpop.permute.xlu0 %1991  ;;  %v2024_v53 = vpop.permute.xlu1 %2023 }
 0x3a6   : > { %v2004_v9 = vadd.f32 %v1992_v22, %v1908_v35  ;;  %v2036_v29 = vadd.f32 %v2024_v53, %v1940_v6  ;;  %v859_v18 = vpop.f32.mrb[20].mxu0  ;;  %v2445_v35 = vmul.f32 %v7493_v40, %v7573_v56 }
 0x3a7   : > { %2425 = vrot.lane.b32.xlu1 %v2413_v49, %s6273_s29  ;;  %2329 = vrot.lane.b32.xlu0 %v2317_v27, %s6272_s19  ;;  %872 = vst.msk [vmem:[#allocation2 + $0x90] sm:$0xff] %vm579_vm2, %v859_v18  ;;  %v6018_v22 = vpop.f32.mrb[21].mxu0  ;;  %v2677_v18 = vmul.f32 %v7569_v10, %v7616_v17 }
 0x3a8   : > { %v2065_v36 = vadd.f32 %v2060_v44, %v2004_v9  ;;  %v2077_v4 = vadd.f32 %v2072_v57, %v2036_v29  ;;  %v2709_v22 = vmul.f32 %v7567_v2, %v7616_v17 }
 0x3a9   : > { %v2097_v24 = vpop.permute.xlu0 %2096  ;;  %v2129_v25 = vpop.permute.xlu1 %2128 }
 0x3aa   : > { %v2109_v46 = vadd.f32 %v2097_v24, %v2053_v7  ;;  %v864_v7 = vpop.f32.mrb[22].mxu0  ;;  %v2141_v53 = vadd.f32 %v2129_v25, %v2065_v36  ;;  %v2581_v24 = vmul.f32 %v7539_v59, %v7616_v17  ;;  %v2305_v36 = vmul.f32 %v7362_v63, %v7573_v56 }
 0x3ab   : > { %2489 = vrot.lane.b32.xlu1 %v2477_v32, %s6273_s29  ;;  %2393 = vrot.lane.b32.xlu0 %v2381_v23, %s6272_s19  ;;  %873 = vst.msk [vmem:[#allocation2 + $0x98] sm:$0xf] %vm584_vm3, %v864_v7  ;;  %v6021_v44 = vpop.f32.mrb[23].mxu0 }
 0x3ad   : > { %v2161_v49 = vpop.permute.xlu0 %2160  ;;  %v2193_v27 = vpop.permute.xlu1 %2192 }
 0x3ae   : > { %v2205_v6 = vadd.f32 %v2193_v27, %v2109_v46  ;;  %v2173_v9 = vadd.f32 %v2161_v49, %v2077_v4  ;;  %v2645_v49 = vmul.f32 %v7549_v34, %v7616_v17  ;;  %v7651_v27 = vld [vmem:[#allocation2 + $0x5a] sm:$0xff] }
 0x3af   : > { %2560 = vrot.lane.b32.xlu1 %v2549_v12, %s6272_s19  ;;  %2457 = vrot.lane.b32.xlu0 %v2445_v35, %s6273_s29  ;;  %v7656_v12 = vld [vmem:[#allocation2 + $0x68] sm:$0xff] }
 0x3b0   : > { %v7630_v29 = vadd.f32 %v2281_v50, %v2205_v6  ;;  %v2782_v50 = vmul.f32 %v7585_v8, %v7651_v27 }
 0x3b1   : > { %v2225_v57 = vpop.permute.xlu0 %2224  ;;  %v2257_v38 = vpop.permute.xlu1 %2256 }
 0x3b2   : > { %v2237_v32 = vadd.f32 %v2225_v57, %v2141_v53  ;;  %v2269_v23 = vadd.f32 %v2257_v38, %v2173_v9  ;;  %v1817_v53 = vmul.f32 %v9863_v1, %v7346_v26  ;;  %v2350_v9 = vmul.f32 %v7465_v37, %v7656_v12 }
 0x3b3   : > { %2624 = vrot.lane.b32.xlu1 %v2613_v21, %s6272_s19  ;;  %2592 = vrot.lane.b32.xlu0 %v2581_v24, %s6272_s19  ;;  %v1829_v1 = vmul.f32 %v6983_v16, %v7346_v26 }
 0x3b4   : > { %v7643_v4 = vadd.f32 %v2293_v47, %v2237_v32  ;;  %v7645_v25 = vadd.f32 %v2305_v36, %v2269_v23  ;;  %v1841_v47 = vmul.f32 %v6977_v11, %v7346_v26  ;;  %v2446_v26 = vmul.f32 %v7493_v40, %v7656_v12 }
 0x3b5   : > { %v1667_v39 = vpop.permute.xlu1 %1666  ;;  %v1635_v46 = vpop.permute.xlu0 %1634 }
 0x3b6   : > { %v1645_v56 = vadd.f32 %v1635_v46, %v7511_v30  ;;  %v2318_v30 = vmul.f32 %v7467_v42, %v7656_v12  ;;  %v1677_v44 = vadd.f32 %v1667_v39, %v7519_v20 }
 0x3b7   : > { %2688 = vrot.lane.b32.xlu1 %v2677_v18, %s6273_s29  ;;  %2656 = vrot.lane.b32.xlu0 %v2645_v49, %s6273_s29  ;;  %v2414_v18 = vmul.f32 %v7481_v15, %v7656_v12  ;;  %v2478_v49 = vmul.f32 %v7491_v45, %v7656_v12 }
 0x3b9   : > { %v1731_v35 = vpop.permute.xlu1 %1730  ;;  %v1699_v6 = vpop.permute.xlu0 %1698 }
 0x3ba   : > { %v1741_v7 = vadd.f32 %v1731_v35, %v1645_v56  ;;  %v1709_v57 = vadd.f32 %v1699_v6, %v7531_v28  ;;  %v2382_v28 = vmul.f32 %v7483_v55, %v7656_v12  ;;  %v7688_v56 = vld [vmem:[#allocation2 + $0x61] sm:$0xff] }
 0x3bb   : > { %2793 = vrot.lane.b32.xlu1 %v2782_v50, %s6272_s19  ;;  %2720 = vrot.lane.b32.xlu0 %v2709_v22, %s6273_s29  ;;  %v2582_v50 = vmul.f32 %v7539_v59, %v7688_v56  ;;  %v2550_v22 = vmul.f32 %v7541_v58, %v7688_v56 }
 0x3bc   : > { %v1822_v38 = vadd.f32 %v1817_v53, %v1741_v7 }
 0x3bd   : > { %v1795_v21 = vpop.permute.xlu1 %1794  ;;  %v1763_v24 = vpop.permute.xlu0 %1762 }
 0x3be   : > { %v1805_v32 = vadd.f32 %v1795_v21, %v1709_v57  ;;  %v1773_v23 = vadd.f32 %v1763_v24, %v1677_v44  ;;  %v2646_v44 = vmul.f32 %v7549_v34, %v7688_v56  ;;  %v2614_v57 = vmul.f32 %v7551_v48, %v7688_v56 }
 0x3bf   : > { %2331 = vrot.lane.b32.xlu1 %v2318_v30, %s6272_s19  ;;  %2363 = vrot.lane.b32.xlu0 %v2350_v9, %s6272_s19 }
 0x3c0   : > { %v1834_v36 = vadd.f32 %v1829_v1, %v1773_v23  ;;  %v1846_v46 = vadd.f32 %v1841_v47, %v1805_v32  ;;  %v2049_v32 = vmul.f32 %v7127_v31, %v7414_v14  ;;  %v2050_v23 = vmul.f32 %v7127_v31, %v7416_v52  ;;  %v7710_v1 = vld [vmem:[#allocation2 + $0x70] sm:$0x3] }
 0x3c1   : > { %v1866_v20 = vpop.permute.xlu1 %1865  ;;  %v1868_v39 = vpop.permute.xlu0 %1867 }
 0x3c2   : > { %v1877_v7 = vadd.f32 %v1866_v20, %v7557_v51  ;;  %v1878_v53 = vadd.f32 %v1868_v39, %v1822_v38 }
 0x3c3   : > { %2395 = vrot.lane.b32.xlu1 %v2382_v28, %s6272_s19  ;;  %2427 = vrot.lane.b32.xlu0 %v2414_v18, %s6273_s29  ;;  %v2710_v18 = vmul.f32 %v7567_v2, %v7688_v56 }
 0x3c5   : > { %v1900_v16 = vpop.permute.xlu1 %1899  ;;  %v1898_v11 = vpop.permute.xlu0 %1897 }
 0x3c6   : > { %v1910_v51 = vadd.f32 %v1900_v16, %v1834_v36  ;;  %v1909_v38 = vadd.f32 %v1898_v11, %v7575_v41  ;;  %v2062_v36 = vmul.f32 %v7138_v60, %v7416_v52  ;;  %v2061_v41 = vmul.f32 %v7138_v60, %v7414_v14 }
 0x3c7   : > { %2459 = vrot.lane.b32.xlu1 %v2446_v26, %s6273_s29  ;;  %2491 = vrot.lane.b32.xlu0 %v2478_v49, %s6273_s29  ;;  %v2678_v26 = vmul.f32 %v7569_v10, %v7688_v56  ;;  %v2351_v16 = vmul.f32 %v7465_v37, %v7710_v1  ;;  %v2073_v60 = vmul.f32 %v7140_v5, %v7414_v14 }
 0x3c8   : > { %v2415_v37 = vmul.f32 %v7481_v15, %v7710_v1  ;;  %v7745_v15 = vld [vmem:[#allocation2 + $0x69] sm:$0xff] }
 0x3c9   : > { %v1930_v35 = vpop.permute.xlu1 %1929  ;;  %v1932_v6 = vpop.permute.xlu0 %1931 }
 0x3ca   : > { %v1941_v11 = vadd.f32 %v1930_v35, %v7577_v33  ;;  %v2319_v33 = vmul.f32 %v7467_v42, %v7710_v1 }
 0x3cb   : > { %2594 = vrot.lane.b32.xlu1 %v2582_v50, %s6272_s19  ;;  %2562 = vrot.lane.b32.xlu0 %v2550_v22, %s6272_s19  ;;  %v7716_v50 = vld [vmem:[#allocation2 + $0x62] sm:$0xff]  ;;  %v1942_v22 = vadd.f32 %v1932_v6, %v1846_v46 }
 0x3cd   : > { %v1964_v30 = vpop.permute.xlu1 %1963  ;;  %v1962_v9 = vpop.permute.xlu0 %1961 }
 0x3ce   : > { %v1974_v21 = vadd.f32 %v1964_v30, %v1878_v53  ;;  %v1973_v24 = vadd.f32 %v1962_v9, %v1877_v7 }
 0x3cf   : > { %2658 = vrot.lane.b32.xlu1 %v2646_v44, %s6273_s29  ;;  %2626 = vrot.lane.b32.xlu0 %v2614_v57, %s6272_s19  ;;  %v2783_v44 = vmul.f32 %v7585_v8, %v7716_v50 }
 0x3d0   : > { %v2054_v47 = vadd.f32 %v2049_v32, %v1973_v24  ;;  %v2055_v20 = vadd.f32 %v2050_v23, %v1974_v21  ;;  %v2074_v24 = vmul.f32 %v7140_v5, %v7416_v52  ;;  %v2479_v52 = vmul.f32 %v7491_v45, %v7710_v1 }
 0x3d1   : > { %v1994_v39 = vpop.permute.xlu1 %1993  ;;  %v1996_v28 = vpop.permute.xlu0 %1995  ;;  %v2383_v23 = vmul.f32 %v7483_v55, %v7710_v1 }
 0x3d2   : > { %v2005_v31 = vadd.f32 %v1994_v39, %v1909_v38  ;;  %v2006_v49 = vadd.f32 %v1996_v28, %v1910_v51  ;;  %v2551_v38 = vmul.f32 %v7541_v58, %v7745_v15  ;;  %v2447_v39 = vmul.f32 %v7493_v40, %v7710_v1  ;;  %v7753_v28 = vld [vmem:[#allocation2 + $0x71] sm:$0x3] }
 0x3d3   : > { %2722 = vrot.lane.b32.xlu1 %v2710_v18, %s6273_s29  ;;  %2690 = vrot.lane.b32.xlu0 %v2678_v26, %s6273_s29  ;;  %v2282_v40 = vmul.f32 %v7350_v13, %v7656_v12 }
 0x3d4   : > { %v2067_v7 = vadd.f32 %v2062_v36, %v2006_v49  ;;  %v2066_v53 = vadd.f32 %v2061_v41, %v2005_v31  ;;  %v2584_v31 = vmul.f32 %v7539_v59, %v7753_v28  ;;  %v2552_v49 = vmul.f32 %v7541_v58, %v7753_v28 }
 0x3d5   : > { %v2028_v30 = vpop.permute.xlu1 %2027  ;;  %v2026_v9 = vpop.permute.xlu0 %2025 }
 0x3d6   : > { %v2038_v57 = vadd.f32 %v2028_v30, %v1942_v22  ;;  %v2037_v21 = vadd.f32 %v2026_v9, %v1941_v11  ;;  %v2615_v9 = vmul.f32 %v7551_v48, %v7745_v15 }
 0x3d7   : > { %2365 = vrot.lane.b32.xlu1 %v2351_v16, %s6272_s19  ;;  %2795 = vrot.lane.b32.xlu0 %v2783_v44, %s6272_s19  ;;  %v2283_v16 = vmul.f32 %v7350_v13, %v7710_v1  ;;  %v2583_v44 = vmul.f32 %v7539_v59, %v7745_v15 }
 0x3d8   : > { %v2078_v46 = vadd.f32 %v2073_v60, %v2037_v21  ;;  %v2079_v35 = vadd.f32 %v2074_v24, %v2038_v57  ;;  %v2294_v60 = vmul.f32 %v7358_v62, %v7656_v12  ;;  %v9865_v24 = vld [vmem:[#allocation28_spill] sm:$0xff] }
 0x3d9   : > { %v2099_v6 = vpop.permute.xlu1 %2098  ;;  %v2101_v32 = vpop.permute.xlu0 %2100 }
 0x3da   : > { %v2110_v55 = vadd.f32 %v2099_v6, %v2054_v47  ;;  %v2111_v45 = vadd.f32 %v2101_v32, %v2055_v20 }
 0x3db   : > { %2429 = vrot.lane.b32.xlu1 %v2415_v37, %s6273_s29  ;;  %2333 = vrot.lane.b32.xlu0 %v2319_v33, %s6272_s19 }
 0x3dd   : > { %v2133_v14 = vpop.permute.xlu1 %2132  ;;  %v2131_v5 = vpop.permute.xlu0 %2130 }
 0x3de   : > { %v2143_v47 = vadd.f32 %v2133_v14, %v2067_v7  ;;  %v2142_v20 = vadd.f32 %v2131_v5, %v2066_v53  ;;  %v2295_v7 = vmul.f32 %v7358_v62, %v7710_v1  ;;  %v9864_v53 = vld [vmem:[#allocation27_spill] sm:$0xff]  ;;  %v9866_v14 = vld [vmem:[#allocation29_spill] sm:$0xff] }
 0x3df   : > { %2493 = vrot.lane.b32.xlu1 %v2479_v52, %s6273_s29  ;;  %2397 = vrot.lane.b32.xlu0 %v2383_v23, %s6272_s19  ;;  %v2107_v37 = vadd.f32 %v9865_v24, %v9864_v53 }
 0x3e1   : > { %v2163_v42 = vpop.permute.xlu1 %2162  ;;  %v2165_v51 = vpop.permute.xlu0 %2164  ;;  %v2203_v5 = vadd.f32 %v9866_v14, %v2107_v37 }
 0x3e2   : > { %v2174_v33 = vadd.f32 %v2163_v42, %v2078_v46  ;;  %v2175_v6 = vadd.f32 %v2165_v51, %v2079_v35  ;;  %v2306_v35 = vmul.f32 %v7362_v63, %v7656_v12  ;;  %v2307_v42 = vmul.f32 %v7362_v63, %v7710_v1  ;;  %v9868_v51 = vld [vmem:[#allocation22_spill] sm:$0xff] }
 0x3e3   : > { %2564 = vrot.lane.b32.xlu1 %v2551_v38, %s6272_s19  ;;  %2461 = vrot.lane.b32.xlu0 %v2447_v39, %s6273_s29  ;;  %v2648_v38 = vmul.f32 %v7549_v34, %v7753_v28  ;;  %v2616_v39 = vmul.f32 %v7551_v48, %v7753_v28  ;;  %v9867_v48 = vld [vmem:[#allocation17_spill] sm:$0xff]  ;;  %v2291_v1 = vmul.f32 %v7358_v62, %v7473_v54  ;;  %v7827_v62 = vstv %s7783_s9  ;;  %s5773_s9 = sld [smem:[#allocation4 + $0x40]] }
 0x3e4   : > { %v2512_v37 = vmul.f32 %v7827_v62, %v7537_v61 }
 0x3e5   : > { %v2197_v18 = vpop.permute.xlu1 %2196  ;;  %v2195_v26 = vpop.permute.xlu0 %2194 }
 0x3e6   : > { %v2207_v36 = vadd.f32 %v2197_v18, %v2111_v45  ;;  %v2206_v41 = vadd.f32 %v2195_v26, %v2110_v55  ;;  %v2279_v55 = vmul.f32 %v7350_v13, %v7473_v54  ;;  %v2139_v18 = vadd.f32 %v9868_v51, %v9867_v48  ;;  %v9869_v13 = vld [vmem:[#allocation18_spill] sm:$0xff]  ;;  %v9870_v26 = vld [vmem:[#allocation19_spill] sm:$0xff] }
 0x3e7   : > { %2598 = vrot.lane.b32.xlu1 %v2584_v31, %s6272_s19  ;;  %2566 = vrot.lane.b32.xlu0 %v2552_v49, %s6272_s19  ;;  %v2171_v31 = vadd.f32 %v9870_v26, %v9869_v13 }
 0x3e8   : > { %v7767_v11 = vadd.f32 %v2282_v40, %v2206_v41  ;;  %v7769_v22 = vadd.f32 %v2283_v16, %v2207_v36  ;;  %v2679_v40 = vmul.f32 %v7569_v10, %v7745_v15  ;;  %v2647_v16 = vmul.f32 %v7549_v34, %v7745_v15 }
 0x3e9   : > { %v2227_v30 = vpop.permute.xlu1 %2226  ;;  %v2229_v58 = vpop.permute.xlu0 %2228 }
 0x3ea   : > { %v2238_v57 = vadd.f32 %v2227_v30, %v2142_v20  ;;  %v2239_v21 = vadd.f32 %v2229_v58, %v2143_v47  ;;  %v9871_v47 = vld [vmem:[#allocation20_spill] sm:$0xff] }
 0x3eb   : > { %2628 = vrot.lane.b32.xlu1 %v2615_v9, %s6272_s19  ;;  %2596 = vrot.lane.b32.xlu0 %v2583_v44, %s6272_s19  ;;  %v2235_v20 = vadd.f32 %v9871_v47, %v2139_v18  ;;  %v9872_v30 = vld [vmem:[#allocation40_spill] sm:$0xff]  ;;  %v2284_v9 = vadd.f32 %v2279_v55, %v2203_v5  ;;  %v2303_v44 = vmul.f32 %v7362_v63, %v7473_v54  ;;  %v2812_v55 = vstv %s5764_s17  ;;  %s5776_s17 = sld [smem:[#allocation4 + $0x41]] }
 0x3ec   : > { %v7785_v59 = vadd.f32 %v2294_v60, %v2238_v57  ;;  %v7787_v32 = vadd.f32 %v2295_v7, %v2239_v21  ;;  %v2267_v58 = vadd.f32 %v9872_v30, %v2171_v31  ;;  %v2712_v60 = vmul.f32 %v7567_v2, %v7753_v28  ;;  %v7833_v54 = vld [vmem:[#allocation2 + $0x6a] sm:$0xff] }
 0x3ed   : > { %v2261_v52 = vpop.permute.xlu1 %2260  ;;  %v2259_v23 = vpop.permute.xlu0 %2258  ;;  %v2680_v7 = vmul.f32 %v7569_v10, %v7753_v28  ;;  %v2296_v53 = vadd.f32 %v2291_v1, %v2235_v20  ;;  %v2513_v47 = vmul.f32 %v7827_v62, %v7616_v17 }
 0x3ee   : > { %v2271_v45 = vadd.f32 %v2261_v52, %v2175_v6  ;;  %v2270_v46 = vadd.f32 %v2259_v23, %v2174_v33  ;;  %v2308_v63 = vadd.f32 %v2303_v44, %v2267_v58  ;;  %v7840_v33 = vstv %s7802_s14  ;;  %s5774_s14 = sld [smem:[#allocation4 + $0x64]] }
 0x3ef   : > { %2662 = vrot.lane.b32.xlu1 %v2648_v38, %s6273_s29  ;;  %2630 = vrot.lane.b32.xlu0 %v2616_v39, %s6272_s19  ;;  %v7843_v6 = vstv %s7804_s15  ;;  %v2784_v38 = vmul.f32 %v7585_v8, %v7833_v54  ;;  %v2711_v39 = vmul.f32 %v7567_v2, %v7745_v15  ;;  %v2813_v2 = vmul.f32 %v2812_v55, %v7583_v0  ;;  %s5775_s15 = sld [smem:[#allocation4 + $0x1d]] }
 0x3f0   : > { %v7810_v49 = vadd.f32 %v2306_v35, %v2270_v46  ;;  %v7812_v12 = vadd.f32 %v2307_v42, %v2271_v45  ;;  %v7849_v35 = vld [vmem:[#allocation2 + $0x72] sm:$0x3]  ;;  %v2524_v42 = vmul.f32 %v7840_v33, %v7537_v61  ;;  %v2536_v48 = vmul.f32 %v7843_v6, %v7537_v61 }
 0x3f1   : > { %v2358_v36 = vpop.permute.xlu1 %2357  ;;  %v2326_v41 = vpop.permute.xlu0 %2325  ;;  %v2785_v31 = vmul.f32 %v7585_v8, %v7849_v35  ;;  %v2816_v44 = vmul.f32 %v2812_v55, %v7833_v54 }
 0x3f2   : > { %v2340_v57 = vadd.f32 %v2326_v41, %v2284_v9  ;;  %v2372_v14 = vadd.f32 %v2358_v36, %v2296_v53  ;;  %v2815_v41 = vmul.f32 %v2812_v55, %v7716_v50  ;;  %v2817_v9 = vmul.f32 %v2812_v55, %v7849_v35 }
 0x3f3   : > { %2692 = vrot.lane.b32.xlu1 %v2679_v40, %s6273_s29  ;;  %2660 = vrot.lane.b32.xlu0 %v2647_v16, %s6273_s29  ;;  %v2814_v40 = vmul.f32 %v2812_v55, %v7651_v27  ;;  %v2876_v55 = vstv %s5766_s21  ;;  %s5782_s21 = sld [smem:[#allocation4 + $0x43]] }
 0x3f5   : > { %v2422_v21 = vpop.permute.xlu1 %2421  ;;  %v2390_v34 = vpop.permute.xlu0 %2389 }
 0x3f6   : > { %v2436_v24 = vadd.f32 %v2422_v21, %v2340_v57  ;;  %v2404_v5 = vadd.f32 %v2390_v34, %v2308_v63  ;;  %v2844_v57 = vstv %s5765_s18  ;;  %s5777_s18 = sld [smem:[#allocation4 + $0x65]] }
 0x3f7   : > { %2726 = vrot.lane.b32.xlu1 %v2712_v60, %s6273_s29  ;;  %2694 = vrot.lane.b32.xlu0 %v2680_v7, %s6273_s29  ;;  %v2537_v60 = vmul.f32 %v7843_v6, %v7616_v17  ;;  %v2846_v63 = vmul.f32 %v2844_v57, %v7651_v27 }
 0x3f8   : > { %v2517_v52 = vadd.f32 %v2512_v37, %v2436_v24  ;;  %v2845_v37 = vmul.f32 %v2844_v57, %v7583_v0 }
 0x3f9   : > { %v2486_v10 = vpop.permute.xlu1 %2485  ;;  %v2454_v23 = vpop.permute.xlu0 %2453 }
 0x3fa   : > { %v2500_v45 = vadd.f32 %v2486_v10, %v2404_v5  ;;  %v2468_v46 = vadd.f32 %v2454_v23, %v2372_v14  ;;  %v2848_v23 = vmul.f32 %v2844_v57, %v7833_v54 }
 0x3fb   : > { %2797 = vrot.lane.b32.xlu1 %v2784_v38, %s6272_s19  ;;  %2724 = vrot.lane.b32.xlu0 %v2711_v39, %s6273_s29  ;;  %v2847_v38 = vmul.f32 %v2844_v57, %v7716_v50 }
 0x3fc   : > { %v2529_v51 = vadd.f32 %v2524_v42, %v2468_v46  ;;  %v2541_v18 = vadd.f32 %v2536_v48, %v2500_v45  ;;  %v7897_v46 = vstv %s5761_s22  ;;  %v7899_v42 = vstv %s5762_s8  ;;  %s5783_s22 = sld [smem:[#allocation4 + $0x67]]  ;;  %s5769_s8 = sld [smem:[#allocation4 + $0x1b]] }
 0x3fd   : > { %v2328_v13 = vpop.permute.xlu1 %2327  ;;  %v2360_v26 = vpop.permute.xlu0 %2359 }
 0x3fe   : > { %v2341_v61 = vadd.f32 %v2328_v13, %v7366_v43  ;;  %v2373_v8 = vadd.f32 %v2360_v26, %v7376_v3  ;;  %v2525_v3 = vmul.f32 %v7840_v33, %v7616_v17  ;;  %v7889_v17 = vstv %s5760_s16  ;;  %s5781_s16 = sld [smem:[#allocation4 + $0x1f]] }
 0x3ff   : > { %2823 = vrot.lane.b32.xlu1 %v2813_v2, %s6272_s19  ;;  %2799 = vrot.lane.b32.xlu0 %v2785_v31, %s6272_s19  ;;  %v2745_v45 = vmul.f32 %v7889_v17, %v7583_v0  ;;  %v2877_v31 = vmul.f32 %v2876_v55, %v7583_v0 }
 0x401   : > { %v2392_v1 = vpop.permute.xlu1 %2391  ;;  %v2424_v36 = vpop.permute.xlu0 %2423 }
 0x402   : > { %v2437_v16 = vadd.f32 %v2424_v36, %v2341_v61  ;;  %v2405_v20 = vadd.f32 %v2392_v1, %v7378_v19  ;;  %v2849_v61 = vmul.f32 %v2844_v57, %v7849_v35 }
 0x403   : > { %2827 = vrot.lane.b32.xlu1 %v2815_v41, %s6272_s19  ;;  %2825 = vrot.lane.b32.xlu0 %v2814_v40, %s6272_s19  ;;  %v2757_v41 = vmul.f32 %v7897_v46, %v7583_v0  ;;  %v2769_v40 = vmul.f32 %v7899_v42, %v7583_v0 }
 0x404   : > { %v7871_v43 = vadd.f32 %v2513_v47, %v2437_v16 }
 0x405   : > { %v2456_v30 = vpop.permute.xlu1 %2455  ;;  %v2488_v58 = vpop.permute.xlu0 %2487 }
 0x406   : > { %v2469_v21 = vadd.f32 %v2456_v30, %v2373_v8  ;;  %v2501_v34 = vadd.f32 %v2488_v58, %v2405_v20  ;;  %v2879_v8 = vmul.f32 %v2876_v55, %v7716_v50  ;;  %v2878_v20 = vmul.f32 %v2876_v55, %v7651_v27 }
 0x407   : > { %2831 = vrot.lane.b32.xlu1 %v2817_v9, %s6272_s19  ;;  %2829 = vrot.lane.b32.xlu0 %v2816_v44, %s6272_s19  ;;  %v2881_v9 = vmul.f32 %v2876_v55, %v7849_v35  ;;  %v2880_v44 = vmul.f32 %v2876_v55, %v7833_v54 }
 0x408   : > { %v7881_v19 = vadd.f32 %v2537_v60, %v2501_v34  ;;  %v7883_v7 = vadd.f32 %v2525_v3, %v2469_v21  ;;  %v2908_v21 = vstv %s5767_s13  ;;  %v2514_v60 = vmul.f32 %v7827_v62, %v7688_v56  ;;  %s5784_s13 = sld [smem:[#allocation4 + $0x20]] }
 0x409   : > { %v2591_v53 = vpop.permute.xlu1 %2590  ;;  %v2559_v24 = vpop.permute.xlu0 %2558  ;;  %v2911_v55 = vmul.f32 %v2908_v21, %v7716_v50 }
 0x40a   : > { %v2573_v14 = vadd.f32 %v2559_v24, %v2517_v52  ;;  %v2605_v52 = vadd.f32 %v2591_v53, %v2529_v51  ;;  %v2910_v24 = vmul.f32 %v2908_v21, %v7651_v27 }
 0x40b   : > { %2857 = vrot.lane.b32.xlu1 %v2846_v63, %s6272_s19  ;;  %2855 = vrot.lane.b32.xlu0 %v2845_v37, %s6272_s19  ;;  %v2909_v63 = vmul.f32 %v2908_v21, %v7583_v0 }
 0x40d   : > { %v2655_v5 = vpop.permute.xlu1 %2654  ;;  %v2623_v10 = vpop.permute.xlu0 %2622 }
 0x40e   : > { %v2669_v39 = vadd.f32 %v2655_v5, %v2573_v14  ;;  %v2637_v48 = vadd.f32 %v2623_v10, %v2541_v18  ;;  %v2538_v10 = vmul.f32 %v7843_v6, %v7688_v56 }
 0x40f   : > { %2861 = vrot.lane.b32.xlu1 %v2848_v23, %s6272_s19  ;;  %2859 = vrot.lane.b32.xlu0 %v2847_v38, %s6272_s19 }
 0x410   : > { %v7901_v13 = vadd.f32 %v2745_v45, %v2669_v39  ;;  %v2912_v39 = vmul.f32 %v2908_v21, %v7833_v54 }
 0x411   : > { %v2719_v26 = vpop.permute.xlu1 %2718  ;;  %v2687_v2 = vpop.permute.xlu0 %2686 }
 0x412   : > { %v2733_v1 = vadd.f32 %v2719_v26, %v2637_v48  ;;  %v2701_v36 = vadd.f32 %v2687_v2, %v2605_v52  ;;  %v2526_v52 = vmul.f32 %v7840_v33, %v7688_v56 }
 0x413   : > { %2887 = vrot.lane.b32.xlu1 %v2877_v31, %s6273_s29  ;;  %2863 = vrot.lane.b32.xlu0 %v2849_v61, %s6272_s19  ;;  %v2913_v61 = vmul.f32 %v2908_v21, %v7849_v35 }
 0x414   : > { %v7911_v51 = vadd.f32 %v2757_v41, %v2701_v36  ;;  %v7913_v18 = vadd.f32 %v2769_v40, %v2733_v1 }
 0x415   : > { %v2362_v16 = vpop.permute.xlu1 %2361  ;;  %v7915_v47 = vpop.permute.xlu0 %2791 }
 0x417   : > { %2891 = vrot.lane.b32.xlu1 %v2879_v8, %s6273_s29  ;;  %2889 = vrot.lane.b32.xlu0 %v2878_v20, %s6273_s29 }
 0x419   : > { %v2426_v30 = vpop.permute.xlu1 %2425  ;;  %v2330_v58 = vpop.permute.xlu0 %2329 }
 0x41a   : > { %v2342_v57 = vadd.f32 %v2330_v58, %v7630_v29  ;;  %v2374_v29 = vadd.f32 %v2362_v16, %v7643_v4 }
 0x41b   : > { %2895 = vrot.lane.b32.xlu1 %v2881_v9, %s6273_s29  ;;  %2893 = vrot.lane.b32.xlu0 %v2880_v44, %s6273_s29 }
 0x41c   : > { %v2438_v34 = vadd.f32 %v2426_v30, %v2342_v57  ;;  %v2758_v30 = vmul.f32 %v7897_v46, %v7651_v27 }
 0x41d   : > { %v2490_v3 = vpop.permute.xlu1 %2489  ;;  %v2394_v53 = vpop.permute.xlu0 %2393 }
 0x41e   : > { %v2406_v37 = vadd.f32 %v2394_v53, %v7645_v25  ;;  %v7931_v14 = vadd.f32 %v2514_v60, %v2438_v34  ;;  %v2940_v25 = vstv %s5768_s20  ;;  %v7971_v60 = vld [vmem:[#allocation2 + $0x78] sm:$0xff]  ;;  %v7973_v53 = vld [vmem:[#allocation2 + $0x80] sm:$0xff]  ;;  %s5770_s20 = sld [smem:[#allocation4 + $0x3f]] }
 0x41f   : > { %2921 = vrot.lane.b32.xlu1 %v2910_v24, %s6273_s29  ;;  %2919 = vrot.lane.b32.xlu0 %v2909_v63, %s6273_s29  ;;  %v2941_v31 = vmul.f32 %v2940_v25, %v7583_v0  ;;  %v2943_v40 = vmul.f32 %v2940_v25, %v7716_v50  ;;  %v2942_v16 = vmul.f32 %v2940_v25, %v7651_v27  ;;  %v7979_v24 = vld [vmem:[#allocation2 + $0x90] sm:$0xff] }
 0x420   : > { %v2502_v5 = vadd.f32 %v2490_v3, %v2406_v37  ;;  %v2746_v0 = vmul.f32 %v7889_v17, %v7651_v27  ;;  %v2945_v57 = vmul.f32 %v2940_v25, %v7849_v35  ;;  %v2944_v21 = vmul.f32 %v2940_v25, %v7833_v54 }
 0x421   : > { %v2561_v23 = vpop.permute.xlu1 %2560  ;;  %v2458_v38 = vpop.permute.xlu0 %2457  ;;  %v3013_v3 = vstv %s5772_s23  ;;  %s8186_s23 = sld [smem:[#allocation4 + $0x44]] }
 0x422   : > { %v2470_v45 = vadd.f32 %v2458_v38, %v2374_v29  ;;  %v7942_v48 = vadd.f32 %v2538_v10, %v2502_v5  ;;  %v2574_v56 = vadd.f32 %v2561_v23, %v7871_v43  ;;  %v3014_v5 = vmul.f32 %v3013_v3, %v7971_v60  ;;  %v7985_v23 = vld [vmem:[#allocation2 + $0x88] sm:$0xff] }
 0x423   : > { %2925 = vrot.lane.b32.xlu1 %v2912_v39, %s6273_s29  ;;  %2923 = vrot.lane.b32.xlu0 %v2911_v55, %s6273_s29  ;;  %v3015_v10 = vmul.f32 %v3013_v3, %v7973_v53  ;;  %v7991_v39 = vld [vmem:[#allocation2 + $0x98] sm:$0x3]  ;;  %v3016_v25 = vmul.f32 %v3013_v3, %v7985_v23 }
 0x424   : > { %v7946_v4 = vadd.f32 %v2526_v52, %v2470_v45 }
 0x425   : > { %v2625_v26 = vpop.permute.xlu1 %2624  ;;  %v2593_v2 = vpop.permute.xlu0 %2592 }
 0x426   : > { %v2606_v1 = vadd.f32 %v2593_v2, %v7883_v7  ;;  %v2638_v43 = vadd.f32 %v2625_v26, %v7881_v19  ;;  %v2770_v19 = vmul.f32 %v7899_v42, %v7651_v27  ;;  %v3017_v27 = vmul.f32 %v3013_v3, %v7979_v24 }
 0x427   : > { %2951 = vrot.lane.b32.xlu1 %v2941_v31, %s6273_s29  ;;  %2927 = vrot.lane.b32.xlu0 %v2913_v61, %s6273_s29  ;;  %v3045_v26 = vstv %s5773_s9  ;;  %v2515_v2 = vmul.f32 %v7827_v62, %v7745_v15  ;;  %v3018_v31 = vmul.f32 %v3013_v3, %v7991_v39  ;;  %s8205_s9 = sld [smem:[#allocation4 + $0x63]] }
 0x428   : > { %v3049_v3 = vmul.f32 %v3045_v26, %v7979_v24 }
 0x429   : > { %v2689_v36 = vpop.permute.xlu1 %2688  ;;  %v2657_v41 = vpop.permute.xlu0 %2656 }
 0x42a   : > { %v2702_v8 = vadd.f32 %v2689_v36, %v2606_v1  ;;  %v2670_v20 = vadd.f32 %v2657_v41, %v2574_v56  ;;  %v3046_v41 = vmul.f32 %v3045_v26, %v7971_v60 }
 0x42b   : > { %2955 = vrot.lane.b32.xlu1 %v2943_v40, %s6273_s29  ;;  %2953 = vrot.lane.b32.xlu0 %v2942_v16, %s6273_s29 }
 0x42c   : > { %v7963_v7 = vadd.f32 %v2746_v0, %v2670_v20  ;;  %v7965_v58 = vadd.f32 %v2758_v30, %v2702_v8  ;;  %v2539_v8 = vmul.f32 %v7843_v6, %v7745_v15  ;;  %v2527_v20 = vmul.f32 %v7840_v33, %v7745_v15 }
 0x42d   : > { %v7967_v9 = vpop.permute.xlu1 %2793  ;;  %v2721_v44 = vpop.permute.xlu0 %2720 }
 0x42e   : > { %v2734_v34 = vadd.f32 %v2721_v44, %v2638_v43  ;;  %v3048_v43 = vmul.f32 %v3045_v26, %v7985_v23  ;;  %v3047_v44 = vmul.f32 %v3045_v26, %v7973_v53 }
 0x42f   : > { %2959 = vrot.lane.b32.xlu1 %v2945_v57, %s6273_s29  ;;  %2957 = vrot.lane.b32.xlu0 %v2944_v21, %s6273_s29 }
 0x430   : > { %v7981_v63 = vadd.f32 %v2770_v19, %v2734_v34  ;;  %v3050_v34 = vmul.f32 %v3045_v26, %v7991_v39  ;;  %v2759_v26 = vmul.f32 %v7897_v46, %v7716_v50 }
 0x431   : > { %v2332_v37 = vpop.permute.xlu1 %2331  ;;  %v2364_v29 = vpop.permute.xlu0 %2363 }
 0x432   : > { %v2343_v38 = vadd.f32 %v2332_v37, %v7767_v11  ;;  %v2375_v61 = vadd.f32 %v2364_v29, %v7785_v59  ;;  %v3077_v37 = vstv %s5774_s14  ;;  %v2747_v29 = vmul.f32 %v7889_v17, %v7716_v50  ;;  %s5786_s14 = sld [smem:[#allocation4 + $0x68]] }
 0x433   : > { %3024 = vrot.lane.b32.xlu0 %v3014_v5, %s6272_s19  ;;  %3026 = vrot.lane.b32.xlu1 %v3015_v10, %s6272_s19 }
 0x435   : > { %v2396_v55 = vpop.permute.xlu1 %2395  ;;  %v2428_v45 = vpop.permute.xlu0 %2427 }
 0x436   : > { %v2439_v52 = vadd.f32 %v2428_v45, %v2343_v38  ;;  %v2407_v11 = vadd.f32 %v2396_v55, %v7810_v49  ;;  %v3079_v55 = vmul.f32 %v3077_v37, %v7973_v53  ;;  %v3078_v45 = vmul.f32 %v3077_v37, %v7971_v60 }
 0x437   : > { %3028 = vrot.lane.b32.xlu0 %v3016_v25, %s6272_s19  ;;  %3030 = vrot.lane.b32.xlu1 %v3017_v27, %s6272_s19 }
 0x438   : > { %v8001_v56 = vadd.f32 %v2515_v2, %v2439_v52  ;;  %v2771_v2 = vmul.f32 %v7899_v42, %v7716_v50 }
 0x439   : > { %v2460_v1 = vpop.permute.xlu1 %2459  ;;  %v2492_v36 = vpop.permute.xlu0 %2491 }
 0x43a   : > { %v2471_v40 = vadd.f32 %v2460_v1, %v2375_v61  ;;  %v2503_v16 = vadd.f32 %v2492_v36, %v2407_v11  ;;  %v3081_v11 = vmul.f32 %v3077_v37, %v7979_v24  ;;  %v3080_v1 = vmul.f32 %v3077_v37, %v7985_v23 }
 0x43b   : > { %3056 = vrot.lane.b32.xlu1 %v3046_v41, %s6272_s19  ;;  %3032 = vrot.lane.b32.xlu0 %v3018_v31, %s6272_s19  ;;  %v3109_v36 = vstv %s5775_s15  ;;  %s5790_s15 = sld [smem:[#allocation4 + $0x22]] }
 0x43c   : > { %v8010_v59 = vadd.f32 %v2539_v8, %v2503_v16  ;;  %v8012_v49 = vadd.f32 %v2527_v20, %v2471_v40  ;;  %v3110_v40 = vmul.f32 %v3109_v36, %v7971_v60  ;;  %v3082_v16 = vmul.f32 %v3077_v37, %v7991_v39 }
 0x43d   : > { %v2595_v0 = vpop.permute.xlu1 %2594  ;;  %v2563_v30 = vpop.permute.xlu0 %2562  ;;  %v3114_v37 = vmul.f32 %v3109_v36, %v7991_v39 }
 0x43e   : > { %v2575_v15 = vadd.f32 %v2563_v30, %v7931_v14  ;;  %v2607_v5 = vadd.f32 %v2595_v0, %v7946_v4  ;;  %v2516_v0 = vmul.f32 %v7827_v62, %v7753_v28 }
 0x43f   : > { %3060 = vrot.lane.b32.xlu1 %v3048_v43, %s6272_s19  ;;  %3058 = vrot.lane.b32.xlu0 %v3047_v44, %s6272_s19  ;;  %v3112_v44 = vmul.f32 %v3109_v36, %v7985_v23 }
 0x441   : > { %v2659_v57 = vpop.permute.xlu1 %2658  ;;  %v2627_v21 = vpop.permute.xlu0 %2626 }
 0x442   : > { %v2671_v19 = vadd.f32 %v2659_v57, %v2575_v15  ;;  %v2639_v14 = vadd.f32 %v2627_v21, %v7942_v48  ;;  %v3111_v15 = vmul.f32 %v3109_v36, %v7973_v53 }
 0x443   : > { %3064 = vrot.lane.b32.xlu1 %v3050_v34, %s6272_s19  ;;  %3062 = vrot.lane.b32.xlu0 %v3049_v3, %s6272_s19  ;;  %v2540_v3 = vmul.f32 %v7843_v6, %v7753_v28 }
 0x444   : > { %v8027_v10 = vadd.f32 %v2747_v29, %v2671_v19  ;;  %v3113_v29 = vmul.f32 %v3109_v36, %v7979_v24 }
 0x445   : > { %v2723_v27 = vpop.permute.xlu1 %2722  ;;  %v2691_v38 = vpop.permute.xlu0 %2690 }
 0x446   : > { %v2735_v25 = vadd.f32 %v2723_v27, %v2639_v14  ;;  %v2703_v52 = vadd.f32 %v2691_v38, %v2607_v5  ;;  %v3141_v14 = vstv %s5776_s17  ;;  %s5791_s17 = sld [smem:[#allocation4 + $0x46]] }
 0x447   : > { %3090 = vrot.lane.b32.xlu1 %v3079_v55, %s6272_s19  ;;  %3088 = vrot.lane.b32.xlu0 %v3078_v45, %s6272_s19  ;;  %v3143_v55 = vmul.f32 %v3141_v14, %v7973_v53  ;;  %v3142_v45 = vmul.f32 %v3141_v14, %v7971_v60  ;;  %v3146_v36 = vmul.f32 %v3141_v14, %v7991_v39 }
 0x448   : > { %v8037_v48 = vadd.f32 %v2759_v26, %v2703_v52  ;;  %v8039_v4 = vadd.f32 %v2771_v2, %v2735_v25  ;;  %v3144_v52 = vmul.f32 %v3141_v14, %v7985_v23  ;;  %v3173_v26 = vstv %s5777_s18  ;;  %s5792_s18 = sld [smem:[#allocation4 + $0x6a]] }
 0x449   : > { %v2366_v31 = vpop.permute.xlu1 %2365  ;;  %v8041_v61 = vpop.permute.xlu0 %2795 }
 0x44b   : > { %3094 = vrot.lane.b32.xlu1 %v3081_v11, %s6272_s19  ;;  %3092 = vrot.lane.b32.xlu0 %v3080_v1, %s6272_s19  ;;  %v3174_v1 = vmul.f32 %v3173_v26, %v7971_v60 }
 0x44d   : > { %v2430_v50 = vpop.permute.xlu1 %2429  ;;  %v2334_v41 = vpop.permute.xlu0 %2333 }
 0x44e   : > { %v2344_v8 = vadd.f32 %v2334_v41, %v7769_v22  ;;  %v2376_v22 = vadd.f32 %v2366_v31, %v7787_v32  ;;  %v2749_v41 = vmul.f32 %v7889_v17, %v7849_v35 }
 0x44f   : > { %3120 = vrot.lane.b32.xlu1 %v3110_v40, %s6273_s29  ;;  %3096 = vrot.lane.b32.xlu0 %v3082_v16, %s6272_s19 }
 0x450   : > { %v2440_v20 = vadd.f32 %v2430_v50, %v2344_v8 }
 0x451   : > { %v2494_v30 = vpop.permute.xlu1 %2493  ;;  %v2398_v43 = vpop.permute.xlu0 %2397 }
 0x452   : > { %v2408_v57 = vadd.f32 %v2398_v43, %v7812_v12  ;;  %v2521_v21 = vadd.f32 %v2516_v0, %v2440_v20  ;;  %v2528_v12 = vmul.f32 %v7840_v33, %v7753_v28  ;;  %v3145_v33 = vmul.f32 %v3141_v14, %v7979_v24 }
 0x453   : > { %3124 = vrot.lane.b32.xlu1 %v3112_v44, %s6273_s29  ;;  %3122 = vrot.lane.b32.xlu0 %v3111_v15, %s6273_s29  ;;  %v3175_v43 = vmul.f32 %v3173_v26, %v7973_v53  ;;  %v3246_v14 = vstv %s5781_s16  ;;  %s5778_s16 = sld [smem:[#allocation4 + $0x1e]] }
 0x454   : > { %v2504_v34 = vadd.f32 %v2494_v30, %v2408_v57  ;;  %v3176_v30 = vmul.f32 %v3173_v26, %v7985_v23  ;;  %v2748_v57 = vmul.f32 %v7889_v17, %v7833_v54  ;;  %v2761_v17 = vmul.f32 %v7897_v46, %v7849_v35 }
 0x455   : > { %v2565_v62 = vpop.permute.xlu1 %2564  ;;  %v2462_v19 = vpop.permute.xlu0 %2461 }
 0x456   : > { %v2472_v5 = vadd.f32 %v2462_v19, %v2376_v22  ;;  %v2545_v27 = vadd.f32 %v2540_v3, %v2504_v34  ;;  %v2576_v40 = vadd.f32 %v2565_v62, %v8001_v56  ;;  %v3178_v19 = vmul.f32 %v3173_v26, %v7991_v39 }
 0x457   : > { %3128 = vrot.lane.b32.xlu1 %v3114_v37, %s6273_s29  ;;  %3126 = vrot.lane.b32.xlu0 %v3113_v29, %s6273_s29  ;;  %v3177_v37 = vmul.f32 %v3173_v26, %v7979_v24  ;;  %v8119_v26 = vld [vmem:[#allocation2 + $0x91] sm:$0xff] }
 0x458   : > { %v2533_v32 = vadd.f32 %v2528_v12, %v2472_v5  ;;  %v8102_v12 = vld [vmem:[#allocation2 + $0x81] sm:$0xff] }
 0x459   : > { %v2599_v38 = vpop.permute.xlu1 %2598  ;;  %v2567_v6 = vpop.permute.xlu0 %2566 }
 0x45a   : > { %v2577_v2 = vadd.f32 %v2567_v6, %v2521_v21  ;;  %v2760_v21 = vmul.f32 %v7897_v46, %v7833_v54  ;;  %v2609_v56 = vadd.f32 %v2599_v38, %v2533_v32  ;;  %v8104_v32 = vld [vmem:[#allocation2 + $0x79] sm:$0xff] }
 0x45b   : > { %3154 = vrot.lane.b32.xlu1 %v3143_v55, %s6273_s29  ;;  %3152 = vrot.lane.b32.xlu0 %v3142_v45, %s6273_s29 }
 0x45d   : > { %v2629_v25 = vpop.permute.xlu1 %2628  ;;  %v2597_v28 = vpop.permute.xlu0 %2596 }
 0x45e   : > { %v2608_v16 = vadd.f32 %v2597_v28, %v8012_v49  ;;  %v2640_v38 = vadd.f32 %v2629_v25, %v8010_v59  ;;  %v3248_v28 = vmul.f32 %v3246_v14, %v8102_v12 }
 0x45f   : > { %3158 = vrot.lane.b32.xlu1 %v3145_v33, %s6273_s29  ;;  %3156 = vrot.lane.b32.xlu0 %v3144_v52, %s6273_s29  ;;  %v3247_v33 = vmul.f32 %v3246_v14, %v8104_v32 }
 0x461   : > { %v2663_v31 = vpop.permute.xlu1 %2662  ;;  %v2631_v11 = vpop.permute.xlu0 %2630 }
 0x462   : > { %v2673_v50 = vadd.f32 %v2663_v31, %v2577_v2  ;;  %v2641_v49 = vadd.f32 %v2631_v11, %v2545_v27  ;;  %v2773_v27 = vmul.f32 %v7899_v42, %v7849_v35  ;;  %v8121_v35 = vld [vmem:[#allocation2 + $0x89] sm:$0xff]  ;;  %v2772_v2 = vmul.f32 %v7899_v42, %v7833_v54 }
 0x463   : > { %3184 = vrot.lane.b32.xlu1 %v3174_v1, %s6273_s29  ;;  %3160 = vrot.lane.b32.xlu0 %v3146_v36, %s6273_s29  ;;  %v3250_v11 = vmul.f32 %v3246_v14, %v8119_v26  ;;  %v3249_v1 = vmul.f32 %v3246_v14, %v8121_v35  ;;  %v3278_v36 = vstv %s5782_s21  ;;  %s5793_s21 = sld [smem:[#allocation4 + $0x23]] }
 0x464   : > { %v8084_v8 = vadd.f32 %v2749_v41, %v2673_v50  ;;  %v8133_v50 = vld [vmem:[#allocation2 + $0x99] sm:$0x3]  ;;  %v3279_v41 = vmul.f32 %v3278_v36, %v8104_v32 }
 0x465   : > { %v2693_v20 = vpop.permute.xlu1 %2692  ;;  %v2661_v0 = vpop.permute.xlu0 %2660 }
 0x466   : > { %v2704_v44 = vadd.f32 %v2693_v20, %v2608_v16  ;;  %v2672_v15 = vadd.f32 %v2661_v0, %v2576_v40  ;;  %v3251_v40 = vmul.f32 %v3246_v14, %v8133_v50  ;;  %v3281_v0 = vmul.f32 %v3278_v36, %v8121_v35 }
 0x467   : > { %3188 = vrot.lane.b32.xlu1 %v3176_v30, %s6273_s29  ;;  %3186 = vrot.lane.b32.xlu0 %v3175_v43, %s6273_s29  ;;  %v3280_v30 = vmul.f32 %v3278_v36, %v8102_v12 }
 0x468   : > { %v8094_v22 = vadd.f32 %v2748_v57, %v2672_v15  ;;  %v8096_v34 = vadd.f32 %v2760_v21, %v2704_v44  ;;  %v3283_v15 = vmul.f32 %v3278_v36, %v8133_v50  ;;  %v3282_v57 = vmul.f32 %v3278_v36, %v8119_v26 }
 0x469   : > { %v2727_v3 = vpop.permute.xlu1 %2726  ;;  %v2695_v62 = vpop.permute.xlu0 %2694  ;;  %v3310_v21 = vstv %s5783_s22  ;;  %s5779_s22 = sld [smem:[#allocation4 + $0x42]] }
 0x46a   : > { %v2737_v29 = vadd.f32 %v2727_v3, %v2641_v49  ;;  %v2705_v5 = vadd.f32 %v2695_v62, %v2609_v56  ;;  %v3312_v3 = vmul.f32 %v3310_v21, %v8102_v12  ;;  %v3311_v62 = vmul.f32 %v3310_v21, %v8104_v32 }
 0x46b   : > { %3192 = vrot.lane.b32.xlu1 %v3178_v19, %s6273_s29  ;;  %3190 = vrot.lane.b32.xlu0 %v3177_v37, %s6273_s29  ;;  %v2977_v19 = vstv %s5769_s8  ;;  %v2806_v37 = vadd.f32 %v7915_v47, %v7901_v13  ;;  %v3313_v14 = vmul.f32 %v3310_v21, %v8121_v35  ;;  %v2808_v13 = vadd.f32 %v8041_v61, %v8027_v10  ;;  %s8358_s8 = sld [smem:[#allocation4 + $0x47]] }
 0x46c   : > { %v8111_v6 = vadd.f32 %v2761_v17, %v2705_v5  ;;  %v8113_v46 = vadd.f32 %v2773_v27, %v2737_v29  ;;  %v3314_v5 = vmul.f32 %v3310_v21, %v8119_v26 }
 0x46d   : > { %v8115_v55 = vpop.permute.xlu1 %2797  ;;  %v2725_v45 = vpop.permute.xlu0 %2724 }
 0x46e   : > { %v2736_v52 = vadd.f32 %v2725_v45, %v2640_v38  ;;  %v3342_v38 = vstv %s5784_s13  ;;  %v2978_v45 = vmul.f32 %v2977_v19, %v7971_v60  ;;  %s8377_s13 = sld [smem:[#allocation4 + $0x66]] }
 0x46f   : > { %3259 = vrot.lane.b32.xlu1 %v3248_v28, %s6272_s19  ;;  %3257 = vrot.lane.b32.xlu0 %v3247_v33, %s6272_s19  ;;  %v2807_v28 = vadd.f32 %v7967_v9, %v7963_v7  ;;  %v2809_v7 = vadd.f32 %v8115_v55, %v8094_v22 }
 0x470   : > { %v8127_v59 = vadd.f32 %v2772_v2, %v2736_v52  ;;  %v3343_v2 = vmul.f32 %v3342_v38, %v8104_v32 }
 0x471   : > { %v8129_v25 = vpop.permute.xlu1 %2823  ;;  %v2800_v31 = vpop.permute.xlu0 %2799 }
 0x472   : > { %v2810_v9 = vadd.f32 %v2800_v31, %v8084_v8  ;;  %v2989_v8 = vstv %s5770_s20  ;;  %v2838_v22 = vadd.f32 %v8129_v25, %v7911_v51  ;;  %s5795_s20 = sld [smem:[#allocation4 + $0x6b]] }
 0x473   : > { %3263 = vrot.lane.b32.xlu1 %v3250_v11, %s6272_s19  ;;  %3261 = vrot.lane.b32.xlu0 %v3249_v1, %s6272_s19  ;;  %v3315_v11 = vmul.f32 %v3310_v21, %v8133_v50  ;;  %v2991_v51 = vmul.f32 %v2989_v8, %v7973_v53 }
 0x475   : > { %v8137_v54 = vpop.permute.xlu1 %2827  ;;  %v8139_v42 = vpop.permute.xlu0 %2825 }
 0x476   : > { %v2839_v55 = vadd.f32 %v8139_v42, %v7965_v58  ;;  %v2840_v58 = vadd.f32 %v8137_v54, %v8037_v48  ;;  %v3001_v48 = vstv %s8205_s9  ;;  %s5788_s9 = sld [smem:[#allocation4 + $0x45]] }
 0x477   : > { %3289 = vrot.lane.b32.xlu1 %v3279_v41, %s6272_s19  ;;  %3265 = vrot.lane.b32.xlu0 %v3251_v40, %s6272_s19  ;;  %v2979_v41 = vmul.f32 %v2977_v19, %v7973_v53  ;;  %v2980_v40 = vmul.f32 %v2977_v19, %v7985_v23 }
 0x479   : > { %v8145_v16 = vpop.permute.xlu1 %2831  ;;  %v8147_v20 = vpop.permute.xlu0 %2829 }
 0x47a   : > { %v2841_v25 = vadd.f32 %v8147_v20, %v8096_v34  ;;  %v2842_v34 = vadd.f32 %v8145_v16, %v8111_v6  ;;  %v3002_v6 = vmul.f32 %v3001_v48, %v7971_v60 }
 0x47b   : > { %3293 = vrot.lane.b32.xlu1 %v3281_v0, %s6272_s19  ;;  %3291 = vrot.lane.b32.xlu0 %v3280_v30, %s6272_s19 }
 0x47d   : > { %v8153_v43 = vpop.permute.xlu1 %2857  ;;  %v8155_v44 = vpop.permute.xlu0 %2855 }
 0x47e   : > { %v2870_v54 = vadd.f32 %v8155_v44, %v7913_v18  ;;  %v2871_v18 = vadd.f32 %v8153_v43, %v7981_v63  ;;  %v3004_v63 = vmul.f32 %v3001_v48, %v7985_v23 }
 0x47f   : > { %3297 = vrot.lane.b32.xlu1 %v3283_v15, %s6272_s19  ;;  %3295 = vrot.lane.b32.xlu0 %v3282_v57, %s6272_s19  ;;  %v3345_v15 = vmul.f32 %v3342_v38, %v8121_v35  ;;  %v3344_v57 = vmul.f32 %v3342_v38, %v8102_v12 }
 0x481   : > { %v8161_v56 = vpop.permute.xlu1 %2861  ;;  %v8163_v49 = vpop.permute.xlu0 %2859 }
 0x482   : > { %v2872_v16 = vadd.f32 %v8163_v49, %v8039_v4  ;;  %v2873_v4 = vadd.f32 %v8161_v56, %v8127_v59 }
 0x483   : > { %3323 = vrot.lane.b32.xlu1 %v3312_v3, %s6272_s19  ;;  %3321 = vrot.lane.b32.xlu0 %v3311_v62, %s6272_s19  ;;  %v2981_v62 = vmul.f32 %v2977_v19, %v7979_v24 }
 0x485   : > { %v2888_v17 = vpop.permute.xlu1 %2887  ;;  %v8171_v29 = vpop.permute.xlu0 %2863 }
 0x486   : > { %v2902_v27 = vadd.f32 %v2888_v17, %v2806_v37  ;;  %v2982_v37 = vmul.f32 %v2977_v19, %v7991_v39  ;;  %v3347_v19 = vmul.f32 %v3342_v38, %v8133_v50  ;;  %v2874_v43 = vadd.f32 %v8171_v29, %v8113_v46 }
 0x487   : > { %3327 = vrot.lane.b32.xlu1 %v3314_v5, %s6272_s19  ;;  %3325 = vrot.lane.b32.xlu0 %v3313_v14, %s6272_s19 }
 0x488   : > { %v8182_v47 = vadd.f32 %v2978_v45, %v2902_v27  ;;  %v3346_v27 = vmul.f32 %v3342_v38, %v8119_v26  ;;  %v3374_v45 = vstv %s8186_s23  ;;  %s5787_s23 = sld [smem:[#allocation4 + $0x21]] }
 0x489   : > { %v2892_v33 = vpop.permute.xlu1 %2891  ;;  %v2890_v52 = vpop.permute.xlu0 %2889 }
 0x48a   : > { %v2904_v1 = vadd.f32 %v2892_v33, %v2808_v13  ;;  %v2903_v36 = vadd.f32 %v2890_v52, %v2807_v28  ;;  %v2990_v33 = vmul.f32 %v2989_v8, %v7971_v60  ;;  %v3379_v60 = vmul.f32 %v3374_v45, %v8133_v50 }
 0x48b   : > { %3353 = vrot.lane.b32.xlu1 %v3343_v2, %s6273_s29  ;;  %3329 = vrot.lane.b32.xlu0 %v3315_v11, %s6272_s19  ;;  %v3376_v11 = vmul.f32 %v3374_v45, %v8102_v12 }
 0x48c   : > { %v8195_v10 = vadd.f32 %v2979_v41, %v2903_v36  ;;  %v8197_v61 = vadd.f32 %v2980_v40, %v2904_v1  ;;  %v3375_v1 = vmul.f32 %v3374_v45, %v8104_v32  ;;  %v2992_v40 = vmul.f32 %v2989_v8, %v7985_v23 }
 0x48d   : > { %v2896_v0 = vpop.permute.xlu1 %2895  ;;  %v2894_v30 = vpop.permute.xlu0 %2893 }
 0x48e   : > { %v2906_v21 = vadd.f32 %v2896_v0, %v2810_v9  ;;  %v2905_v3 = vadd.f32 %v2894_v30, %v2809_v7  ;;  %v2993_v7 = vmul.f32 %v2989_v8, %v7979_v24 }
 0x48f   : > { %3357 = vrot.lane.b32.xlu1 %v3345_v15, %s6273_s29  ;;  %3355 = vrot.lane.b32.xlu0 %v3344_v57, %s6273_s29  ;;  %v3378_v15 = vmul.f32 %v3374_v45, %v8119_v26  ;;  %v3377_v57 = vmul.f32 %v3374_v45, %v8121_v35 }
 0x490   : > { %v8211_v31 = vadd.f32 %v2981_v62, %v2905_v3  ;;  %v8213_v17 = vadd.f32 %v2982_v37, %v2906_v21  ;;  %v3406_v21 = vstv %s5786_s14  ;;  %v2994_v37 = vmul.f32 %v2989_v8, %v7991_v39  ;;  %s5789_s14 = sld [smem:[#allocation4 + $0x69]] }
 0x491   : > { %v2922_v5 = vpop.permute.xlu1 %2921  ;;  %v2920_v14 = vpop.permute.xlu0 %2919  ;;  %v3407_v8 = vmul.f32 %v3406_v21, %v8104_v32  ;;  %v3408_v23 = vmul.f32 %v3406_v21, %v8102_v12 }
 0x492   : > { %v2935_v28 = vadd.f32 %v2922_v5, %v2839_v55  ;;  %v2934_v13 = vadd.f32 %v2920_v14, %v2838_v22 }
 0x493   : > { %3361 = vrot.lane.b32.xlu1 %v3347_v19, %s6273_s29  ;;  %3359 = vrot.lane.b32.xlu0 %v3346_v27, %s6273_s29  ;;  %v3003_v27 = vmul.f32 %v3001_v48, %v7973_v53  ;;  %v3409_v53 = vmul.f32 %v3406_v21, %v8121_v35 }
 0x494   : > { %v8226_v42 = vadd.f32 %v2990_v33, %v2934_v13  ;;  %v8228_v38 = vadd.f32 %v2991_v51, %v2935_v28 }
 0x495   : > { %v2926_v52 = vpop.permute.xlu1 %2925  ;;  %v2924_v2 = vpop.permute.xlu0 %2923 }
 0x496   : > { %v2937_v36 = vadd.f32 %v2926_v52, %v2841_v25  ;;  %v2936_v41 = vadd.f32 %v2924_v2, %v2840_v58  ;;  %v3005_v58 = vmul.f32 %v3001_v48, %v7979_v24  ;;  %v3006_v25 = vmul.f32 %v3001_v48, %v7991_v39  ;;  %v8299_v48 = vld [vmem:[#allocation2 + $0x8a] sm:$0xff] }
 0x497   : > { %3387 = vrot.lane.b32.xlu1 %v3376_v11, %s6273_s29  ;;  %3385 = vrot.lane.b32.xlu0 %v3375_v1, %s6273_s29  ;;  %v3411_v52 = vmul.f32 %v3406_v21, %v8133_v50  ;;  %v3410_v2 = vmul.f32 %v3406_v21, %v8119_v26  ;;  %v8287_v11 = vld [vmem:[#allocation2 + $0x82] sm:$0xff]  ;;  %v3479_v24 = vstv %s5790_s15  ;;  %v8289_v1 = vld [vmem:[#allocation2 + $0x7a] sm:$0xff]  ;;  %s3705_s15 = sld [smem:[#allocation7]] }
 0x498   : > { %v8241_v20 = vadd.f32 %v2992_v40, %v2936_v41  ;;  %v8243_v9 = vadd.f32 %v2993_v7, %v2937_v36  ;;  %v3481_v41 = vmul.f32 %v3479_v24, %v8287_v11  ;;  %v3480_v40 = vmul.f32 %v3479_v24, %v8289_v1  ;;  %v8297_v7 = vld [vmem:[#allocation2 + $0x92] sm:$0xff] }
 0x499   : > { %v2952_v0 = vpop.permute.xlu1 %2951  ;;  %v2928_v30 = vpop.permute.xlu0 %2927 }
 0x49a   : > { %v2966_v3 = vadd.f32 %v2952_v0, %v2870_v54  ;;  %v2938_v62 = vadd.f32 %v2928_v30, %v2842_v34  ;;  %v3483_v0 = vmul.f32 %v3479_v24, %v8297_v7  ;;  %v3482_v30 = vmul.f32 %v3479_v24, %v8299_v48 }
 0x49b   : > { %3391 = vrot.lane.b32.xlu1 %v3378_v15, %s6273_s29  ;;  %3389 = vrot.lane.b32.xlu0 %v3377_v57, %s6273_s29  ;;  %v3511_v15 = vstv %s5791_s17  ;;  %v8307_v57 = vld [vmem:[#allocation2 + $0x9a] sm:$0x3]  ;;  %s8553_s17 = sld [smem:[#allocation7 + $0x1]] }
 0x49c   : > { %v8255_v44 = vadd.f32 %v2994_v37, %v2938_v62  ;;  %v8257_v22 = vadd.f32 %v3002_v6, %v2966_v3  ;;  %v3512_v62 = vmul.f32 %v3511_v15, %v8289_v1  ;;  %v3484_v37 = vmul.f32 %v3479_v24, %v8307_v57 }
 0x49d   : > { %v2956_v55 = vpop.permute.xlu1 %2955  ;;  %v2954_v5 = vpop.permute.xlu0 %2953 }
 0x49e   : > { %v2968_v14 = vadd.f32 %v2956_v55, %v2872_v16  ;;  %v2967_v19 = vadd.f32 %v2954_v5, %v2871_v18  ;;  %v3514_v16 = vmul.f32 %v3511_v15, %v8299_v48  ;;  %v3513_v55 = vmul.f32 %v3511_v15, %v8287_v11 }
 0x49f   : > { %3417 = vrot.lane.b32.xlu1 %v3407_v8, %s6273_s29  ;;  %3393 = vrot.lane.b32.xlu0 %v3379_v60, %s6273_s29  ;;  %v3516_v60 = vmul.f32 %v3511_v15, %v8307_v57 }
 0x4a0   : > { %v8269_v49 = vadd.f32 %v3003_v27, %v2967_v19  ;;  %v8271_v45 = vadd.f32 %v3004_v63, %v2968_v14  ;;  %v3515_v14 = vmul.f32 %v3511_v15, %v8297_v7  ;;  %v3543_v19 = vstv %s5792_s18  ;;  %s8555_s18 = sld [smem:[#allocation9 + $0x1]] }
 0x4a1   : > { %v2960_v28 = vpop.permute.xlu1 %2959  ;;  %v2958_v13 = vpop.permute.xlu0 %2957 }
 0x4a2   : > { %v2970_v33 = vadd.f32 %v2960_v28, %v2874_v43  ;;  %v2969_v51 = vadd.f32 %v2958_v13, %v2873_v4  ;;  %v3545_v4 = vmul.f32 %v3543_v19, %v8287_v11  ;;  %v3544_v43 = vmul.f32 %v3543_v19, %v8289_v1 }
 0x4a3   : > { %3421 = vrot.lane.b32.xlu1 %v3409_v53, %s6273_s29  ;;  %3419 = vrot.lane.b32.xlu0 %v3408_v23, %s6273_s29  ;;  %v3210_v28 = vstv %s5778_s16  ;;  %s8584_s16 = sld [smem:[#allocation7 + $0x2]] }
 0x4a4   : > { %v8279_v46 = vadd.f32 %v3005_v58, %v2969_v51  ;;  %v8281_v59 = vadd.f32 %v3006_v25, %v2970_v33  ;;  %v3547_v33 = vmul.f32 %v3543_v19, %v8297_v7  ;;  %v3546_v51 = vmul.f32 %v3543_v19, %v8299_v48 }
 0x4a5   : > { %v3025_v56 = vpop.permute.xlu0 %3024  ;;  %v8283_v29 = vpop.permute.xlu1 %3026  ;;  %v3575_v25 = vstv %s5793_s21  ;;  %s8586_s21 = sld [smem:[#allocation9 + $0x1c]] }
 0x4a6   : > { %v3039_v13 = vadd.f32 %v3025_v56, %v8182_v47 }
 0x4a7   : > { %3425 = vrot.lane.b32.xlu1 %v3411_v52, %s6273_s29  ;;  %3423 = vrot.lane.b32.xlu0 %v3410_v2, %s6273_s29  ;;  %v3211_v52 = vmul.f32 %v3210_v28, %v8104_v32  ;;  %v3040_v2 = vadd.f32 %v8283_v29, %v8195_v10 }
 0x4a9   : > { %v3029_v39 = vpop.permute.xlu0 %3028  ;;  %v8293_v36 = vpop.permute.xlu1 %3030 }
 0x4aa   : > { %v3041_v47 = vadd.f32 %v3029_v39, %v8197_v61  ;;  %v3042_v10 = vadd.f32 %v8293_v36, %v8211_v31  ;;  %v3222_v31 = vstv %s5779_s22  ;;  %s8620_s22 = sld [smem:[#allocation9 + $0x37]] }
 0x4ab   : > { %3492 = vrot.lane.b32.xlu1 %v3481_v41, %s6272_s19  ;;  %3490 = vrot.lane.b32.xlu0 %v3480_v40, %s6272_s19  ;;  %v3576_v40 = vmul.f32 %v3575_v25, %v8289_v1 }
 0x4ad   : > { %v8303_v34 = vpop.permute.xlu1 %3056  ;;  %v3033_v54 = vpop.permute.xlu0 %3032 }
 0x4ae   : > { %v3043_v61 = vadd.f32 %v3033_v54, %v8213_v17  ;;  %v3071_v17 = vadd.f32 %v8303_v34, %v8226_v42  ;;  %v3224_v42 = vmul.f32 %v3222_v31, %v8102_v12 }
 0x4af   : > { %3496 = vrot.lane.b32.xlu1 %v3483_v0, %s6272_s19  ;;  %3494 = vrot.lane.b32.xlu0 %v3482_v30, %s6272_s19  ;;  %v3548_v0 = vmul.f32 %v3543_v19, %v8307_v57 }
 0x4b1   : > { %v8311_v21 = vpop.permute.xlu1 %3060  ;;  %v8313_v3 = vpop.permute.xlu0 %3058 }
 0x4b2   : > { %v3072_v36 = vadd.f32 %v8313_v3, %v8228_v38  ;;  %v3073_v38 = vadd.f32 %v8311_v21, %v8241_v20  ;;  %v3234_v20 = vstv %s8377_s13  ;;  %s5804_s13 = sld [smem:[#allocation9 + $0x1d]] }
 0x4b3   : > { %3522 = vrot.lane.b32.xlu1 %v3512_v62, %s6272_s19  ;;  %3498 = vrot.lane.b32.xlu0 %v3484_v37, %s6272_s19  ;;  %v3212_v62 = vmul.f32 %v3210_v28, %v8102_v12  ;;  %v3213_v37 = vmul.f32 %v3210_v28, %v8121_v35 }
 0x4b5   : > { %v8319_v6 = vpop.permute.xlu1 %3064  ;;  %v8321_v18 = vpop.permute.xlu0 %3062 }
 0x4b6   : > { %v3074_v34 = vadd.f32 %v8321_v18, %v8243_v9  ;;  %v3075_v9 = vadd.f32 %v8319_v6, %v8255_v44  ;;  %v3235_v44 = vmul.f32 %v3234_v20, %v8104_v32 }
 0x4b7   : > { %3526 = vrot.lane.b32.xlu1 %v3514_v16, %s6272_s19  ;;  %3524 = vrot.lane.b32.xlu0 %v3513_v55, %s6272_s19 }
 0x4b9   : > { %v8327_v5 = vpop.permute.xlu1 %3090  ;;  %v8329_v8 = vpop.permute.xlu0 %3088 }
 0x4ba   : > { %v3103_v21 = vadd.f32 %v8329_v8, %v8257_v22  ;;  %v3104_v22 = vadd.f32 %v8327_v5, %v8269_v49 }
 0x4bb   : > { %3530 = vrot.lane.b32.xlu1 %v3516_v60, %s6272_s19  ;;  %3528 = vrot.lane.b32.xlu0 %v3515_v14, %s6272_s19  ;;  %v3578_v60 = vmul.f32 %v3575_v25, %v8299_v48  ;;  %v3577_v14 = vmul.f32 %v3575_v25, %v8287_v11 }
 0x4bd   : > { %v8335_v27 = vpop.permute.xlu1 %3094  ;;  %v8337_v63 = vpop.permute.xlu0 %3092 }
 0x4be   : > { %v3105_v6 = vadd.f32 %v8337_v63, %v8271_v45  ;;  %v3106_v49 = vadd.f32 %v8335_v27, %v8279_v46 }
 0x4bf   : > { %3556 = vrot.lane.b32.xlu1 %v3545_v4, %s6272_s19  ;;  %3554 = vrot.lane.b32.xlu0 %v3544_v43, %s6272_s19  ;;  %v3214_v43 = vmul.f32 %v3210_v28, %v8119_v26 }
 0x4c1   : > { %v3121_v53 = vpop.permute.xlu1 %3120  ;;  %v8344_v23 = vpop.permute.xlu0 %3096 }
 0x4c2   : > { %v3135_v58 = vadd.f32 %v3121_v53, %v3039_v13  ;;  %v3215_v13 = vmul.f32 %v3210_v28, %v8133_v50  ;;  %v3580_v28 = vmul.f32 %v3575_v25, %v8307_v57  ;;  %v3107_v45 = vadd.f32 %v8344_v23, %v8281_v59 }
 0x4c3   : > { %3560 = vrot.lane.b32.xlu1 %v3547_v33, %s6272_s19  ;;  %3558 = vrot.lane.b32.xlu0 %v3546_v51, %s6272_s19 }
 0x4c4   : > { %v8354_v56 = vadd.f32 %v3211_v52, %v3135_v58  ;;  %v3579_v58 = vmul.f32 %v3575_v25, %v8297_v7  ;;  %v3607_v52 = vstv %s8358_s8  ;;  %s5803_s8 = sld [smem:[#allocation9 + $0x2]] }
 0x4c5   : > { %v3125_v24 = vpop.permute.xlu1 %3124  ;;  %v3123_v41 = vpop.permute.xlu0 %3122 }
 0x4c6   : > { %v3137_v30 = vadd.f32 %v3125_v24, %v3041_v47  ;;  %v3136_v15 = vadd.f32 %v3123_v41, %v3040_v2  ;;  %v3223_v24 = vmul.f32 %v3222_v31, %v8104_v32  ;;  %v3612_v32 = vmul.f32 %v3607_v52, %v8307_v57 }
 0x4c7   : > { %3586 = vrot.lane.b32.xlu1 %v3576_v40, %s6273_s29  ;;  %3562 = vrot.lane.b32.xlu0 %v3548_v0, %s6272_s19  ;;  %v3609_v0 = vmul.f32 %v3607_v52, %v8287_v11 }
 0x4c8   : > { %v8367_v29 = vadd.f32 %v3212_v62, %v3136_v15  ;;  %v8369_v39 = vadd.f32 %v3213_v37, %v3137_v30  ;;  %v3608_v30 = vmul.f32 %v3607_v52, %v8289_v1  ;;  %v3225_v37 = vmul.f32 %v3222_v31, %v8121_v35 }
 0x4c9   : > { %v3129_v16 = vpop.permute.xlu1 %3128  ;;  %v3127_v55 = vpop.permute.xlu0 %3126 }
 0x4ca   : > { %v3139_v19 = vadd.f32 %v3129_v16, %v3043_v61  ;;  %v3138_v4 = vadd.f32 %v3127_v55, %v3042_v10  ;;  %v3226_v10 = vmul.f32 %v3222_v31, %v8119_v26 }
 0x4cb   : > { %3590 = vrot.lane.b32.xlu1 %v3578_v60, %s6273_s29  ;;  %3588 = vrot.lane.b32.xlu0 %v3577_v14, %s6273_s29  ;;  %v3611_v60 = vmul.f32 %v3607_v52, %v8297_v7  ;;  %v3610_v14 = vmul.f32 %v3607_v52, %v8299_v48 }
 0x4cc   : > { %v8383_v54 = vadd.f32 %v3214_v43, %v3138_v4  ;;  %v8385_v53 = vadd.f32 %v3215_v13, %v3139_v19  ;;  %v3639_v19 = vstv %s5795_s20  ;;  %v3227_v13 = vmul.f32 %v3222_v31, %v8133_v50  ;;  %s5805_s20 = sld [smem:[#allocation9 + $0x38]] }
 0x4cd   : > { %v3155_v33 = vpop.permute.xlu1 %3154  ;;  %v3153_v51 = vpop.permute.xlu0 %3152  ;;  %v3640_v31 = vmul.f32 %v3639_v19, %v8289_v1 }
 0x4ce   : > { %v3168_v2 = vadd.f32 %v3155_v33, %v3072_v36  ;;  %v3167_v47 = vadd.f32 %v3153_v51, %v3071_v17 }
 0x4cf   : > { %3594 = vrot.lane.b32.xlu1 %v3580_v28, %s6273_s29  ;;  %3592 = vrot.lane.b32.xlu0 %v3579_v58, %s6273_s29  ;;  %v3236_v58 = vmul.f32 %v3234_v20, %v8102_v12  ;;  %v3642_v12 = vmul.f32 %v3639_v19, %v8299_v48 }
 0x4d0   : > { %v8398_v3 = vadd.f32 %v3223_v24, %v3167_v47  ;;  %v8400_v25 = vadd.f32 %v3224_v42, %v3168_v2  ;;  %v3237_v2 = vmul.f32 %v3234_v20, %v8121_v35  ;;  %v3641_v35 = vmul.f32 %v3639_v19, %v8287_v11 }
 0x4d1   : > { %v3159_v41 = vpop.permute.xlu1 %3158  ;;  %v3157_v40 = vpop.permute.xlu0 %3156 }
 0x4d2   : > { %v3170_v15 = vadd.f32 %v3159_v41, %v3074_v34  ;;  %v3169_v62 = vadd.f32 %v3157_v40, %v3073_v38  ;;  %v3238_v38 = vmul.f32 %v3234_v20, %v8119_v26  ;;  %v3239_v34 = vmul.f32 %v3234_v20, %v8133_v50 }
 0x4d3   : > { %3620 = vrot.lane.b32.xlu1 %v3609_v0, %s6273_s29  ;;  %3618 = vrot.lane.b32.xlu0 %v3608_v30, %s6273_s29  ;;  %v3644_v41 = vmul.f32 %v3639_v19, %v8307_v57  ;;  %v3643_v40 = vmul.f32 %v3639_v19, %v8297_v7 }
 0x4d4   : > { %v8413_v18 = vadd.f32 %v3225_v37, %v3169_v62  ;;  %v8415_v61 = vadd.f32 %v3226_v10, %v3170_v15 }
 0x4d5   : > { %v3185_v16 = vpop.permute.xlu1 %3184  ;;  %v3161_v55 = vpop.permute.xlu0 %3160 }
 0x4d6   : > { %v3199_v4 = vadd.f32 %v3185_v16, %v3103_v21  ;;  %v3171_v43 = vadd.f32 %v3161_v55, %v3075_v9  ;;  %v3443_v55 = vstv %s5787_s23  ;;  %s5809_s23 = sld [smem:[#allocation9 + $0x4]] }
 0x4d7   : > { %3624 = vrot.lane.b32.xlu1 %v3611_v60, %s6273_s29  ;;  %3622 = vrot.lane.b32.xlu0 %v3610_v14, %s6273_s29 }
 0x4d8   : > { %v8427_v8 = vadd.f32 %v3227_v13, %v3171_v43  ;;  %v8429_v17 = vadd.f32 %v3235_v44, %v3199_v4  ;;  %v3444_v43 = vmul.f32 %v3443_v55, %v8289_v1 }
 0x4d9   : > { %v3189_v36 = vpop.permute.xlu1 %3188  ;;  %v3187_v33 = vpop.permute.xlu0 %3186 }
 0x4da   : > { %v3201_v51 = vadd.f32 %v3189_v36, %v3105_v6  ;;  %v3200_v28 = vadd.f32 %v3187_v33, %v3104_v22 }
 0x4db   : > { %3650 = vrot.lane.b32.xlu1 %v3640_v31, %s6273_s29  ;;  %3626 = vrot.lane.b32.xlu0 %v3612_v32, %s6273_s29  ;;  %v3445_v32 = vmul.f32 %v3443_v55, %v8287_v11 }
 0x4dc   : > { %v8441_v5 = vadd.f32 %v3236_v58, %v3200_v28  ;;  %v8443_v63 = vadd.f32 %v3237_v2, %v3201_v51 }
 0x4dd   : > { %v3193_v52 = vpop.permute.xlu1 %3192  ;;  %v3191_v47 = vpop.permute.xlu0 %3190 }
 0x4de   : > { %v3203_v24 = vadd.f32 %v3193_v52, %v3107_v45  ;;  %v3202_v42 = vadd.f32 %v3191_v47, %v3106_v49  ;;  %v3447_v52 = vmul.f32 %v3443_v55, %v8297_v7  ;;  %v3448_v47 = vmul.f32 %v3443_v55, %v8307_v57 }
 0x4df   : > { %3654 = vrot.lane.b32.xlu1 %v3642_v12, %s6273_s29  ;;  %3652 = vrot.lane.b32.xlu0 %v3641_v35, %s6273_s29  ;;  %v3455_v12 = vstv %s5788_s9  ;;  %s5810_s9 = sld [smem:[#allocation9 + $0x1f]] }
 0x4e0   : > { %v8451_v46 = vadd.f32 %v3238_v38, %v3202_v42  ;;  %v8453_v59 = vadd.f32 %v3239_v34, %v3203_v24 }
 0x4e1   : > { %v3260_v27 = vpop.permute.xlu1 %3259  ;;  %v3258_v23 = vpop.permute.xlu0 %3257 }
 0x4e2   : > { %v3272_v60 = vadd.f32 %v3258_v23, %v8354_v56  ;;  %v3273_v13 = vadd.f32 %v3260_v27, %v8367_v29  ;;  %v3446_v56 = vmul.f32 %v3443_v55, %v8299_v48  ;;  %v3456_v23 = vmul.f32 %v3455_v12, %v8289_v1 }
 0x4e3   : > { %3658 = vrot.lane.b32.xlu1 %v3644_v41, %s6273_s29  ;;  %3656 = vrot.lane.b32.xlu0 %v3643_v40, %s6273_s29  ;;  %v3457_v41 = vmul.f32 %v3455_v12, %v8287_v11  ;;  %v3458_v55 = vmul.f32 %v3455_v12, %v8299_v48 }
 0x4e5   : > { %v3264_v26 = vpop.permute.xlu1 %3263  ;;  %v3262_v50 = vpop.permute.xlu0 %3261 }
 0x4e6   : > { %v3274_v44 = vadd.f32 %v3262_v50, %v8369_v39  ;;  %v3275_v51 = vadd.f32 %v3264_v26, %v8383_v54 }
 0x4e9   : > { %v3290_v0 = vpop.permute.xlu1 %3289  ;;  %v3266_v30 = vpop.permute.xlu0 %3265 }
 0x4ea   : > { %v3276_v28 = vadd.f32 %v3266_v30, %v8385_v53  ;;  %v3304_v35 = vadd.f32 %v3290_v0, %v8398_v3 }
 0x4ed   : > { %v3294_v15 = vpop.permute.xlu1 %3293  ;;  %v3292_v62 = vpop.permute.xlu0 %3291 }
 0x4ee   : > { %v3305_v54 = vadd.f32 %v3292_v62, %v8400_v25  ;;  %v3306_v40 = vadd.f32 %v3294_v15, %v8413_v18 }
 0x4f1   : > { %v3298_v37 = vpop.permute.xlu1 %3297  ;;  %v3296_v10 = vpop.permute.xlu0 %3295 }
 0x4f2   : > { %v3307_v26 = vadd.f32 %v3296_v10, %v8415_v61 }
 0x4f5   : > { %v8459_v20 = vpop.permute.xlu1 %3323  ;;  %v3322_v9 = vpop.permute.xlu0 %3321 }
 0x4f9   : > { %v8461_v21 = vpop.permute.xlu1 %3327  ;;  %v3326_v16 = vpop.permute.xlu0 %3325 }
 0x4fd   : > { %v3354_v14 = vpop.permute.xlu1 %3353  ;;  %v8464_v19 = vpop.permute.xlu0 %3329 }
 0x4fe   : > { %v3368_v4 = vadd.f32 %v3354_v14, %v3272_v60  ;;  %v3459_v60 = vmul.f32 %v3455_v12, %v8297_v7  ;;  %v3467_v14 = vstv %s5789_s14  ;;  %s5811_s14 = sld [smem:[#allocation9 + $0x3a]] }
 0x500   : > { %v8469_v22 = vadd.f32 %v3444_v43, %v3368_v4  ;;  %v3308_v4 = vadd.f32 %v3298_v37, %v8427_v8  ;;  %v3336_v43 = vadd.f32 %v3322_v9, %v8429_v17 }
 0x501   : > { %v3358_v6 = vpop.permute.xlu1 %3357  ;;  %v3356_v36 = vpop.permute.xlu0 %3355 }
 0x502   : > { %v3370_v33 = vadd.f32 %v3358_v6, %v3274_v44  ;;  %v3369_v31 = vadd.f32 %v3356_v36, %v3273_v13  ;;  %v3460_v6 = vmul.f32 %v3455_v12, %v8307_v57  ;;  %v3468_v36 = vmul.f32 %v3467_v14, %v8289_v1 }
 0x503   : > { %v3339_v1 = vadd.f32 %v8461_v21, %v8451_v46 }
 0x504   : > { %v8475_v58 = vadd.f32 %v3445_v32, %v3369_v31  ;;  %v8477_v2 = vadd.f32 %v3446_v56, %v3370_v33  ;;  %v3337_v33 = vadd.f32 %v8459_v20, %v8441_v5  ;;  %v3338_v31 = vadd.f32 %v3326_v16, %v8443_v63 }
 0x505   : > { %v3362_v29 = vpop.permute.xlu1 %3361  ;;  %v3360_v39 = vpop.permute.xlu0 %3359  ;;  %v3340_v5 = vadd.f32 %v8464_v19, %v8453_v59 }
 0x506   : > { %v3372_v49 = vadd.f32 %v3362_v29, %v3276_v28  ;;  %v3371_v45 = vadd.f32 %v3360_v39, %v3275_v51  ;;  %v3469_v51 = vmul.f32 %v3467_v14, %v8287_v11  ;;  %v3470_v28 = vmul.f32 %v3467_v14, %v8299_v48 }
 0x507   : > { %v3472_v11 = vmul.f32 %v3467_v14, %v8307_v57 }
 0x508   : > { %v8483_v24 = vadd.f32 %v3447_v52, %v3371_v45  ;;  %v8485_v53 = vadd.f32 %v3448_v47, %v3372_v49  ;;  %v3471_v45 = vmul.f32 %v3467_v14, %v8297_v7  ;;  %v3670_v7 = vlaneseq }
 0x509   : > { %v3388_v42 = vpop.permute.xlu1 %3387  ;;  %v3386_v38 = vpop.permute.xlu0 %3385 }
 0x50a   : > { %v3401_v34 = vadd.f32 %v3388_v42, %v3305_v54  ;;  %v3400_v27 = vadd.f32 %v3386_v38, %v3304_v35 }
 0x50c   : > { %v8491_v50 = vadd.f32 %v3456_v23, %v3400_v27  ;;  %v8493_v3 = vadd.f32 %v3457_v41, %v3401_v34  ;;  %v3671_v27 = vshrl.u32 %v3670_v7, 7  ;;  %v3677_v23 = vand.u32 127, %v3670_v7 }
 0x50d   : > { %v3392_v25 = vpop.permute.xlu1 %3391  ;;  %v3390_v0 = vpop.permute.xlu0 %3389 }
 0x50e   : > { %v3403_v30 = vadd.f32 %v3392_v25, %v3307_v26  ;;  %v3402_v62 = vadd.f32 %v3390_v0, %v3306_v40  ;;  %vm3678_vm4 = vcmp.ge.s32.totalorder %v3671_v27, 1  ;;  %vm3693_vm5 = vcmp.ge.s32.totalorder %v3677_v23, 1 }
 0x50f   : > { %v3706_v25 = vstv %s3705_s15  ;;  %vm3694_vm6 = vmand %vm3678_vm4, %vm3693_vm5  ;;  %vm3699_vm7 = vcmp.le.s32.totalorder %v3677_v23, 32  ;;  %s5812_s15 = sld [smem:[#allocation9 + $0x5]] }
 0x510   : > { %v8499_v18 = vadd.f32 %v3458_v55, %v3402_v62  ;;  %v8501_v61 = vadd.f32 %v3459_v60, %v3403_v30  ;;  %v3675_v55 = vadd.s32 32, %v3671_v27  ;;  %vm8549_vm8 = vmand %vm3694_vm6, %vm3699_vm7 }
 0x511   : > { %v3418_v15 = vpop.permute.xlu1 %3417  ;;  %v3394_v10 = vpop.permute.xlu0 %3393  ;;  %vm8563_vm11 = vmand %vm3693_vm5, %vm3699_vm7 }
 0x512   : > { %v3432_v13 = vadd.f32 %v3418_v15, %v3336_v43  ;;  %v3404_v44 = vadd.f32 %v3394_v10, %v3308_v4  ;;  %vm3687_vm10 = vcmp.le.s32.totalorder %v3675_v55, 32 }
 0x513   : > { %vm3698_vm12 = vmand %vm3687_vm10, %vm3693_vm5 }
 0x514   : > { %v8508_v8 = vadd.f32 %v3460_v6, %v3404_v44  ;;  %v8510_v17 = vadd.f32 %v3468_v36, %v3432_v13  ;;  %vm8578_vm13 = vmand %vm3698_vm12, %vm3699_vm7 }
 0x515   : > { %v3422_v37 = vpop.permute.xlu1 %3421  ;;  %v3420_v9 = vpop.permute.xlu0 %3419 }
 0x516   : > { %v3434_v32 = vadd.f32 %v3422_v37, %v3338_v31  ;;  %v3433_v56 = vadd.f32 %v3420_v9, %v3337_v33 }
 0x518   : > { %v8518_v20 = vadd.f32 %v3469_v51, %v3433_v56  ;;  %v8520_v63 = vadd.f32 %v3470_v28, %v3434_v32 }
 0x519   : > { %v3426_v16 = vpop.permute.xlu1 %3425  ;;  %v3424_v29 = vpop.permute.xlu0 %3423 }
 0x51a   : > { %v3436_v39 = vadd.f32 %v3426_v16, %v3340_v5  ;;  %v3435_v49 = vadd.f32 %v3424_v29, %v3339_v1 }
 0x51c   : > { %v8524_v52 = vadd.f32 %v3471_v45, %v3435_v49  ;;  %v8526_v48 = vadd.f32 %v3472_v11, %v3436_v39  ;;  %v3810_v45 = vstv %s8555_s18  ;;  %s5814_s18 = sld [smem:[#allocation9 + $0x3b]] }
 0x51d   : > { %v3493_v46 = vpop.permute.xlu1 %3492  ;;  %v3491_v21 = vpop.permute.xlu0 %3490 }
 0x51e   : > { %v3505_v26 = vadd.f32 %v3491_v21, %v8469_v22  ;;  %v3506_v60 = vadd.f32 %v3493_v46, %v8475_v58 }
 0x521   : > { %v3497_v47 = vpop.permute.xlu1 %3496  ;;  %v3495_v59 = vpop.permute.xlu0 %3494 }
 0x522   : > { %v3507_v14 = vadd.f32 %v3495_v59, %v8477_v2  ;;  %v3508_v58 = vadd.f32 %v3497_v47, %v8483_v24 }
 0x525   : > { %v3523_v19 = vpop.permute.xlu1 %3522  ;;  %v3499_v12 = vpop.permute.xlu0 %3498 }
 0x526   : > { %v3509_v2 = vadd.f32 %v3499_v12, %v8485_v53  ;;  %v3537_v51 = vadd.f32 %v3523_v19, %v8491_v50  ;;  %v3730_v50 = vstv %s8553_s17  ;;  %s5813_s17 = sld [smem:[#allocation9 + $0x20]] }
 0x529   : > { %v8528_v35 = vpop.permute.xlu1 %3526  ;;  %v3525_v54 = vpop.permute.xlu0 %3524 }
 0x52a   : > { %v3538_v28 = vadd.f32 %v3525_v54, %v8493_v3  ;;  %v3539_v59 = vadd.f32 %v8528_v35, %v8499_v18 }
 0x52d   : > { %v8530_v42 = vpop.permute.xlu1 %3530  ;;  %v8532_v38 = vpop.permute.xlu0 %3528 }
 0x52e   : > { %v3540_v19 = vadd.f32 %v8532_v38, %v8501_v61 }
 0x531   : > { %v8534_v34 = vpop.permute.xlu1 %3556  ;;  %v8536_v57 = vpop.permute.xlu0 %3554 }
 0x532   : > { %v3569_v55 = vadd.f32 %v8536_v57, %v8510_v17 }
 0x535   : > { %v8538_v41 = vpop.permute.xlu1 %3560  ;;  %v8540_v40 = vpop.permute.xlu0 %3558 }
 0x539   : > { %v3587_v0 = vpop.permute.xlu1 %3586  ;;  %v8543_v30 = vpop.permute.xlu0 %3562 }
 0x53a   : > { %v3601_v62 = vadd.f32 %v3587_v0, %v3505_v26 }
 0x53c   : > { %v3707_v4 = vadd.f32 %v3706_v25, %v3601_v62  ;;  %v3541_v62 = vadd.f32 %v8530_v42, %v8508_v8  ;;  %v3753_v8 = vstv %s8584_s16  ;;  %s5818_s16 = sld [smem:[#allocation9 + $0x7]] }
 0x53d   : > { %v3591_v22 = vpop.permute.xlu1 %3590  ;;  %v3589_v15 = vpop.permute.xlu0 %3588 }
 0x53e   : > { %v3712_v10 = vmax.f32 %v3707_v4, 0.0  ;;  %v3603_v13 = vadd.f32 %v3591_v22, %v3507_v14  ;;  %v3602_v44 = vadd.f32 %v3589_v15, %v3506_v60 }
 0x540   : > { %v3717_v6 = vsel %vm8549_vm8, %v3712_v10, 0.0  ;;  %v3709_v36 = vadd.f32 %v3706_v25, %v3603_v13  ;;  %v3708_v33 = vadd.f32 %v3706_v25, %v3602_v44  ;;  %v3836_v44 = vstv %s8586_s21  ;;  %s5819_s21 = sld [smem:[#allocation9 + $0x22]] }
 0x541   : > { %3723 = vst.msk [vmem:[#allocation3] sm:$0xff] %vm3722_vm9, %v3717_v6  ;;  %v3595_v37 = vpop.permute.xlu1 %3594  ;;  %v3593_v9 = vpop.permute.xlu0 %3592 }
 0x542   : > { %v3714_v24 = vmax.f32 %v3709_v36, 0.0  ;;  %v3713_v32 = vmax.f32 %v3708_v33, 0.0  ;;  %v3605_v53 = vadd.f32 %v3595_v37, %v3509_v2  ;;  %v3604_v56 = vadd.f32 %v3593_v9, %v3508_v58 }
 0x543   : > { %v3570_v33 = vadd.f32 %v8534_v34, %v8518_v20  ;;  %v3571_v37 = vadd.f32 %v8540_v40, %v8520_v63 }
 0x544   : > { %v3719_v1 = vsel %vm8563_vm11, %v3714_v24, 0.0  ;;  %v3718_v5 = vsel %vm8563_vm11, %v3713_v32, 0.0  ;;  %v3711_v16 = vadd.f32 %v3706_v25, %v3605_v53  ;;  %v3710_v29 = vadd.f32 %v3706_v25, %v3604_v56 }
 0x545   : > { %3725 = vst.msk [vmem:[#allocation3 + $0x10] sm:$0xff] %vm3722_vm9, %v3719_v1  ;;  %3724 = vst.msk [vmem:[#allocation3 + $0x8] sm:$0xff] %vm3722_vm9, %v3718_v5  ;;  %v3621_v3 = vpop.permute.xlu1 %3620  ;;  %v3619_v49 = vpop.permute.xlu0 %3618 }
 0x546   : > { %v3716_v11 = vmax.f32 %v3711_v16, 0.0  ;;  %v3715_v46 = vmax.f32 %v3710_v29, 0.0  ;;  %v3634_v21 = vadd.f32 %v3621_v3, %v3538_v28  ;;  %v3633_v47 = vadd.f32 %v3619_v49, %v3537_v51 }
 0x547   : > { %v3572_v16 = vadd.f32 %v8538_v41, %v8524_v52  ;;  %v3573_v29 = vadd.f32 %v8543_v30, %v8526_v48 }
 0x548   : > { %v3721_v12 = vsel %vm8578_vm13, %v3716_v11, 0.0  ;;  %v3720_v54 = vsel %vm8563_vm11, %v3715_v46, 0.0  ;;  %v3732_v7 = vadd.f32 %v3730_v50, %v3634_v21  ;;  %v3731_v27 = vadd.f32 %v3730_v50, %v3633_v47  ;;  %v8596_v23 = vld [vmem:[#allocation3] sm:$0xff] }
 0x549   : > { %3728 = vst.msk [vmem:[#allocation3 + $0x20] sm:$0x3] %vm3727_vm14, %v3721_v12  ;;  %v3625_v26 = vpop.permute.xlu1 %3624  ;;  %v3623_v25 = vpop.permute.xlu0 %3622  ;;  %v3811_v18 = vmul.f32 %v3810_v45, %v8596_v23  ;;  %v3837_v34 = vmul.f32 %v3836_v44, %v8596_v23  ;;  %v3862_v11 = vstv %s8620_s22  ;;  %s5820_s22 = sld [smem:[#allocation9 + $0x3d]] }
 0x54a   : > { %3726 = vst.msk [vmem:[#allocation3 + $0x18] sm:$0xff] %vm3722_vm9, %v3720_v54  ;;  %v3737_v61 = vmax.f32 %v3732_v7, 0.0  ;;  %v3736_v35 = vmax.f32 %v3731_v27, 0.0  ;;  %v3636_v38 = vadd.f32 %v3625_v26, %v3540_v19  ;;  %v3635_v0 = vadd.f32 %v3623_v25, %v3539_v59 }
 0x54b   : > { %3819 = vrot.lane.b32.xlu0 %v3811_v18, %s6272_s19  ;;  %v3863_v7 = vmul.f32 %v3862_v11, %v8596_v23 }
 0x54c   : > { %v3742_v60 = vsel %vm8563_vm11, %v3737_v61, 0.0  ;;  %v3741_v14 = vsel %vm8549_vm8, %v3736_v35, 0.0  ;;  %v3734_v4 = vadd.f32 %v3730_v50, %v3636_v38  ;;  %v3733_v22 = vadd.f32 %v3730_v50, %v3635_v0  ;;  %v8610_v15 = vld [vmem:[#allocation3 + $0x10] sm:$0xff]  ;;  %v8612_v10 = vld [vmem:[#allocation3 + $0x8] sm:$0xff] }
 0x54d   : > { %3748 = vst.msk [vmem:[#allocation3 + $0x30] sm:$0xff] %vm3722_vm9, %v3742_v60  ;;  %3747 = vst.msk [vmem:[#allocation3 + $0x28] sm:$0xff] %vm3722_vm9, %v3741_v14  ;;  %v3651_v17 = vpop.permute.xlu1 %3650  ;;  %v3627_v42 = vpop.permute.xlu0 %3626  ;;  %v3813_v57 = vmul.f32 %v3810_v45, %v8610_v15  ;;  %v3812_v13 = vmul.f32 %v3810_v45, %v8612_v10  ;;  %v3839_v48 = vmul.f32 %v3836_v44, %v8610_v15  ;;  %v3888_v0 = vstv %s5803_s8  ;;  %s5821_s8 = sld [smem:[#allocation9 + $0x8]] }
 0x54e   : > { %v3739_v58 = vmax.f32 %v3734_v4, 0.0  ;;  %v3738_v2 = vmax.f32 %v3733_v22, 0.0  ;;  %v3665_v6 = vadd.f32 %v3651_v17, %v3569_v55  ;;  %v3637_v36 = vadd.f32 %v3627_v42, %v3541_v62 }
 0x54f   : > { %3823 = vrot.lane.b32.xlu0 %v3813_v57, %s6272_s19  ;;  %3821 = vrot.lane.b32.xlu1 %v3812_v13, %s6272_s19  ;;  %v3838_v30 = vmul.f32 %v3836_v44, %v8612_v10  ;;  %v3865_v35 = vmul.f32 %v3862_v11, %v8610_v15  ;;  %v3864_v38 = vmul.f32 %v3862_v11, %v8612_v10  ;;  %v3914_v60 = vstv %s5804_s13  ;;  %s5822_s13 = sld [smem:[#allocation9 + $0x23]] }
 0x550   : > { %v3744_v9 = vsel %vm8563_vm11, %v3739_v58, 0.0  ;;  %v3743_v24 = vsel %vm8563_vm11, %v3738_v2, 0.0  ;;  %v3754_v32 = vadd.f32 %v3753_v8, %v3665_v6  ;;  %v3735_v53 = vadd.f32 %v3730_v50, %v3637_v36  ;;  %v8697_v58 = vld [vmem:[#allocation3 + $0x1] sm:$0xff] }
 0x551   : > { %v8632_v56 = vld [vmem:[#allocation3 + $0x18] sm:$0xff]  ;;  %3750 = vst.msk [vmem:[#allocation3 + $0x40] sm:$0xff] %vm3722_vm9, %v3744_v9  ;;  %3749 = vst.msk [vmem:[#allocation3 + $0x38] sm:$0xff] %vm3722_vm9, %v3743_v24  ;;  %v3655_v20 = vpop.permute.xlu1 %3654  ;;  %v3653_v63 = vpop.permute.xlu0 %3652  ;;  %v3889_v39 = vmul.f32 %v3888_v0, %v8596_v23  ;;  %v3891_v31 = vmul.f32 %v3888_v0, %v8610_v15  ;;  %v3890_v55 = vmul.f32 %v3888_v0, %v8612_v10  ;;  %v3940_v17 = vstv %s5805_s20  ;;  %s5823_s20 = sld [smem:[#allocation9 + $0x3e]] }
 0x552   : > { %v3814_v40 = vmul.f32 %v3810_v45, %v8632_v56  ;;  %v3759_v51 = vmax.f32 %v3754_v32, 0.0  ;;  %v3740_v28 = vmax.f32 %v3735_v53, 0.0  ;;  %v3667_v1 = vadd.f32 %v3655_v20, %v3571_v37  ;;  %v8705_v37 = vld [vmem:[#allocation3 + $0x9] sm:$0xff]  ;;  %v8711_v53 = vld [vmem:[#allocation3 + $0x19] sm:$0xff] }
 0x553   : > { %v3666_v5 = vadd.f32 %v3653_v63, %v3570_v33  ;;  %3845 = vrot.lane.b32.xlu0 %v3837_v34, %s6272_s19  ;;  %v3840_v27 = vmul.f32 %v3836_v44, %v8632_v56  ;;  %v3866_v62 = vmul.f32 %v3862_v11, %v8632_v56  ;;  %v3915_v14 = vmul.f32 %v3914_v60, %v8596_v23  ;;  %v8703_v33 = vld [vmem:[#allocation3 + $0x11] sm:$0xff] }
 0x554   : > { %3825 = vrot.lane.b32.xlu1 %v3814_v40, %s6272_s19  ;;  %v3764_v50 = vsel %vm8549_vm8, %v3759_v51, 0.0  ;;  %v3745_v3 = vsel %vm8578_vm13, %v3740_v28, 0.0  ;;  %v3756_v49 = vadd.f32 %v3753_v8, %v3667_v1  ;;  %v3892_v4 = vmul.f32 %v3888_v0, %v8632_v56 }
 0x555   : > { %v3755_v45 = vadd.f32 %v3753_v8, %v3666_v5  ;;  %3770 = vst.msk [vmem:[#allocation3 + $0x50] sm:$0xff] %vm3722_vm9, %v3764_v50  ;;  %v3659_v52 = vpop.permute.xlu1 %3658  ;;  %v3657_v41 = vpop.permute.xlu0 %3656  ;;  %v3917_v22 = vmul.f32 %v3914_v60, %v8610_v15  ;;  %v3941_v42 = vmul.f32 %v3940_v17, %v8596_v23  ;;  %v3918_v57 = vmul.f32 %v3914_v60, %v8632_v56 }
 0x556   : > { %3751 = vst.msk [vmem:[#allocation3 + $0x48] sm:$0x3] %vm3727_vm14, %v3745_v3  ;;  %v3761_v46 = vmax.f32 %v3756_v49, 0.0  ;;  %v3669_v43 = vadd.f32 %v3659_v52, %v3573_v29  ;;  %v3668_v47 = vadd.f32 %v3657_v41, %v3572_v16  ;;  %v3943_v13 = vmul.f32 %v3940_v17, %v8610_v15 }
 0x557   : > { %v3760_v21 = vmax.f32 %v3755_v45, 0.0  ;;  %3849 = vrot.lane.b32.xlu0 %v3839_v48, %s6272_s19  ;;  %v3942_v44 = vmul.f32 %v3940_v17, %v8612_v10  ;;  %v4000_v2 = vstv %s5809_s23  ;;  %v3944_v36 = vmul.f32 %v3940_v17, %v8632_v56  ;;  %s3779_s23 = sld [smem:[#allocation9]] }
 0x558   : > { %3847 = vrot.lane.b32.xlu1 %v3838_v30, %s6272_s19  ;;  %v3766_v59 = vsel %vm8563_vm11, %v3761_v46, 0.0  ;;  %v3758_v12 = vadd.f32 %v3753_v8, %v3669_v43  ;;  %v3757_v54 = vadd.f32 %v3753_v8, %v3668_v47  ;;  %v3916_v8 = vmul.f32 %v3914_v60, %v8612_v10 }
 0x559   : > { %v3765_v19 = vsel %vm8563_vm11, %v3760_v21, 0.0  ;;  %3772 = vst.msk [vmem:[#allocation3 + $0x60] sm:$0xff] %vm3722_vm9, %v3766_v59  ;;  %v4001_v6 = vmul.f32 %v4000_v2, %v8697_v58  ;;  %v4003_v9 = vmul.f32 %v4000_v2, %v8703_v33  ;;  %v4002_v24 = vmul.f32 %v4000_v2, %v8705_v37 }
 0x55a   : > { %3771 = vst.msk [vmem:[#allocation3 + $0x58] sm:$0xff] %vm3722_vm9, %v3765_v19  ;;  %v3763_v26 = vmax.f32 %v3758_v12, 0.0  ;;  %v3762_v25 = vmax.f32 %v3757_v54, 0.0  ;;  %v4026_v32 = vstv %s5810_s9  ;;  %v4004_v63 = vmul.f32 %v4000_v2, %v8711_v53  ;;  %v8753_v19 = vld [vmem:[#allocation3 + $0x2] sm:$0xff]  ;;  %s5806_s9 = sld [smem:[#allocation9 + $0x3]] }
 0x55b   : > { %3871 = vrot.lane.b32.xlu0 %v3863_v7, %s6272_s19  ;;  %v4027_v20 = vmul.f32 %v4026_v32, %v8697_v58  ;;  %v4029_v34 = vmul.f32 %v4026_v32, %v8703_v33  ;;  %v4028_v40 = vmul.f32 %v4026_v32, %v8705_v37  ;;  %v4052_v51 = vstv %s5811_s14  ;;  %s5798_s14 = sld [smem:[#allocation9 + $0x1b]] }
 0x55c   : > { %3851 = vrot.lane.b32.xlu1 %v3840_v27, %s6272_s19  ;;  %v3768_v18 = vsel %vm8578_vm13, %v3763_v26, 0.0  ;;  %v3767_v61 = vsel %vm8563_vm11, %v3762_v25, 0.0  ;;  %v4053_v28 = vmul.f32 %v4052_v51, %v8697_v58  ;;  %v4030_v1 = vmul.f32 %v4026_v32, %v8711_v53  ;;  %v8759_v27 = vld [vmem:[#allocation3 + $0x12] sm:$0xff]  ;;  %v8761_v26 = vld [vmem:[#allocation3 + $0xa] sm:$0xff] }
 0x55d   : > { %3774 = vst.msk [vmem:[#allocation3 + $0x70] sm:$0x3] %vm3727_vm14, %v3768_v18  ;;  %v4055_v5 = vmul.f32 %v4052_v51, %v8703_v33  ;;  %v4054_v16 = vmul.f32 %v4052_v51, %v8705_v37  ;;  %v4078_v29 = vstv %s5812_s15  ;;  %v4056_v3 = vmul.f32 %v4052_v51, %v8711_v53  ;;  %s5827_s15 = sld [smem:[#allocation9 + $0xa]] }
 0x55e   : > { %3773 = vst.msk [vmem:[#allocation3 + $0x68] sm:$0xff] %vm3722_vm9, %v3767_v61  ;;  %v4079_v50 = vmul.f32 %v4078_v29, %v8697_v58  ;;  %v4081_v49 = vmul.f32 %v4078_v29, %v8703_v33  ;;  %v4080_v45 = vmul.f32 %v4078_v29, %v8705_v37  ;;  %v4104_v52 = vstv %s5813_s17  ;;  %s5799_s17 = sld [smem:[#allocation9 + $0x36]] }
 0x55f   : > { %3875 = vrot.lane.b32.xlu0 %v3865_v35, %s6272_s19  ;;  %v4105_v41 = vmul.f32 %v4104_v52, %v8697_v58  ;;  %v4082_v48 = vmul.f32 %v4078_v29, %v8711_v53  ;;  %v4107_v30 = vmul.f32 %v4104_v52, %v8703_v33  ;;  %v4106_v11 = vmul.f32 %v4104_v52, %v8705_v37  ;;  %v8767_v35 = vld [vmem:[#allocation3 + $0x1a] sm:$0xff] }
 0x560   : > { %3873 = vrot.lane.b32.xlu1 %v3864_v38, %s6272_s19  ;;  %v4130_v46 = vstv %s5814_s18  ;;  %v4108_v43 = vmul.f32 %v4104_v52, %v8711_v53  ;;  %v4190_v12 = vstv %s5818_s16  ;;  %v4216_v61 = vstv %s5819_s21  ;;  %s8824_s18 = sld [smem:[#allocation9 + $0x25]]  ;;  %s8826_s16 = sld [smem:[#allocation9 + $0x1e]] }
 0x561   : > { %v4131_v21 = vmul.f32 %v4130_v46, %v8697_v58  ;;  %v4133_v47 = vmul.f32 %v4130_v46, %v8703_v33  ;;  %v4132_v59 = vmul.f32 %v4130_v46, %v8705_v37  ;;  %v4191_v54 = vmul.f32 %v4190_v12, %v8753_v19  ;;  %s8858_s21 = sld [smem:[#allocation9 + $0x40]] }
 0x562   : > { %v4134_v7 = vmul.f32 %v4130_v46, %v8711_v53  ;;  %v4193_v25 = vmul.f32 %v4190_v12, %v8759_v27  ;;  %v4192_v18 = vmul.f32 %v4190_v12, %v8761_v26  ;;  %v4217_v38 = vmul.f32 %v4216_v61, %v8753_v19 }
 0x563   : > { %3897 = vrot.lane.b32.xlu0 %v3889_v39, %s6273_s29  ;;  %v4194_v0 = vmul.f32 %v4190_v12, %v8767_v35  ;;  %v4219_v39 = vmul.f32 %v4216_v61, %v8759_v27  ;;  %v4220_v60 = vmul.f32 %v4216_v61, %v8767_v35  ;;  %v8834_v12 = vld [vmem:[#allocation3 + $0x28] sm:$0xff] }
 0x564   : > { %3877 = vrot.lane.b32.xlu1 %v3866_v62, %s6272_s19  ;;  %v4218_v62 = vmul.f32 %v4216_v61, %v8761_v26 }
 0x567   : > { %3901 = vrot.lane.b32.xlu0 %v3891_v31, %s6273_s29  ;;  %v4242_v31 = vstv %s5820_s22  ;;  %s8861_s22 = sld [smem:[#allocation9 + $0x39]] }
 0x568   : > { %3899 = vrot.lane.b32.xlu1 %v3890_v55, %s6273_s29  ;;  %v4243_v55 = vmul.f32 %v4242_v31, %v8753_v19 }
 0x56b   : > { %3923 = vrot.lane.b32.xlu0 %v3915_v14, %s6273_s29 }
 0x56c   : > { %3903 = vrot.lane.b32.xlu1 %v3892_v4, %s6273_s29  ;;  %v4245_v4 = vmul.f32 %v4242_v31, %v8759_v27 }
 0x56f   : > { %3927 = vrot.lane.b32.xlu0 %v3917_v22, %s6273_s29  ;;  %v4244_v22 = vmul.f32 %v4242_v31, %v8761_v26 }
 0x570   : > { %3925 = vrot.lane.b32.xlu1 %v3916_v8, %s6273_s29  ;;  %v4268_v8 = vstv %s5821_s8  ;;  %s5830_s8 = sld [smem:[#allocation9 + $0xb]] }
 0x573   : > { %3949 = vrot.lane.b32.xlu0 %v3941_v42, %s6273_s29 }
 0x574   : > { %3929 = vrot.lane.b32.xlu1 %v3918_v57, %s6273_s29  ;;  %v4269_v57 = vmul.f32 %v4268_v8, %v8753_v19 }
 0x577   : > { %3953 = vrot.lane.b32.xlu0 %v3943_v13, %s6273_s29  ;;  %v4246_v13 = vmul.f32 %v4242_v31, %v8767_v35 }
 0x578   : > { %3951 = vrot.lane.b32.xlu1 %v3942_v44, %s6273_s29 }
 0x57b   : > { %4009 = vrot.lane.b32.xlu0 %v4001_v6, %s6272_s19  ;;  %v4271_v6 = vmul.f32 %v4268_v8, %v8759_v27 }
 0x57c   : > { %3955 = vrot.lane.b32.xlu1 %v3944_v36, %s6273_s29  ;;  %v4270_v36 = vmul.f32 %v4268_v8, %v8761_v26 }
 0x57f   : > { %4013 = vrot.lane.b32.xlu0 %v4003_v9, %s6272_s19  ;;  %v4294_v9 = vstv %s5822_s13  ;;  %s5831_s13 = sld [smem:[#allocation9 + $0x26]] }
 0x580   : > { %4011 = vrot.lane.b32.xlu1 %v4002_v24, %s6272_s19  ;;  %v4297_v51 = vmul.f32 %v4294_v9, %v8759_v27 }
 0x583   : > { %4035 = vrot.lane.b32.xlu0 %v4027_v20, %s6272_s19  ;;  %v4295_v20 = vmul.f32 %v4294_v9, %v8753_v19 }
 0x584   : > { %4015 = vrot.lane.b32.xlu1 %v4004_v63, %s6272_s19  ;;  %v4272_v63 = vmul.f32 %v4268_v8, %v8767_v35 }
 0x587   : > { %4039 = vrot.lane.b32.xlu0 %v4029_v34, %s6272_s19 }
 0x588   : > { %4037 = vrot.lane.b32.xlu1 %v4028_v40, %s6272_s19 }
 0x58b   : > { %4061 = vrot.lane.b32.xlu0 %v4053_v28, %s6272_s19  ;;  %v4296_v28 = vmul.f32 %v4294_v9, %v8761_v26 }
 0x58c   : > { %4041 = vrot.lane.b32.xlu1 %v4030_v1, %s6272_s19  ;;  %v4320_v1 = vstv %s5823_s20  ;;  %s5832_s20 = sld [smem:[#allocation9 + $0x41]] }
 0x58d   : > { %v4322_v46 = vmul.f32 %v4320_v1, %v8761_v26 }
 0x58f   : > { %4065 = vrot.lane.b32.xlu0 %v4055_v5, %s6272_s19  ;;  %v3780_v5 = vstv %s3779_s23  ;;  %s5815_s23 = sld [smem:[#allocation9 + $0x6]] }
 0x590   : > { %4063 = vrot.lane.b32.xlu1 %v4054_v16, %s6272_s19 }
 0x593   : > { %4087 = vrot.lane.b32.xlu0 %v4079_v50, %s6273_s29  ;;  %v4321_v50 = vmul.f32 %v4320_v1, %v8753_v19 }
 0x594   : > { %4067 = vrot.lane.b32.xlu1 %v4056_v3, %s6272_s19  ;;  %v4298_v3 = vmul.f32 %v4294_v9, %v8767_v35 }
 0x597   : > { %4091 = vrot.lane.b32.xlu0 %v4081_v49, %s6273_s29  ;;  %v3781_v49 = vmul.f32 %v3780_v5, %v8596_v23 }
 0x598   : > { %4089 = vrot.lane.b32.xlu1 %v4080_v45, %s6273_s29  ;;  %v3970_v45 = vstv %s5806_s9  ;;  %s5836_s9 = sld [smem:[#allocation9 + $0xd]] }
 0x599   : > { %v3972_v8 = vmul.f32 %v3970_v45, %v8705_v37 }
 0x59b   : > { %4113 = vrot.lane.b32.xlu0 %v4105_v41, %s6273_s29  ;;  %v3790_v41 = vstv %s5798_s14  ;;  %s5816_s14 = sld [smem:[#allocation9 + $0x21]] }
 0x59c   : > { %4093 = vrot.lane.b32.xlu1 %v4082_v48, %s6273_s29 }
 0x59f   : > { %4117 = vrot.lane.b32.xlu0 %v4107_v30, %s6273_s29 }
 0x5a0   : > { %4115 = vrot.lane.b32.xlu1 %v4106_v11, %s6273_s29  ;;  %v4323_v11 = vmul.f32 %v4320_v1, %v8759_v27 }
 0x5a3   : > { %4139 = vrot.lane.b32.xlu0 %v4131_v21, %s6273_s29  ;;  %v4380_v21 = vstv %s5827_s15  ;;  %s8979_s15 = sld [smem:[#allocation9 + $0x28]] }
 0x5a4   : > { %4119 = vrot.lane.b32.xlu1 %v4108_v43, %s6273_s29  ;;  %v3782_v43 = vmul.f32 %v3780_v5, %v8612_v10  ;;  %v4381_v31 = vmul.f32 %v4380_v21, %v8834_v12 }
 0x5a7   : > { %4143 = vrot.lane.b32.xlu0 %v4133_v47, %s6273_s29  ;;  %v3783_v47 = vmul.f32 %v3780_v5, %v8610_v15 }
 0x5a8   : > { %4141 = vrot.lane.b32.xlu1 %v4132_v59, %s6273_s29 }
 0x5ab   : > { %4199 = vrot.lane.b32.xlu0 %v4191_v54, %s6272_s19  ;;  %v3971_v54 = vmul.f32 %v3970_v45, %v8697_v58 }
 0x5ac   : > { %4145 = vrot.lane.b32.xlu1 %v4134_v7, %s6273_s29 }
 0x5af   : > { %4203 = vrot.lane.b32.xlu0 %v4193_v25, %s6272_s19 }
 0x5b0   : > { %4201 = vrot.lane.b32.xlu1 %v4192_v18, %s6272_s19  ;;  %v8839_v18 = vstv %s5799_s17  ;;  %s9000_s17 = sld [smem:[#allocation9 + $0x3c]] }
 0x5b3   : > { %4225 = vrot.lane.b32.xlu0 %v4217_v38, %s6272_s19  ;;  %v3784_v38 = vmul.f32 %v3780_v5, %v8632_v56 }
 0x5b4   : > { %4205 = vrot.lane.b32.xlu1 %v4194_v0, %s6272_s19  ;;  %v3791_v0 = vmul.f32 %v3790_v41, %v8596_v23 }
 0x5b7   : > { %4229 = vrot.lane.b32.xlu0 %v4219_v39, %s6272_s19 }
 0x5b8   : > { %4227 = vrot.lane.b32.xlu1 %v4218_v62, %s6272_s19 }
 0x5bb   : > { %4251 = vrot.lane.b32.xlu0 %v4243_v55, %s6272_s19  ;;  %v4324_v55 = vmul.f32 %v4320_v1, %v8767_v35 }
 0x5bc   : > { %4231 = vrot.lane.b32.xlu1 %v4220_v60, %s6272_s19 }
 0x5bd   : > { %v3820_v14 = vpop.permute.xlu0 %3819 }
 0x5be   : > { %v3831_v52 = vadd.f32 %v3820_v14, %v3781_v49  ;;  %v8873_v49 = vld [vmem:[#allocation3 + $0x40] sm:$0xff] }
 0x5bf   : > { %4255 = vrot.lane.b32.xlu0 %v4245_v4, %s6272_s19  ;;  %v8847_v4 = vld [vmem:[#allocation3 + $0x38] sm:$0xff] }
 0x5c0   : > { %4253 = vrot.lane.b32.xlu1 %v4244_v22, %s6272_s19  ;;  %v8849_v22 = vld [vmem:[#allocation3 + $0x30] sm:$0xff]  ;;  %v4383_v1 = vmul.f32 %v4380_v21, %v8847_v4 }
 0x5c1   : > { %v3822_v17 = vpop.permute.xlu1 %3821  ;;  %v3824_v42 = vpop.permute.xlu0 %3823  ;;  %v4382_v5 = vmul.f32 %v4380_v21, %v8849_v22 }
 0x5c2   : > { %v3832_v7 = vadd.f32 %v3822_v17, %v3782_v43  ;;  %v3833_v25 = vadd.f32 %v3824_v42, %v3783_v47  ;;  %v3973_v17 = vmul.f32 %v3970_v45, %v8703_v33  ;;  %v8856_v42 = vstv %s8824_s18  ;;  %s9011_s18 = sld [smem:[#allocation9 + $0x43]] }
 0x5c3   : > { %4277 = vrot.lane.b32.xlu0 %v4269_v57, %s6273_s29  ;;  %v3980_v57 = vstv %s8826_s16  ;;  %v3794_v43 = vmul.f32 %v3790_v41, %v8632_v56  ;;  %v3801_v47 = vmul.f32 %v8839_v18, %v8596_v23  ;;  %s5839_s16 = sld [smem:[#allocation9 + $0xe]] }
 0x5c4   : > { %4257 = vrot.lane.b32.xlu1 %v4246_v13, %s6272_s19 }
 0x5c5   : > { %v8793_v2 = vpop.permute.xlu0 %3845 }
 0x5c6   : > { %v8791_v44 = vpop.permute.xlu1 %3825 }
 0x5c7   : > { %4281 = vrot.lane.b32.xlu0 %v4271_v6, %s6273_s29  ;;  %v3834_v13 = vadd.f32 %v8791_v44, %v3784_v38  ;;  %v3857_v6 = vadd.f32 %v8793_v2, %v3791_v0  ;;  %v3981_v44 = vmul.f32 %v3980_v57, %v8697_v58  ;;  %v3974_v2 = vmul.f32 %v3970_v45, %v8711_v53 }
 0x5c8   : > { %4279 = vrot.lane.b32.xlu1 %v4270_v36, %s6273_s29  ;;  %v3982_v38 = vmul.f32 %v3980_v57, %v8705_v37  ;;  %v3990_v0 = vstv %s8861_s22  ;;  %s5841_s22 = sld [smem:[#allocation9 + $0x44]] }
 0x5c9   : > { %v8801_v32 = vpop.permute.xlu0 %3849 }
 0x5ca   : > { %v8799_v24 = vpop.permute.xlu1 %3847 }
 0x5cb   : > { %4303 = vrot.lane.b32.xlu0 %v4295_v20, %s6273_s29  ;;  %v3792_v20 = vmul.f32 %v3790_v41, %v8612_v10 }
 0x5cc   : > { %4283 = vrot.lane.b32.xlu1 %v4272_v63, %s6273_s29  ;;  %v3793_v63 = vmul.f32 %v3790_v41, %v8610_v15  ;;  %v4432_v41 = vstv %s8858_s21  ;;  %s5840_s21 = sld [smem:[#allocation9 + $0x29]] }
 0x5cd   : > { %v8809_v40 = vpop.permute.xlu0 %3871 }
 0x5ce   : > { %v8807_v34 = vpop.permute.xlu1 %3851 }
 0x5cf   : > { %4307 = vrot.lane.b32.xlu0 %v4297_v51, %s6273_s29  ;;  %v3860_v23 = vadd.f32 %v8807_v34, %v3794_v43  ;;  %v4408_v34 = vmul.f32 %v8856_v42, %v8849_v22 }
 0x5d0   : > { %4305 = vrot.lane.b32.xlu1 %v4296_v28, %s6273_s29 }
 0x5d1   : > { %v8817_v29 = vpop.permute.xlu0 %3875 }
 0x5d2   : > { %v8815_v16 = vpop.permute.xlu1 %3873 }
 0x5d3   : > { %4329 = vrot.lane.b32.xlu0 %v4321_v50, %s6273_s29 }
 0x5d4   : > { %4309 = vrot.lane.b32.xlu1 %v4298_v3, %s6273_s29 }
 0x5d5   : > { %v3898_v30 = vpop.permute.xlu0 %3897 }
 0x5d6   : > { %v8828_v48 = vpop.permute.xlu1 %3877  ;;  %v3909_v59 = vadd.f32 %v3898_v30, %v3831_v52  ;;  %v3858_v52 = vadd.f32 %v8799_v24, %v3792_v20  ;;  %v3859_v30 = vadd.f32 %v8801_v32, %v3793_v63  ;;  %v4384_v24 = vmul.f32 %v4380_v21, %v8873_v49 }
 0x5d7   : > { %4333 = vrot.lane.b32.xlu0 %v4323_v11, %s6273_s29  ;;  %v3983_v32 = vmul.f32 %v3980_v57, %v8703_v33  ;;  %v3802_v21 = vmul.f32 %v8839_v18, %v8612_v10 }
 0x5d8   : > { %4331 = vrot.lane.b32.xlu1 %v4322_v46, %s6273_s29  ;;  %v8841_v61 = vadd.f32 %v3971_v54, %v3909_v59  ;;  %v4407_v54 = vmul.f32 %v8856_v42, %v8834_v12 }
 0x5d9   : > { %v3902_v62 = vpop.permute.xlu0 %3901 }
 0x5da   : > { %v3900_v39 = vpop.permute.xlu1 %3899  ;;  %v3911_v14 = vadd.f32 %v3902_v62, %v3833_v25 }
 0x5db   : > { %v3910_v60 = vadd.f32 %v3900_v39, %v3832_v7  ;;  %4389 = vrot.lane.b32.xlu0 %v4381_v31, %s6272_s19  ;;  %v3883_v39 = vadd.f32 %v8809_v40, %v3801_v47 }
 0x5dc   : > { %4335 = vrot.lane.b32.xlu1 %v4324_v55, %s6273_s29  ;;  %v8867_v9 = vadd.f32 %v3973_v17, %v3911_v14  ;;  %v3803_v55 = vmul.f32 %v8839_v18, %v8610_v15  ;;  %v3884_v15 = vadd.f32 %v8815_v16, %v3802_v21  ;;  %v3993_v16 = vmul.f32 %v3990_v0, %v8703_v33 }
 0x5dd   : > { %v8865_v36 = vadd.f32 %v3972_v8, %v3910_v60  ;;  %v3924_v28 = vpop.permute.xlu0 %3923  ;;  %v4409_v8 = vmul.f32 %v8856_v42, %v8847_v4  ;;  %v4458_v33 = vstv %s5830_s8  ;;  %s5824_s8 = sld [smem:[#allocation9 + $0x9]] }
 0x5de   : > { %v3904_v51 = vpop.permute.xlu1 %3903  ;;  %v3935_v3 = vadd.f32 %v3924_v28, %v3857_v6  ;;  %v3984_v6 = vmul.f32 %v3980_v57, %v8711_v53  ;;  %v3885_v10 = vadd.f32 %v8817_v29, %v3803_v55  ;;  %v4410_v57 = vmul.f32 %v8856_v42, %v8873_v49 }
 0x5df   : > { %v3912_v50 = vadd.f32 %v3904_v51, %v3834_v13  ;;  %4393 = vrot.lane.b32.xlu0 %v4383_v1, %s6272_s19  ;;  %v3991_v13 = vmul.f32 %v3990_v0, %v8697_v58  ;;  %v3804_v51 = vmul.f32 %v8839_v18, %v8632_v56  ;;  %v4433_v58 = vmul.f32 %v4432_v41, %v8834_v12 }
 0x5e0   : > { %4391 = vrot.lane.b32.xlu1 %v4382_v5, %s6272_s19  ;;  %v8881_v11 = vadd.f32 %v3981_v44, %v3935_v3  ;;  %v3992_v29 = vmul.f32 %v3990_v0, %v8705_v37  ;;  %v4435_v42 = vmul.f32 %v4432_v41, %v8847_v4  ;;  %v3994_v37 = vmul.f32 %v3990_v0, %v8711_v53 }
 0x5e1   : > { %v8883_v46 = vadd.f32 %v3974_v2, %v3912_v50  ;;  %v3928_v59 = vpop.permute.xlu0 %3927  ;;  %v3886_v3 = vadd.f32 %v8828_v48, %v3804_v51  ;;  %v4461_v53 = vmul.f32 %v4458_v33, %v8847_v4  ;;  %v4462_v0 = vmul.f32 %v4458_v33, %v8873_v49 }
 0x5e2   : > { %v3926_v45 = vpop.permute.xlu1 %3925  ;;  %v3937_v25 = vadd.f32 %v3928_v59, %v3859_v30  ;;  %v4436_v59 = vmul.f32 %v4432_v41, %v8873_v49 }
 0x5e3   : > { %v3936_v7 = vadd.f32 %v3926_v45, %v3858_v52  ;;  %4415 = vrot.lane.b32.xlu0 %v4407_v54, %s6272_s19  ;;  %v4434_v52 = vmul.f32 %v4432_v41, %v8849_v22  ;;  %v4459_v45 = vmul.f32 %v4458_v33, %v8834_v12 }
 0x5e4   : > { %4395 = vrot.lane.b32.xlu1 %v4384_v24, %s6272_s19  ;;  %v8899_v62 = vadd.f32 %v3983_v32, %v3937_v25  ;;  %v4484_v25 = vstv %s5831_s13  ;;  %s5845_s13 = sld [smem:[#allocation9 + $0x10]] }
 0x5e5   : > { %v8901_v31 = vadd.f32 %v3982_v38, %v3936_v7  ;;  %v3950_v14 = vpop.permute.xlu0 %3949  ;;  %v4460_v7 = vmul.f32 %v4458_v33, %v8849_v22  ;;  %v4485_v41 = vmul.f32 %v4484_v25, %v8834_v12  ;;  %v4487_v21 = vmul.f32 %v4484_v25, %v8847_v4 }
 0x5e6   : > { %v3930_v60 = vpop.permute.xlu1 %3929  ;;  %v3961_v40 = vadd.f32 %v3950_v14, %v3883_v39  ;;  %v4486_v55 = vmul.f32 %v4484_v25, %v8849_v22 }
 0x5e7   : > { %v3938_v17 = vadd.f32 %v3930_v60, %v3860_v23  ;;  %4419 = vrot.lane.b32.xlu0 %v4409_v8, %s6272_s19  ;;  %v4510_v60 = vstv %s5832_s20  ;;  %s5825_s20 = sld [smem:[#allocation9 + $0x24]] }
 0x5e8   : > { %4417 = vrot.lane.b32.xlu1 %v4408_v34, %s6272_s19  ;;  %v8917_v20 = vadd.f32 %v3991_v13, %v3961_v40  ;;  %v4511_v34 = vmul.f32 %v4510_v60, %v8834_v12  ;;  %v4160_v40 = vstv %s5815_s23  ;;  %v4512_v51 = vmul.f32 %v4510_v60, %v8849_v22  ;;  %s9113_s23 = sld [smem:[#allocation9 + $0x2b]] }
 0x5e9   : > { %v8919_v63 = vadd.f32 %v3984_v6, %v3938_v17  ;;  %v3954_v1 = vpop.permute.xlu0 %3953  ;;  %v4488_v17 = vmul.f32 %v4484_v25, %v8873_v49  ;;  %v4163_v33 = vmul.f32 %v4160_v40, %v8759_v27 }
 0x5ea   : > { %v3952_v28 = vpop.permute.xlu1 %3951  ;;  %v3963_v50 = vadd.f32 %v3954_v1, %v3885_v10  ;;  %v4513_v10 = vmul.f32 %v4510_v60, %v8847_v4  ;;  %v8981_v1 = vld [vmem:[#allocation3 + $0x29] sm:$0xff] }
 0x5eb   : > { %v3962_v5 = vadd.f32 %v3952_v28, %v3884_v15  ;;  %4441 = vrot.lane.b32.xlu0 %v4433_v58, %s6272_s19  ;;  %v4570_v58 = vstv %s5836_s9  ;;  %s9134_s9 = sld [smem:[#allocation9 + $0x3f]] }
 0x5ec   : > { %4421 = vrot.lane.b32.xlu1 %v4410_v57, %s6272_s19  ;;  %v8931_v56 = vadd.f32 %v3993_v16, %v3963_v50  ;;  %v4161_v57 = vmul.f32 %v4160_v40, %v8753_v19 }
 0x5ed   : > { %v8933_v18 = vadd.f32 %v3992_v29, %v3962_v5  ;;  %v4010_v2 = vpop.permute.xlu0 %4009 }
 0x5ee   : > { %v3956_v44 = vpop.permute.xlu1 %3955  ;;  %v4021_v13 = vadd.f32 %v4010_v2, %v8841_v61 }
 0x5ef   : > { %v3964_v30 = vadd.f32 %v3956_v44, %v3886_v3  ;;  %4445 = vrot.lane.b32.xlu0 %v4435_v42, %s6272_s19  ;;  %v4571_v3 = vmul.f32 %v4570_v58, %v8981_v1  ;;  %v4514_v44 = vmul.f32 %v4510_v60, %v8873_v49 }
 0x5f0   : > { %4443 = vrot.lane.b32.xlu1 %v4434_v52, %s6272_s19  ;;  %v8992_v52 = vld [vmem:[#allocation3 + $0x39] sm:$0xff] }
 0x5f1   : > { %v8940_v48 = vadd.f32 %v3994_v37, %v3964_v30  ;;  %v4014_v47 = vpop.permute.xlu0 %4013  ;;  %v8994_v30 = vld [vmem:[#allocation3 + $0x31] sm:$0xff] }
 0x5f2   : > { %v4012_v43 = vpop.permute.xlu1 %4011  ;;  %v4023_v5 = vadd.f32 %v4014_v47, %v8867_v9  ;;  %v4170_v9 = vstv %s5816_s14  ;;  %v4572_v25 = vmul.f32 %v4570_v58, %v8994_v30  ;;  %s9145_s14 = sld [smem:[#allocation9 + $0x46]] }
 0x5f3   : > { %4467 = vrot.lane.b32.xlu0 %v4459_v45, %s6273_s29  ;;  %v4022_v61 = vadd.f32 %v4012_v43, %v8865_v36  ;;  %v4162_v36 = vmul.f32 %v4160_v40, %v8761_v26 }
 0x5f4   : > { %4447 = vrot.lane.b32.xlu1 %v4436_v59, %s6272_s19 }
 0x5f5   : > { %v4036_v54 = vpop.permute.xlu0 %4035 }
 0x5f6   : > { %v4016_v24 = vpop.permute.xlu1 %4015  ;;  %v4047_v37 = vadd.f32 %v4036_v54, %v8881_v11  ;;  %v4171_v11 = vmul.f32 %v4170_v9, %v8753_v19 }
 0x5f7   : > { %4471 = vrot.lane.b32.xlu0 %v4461_v53, %s6273_s29  ;;  %v4024_v43 = vadd.f32 %v4016_v24, %v8883_v46  ;;  %v4164_v46 = vmul.f32 %v4160_v40, %v8767_v35 }
 0x5f8   : > { %4469 = vrot.lane.b32.xlu1 %v4460_v7, %s6273_s29  ;;  %v4573_v7 = vmul.f32 %v4570_v58, %v8992_v52 }
 0x5f9   : > { %v8950_v32 = vpop.permute.xlu0 %4039 }
 0x5fa   : > { %v8952_v38 = vpop.permute.xlu1 %4037  ;;  %v4049_v54 = vadd.f32 %v8950_v32, %v8899_v62  ;;  %v4172_v62 = vmul.f32 %v4170_v9, %v8761_v26 }
 0x5fb   : > { %4493 = vrot.lane.b32.xlu0 %v4485_v41, %s6273_s29  ;;  %v4596_v41 = vstv %s8979_s15  ;;  %v4048_v24 = vadd.f32 %v8952_v38, %v8901_v31  ;;  %v4180_v31 = vstv %s9000_s17  ;;  %s5848_s15 = sld [smem:[#allocation9 + $0x11]]  ;;  %s5849_s17 = sld [smem:[#allocation9 + $0x2c]] }
 0x5fc   : > { %4473 = vrot.lane.b32.xlu1 %v4462_v0, %s6273_s29 }
 0x5fd   : > { %v8958_v23 = vpop.permute.xlu0 %4061 }
 0x5fe   : > { %v8960_v39 = vpop.permute.xlu1 %4041  ;;  %v4073_v32 = vadd.f32 %v8958_v23, %v8917_v20  ;;  %v4174_v20 = vmul.f32 %v4170_v9, %v8767_v35 }
 0x5ff   : > { %4497 = vrot.lane.b32.xlu0 %v4487_v21, %s6273_s29  ;;  %v4050_v38 = vadd.f32 %v8960_v39, %v8919_v63 }
 0x600   : > { %4495 = vrot.lane.b32.xlu1 %v4486_v55, %s6273_s29  ;;  %v9013_v55 = vld [vmem:[#allocation3 + $0x41] sm:$0xff] }
 0x601   : > { %v8966_v14 = vpop.permute.xlu0 %4065  ;;  %v4574_v40 = vmul.f32 %v4570_v58, %v9013_v55 }
 0x602   : > { %v8968_v8 = vpop.permute.xlu1 %4063  ;;  %v4075_v63 = vadd.f32 %v8966_v14, %v8931_v56 }
 0x603   : > { %4519 = vrot.lane.b32.xlu0 %v4511_v34, %s6273_s29  ;;  %v4074_v23 = vadd.f32 %v8968_v8, %v8933_v18 }
 0x604   : > { %4499 = vrot.lane.b32.xlu1 %v4488_v17, %s6273_s29 }
 0x605   : > { %v4088_v6 = vpop.permute.xlu0 %4087 }
 0x606   : > { %v8975_v15 = vpop.permute.xlu1 %4067  ;;  %v4099_v28 = vadd.f32 %v4088_v6, %v4021_v13  ;;  %v4597_v6 = vmul.f32 %v4596_v41, %v8981_v1 }
 0x607   : > { %4523 = vrot.lane.b32.xlu0 %v4513_v10, %s6273_s29  ;;  %v4076_v56 = vadd.f32 %v8975_v15, %v8940_v48 }
 0x608   : > { %4521 = vrot.lane.b32.xlu1 %v4512_v51, %s6273_s29  ;;  %v8988_v50 = vadd.f32 %v4161_v57, %v4099_v28  ;;  %v4173_v28 = vmul.f32 %v4170_v9, %v8759_v27  ;;  %v4600_v9 = vmul.f32 %v4596_v41, %v9013_v55 }
 0x609   : > { %v4092_v16 = vpop.permute.xlu0 %4091 }
 0x60a   : > { %v4090_v29 = vpop.permute.xlu1 %4089  ;;  %v4101_v2 = vadd.f32 %v4092_v16, %v4023_v5  ;;  %v4599_v16 = vmul.f32 %v4596_v41, %v8992_v52 }
 0x60b   : > { %v4100_v42 = vadd.f32 %v4090_v29, %v4022_v61  ;;  %4579 = vrot.lane.b32.xlu0 %v4571_v3, %s6272_s19  ;;  %v4598_v29 = vmul.f32 %v4596_v41, %v8994_v30  ;;  %v4622_v3 = vstv %s9011_s18  ;;  %s5850_s18 = sld [smem:[#allocation9 + $0x47]] }
 0x60c   : > { %4525 = vrot.lane.b32.xlu1 %v4514_v44, %s6273_s29  ;;  %v9004_v47 = vadd.f32 %v4163_v33, %v4101_v2  ;;  %v4625_v41 = vmul.f32 %v4622_v3, %v8992_v52 }
 0x60d   : > { %v9006_v45 = vadd.f32 %v4162_v36, %v4100_v42  ;;  %v4114_v59 = vpop.permute.xlu0 %4113  ;;  %v4181_v42 = vmul.f32 %v4180_v31, %v8753_v19  ;;  %v4623_v19 = vmul.f32 %v4622_v3, %v8981_v1 }
 0x60e   : > { %v4094_v53 = vpop.permute.xlu1 %4093  ;;  %v4125_v0 = vadd.f32 %v4114_v59, %v4047_v37 }
 0x60f   : > { %v4102_v21 = vadd.f32 %v4094_v53, %v4024_v43  ;;  %4583 = vrot.lane.b32.xlu0 %v4573_v7, %s6272_s19  ;;  %v4183_v53 = vmul.f32 %v4180_v31, %v8759_v27  ;;  %v4182_v7 = vmul.f32 %v4180_v31, %v8761_v26  ;;  %v4184_v26 = vmul.f32 %v4180_v31, %v8767_v35 }
 0x610   : > { %4581 = vrot.lane.b32.xlu1 %v4572_v25, %s6272_s19  ;;  %v9023_v60 = vadd.f32 %v4171_v11, %v4125_v0  ;;  %v4624_v0 = vmul.f32 %v4622_v3, %v8994_v30 }
 0x611   : > { %v9025_v34 = vadd.f32 %v4164_v46, %v4102_v21  ;;  %v4118_v17 = vpop.permute.xlu0 %4117  ;;  %v4648_v21 = vstv %s5839_s16  ;;  %s5833_s16 = sld [smem:[#allocation9 + $0xc]] }
 0x612   : > { %v4116_v13 = vpop.permute.xlu1 %4115  ;;  %v4127_v10 = vadd.f32 %v4118_v17, %v4049_v54  ;;  %v4649_v46 = vmul.f32 %v4648_v21, %v8981_v1  ;;  %v4626_v54 = vmul.f32 %v4622_v3, %v9013_v55  ;;  %v4651_v35 = vmul.f32 %v4648_v21, %v8992_v52 }
 0x613   : > { %v4126_v51 = vadd.f32 %v4116_v13, %v4048_v24  ;;  %4605 = vrot.lane.b32.xlu0 %v4597_v6, %s6272_s19  ;;  %v4650_v13 = vmul.f32 %v4648_v21, %v8994_v30  ;;  %v4674_v6 = vstv %s5840_s21  ;;  %s5854_s21 = sld [smem:[#allocation9 + $0x13]] }
 0x614   : > { %4585 = vrot.lane.b32.xlu1 %v4574_v40, %s6272_s19  ;;  %v9038_v57 = vadd.f32 %v4173_v28, %v4127_v10  ;;  %v4652_v28 = vmul.f32 %v4648_v21, %v9013_v55  ;;  %v4678_v3 = vmul.f32 %v4674_v6, %v9013_v55 }
 0x615   : > { %v9040_v58 = vadd.f32 %v4172_v62, %v4126_v51  ;;  %v4140_v61 = vpop.permute.xlu0 %4139  ;;  %v4675_v51 = vmul.f32 %v4674_v6, %v8981_v1 }
 0x616   : > { %v4120_v5 = vpop.permute.xlu1 %4119  ;;  %v4151_v44 = vadd.f32 %v4140_v61, %v4073_v32  ;;  %v4677_v32 = vmul.f32 %v4674_v6, %v8992_v52  ;;  %v4700_v61 = vstv %s5841_s22  ;;  %s5834_s22 = sld [smem:[#allocation9 + $0x27]] }
 0x617   : > { %v4128_v2 = vadd.f32 %v4120_v5, %v4050_v38  ;;  %4609 = vrot.lane.b32.xlu0 %v4599_v16, %s6272_s19  ;;  %v4676_v38 = vmul.f32 %v4674_v6, %v8994_v30 }
 0x618   : > { %4607 = vrot.lane.b32.xlu1 %v4598_v29, %s6272_s19  ;;  %v9053_v39 = vadd.f32 %v4181_v42, %v4151_v44  ;;  %v4701_v29 = vmul.f32 %v4700_v61, %v8981_v1  ;;  %v4350_v44 = vstv %s5824_s8  ;;  %s9247_s8 = sld [smem:[#allocation9 + $0x2e]] }
 0x619   : > { %v9055_v33 = vadd.f32 %v4174_v20, %v4128_v2  ;;  %v4144_v36 = vpop.permute.xlu0 %4143  ;;  %v4353_v21 = vmul.f32 %v4350_v44, %v8847_v4 }
 0x61a   : > { %v4142_v37 = vpop.permute.xlu1 %4141  ;;  %v4153_v43 = vadd.f32 %v4144_v36, %v4075_v63  ;;  %v4703_v63 = vmul.f32 %v4700_v61, %v8992_v52 }
 0x61b   : > { %v4152_v59 = vadd.f32 %v4142_v37, %v4074_v23  ;;  %4631 = vrot.lane.b32.xlu0 %v4623_v19, %s6272_s19  ;;  %v4702_v23 = vmul.f32 %v4700_v61, %v8994_v30  ;;  %v9115_v37 = vld [vmem:[#allocation3 + $0x2a] sm:$0xff]  ;;  %v4760_v19 = vstv %s5845_s13  ;;  %s9268_s13 = sld [smem:[#allocation9 + $0x42]] }
 0x61c   : > { %4611 = vrot.lane.b32.xlu1 %v4600_v9, %s6272_s19  ;;  %v9065_v18 = vadd.f32 %v4183_v53, %v4153_v43  ;;  %v4351_v9 = vmul.f32 %v4350_v44, %v8834_v12 }
 0x61d   : > { %v9067_v14 = vadd.f32 %v4182_v7, %v4152_v59  ;;  %v4200_v8 = vpop.permute.xlu0 %4199 }
 0x61e   : > { %v4146_v25 = vpop.permute.xlu1 %4145  ;;  %v4211_v2 = vadd.f32 %v4200_v8, %v8988_v50  ;;  %v4704_v8 = vmul.f32 %v4700_v61, %v9013_v55 }
 0x61f   : > { %v4154_v27 = vadd.f32 %v4146_v25, %v4076_v56  ;;  %4635 = vrot.lane.b32.xlu0 %v4625_v41, %s6272_s19  ;;  %v4761_v56 = vmul.f32 %v4760_v19, %v9115_v37 }
 0x620   : > { %4633 = vrot.lane.b32.xlu1 %v4624_v0, %s6272_s19  ;;  %v9126_v0 = vld [vmem:[#allocation3 + $0x3a] sm:$0xff] }
 0x621   : > { %v9074_v48 = vadd.f32 %v4184_v26, %v4154_v27  ;;  %v4204_v15 = vpop.permute.xlu0 %4203  ;;  %v9128_v27 = vld [vmem:[#allocation3 + $0x32] sm:$0xff] }
 0x622   : > { %v4202_v11 = vpop.permute.xlu1 %4201  ;;  %v4213_v50 = vadd.f32 %v4204_v15, %v9004_v47  ;;  %v4352_v47 = vmul.f32 %v4350_v44, %v8849_v22  ;;  %v4762_v6 = vmul.f32 %v4760_v19, %v9128_v27 }
 0x623   : > { %4657 = vrot.lane.b32.xlu0 %v4649_v46, %s6273_s29  ;;  %v4212_v43 = vadd.f32 %v4202_v11, %v9006_v45  ;;  %v4360_v45 = vstv %s5825_s20  ;;  %s9279_s20 = sld [smem:[#allocation9 + $0x49]] }
 0x624   : > { %4637 = vrot.lane.b32.xlu1 %v4626_v54, %s6272_s19 }
 0x625   : > { %v4226_v24 = vpop.permute.xlu0 %4225 }
 0x626   : > { %v4206_v17 = vpop.permute.xlu1 %4205  ;;  %v4237_v26 = vadd.f32 %v4226_v24, %v9023_v60  ;;  %v4361_v60 = vmul.f32 %v4360_v45, %v8834_v12 }
 0x627   : > { %4661 = vrot.lane.b32.xlu0 %v4651_v35, %s6273_s29  ;;  %v4214_v15 = vadd.f32 %v4206_v17, %v9025_v34  ;;  %v4354_v34 = vmul.f32 %v4350_v44, %v8873_v49 }
 0x628   : > { %4659 = vrot.lane.b32.xlu1 %v4650_v13, %s6273_s29  ;;  %v4763_v13 = vmul.f32 %v4760_v19, %v9126_v0 }
 0x629   : > { %v9084_v40 = vpop.permute.xlu0 %4229 }
 0x62a   : > { %v9086_v10 = vpop.permute.xlu1 %4227  ;;  %v4239_v24 = vadd.f32 %v9084_v40, %v9038_v57  ;;  %v4362_v57 = vmul.f32 %v4360_v45, %v8849_v22 }
 0x62b   : > { %4683 = vrot.lane.b32.xlu0 %v4675_v51, %s6273_s29  ;;  %v4786_v51 = vstv %s9113_s23  ;;  %v4238_v17 = vadd.f32 %v9086_v10, %v9040_v58  ;;  %v4370_v58 = vstv %s9134_s9  ;;  %s5857_s23 = sld [smem:[#allocation9 + $0x14]]  ;;  %s5858_s9 = sld [smem:[#allocation9 + $0x2f]] }
 0x62c   : > { %4663 = vrot.lane.b32.xlu1 %v4652_v28, %s6273_s29 }
 0x62d   : > { %v9092_v62 = vpop.permute.xlu0 %4251 }
 0x62e   : > { %v9094_v31 = vpop.permute.xlu1 %4231  ;;  %v4263_v40 = vadd.f32 %v9092_v62, %v9053_v39  ;;  %v4364_v39 = vmul.f32 %v4360_v45, %v8873_v49 }
 0x62f   : > { %4687 = vrot.lane.b32.xlu0 %v4677_v32, %s6273_s29  ;;  %v4240_v10 = vadd.f32 %v9094_v31, %v9055_v33 }
 0x630   : > { %4685 = vrot.lane.b32.xlu1 %v4676_v38, %s6273_s29  ;;  %v9147_v38 = vld [vmem:[#allocation3 + $0x42] sm:$0xff] }
 0x631   : > { %v9100_v5 = vpop.permute.xlu0 %4255  ;;  %v4764_v44 = vmul.f32 %v4760_v19, %v9147_v38 }
 0x632   : > { %v9102_v16 = vpop.permute.xlu1 %4253  ;;  %v4265_v33 = vadd.f32 %v9100_v5, %v9065_v18 }
 0x633   : > { %4709 = vrot.lane.b32.xlu0 %v4701_v29, %s6273_s29  ;;  %v4264_v62 = vadd.f32 %v9102_v16, %v9067_v14 }
 0x634   : > { %4689 = vrot.lane.b32.xlu1 %v4678_v3, %s6273_s29 }
 0x635   : > { %v4278_v42 = vpop.permute.xlu0 %4277 }
 0x636   : > { %v9109_v20 = vpop.permute.xlu1 %4257  ;;  %v4289_v36 = vadd.f32 %v4278_v42, %v4211_v2  ;;  %v4787_v42 = vmul.f32 %v4786_v51, %v9115_v37 }
 0x637   : > { %4713 = vrot.lane.b32.xlu0 %v4703_v63, %s6273_s29  ;;  %v4266_v18 = vadd.f32 %v9109_v20, %v9074_v48 }
 0x638   : > { %4711 = vrot.lane.b32.xlu1 %v4702_v23, %s6273_s29  ;;  %v9122_v59 = vadd.f32 %v4351_v9, %v4289_v36  ;;  %v4363_v36 = vmul.f32 %v4360_v45, %v8847_v4  ;;  %v4790_v45 = vmul.f32 %v4786_v51, %v9147_v38 }
 0x639   : > { %v4282_v53 = vpop.permute.xlu0 %4281 }
 0x63a   : > { %v4280_v7 = vpop.permute.xlu1 %4279  ;;  %v4291_v25 = vadd.f32 %v4282_v53, %v4213_v50  ;;  %v4789_v53 = vmul.f32 %v4786_v51, %v9126_v0 }
 0x63b   : > { %v4290_v41 = vadd.f32 %v4280_v7, %v4212_v43  ;;  %4769 = vrot.lane.b32.xlu0 %v4761_v56, %s6272_s19  ;;  %v4788_v7 = vmul.f32 %v4786_v51, %v9128_v27  ;;  %v4812_v56 = vstv %s9145_s14  ;;  %s5859_s14 = sld [smem:[#allocation9 + $0x4a]] }
 0x63c   : > { %4715 = vrot.lane.b32.xlu1 %v4704_v8, %s6273_s29  ;;  %v9138_v11 = vadd.f32 %v4353_v21, %v4291_v25  ;;  %v4815_v51 = vmul.f32 %v4812_v56, %v9126_v0 }
 0x63d   : > { %v9140_v46 = vadd.f32 %v4352_v47, %v4290_v41  ;;  %v4304_v54 = vpop.permute.xlu0 %4303  ;;  %v4371_v41 = vmul.f32 %v4370_v58, %v8834_v12  ;;  %v4813_v12 = vmul.f32 %v4812_v56, %v9115_v37 }
 0x63e   : > { %v4284_v35 = vpop.permute.xlu1 %4283  ;;  %v4315_v28 = vadd.f32 %v4304_v54, %v4237_v26 }
 0x63f   : > { %v4292_v32 = vadd.f32 %v4284_v35, %v4214_v15  ;;  %4773 = vrot.lane.b32.xlu0 %v4763_v13, %s6272_s19  ;;  %v4373_v35 = vmul.f32 %v4370_v58, %v8847_v4  ;;  %v4372_v13 = vmul.f32 %v4370_v58, %v8849_v22  ;;  %v4374_v22 = vmul.f32 %v4370_v58, %v8873_v49 }
 0x640   : > { %4771 = vrot.lane.b32.xlu1 %v4762_v6, %s6272_s19  ;;  %v9157_v61 = vadd.f32 %v4361_v60, %v4315_v28  ;;  %v4814_v28 = vmul.f32 %v4812_v56, %v9128_v27 }
 0x641   : > { %v9159_v29 = vadd.f32 %v4354_v34, %v4292_v32  ;;  %v4308_v3 = vpop.permute.xlu0 %4307  ;;  %v4838_v32 = vstv %s5848_s15  ;;  %s5842_s15 = sld [smem:[#allocation9 + $0xf]] }
 0x642   : > { %v4306_v2 = vpop.permute.xlu1 %4305  ;;  %v4317_v63 = vadd.f32 %v4308_v3, %v4239_v24  ;;  %v4839_v34 = vmul.f32 %v4838_v32, %v9115_v37  ;;  %v4816_v24 = vmul.f32 %v4812_v56, %v9147_v38  ;;  %v4841_v49 = vmul.f32 %v4838_v32, %v9126_v0 }
 0x643   : > { %v4316_v23 = vadd.f32 %v4306_v2, %v4238_v17  ;;  %4795 = vrot.lane.b32.xlu0 %v4787_v42, %s6272_s19  ;;  %v4840_v2 = vmul.f32 %v4838_v32, %v9128_v27  ;;  %v4864_v42 = vstv %s5849_s17  ;;  %s5863_s17 = sld [smem:[#allocation9 + $0x16]] }
 0x644   : > { %4775 = vrot.lane.b32.xlu1 %v4764_v44, %s6272_s19  ;;  %v9172_v9 = vadd.f32 %v4363_v36, %v4317_v63  ;;  %v4842_v36 = vmul.f32 %v4838_v32, %v9147_v38  ;;  %v4868_v56 = vmul.f32 %v4864_v42, %v9147_v38 }
 0x645   : > { %v9174_v19 = vadd.f32 %v4362_v57, %v4316_v23  ;;  %v4330_v50 = vpop.permute.xlu0 %4329  ;;  %v4865_v23 = vmul.f32 %v4864_v42, %v9115_v37 }
 0x646   : > { %v4310_v43 = vpop.permute.xlu1 %4309  ;;  %v4341_v8 = vadd.f32 %v4330_v50, %v4263_v40  ;;  %v4867_v40 = vmul.f32 %v4864_v42, %v9126_v0  ;;  %v4890_v50 = vstv %s5850_s18  ;;  %s5843_s18 = sld [smem:[#allocation9 + $0x2a]] }
 0x647   : > { %v4318_v25 = vadd.f32 %v4310_v43, %v4240_v10  ;;  %4799 = vrot.lane.b32.xlu0 %v4789_v53, %s6272_s19  ;;  %v4866_v10 = vmul.f32 %v4864_v42, %v9128_v27 }
 0x648   : > { %4797 = vrot.lane.b32.xlu1 %v4788_v7, %s6272_s19  ;;  %v9187_v31 = vadd.f32 %v4371_v41, %v4341_v8  ;;  %v4891_v7 = vmul.f32 %v4890_v50, %v9115_v37  ;;  %v4540_v8 = vstv %s5833_s16  ;;  %s9381_s16 = sld [smem:[#allocation9 + $0x31]] }
 0x649   : > { %v9189_v21 = vadd.f32 %v4364_v39, %v4318_v25  ;;  %v4334_v47 = vpop.permute.xlu0 %4333  ;;  %v4543_v32 = vmul.f32 %v4540_v8, %v8992_v52 }
 0x64a   : > { %v4332_v26 = vpop.permute.xlu1 %4331  ;;  %v4343_v15 = vadd.f32 %v4334_v47, %v4265_v33  ;;  %v4893_v33 = vmul.f32 %v4890_v50, %v9126_v0 }
 0x64b   : > { %v4342_v54 = vadd.f32 %v4332_v26, %v4264_v62  ;;  %4821 = vrot.lane.b32.xlu0 %v4813_v12, %s6272_s19  ;;  %v4892_v62 = vmul.f32 %v4890_v50, %v9128_v27  ;;  %v9249_v26 = vld [vmem:[#allocation3 + $0x50] sm:$0xff]  ;;  %v4950_v12 = vstv %s5854_s21  ;;  %s9402_s21 = sld [smem:[#allocation9 + $0x45]] }
 0x64c   : > { %4801 = vrot.lane.b32.xlu1 %v4790_v45, %s6272_s19  ;;  %v9199_v14 = vadd.f32 %v4373_v35, %v4343_v15  ;;  %v4541_v45 = vmul.f32 %v4540_v8, %v8981_v1 }
 0x64d   : > { %v9201_v5 = vadd.f32 %v4372_v13, %v4342_v54  ;;  %v4390_v16 = vpop.permute.xlu0 %4389 }
 0x64e   : > { %v4336_v6 = vpop.permute.xlu1 %4335  ;;  %v4401_v25 = vadd.f32 %v4390_v16, %v9122_v59  ;;  %v4894_v16 = vmul.f32 %v4890_v50, %v9147_v38 }
 0x64f   : > { %v4344_v4 = vadd.f32 %v4336_v6, %v4266_v18  ;;  %4825 = vrot.lane.b32.xlu0 %v4815_v51, %s6272_s19  ;;  %v4951_v18 = vmul.f32 %v4950_v12, %v9249_v26 }
 0x650   : > { %4823 = vrot.lane.b32.xlu1 %v4814_v28, %s6272_s19  ;;  %v9260_v28 = vld [vmem:[#allocation3 + $0x60] sm:$0xff] }
 0x651   : > { %v9208_v48 = vadd.f32 %v4374_v22, %v4344_v4  ;;  %v4394_v20 = vpop.permute.xlu0 %4393  ;;  %v9262_v4 = vld [vmem:[#allocation3 + $0x58] sm:$0xff] }
 0x652   : > { %v4392_v60 = vpop.permute.xlu1 %4391  ;;  %v4403_v59 = vadd.f32 %v4394_v20, %v9138_v11  ;;  %v4542_v11 = vmul.f32 %v4540_v8, %v8994_v30  ;;  %v4952_v42 = vmul.f32 %v4950_v12, %v9262_v4 }
 0x653   : > { %4847 = vrot.lane.b32.xlu0 %v4839_v34, %s6273_s29  ;;  %v4402_v15 = vadd.f32 %v4392_v60, %v9140_v46  ;;  %v4550_v46 = vstv %s5834_s22  ;;  %s9413_s22 = sld [smem:[#allocation9 + $0x4c]] }
 0x654   : > { %4827 = vrot.lane.b32.xlu1 %v4816_v24, %s6272_s19 }
 0x655   : > { %v4416_v17 = vpop.permute.xlu0 %4415 }
 0x656   : > { %v4396_v3 = vpop.permute.xlu1 %4395  ;;  %v4427_v22 = vadd.f32 %v4416_v17, %v9157_v61  ;;  %v4551_v61 = vmul.f32 %v4550_v46, %v8981_v1 }
 0x657   : > { %4851 = vrot.lane.b32.xlu0 %v4841_v49, %s6273_s29  ;;  %v4404_v20 = vadd.f32 %v4396_v3, %v9159_v29  ;;  %v4544_v29 = vmul.f32 %v4540_v8, %v9013_v55 }
 0x658   : > { %4849 = vrot.lane.b32.xlu1 %v4840_v2, %s6273_s29  ;;  %v4953_v2 = vmul.f32 %v4950_v12, %v9260_v28 }
 0x659   : > { %v9218_v44 = vpop.permute.xlu0 %4419 }
 0x65a   : > { %v9220_v63 = vpop.permute.xlu1 %4417  ;;  %v4429_v17 = vadd.f32 %v9218_v44, %v9172_v9  ;;  %v4552_v9 = vmul.f32 %v4550_v46, %v8994_v30 }
 0x65b   : > { %4873 = vrot.lane.b32.xlu0 %v4865_v23, %s6273_s29  ;;  %v4976_v23 = vstv %s9247_s8  ;;  %v4428_v3 = vadd.f32 %v9220_v63, %v9174_v19  ;;  %v4560_v19 = vstv %s9268_s13  ;;  %s5866_s8 = sld [smem:[#allocation9 + $0x17]]  ;;  %s5867_s13 = sld [smem:[#allocation9 + $0x32]] }
 0x65c   : > { %4853 = vrot.lane.b32.xlu1 %v4842_v36, %s6273_s29 }
 0x65d   : > { %v9226_v57 = vpop.permute.xlu0 %4441 }
 0x65e   : > { %v9228_v58 = vpop.permute.xlu1 %4421  ;;  %v4453_v44 = vadd.f32 %v9226_v57, %v9187_v31  ;;  %v4554_v31 = vmul.f32 %v4550_v46, %v9013_v55 }
 0x65f   : > { %4877 = vrot.lane.b32.xlu0 %v4867_v40, %s6273_s29  ;;  %v4430_v63 = vadd.f32 %v9228_v58, %v9189_v21 }
 0x660   : > { %4875 = vrot.lane.b32.xlu1 %v4866_v10, %s6273_s29  ;;  %v9281_v10 = vld [vmem:[#allocation3 + $0x68] sm:$0xff] }
 0x661   : > { %v9234_v43 = vpop.permute.xlu0 %4445  ;;  %v4954_v8 = vmul.f32 %v4950_v12, %v9281_v10 }
 0x662   : > { %v9236_v53 = vpop.permute.xlu1 %4443  ;;  %v4455_v21 = vadd.f32 %v9234_v43, %v9199_v14 }
 0x663   : > { %4899 = vrot.lane.b32.xlu0 %v4891_v7, %s6273_s29  ;;  %v4454_v57 = vadd.f32 %v9236_v53, %v9201_v5 }
 0x664   : > { %4879 = vrot.lane.b32.xlu1 %v4868_v56, %s6273_s29 }
 0x665   : > { %v4468_v41 = vpop.permute.xlu0 %4467 }
 0x666   : > { %v9243_v39 = vpop.permute.xlu1 %4447  ;;  %v4479_v47 = vadd.f32 %v4468_v41, %v4401_v25  ;;  %v4977_v41 = vmul.f32 %v4976_v23, %v9249_v26 }
 0x667   : > { %4903 = vrot.lane.b32.xlu0 %v4893_v33, %s6273_s29  ;;  %v4456_v14 = vadd.f32 %v9243_v39, %v9208_v48 }
 0x668   : > { %4901 = vrot.lane.b32.xlu1 %v4892_v62, %s6273_s29  ;;  %v9256_v54 = vadd.f32 %v4541_v45, %v4479_v47  ;;  %v4553_v47 = vmul.f32 %v4550_v46, %v8992_v52  ;;  %v4980_v46 = vmul.f32 %v4976_v23, %v9281_v10 }
 0x669   : > { %v4472_v35 = vpop.permute.xlu0 %4471 }
 0x66a   : > { %v4470_v13 = vpop.permute.xlu1 %4469  ;;  %v4481_v6 = vadd.f32 %v4472_v35, %v4403_v59  ;;  %v4979_v35 = vmul.f32 %v4976_v23, %v9260_v28 }
 0x66b   : > { %v4480_v51 = vadd.f32 %v4470_v13, %v4402_v15  ;;  %4959 = vrot.lane.b32.xlu0 %v4951_v18, %s6272_s19  ;;  %v4978_v13 = vmul.f32 %v4976_v23, %v9262_v4  ;;  %v5002_v18 = vstv %s9279_s20  ;;  %s5868_s20 = sld [smem:[#allocation9 + $0x4d]] }
 0x66c   : > { %4905 = vrot.lane.b32.xlu1 %v4894_v16, %s6273_s29  ;;  %v9272_v60 = vadd.f32 %v4543_v32, %v4481_v6  ;;  %v5005_v23 = vmul.f32 %v5002_v18, %v9260_v28 }
 0x66d   : > { %v9274_v34 = vadd.f32 %v4542_v11, %v4480_v51  ;;  %v4494_v24 = vpop.permute.xlu0 %4493  ;;  %v4561_v51 = vmul.f32 %v4560_v19, %v8981_v1  ;;  %v5003_v1 = vmul.f32 %v5002_v18, %v9249_v26 }
 0x66e   : > { %v4474_v49 = vpop.permute.xlu1 %4473  ;;  %v4505_v36 = vadd.f32 %v4494_v24, %v4427_v22 }
 0x66f   : > { %v4482_v40 = vadd.f32 %v4474_v49, %v4404_v20  ;;  %4963 = vrot.lane.b32.xlu0 %v4953_v2, %s6272_s19  ;;  %v4563_v49 = vmul.f32 %v4560_v19, %v8992_v52  ;;  %v4562_v2 = vmul.f32 %v4560_v19, %v8994_v30  ;;  %v4564_v30 = vmul.f32 %v4560_v19, %v9013_v55 }
 0x670   : > { %4961 = vrot.lane.b32.xlu1 %v4952_v42, %s6272_s19  ;;  %v9291_v50 = vadd.f32 %v4551_v61, %v4505_v36  ;;  %v5004_v36 = vmul.f32 %v5002_v18, %v9262_v4 }
 0x671   : > { %v9293_v7 = vadd.f32 %v4544_v29, %v4482_v40  ;;  %v4498_v56 = vpop.permute.xlu0 %4497  ;;  %v5028_v40 = vstv %s5857_s23  ;;  %s5851_s23 = sld [smem:[#allocation9 + $0x12]] }
 0x672   : > { %v4496_v25 = vpop.permute.xlu1 %4495  ;;  %v4507_v33 = vadd.f32 %v4498_v56, %v4429_v17  ;;  %v5029_v29 = vmul.f32 %v5028_v40, %v9249_v26  ;;  %v5006_v17 = vmul.f32 %v5002_v18, %v9281_v10  ;;  %v5031_v55 = vmul.f32 %v5028_v40, %v9260_v28 }
 0x673   : > { %v4506_v62 = vadd.f32 %v4496_v25, %v4428_v3  ;;  %4985 = vrot.lane.b32.xlu0 %v4977_v41, %s6272_s19  ;;  %v5030_v25 = vmul.f32 %v5028_v40, %v9262_v4  ;;  %v5054_v41 = vstv %s5858_s9  ;;  %s5872_s9 = sld [smem:[#allocation9 + $0x19]] }
 0x674   : > { %4965 = vrot.lane.b32.xlu1 %v4954_v8, %s6272_s19  ;;  %v9306_v45 = vadd.f32 %v4553_v47, %v4507_v33  ;;  %v5032_v47 = vmul.f32 %v5028_v40, %v9281_v10  ;;  %v5058_v18 = vmul.f32 %v5054_v41, %v9281_v10 }
 0x675   : > { %v9308_v12 = vadd.f32 %v4552_v9, %v4506_v62  ;;  %v4520_v59 = vpop.permute.xlu0 %4519  ;;  %v5055_v62 = vmul.f32 %v5054_v41, %v9249_v26 }
 0x676   : > { %v4500_v15 = vpop.permute.xlu1 %4499  ;;  %v4531_v16 = vadd.f32 %v4520_v59, %v4453_v44  ;;  %v5057_v44 = vmul.f32 %v5054_v41, %v9260_v28  ;;  %v5080_v59 = vstv %s5859_s14  ;;  %s5852_s14 = sld [smem:[#allocation9 + $0x2d]] }
 0x677   : > { %v4508_v6 = vadd.f32 %v4500_v15, %v4430_v63  ;;  %4989 = vrot.lane.b32.xlu0 %v4979_v35, %s6272_s19  ;;  %v5056_v63 = vmul.f32 %v5054_v41, %v9262_v4 }
 0x678   : > { %4987 = vrot.lane.b32.xlu1 %v4978_v13, %s6272_s19  ;;  %v9321_v58 = vadd.f32 %v4561_v51, %v4531_v16  ;;  %v5081_v13 = vmul.f32 %v5080_v59, %v9249_v26  ;;  %v4730_v16 = vstv %s5842_s15  ;;  %s5873_s15 = sld [smem:[#allocation9 + $0x34]] }
 0x679   : > { %v9323_v32 = vadd.f32 %v4554_v31, %v4508_v6  ;;  %v4524_v11 = vpop.permute.xlu0 %4523  ;;  %v4733_v40 = vmul.f32 %v4730_v16, %v9126_v0 }
 0x67a   : > { %v4522_v22 = vpop.permute.xlu1 %4521  ;;  %v4533_v20 = vadd.f32 %v4524_v11, %v4455_v21  ;;  %v5083_v21 = vmul.f32 %v5080_v59, %v9260_v28 }
 0x67b   : > { %v4532_v24 = vadd.f32 %v4522_v22, %v4454_v57  ;;  %5011 = vrot.lane.b32.xlu0 %v5003_v1, %s6272_s19  ;;  %v5082_v57 = vmul.f32 %v5080_v59, %v9262_v4  ;;  %v9383_v22 = vld [vmem:[#allocation3 + $0x51] sm:$0xff]  ;;  %v5140_v1 = vstv %s5863_s17  ;;  %s5853_s17 = sld [smem:[#allocation9 + $0x48]] }
 0x67c   : > { %4991 = vrot.lane.b32.xlu1 %v4980_v46, %s6272_s19  ;;  %v9333_v5 = vadd.f32 %v4563_v49, %v4533_v20  ;;  %v4731_v46 = vmul.f32 %v4730_v16, %v9115_v37 }
 0x67d   : > { %v9335_v43 = vadd.f32 %v4562_v2, %v4532_v24  ;;  %v4580_v53 = vpop.permute.xlu0 %4579 }
 0x67e   : > { %v4526_v42 = vpop.permute.xlu1 %4525  ;;  %v4591_v6 = vadd.f32 %v4580_v53, %v9256_v54  ;;  %v5084_v53 = vmul.f32 %v5080_v59, %v9281_v10 }
 0x67f   : > { %v4534_v52 = vadd.f32 %v4526_v42, %v4456_v14  ;;  %5015 = vrot.lane.b32.xlu0 %v5005_v23, %s6272_s19  ;;  %v5141_v14 = vmul.f32 %v5140_v1, %v9383_v22 }
 0x680   : > { %5013 = vrot.lane.b32.xlu1 %v5004_v36, %s6272_s19  ;;  %v9394_v36 = vld [vmem:[#allocation3 + $0x61] sm:$0xff] }
 0x681   : > { %v9342_v48 = vadd.f32 %v4564_v30, %v4534_v52  ;;  %v4584_v39 = vpop.permute.xlu0 %4583  ;;  %v9396_v52 = vld [vmem:[#allocation3 + $0x59] sm:$0xff] }
 0x682   : > { %v4582_v61 = vpop.permute.xlu1 %4581  ;;  %v4593_v54 = vadd.f32 %v4584_v39, %v9272_v60  ;;  %v4732_v60 = vmul.f32 %v4730_v16, %v9128_v27  ;;  %v5142_v41 = vmul.f32 %v5140_v1, %v9396_v52 }
 0x683   : > { %5037 = vrot.lane.b32.xlu0 %v5029_v29, %s6273_s29  ;;  %v4592_v20 = vadd.f32 %v4582_v61, %v9274_v34  ;;  %v4740_v34 = vstv %s5843_s18  ;;  %s5874_s18 = sld [smem:[#allocation9 + $0x4f]] }
 0x684   : > { %5017 = vrot.lane.b32.xlu1 %v5006_v17, %s6272_s19 }
 0x685   : > { %v4606_v3 = vpop.permute.xlu0 %4605 }
 0x686   : > { %v4586_v56 = vpop.permute.xlu1 %4585  ;;  %v4617_v30 = vadd.f32 %v4606_v3, %v9291_v50  ;;  %v4741_v50 = vmul.f32 %v4740_v34, %v9115_v37 }
 0x687   : > { %5041 = vrot.lane.b32.xlu0 %v5031_v55, %s6273_s29  ;;  %v4594_v39 = vadd.f32 %v4586_v56, %v9293_v7  ;;  %v4734_v7 = vmul.f32 %v4730_v16, %v9147_v38 }
 0x688   : > { %5039 = vrot.lane.b32.xlu1 %v5030_v25, %s6273_s29  ;;  %v5143_v25 = vmul.f32 %v5140_v1, %v9394_v36 }
 0x689   : > { %v9352_v8 = vpop.permute.xlu0 %4609 }
 0x68a   : > { %v9354_v33 = vpop.permute.xlu1 %4607  ;;  %v4619_v3 = vadd.f32 %v9352_v8, %v9306_v45  ;;  %v4742_v45 = vmul.f32 %v4740_v34, %v9128_v27 }
 0x68b   : > { %5063 = vrot.lane.b32.xlu0 %v5055_v62, %s6273_s29  ;;  %v5166_v62 = vstv %s9381_s16  ;;  %v4618_v56 = vadd.f32 %v9354_v33, %v9308_v12  ;;  %v4750_v12 = vstv %s9402_s21  ;;  %s5875_s16 = sld [smem:[#allocation9 + $0x1a]]  ;;  %s5876_s21 = sld [smem:[#allocation9 + $0x35]] }
 0x68c   : > { %5043 = vrot.lane.b32.xlu1 %v5032_v47, %s6273_s29 }
 0x68d   : > { %v9360_v9 = vpop.permute.xlu0 %4631 }
 0x68e   : > { %v9362_v19 = vpop.permute.xlu1 %4611  ;;  %v4643_v8 = vadd.f32 %v9360_v9, %v9321_v58  ;;  %v4744_v58 = vmul.f32 %v4740_v34, %v9147_v38 }
 0x68f   : > { %5067 = vrot.lane.b32.xlu0 %v5057_v44, %s6273_s29  ;;  %v4620_v33 = vadd.f32 %v9362_v19, %v9323_v32 }
 0x690   : > { %5065 = vrot.lane.b32.xlu1 %v5056_v63, %s6273_s29  ;;  %v9415_v63 = vld [vmem:[#allocation3 + $0x69] sm:$0xff] }
 0x691   : > { %v9368_v15 = vpop.permute.xlu0 %4635  ;;  %v5144_v16 = vmul.f32 %v5140_v1, %v9415_v63 }
 0x692   : > { %v9370_v35 = vpop.permute.xlu1 %4633  ;;  %v4645_v32 = vadd.f32 %v9368_v15, %v9333_v5 }
 0x693   : > { %5089 = vrot.lane.b32.xlu0 %v5081_v13, %s6273_s29  ;;  %v4644_v9 = vadd.f32 %v9370_v35, %v9335_v43 }
 0x694   : > { %5069 = vrot.lane.b32.xlu1 %v5058_v18, %s6273_s29 }
 0x695   : > { %v4658_v51 = vpop.permute.xlu0 %4657 }
 0x696   : > { %v9377_v31 = vpop.permute.xlu1 %4637  ;;  %v4669_v11 = vadd.f32 %v4658_v51, %v4591_v6  ;;  %v5167_v51 = vmul.f32 %v5166_v62, %v9383_v22 }
 0x697   : > { %5093 = vrot.lane.b32.xlu0 %v5083_v21, %s6273_s29  ;;  %v4646_v5 = vadd.f32 %v9377_v31, %v9342_v48 }
 0x698   : > { %5091 = vrot.lane.b32.xlu1 %v5082_v57, %s6273_s29  ;;  %v9390_v24 = vadd.f32 %v4731_v46, %v4669_v11  ;;  %v4743_v11 = vmul.f32 %v4740_v34, %v9126_v0 }
 0x699   : > { %v4662_v49 = vpop.permute.xlu0 %4661 }
 0x69a   : > { %v4660_v2 = vpop.permute.xlu1 %4659  ;;  %v4671_v42 = vadd.f32 %v4662_v49, %v4593_v54  ;;  %v5169_v49 = vmul.f32 %v5166_v62, %v9394_v36 }
 0x69b   : > { %v4670_v23 = vadd.f32 %v4660_v2, %v4592_v20  ;;  %5149 = vrot.lane.b32.xlu0 %v5141_v14, %s6272_s19  ;;  %v5168_v2 = vmul.f32 %v5166_v62, %v9396_v52  ;;  %v5192_v14 = vstv %s9413_s22  ;;  %s5877_s22 = sld [smem:[#allocation9 + $0x50]] }
 0x69c   : > { %5095 = vrot.lane.b32.xlu1 %v5084_v53, %s6273_s29  ;;  %v9406_v61 = vadd.f32 %v4733_v40, %v4671_v42 }
 0x69d   : > { %v9408_v29 = vadd.f32 %v4732_v60, %v4670_v23  ;;  %v4684_v17 = vpop.permute.xlu0 %4683  ;;  %v4751_v23 = vmul.f32 %v4750_v12, %v9115_v37  ;;  %v5170_v37 = vmul.f32 %v5166_v62, %v9415_v63  ;;  %v5194_v62 = vmul.f32 %v5192_v14, %v9396_v52 }
 0x69e   : > { %v4664_v55 = vpop.permute.xlu1 %4663  ;;  %v4695_v47 = vadd.f32 %v4684_v17, %v4617_v30 }
 0x69f   : > { %v4672_v44 = vadd.f32 %v4664_v55, %v4594_v39  ;;  %5153 = vrot.lane.b32.xlu0 %v5143_v25, %s6272_s19  ;;  %v5193_v39 = vmul.f32 %v5192_v14, %v9383_v22  ;;  %v4753_v55 = vmul.f32 %v4750_v12, %v9126_v0  ;;  %v4752_v25 = vmul.f32 %v4750_v12, %v9128_v27 }
 0x6a0   : > { %5151 = vrot.lane.b32.xlu1 %v5142_v41, %s6272_s19  ;;  %v9425_v59 = vadd.f32 %v4741_v50, %v4695_v47  ;;  %v5195_v47 = vmul.f32 %v5192_v14, %v9394_v36  ;;  %v5218_v50 = vstv %s5866_s8  ;;  %v4754_v27 = vmul.f32 %v4750_v12, %v9147_v38  ;;  %s5861_s8 = sld [smem:[#allocation9 + $0x30]] }
 0x6a1   : > { %v9427_v13 = vadd.f32 %v4734_v7, %v4672_v44  ;;  %v4688_v18 = vpop.permute.xlu0 %4687  ;;  %v5222_v12 = vmul.f32 %v5218_v50, %v9415_v63 }
 0x6a2   : > { %v4686_v6 = vpop.permute.xlu1 %4685  ;;  %v4697_v21 = vadd.f32 %v4688_v18, %v4619_v3  ;;  %v5219_v3 = vmul.f32 %v5218_v50, %v9383_v22 }
 0x6a3   : > { %v4696_v57 = vadd.f32 %v4686_v6, %v4618_v56  ;;  %5175 = vrot.lane.b32.xlu0 %v5167_v51, %s6272_s19  ;;  %v5196_v56 = vmul.f32 %v5192_v14, %v9415_v63  ;;  %v5221_v51 = vmul.f32 %v5218_v50, %v9394_v36 }
 0x6a4   : > { %5155 = vrot.lane.b32.xlu1 %v5144_v16, %s6272_s19  ;;  %v9440_v46 = vadd.f32 %v4743_v11, %v4697_v21  ;;  %v5220_v16 = vmul.f32 %v5218_v50, %v9396_v52  ;;  %v5244_v11 = vstv %s5867_s13  ;;  %v4930_v50 = vstv %s5852_s14  ;;  %s5862_s13 = sld [smem:[#allocation9 + $0x4b]]  ;;  %s321_s14 = sand.u32 1, %s6255_s25  }
 0x6a5   : > { %v9442_v1 = vadd.f32 %v4742_v45, %v4696_v57  ;;  %v4710_v54 = vpop.permute.xlu0 %4709  ;;  %v5245_v45 = vmul.f32 %v5244_v11, %v9383_v22 }
 0x6a6   : > { %v4690_v20 = vpop.permute.xlu1 %4689  ;;  %v4721_v53 = vadd.f32 %v4710_v54, %v4643_v8  ;;  %v5247_v54 = vmul.f32 %v5244_v11, %v9394_v36 }
 0x6a7   : > { %v4698_v42 = vadd.f32 %v4690_v20, %v4620_v33  ;;  %5179 = vrot.lane.b32.xlu0 %v5169_v49, %s6272_s19  ;;  %v5246_v20 = vmul.f32 %v5244_v11, %v9396_v52 }
 0x6a8   : > { %5177 = vrot.lane.b32.xlu1 %v5168_v2, %s6272_s19  ;;  %v4755_v19 = vadd.f32 %v4751_v23, %v4721_v53 }
 0x6a9   : > { %v4748_v40 = vadd.f32 %v4744_v58, %v4698_v42  ;;  %v4714_v60 = vpop.permute.xlu0 %4713  ;;  %v5248_v42 = vmul.f32 %v5244_v11, %v9415_v63 }
 0x6aa   : > { %v4712_v30 = vpop.permute.xlu1 %4711  ;;  %v4723_v17 = vadd.f32 %v4714_v60, %v4645_v32  ;;  %v4920_v32 = vstv %s5851_s23  ;;  %s5871_s23 = sld [smem:[#allocation9 + $0x4e]] }
 0x6ab   : > { %v4722_v34 = vadd.f32 %v4712_v30, %v4644_v9  ;;  %5201 = vrot.lane.b32.xlu0 %v5193_v39, %s6272_s19 }
 0x6ac   : > { %5181 = vrot.lane.b32.xlu1 %v5170_v37, %s6272_s19  ;;  %v4757_v43 = vadd.f32 %v4753_v55, %v4723_v17  ;;  %v9515_v37 = vld [vmem:[#allocation3 + $0x52] sm:$0xff]  ;;  %v5330_v17 = vstv %s5872_s9  ;;  %s5485_s9 = sld [smem:[#allocation10]] }
 0x6ad   : > { %v4756_v15 = vadd.f32 %v4752_v25, %v4722_v34  ;;  %v4770_v35 = vpop.permute.xlu0 %4769  ;;  %v4921_v34 = vmul.f32 %v4920_v32, %v9249_v26 }
 0x6ae   : > { %v4716_v41 = vpop.permute.xlu1 %4715  ;;  %v4781_v44 = vadd.f32 %v4770_v35, %v9390_v24 }
 0x6af   : > { %v4724_v0 = vadd.f32 %v4716_v41, %v4646_v5  ;;  %5205 = vrot.lane.b32.xlu0 %v5195_v47, %s6272_s19  ;;  %v9524_v47 = vld [vmem:[#allocation3 + $0x62] sm:$0xff] }
 0x6b0   : > { %5203 = vrot.lane.b32.xlu1 %v5194_v62, %s6272_s19  ;;  %v9526_v62 = vld [vmem:[#allocation3 + $0x5a] sm:$0xff] }
 0x6b1   : > { %v4758_v48 = vadd.f32 %v4754_v27, %v4724_v0  ;;  %v4774_v31 = vpop.permute.xlu0 %4773  ;;  %v4922_v0 = vmul.f32 %v4920_v32, %v9262_v4 }
 0x6b2   : > { %v4772_v7 = vpop.permute.xlu1 %4771  ;;  %v4783_v18 = vadd.f32 %v4774_v31, %v9406_v61 }
 0x6b3   : > { %v4782_v24 = vadd.f32 %v4772_v7, %v9408_v29  ;;  %5227 = vrot.lane.b32.xlu0 %v5219_v3, %s6273_s29  ;;  %v5333_v3 = vmul.f32 %v5330_v17, %v9524_v47 }
 0x6b4   : > { %5207 = vrot.lane.b32.xlu1 %v5196_v56, %s6272_s19  ;;  %v5332_v56 = vmul.f32 %v5330_v17, %v9526_v62 }
 0x6b5   : > { %v4796_v38 = vpop.permute.xlu0 %4795 }
 0x6b6   : > { %v4776_v6 = vpop.permute.xlu1 %4775  ;;  %v9478_v21 = vadd.f32 %v4796_v38, %v9425_v59 }
 0x6b7   : > { %v9481_v57 = vadd.f32 %v4776_v6, %v9427_v13  ;;  %5231 = vrot.lane.b32.xlu0 %v5221_v51, %s6273_s29  ;;  %v9540_v6 = vld [vmem:[#allocation3 + $0x6a] sm:$0xff]  ;;  %v4931_v51 = vmul.f32 %v4930_v50, %v9249_v26 }
 0x6b8   : > { %5229 = vrot.lane.b32.xlu1 %v5220_v16, %s6273_s29  ;;  %v4924_v16 = vmul.f32 %v4920_v32, %v9281_v10 }
 0x6b9   : > { %v4800_v61 = vpop.permute.xlu0 %4799 }
 0x6ba   : > { %v4798_v29 = vpop.permute.xlu1 %4797  ;;  %v9488_v8 = vadd.f32 %v4800_v61, %v9440_v46  ;;  %v5270_v46 = vstv %s5868_s20  ;;  %s5870_s20 = sld [smem:[#allocation9 + $0x33]] }
 0x6bb   : > { %v9491_v59 = vadd.f32 %v4798_v29, %v9442_v1  ;;  %5253 = vrot.lane.b32.xlu0 %v5245_v45, %s6273_s29  ;;  %v5271_v53 = vmul.f32 %v5270_v46, %v9383_v22  ;;  %v5272_v60 = vmul.f32 %v5270_v46, %v9396_v52 }
 0x6bc   : > { %5233 = vrot.lane.b32.xlu1 %v5222_v12, %s6273_s29 }
 0x6bd   : > { %v4822_v13 = vpop.permute.xlu0 %4821 }
 0x6be   : > { %v4802_v33 = vpop.permute.xlu1 %4801  ;;  %v9497_v49 = vadd.f32 %v4822_v13, %v4755_v19 }
 0x6bf   : > { %v9499_v2 = vadd.f32 %v4802_v33, %v4748_v40  ;;  %5257 = vrot.lane.b32.xlu0 %v5247_v54, %s6273_s29  ;;  %v5273_v40 = vmul.f32 %v5270_v46, %v9394_v36  ;;  %v4933_v33 = vmul.f32 %v4930_v50, %v9260_v28  ;;  %v4932_v54 = vmul.f32 %v4930_v50, %v9262_v4 }
 0x6c0   : > { %5255 = vrot.lane.b32.xlu1 %v5246_v20, %s6273_s29  ;;  %v4940_v20 = vstv %s5853_s17  ;;  %s5878_s17 = sld [smem:[#allocation10 + $0x1]] }
 0x6c1   : > { %v4826_v1 = vpop.permute.xlu0 %4825 }
 0x6c2   : > { %v4824_v14 = vpop.permute.xlu1 %4823  ;;  %v9505_v23 = vadd.f32 %v4826_v1, %v4757_v43  ;;  %v5331_v43 = vmul.f32 %v5330_v17, %v9515_v37 }
 0x6c3   : > { %v9507_v58 = vadd.f32 %v4824_v14, %v4756_v15  ;;  %5279 = vrot.lane.b32.xlu0 %v5271_v53, %s6273_s29  ;;  %v5274_v15 = vmul.f32 %v5270_v46, %v9415_v63 }
 0x6c4   : > { %5259 = vrot.lane.b32.xlu1 %v5248_v42, %s6273_s29 }
 0x6c5   : > { %v4848_v9 = vpop.permute.xlu0 %4847 }
 0x6c6   : > { %v4828_v19 = vpop.permute.xlu1 %4827  ;;  %v4859_v30 = vadd.f32 %v4848_v9, %v4781_v44  ;;  %v4923_v44 = vmul.f32 %v4920_v32, %v9260_v28 }
 0x6c7   : > { %v9513_v39 = vadd.f32 %v4828_v19, %v4758_v48  ;;  %5283 = vrot.lane.b32.xlu0 %v5273_v40, %s6273_s29  ;;  %v4941_v19 = vmul.f32 %v4940_v20, %v9249_v26  ;;  %v4934_v40 = vmul.f32 %v4930_v50, %v9281_v10  ;;  %v4943_v26 = vmul.f32 %v4940_v20, %v9260_v28 }
 0x6c8   : > { %5281 = vrot.lane.b32.xlu1 %v5272_v60, %s6273_s29  ;;  %v9520_v55 = vadd.f32 %v4921_v34, %v4859_v30  ;;  %v4944_v28 = vmul.f32 %v4940_v20, %v9281_v10 }
 0x6c9   : > { %v4852_v25 = vpop.permute.xlu0 %4851 }
 0x6ca   : > { %v4850_v5 = vpop.permute.xlu1 %4849  ;;  %v4861_v35 = vadd.f32 %v4852_v25, %v4783_v18  ;;  %v5356_v18 = vstv %s5873_s15  ;;  %s6040_s15 = smul.u32 96, %s321_s14 }
 0x6cb   : > { %v4860_v41 = vadd.f32 %v4850_v5, %v4782_v24  ;;  %5339 = vrot.lane.b32.xlu0 %v5331_v43, %s6272_s19  ;;  %v5359_v42 = vmul.f32 %v5356_v18, %v9524_v47  ;;  %v5358_v32 = vmul.f32 %v5356_v18, %v9526_v62  ;;  %v5360_v5 = vmul.f32 %v5356_v18, %v9540_v6 }
 0x6cc   : > { %5285 = vrot.lane.b32.xlu1 %v5274_v15, %s6273_s29  ;;  %v9532_v27 = vadd.f32 %v4923_v44, %v4861_v35  ;;  %v4942_v43 = vmul.f32 %v4940_v20, %v9262_v4 }
 0x6cd   : > { %v9534_v48 = vadd.f32 %v4922_v0, %v4860_v41  ;;  %v4874_v31 = vpop.permute.xlu0 %4873 }
 0x6ce   : > { %v4854_v7 = vpop.permute.xlu1 %4853  ;;  %v4885_v24 = vadd.f32 %v4874_v31, %v9478_v21  ;;  %v5357_v21 = vmul.f32 %v5356_v18, %v9515_v37  ;;  %v5408_v31 = vstv %s5875_s16  ;;  %s5883_s16 = sld [smem:[#allocation10 + $0x2]] }
 0x6cf   : > { %v4862_v38 = vadd.f32 %v4854_v7, %v9481_v57  ;;  %5343 = vrot.lane.b32.xlu0 %v5333_v3, %s6272_s19  ;;  %v5334_v57 = vmul.f32 %v5330_v17, %v9540_v6 }
 0x6d0   : > { %5341 = vrot.lane.b32.xlu1 %v5332_v56, %s6272_s19  ;;  %v9546_v11 = vadd.f32 %v4931_v51, %v4885_v24  ;;  %v5409_v56 = vmul.f32 %v5408_v31, %v9515_v37  ;;  %v5410_v51 = vmul.f32 %v5408_v31, %v9526_v62 }
 0x6d1   : > { %v9548_v61 = vadd.f32 %v4924_v16, %v4862_v38  ;;  %v4878_v29 = vpop.permute.xlu0 %4877  ;;  %v5411_v38 = vmul.f32 %v5408_v31, %v9524_v47 }
 0x6d2   : > { %v4876_v45 = vpop.permute.xlu1 %4875  ;;  %v4887_v12 = vadd.f32 %v4878_v29, %v9488_v8  ;;  %v5382_v8 = vstv %s5874_s18  ;;  %s9654_s18 = scalar_lea.vmem [#allocation12], %s6040_s15 }
 0x6d3   : > { %v4886_v13 = vadd.f32 %v4876_v45, %v9491_v59  ;;  %5365 = vrot.lane.b32.xlu0 %v5357_v21, %s6272_s19  ;;  %v5383_v25 = vmul.f32 %v5382_v8, %v9515_v37  ;;  %v5385_v0 = vmul.f32 %v5382_v8, %v9524_v47  ;;  %v5384_v50 = vmul.f32 %v5382_v8, %v9526_v62 }
 0x6d4   : > { %5345 = vrot.lane.b32.xlu1 %v5334_v57, %s6272_s19  ;;  %v4937_v46 = vadd.f32 %v4933_v33, %v4887_v12  ;;  %v5386_v18 = vmul.f32 %v5382_v8, %v9540_v6  ;;  %v5434_v45 = vstv %s5876_s21  ;;  %v5412_v57 = vmul.f32 %v5408_v31, %v9540_v6  ;;  %s6041_s21 = smul.u32 1536, %s6338_s28  ;;  %s9699_s28 = scalar_lea.sflag [#allocation5], %s321_s14 }
 0x6d5   : > { %v4936_v1 = vadd.f32 %v4932_v54, %v4886_v13  ;;  %v4900_v14 = vpop.permute.xlu0 %4899  ;;  %v5435_v21 = vmul.f32 %v5434_v45, %v9515_v37  ;;  %v5437_v33 = vmul.f32 %v5434_v45, %v9524_v47  ;;  %v5436_v54 = vmul.f32 %v5434_v45, %v9526_v62 }
 0x6d6   : > { %v4880_v53 = vpop.permute.xlu1 %4879  ;;  %v4911_v59 = vadd.f32 %v4900_v14, %v9497_v49 }
 0x6d7   : > { %v4888_v9 = vadd.f32 %v4880_v53, %v9499_v2  ;;  %5369 = vrot.lane.b32.xlu0 %v5359_v42, %s6272_s19  ;;  %v5460_v53 = vstv %s5877_s22  ;;  %s5544_s22 = sshll.u32 %s9654_s18, 4  ;;  %s9688_s22 = int_to_ptr.vmem [resolvable:$true] %s5544_s22 }
 0x6d8   : > { %5367 = vrot.lane.b32.xlu1 %v5358_v32, %s6272_s19  ;;  %v4945_v60 = vadd.f32 %v4941_v19, %v4911_v59  ;;  %v5461_v42 = vmul.f32 %v5460_v53, %v9515_v37  ;;  %v5438_v32 = vmul.f32 %v5434_v45, %v9540_v6 }
 0x6d9   : > { %v4938_v30 = vadd.f32 %v4934_v40, %v4888_v9  ;;  %v4904_v17 = vpop.permute.xlu0 %4903 }
 0x6da   : > { %v4902_v34 = vpop.permute.xlu1 %4901  ;;  %v4913_v49 = vadd.f32 %v4904_v17, %v9505_v23 }
 0x6db   : > { %v4912_v2 = vadd.f32 %v4902_v34, %v9507_v58  ;;  %5391 = vrot.lane.b32.xlu0 %v5383_v25, %s6272_s19 }
 0x6dc   : > { %5371 = vrot.lane.b32.xlu1 %v5360_v5, %s6272_s19  ;;  %v4947_v15 = vadd.f32 %v4943_v26, %v4913_v49  ;;  %v5464_v26 = vmul.f32 %v5460_v53, %v9540_v6 }
 0x6dd   : > { %v4946_v35 = vadd.f32 %v4942_v43, %v4912_v2  ;;  %v4960_v41 = vpop.permute.xlu0 %4959 }
 0x6de   : > { %v4906_v44 = vpop.permute.xlu1 %4905  ;;  %v4971_v23 = vadd.f32 %v4960_v41, %v9520_v55 }
 0x6df   : > { %v4914_v58 = vadd.f32 %v4906_v44, %v9513_v39  ;;  %5395 = vrot.lane.b32.xlu0 %v5385_v0, %s6272_s19  ;;  %v5120_v44 = vstv %s5861_s8 }
 0x6e0   : > { %5393 = vrot.lane.b32.xlu1 %v5384_v50, %s6272_s19 }
 0x6e1   : > { %v4948_v4 = vadd.f32 %v4944_v28, %v4914_v58  ;;  %v4964_v7 = vpop.permute.xlu0 %4963 }
 0x6e2   : > { %v4962_v3 = vpop.permute.xlu1 %4961  ;;  %v4973_v24 = vadd.f32 %v4964_v7, %v9532_v27 }
 0x6e3   : > { %v4972_v55 = vadd.f32 %v4962_v3, %v9534_v48  ;;  %5417 = vrot.lane.b32.xlu0 %v5409_v56, %s6273_s29 }
 0x6e4   : > { %5397 = vrot.lane.b32.xlu1 %v5386_v18, %s6272_s19  ;;  %s5860_s19 = sld [smem:[#allocation9 + $0x15]] }
 0x6e5   : > { %v4986_v10 = vpop.permute.xlu0 %4985 }
 0x6e6   : > { %v4966_v39 = vpop.permute.xlu1 %4965  ;;  %v4997_v16 = vadd.f32 %v4986_v10, %v9546_v11 }
 0x6e7   : > { %v4974_v29 = vadd.f32 %v4966_v39, %v9548_v61  ;;  %5421 = vrot.lane.b32.xlu0 %v5411_v38, %s6273_s29  ;;  %v5123_v39 = vmul.f32 %v5120_v44, %v9394_v36  ;;  %v5122_v38 = vmul.f32 %v5120_v44, %v9396_v52 }
 0x6e8   : > { %5419 = vrot.lane.b32.xlu1 %v5410_v51, %s6273_s29  ;;  %v5130_v51 = vstv %s5862_s13  ;;  %s9693_s13 = scalar_lea.hbm %s9747_s7, %s6041_s21 }
 0x6e9   : > { %v4990_v27 = vpop.permute.xlu0 %4989 }
 0x6ea   : > { %v4988_v48 = vpop.permute.xlu1 %4987  ;;  %v4999_v12 = vadd.f32 %v4990_v27, %v4937_v46  ;;  %v5110_v9 = vstv %s5860_s19 }
 0x6eb   : > { %v4998_v13 = vadd.f32 %v4988_v48, %v4936_v1  ;;  %5443 = vrot.lane.b32.xlu0 %v5435_v21, %s6273_s29  ;;  %v5111_v25 = vmul.f32 %v5110_v9, %v9383_v22  ;;  %v5112_v41 = vmul.f32 %v5110_v9, %v9396_v52  ;;  %v5114_v7 = vmul.f32 %v5110_v9, %v9415_v63 }
 0x6ec   : > { %5423 = vrot.lane.b32.xlu1 %v5412_v57, %s6273_s29  ;;  %v5131_v57 = vmul.f32 %v5130_v51, %v9383_v22 }
 0x6ed   : > { %v5012_v11 = vpop.permute.xlu0 %5011 }
 0x6ee   : > { %v4992_v61 = vpop.permute.xlu1 %4991  ;;  %v5023_v20 = vadd.f32 %v5012_v11, %v4945_v60  ;;  %v5463_v60 = vmul.f32 %v5460_v53, %v9524_v47  ;;  %v5124_v11 = vmul.f32 %v5120_v44, %v9415_v63 }
 0x6ef   : > { %v5000_v14 = vadd.f32 %v4992_v61, %v4938_v30  ;;  %5447 = vrot.lane.b32.xlu0 %v5437_v33, %s6273_s29  ;;  %v5462_v30 = vmul.f32 %v5460_v53, %v9526_v62 }
 0x6f0   : > { %5445 = vrot.lane.b32.xlu1 %v5436_v54, %s6273_s29 }
 0x6f1   : > { %v5016_v46 = vpop.permute.xlu0 %5015 }
 0x6f2   : > { %v5014_v1 = vpop.permute.xlu1 %5013  ;;  %v5025_v8 = vadd.f32 %v5016_v46, %v4947_v15  ;;  %v5133_v46 = vmul.f32 %v5130_v51, %v9394_v36 }
 0x6f3   : > { %v5024_v59 = vadd.f32 %v5014_v1, %v4946_v35  ;;  %5469 = vrot.lane.b32.xlu0 %v5461_v42, %s6273_s29  ;;  %v5113_v35 = vmul.f32 %v5110_v9, %v9394_v36  ;;  %v5132_v1 = vmul.f32 %v5130_v51, %v9396_v52 }
 0x6f4   : > { %5449 = vrot.lane.b32.xlu1 %v5438_v32, %s6273_s29 }
 0x6f5   : > { %v5038_v19 = vpop.permute.xlu0 %5037 }
 0x6f6   : > { %v5018_v40 = vpop.permute.xlu1 %5017  ;;  %v5049_v17 = vadd.f32 %v5038_v19, %v4971_v23 }
 0x6f7   : > { %v5026_v34 = vadd.f32 %v5018_v40, %v4948_v4  ;;  %5473 = vrot.lane.b32.xlu0 %v5463_v60, %s6273_s29  ;;  %v5121_v4 = vmul.f32 %v5120_v44, %v9383_v22  ;;  %v5134_v22 = vmul.f32 %v5130_v51, %v9415_v63 }
 0x6f8   : > { %5471 = vrot.lane.b32.xlu1 %v5462_v30, %s6273_s29  ;;  %v5115_v5 = vadd.f32 %v5111_v25, %v5049_v17 }
 0x6f9   : > { %v5042_v49 = vpop.permute.xlu0 %5041 }
 0x6fa   : > { %v5040_v2 = vpop.permute.xlu1 %5039  ;;  %v5051_v43 = vadd.f32 %v5042_v49, %v4973_v24 }
 0x6fb   : > { %v5050_v15 = vadd.f32 %v5040_v2, %v4972_v55 }
 0x6fc   : > { %5475 = vrot.lane.b32.xlu1 %v5464_v26, %s6273_s29  ;;  %v5117_v0 = vadd.f32 %v5113_v35, %v5051_v43  ;;  %s5869_s29 = sld [smem:[#allocation9 + $0x18]] }
 0x6fd   : > { %v5116_v50 = vadd.f32 %v5112_v41, %v5050_v15  ;;  %v5064_v23 = vpop.permute.xlu0 %5063 }
 0x6fe   : > { %v5044_v58 = vpop.permute.xlu1 %5043  ;;  %v5075_v31 = vadd.f32 %v5064_v23, %v4997_v16 }
 0x6ff   : > { %v5052_v28 = vadd.f32 %v5044_v58, %v4974_v29 }
 0x700   : > { %v5125_v3 = vadd.f32 %v5121_v4, %v5075_v31 }
 0x701   : > { %v5118_v56 = vadd.f32 %v5114_v7, %v5052_v28  ;;  %v5068_v18 = vpop.permute.xlu0 %5067 }
 0x702   : > { %v5066_v24 = vpop.permute.xlu1 %5065  ;;  %v5077_v55 = vadd.f32 %v5068_v18, %v4999_v12  ;;  %v5300_v58 = vstv %s5869_s29  ;;  %s6189_s29 = scalar_lea.vmem %s9688_s22, 1536 }
 0x703   : > { %v5076_v10 = vadd.f32 %v5066_v24, %v4998_v13  ;;  %v5301_v4 = vmul.f32 %v5300_v58, %v9515_v37  ;;  %p6190_p8 = scmp.ne.s32.totalorder %s9688_s22, %s6189_s29 }
 0x704   : > { %v5127_v45 = vadd.f32 %v5123_v39, %v5077_v55  ;;  %v5303_v55 = vmul.f32 %v5300_v58, %v9524_v47  ;;  %v5310_v39 = vstv %s5870_s20  ;;  %s6274_s20 = smov [#allocation12]  }
 0x705   : > { %v5126_v27 = vadd.f32 %v5122_v38, %v5076_v10  ;;  %v5090_v48 = vpop.permute.xlu0 %5089  ;;  %v5302_v10 = vmul.f32 %v5300_v58, %v9526_v62  ;;  %p6191_p13 = pnand %p6190_p8, %p9879_p11 }
 0x706   : > { %v5070_v16 = vpop.permute.xlu1 %5069  ;;  %v5101_v29 = vadd.f32 %v5090_v48, %v5023_v20 }
 0x707   : > { %v5078_v21 = vadd.f32 %v5070_v16, %v5000_v14  ;;  %p6192_p1 = pneg %p6191_p13 }
 0x708   : > { %v5135_v61 = vadd.f32 %v5131_v57, %v5101_v29  ;;  %v5311_v29 = vmul.f32 %v5310_v39, %v9515_v37 }
 0x709   : > { %v5128_v33 = vadd.f32 %v5124_v11, %v5078_v21  ;;  %v5094_v54 = vpop.permute.xlu0 %5093  ;;  %v5304_v21 = vmul.f32 %v5300_v58, %v9540_v6 }
 0x70a   : > { %v5092_v12 = vpop.permute.xlu1 %5091  ;;  %v5103_v13 = vadd.f32 %v5094_v54, %v5025_v8 }
 0x70b   : > { %v5102_v53 = vadd.f32 %v5092_v12, %v5024_v59 }
 0x70c   : > { %v5137_v42 = vadd.f32 %v5133_v46, %v5103_v13  ;;  %v5313_v13 = vmul.f32 %v5310_v39, %v9524_v47  ;;  %v5320_v46 = vstv %s5871_s23  ;;  %s6193_s23 = sshll.u32 %s6274_s20, 4  ;;  %s6194_s23 = int_to_ptr.vmem [resolvable:$false] %s6193_s23 }
 0x70d   : > { %v5136_v32 = vadd.f32 %v5132_v1, %v5102_v53  ;;  %v5150_v9 = vpop.permute.xlu0 %5149  ;;  %v5312_v53 = vmul.f32 %v5310_v39, %v9526_v62  ;;  %p6196_p2 = scmp.lt.s32.totalorder %s9688_s22, %s6194_s23 }
 0x70e   : > { %v5096_v19 = vpop.permute.xlu1 %5095  ;;  %v5161_v20 = vadd.f32 %v5150_v9, %v5115_v5 }
 0x70f   : > { %v5104_v14 = vadd.f32 %v5096_v19, %v5026_v34 }
 0x711   : > { %v5138_v40 = vadd.f32 %v5134_v22, %v5104_v14  ;;  %v5154_v60 = vpop.permute.xlu0 %5153  ;;  %v5321_v14 = vmul.f32 %v5320_v46, %v9515_v37  ;;  %v5314_v22 = vmul.f32 %v5310_v39, %v9540_v6 }
 0x712   : > { %v5152_v30 = vpop.permute.xlu1 %5151  ;;  %v5163_v17 = vadd.f32 %v5154_v60, %v5117_v0 }
 0x713   : > { %v5162_v25 = vadd.f32 %v5152_v30, %v5116_v50 }
 0x715   : > { %v5176_v49 = vpop.permute.xlu0 %5175 }
 0x716   : > { %v5156_v8 = vpop.permute.xlu1 %5155  ;;  %v5187_v59 = vadd.f32 %v5176_v49, %v5125_v3 }
 0x717   : > { %v5164_v2 = vadd.f32 %v5156_v8, %v5118_v56  ;;  %v5323_v8 = vmul.f32 %v5320_v46, %v9524_v47 }
 0x719   : > { %v5180_v36 = vpop.permute.xlu0 %5179 }
 0x71a   : > { %v5178_v26 = vpop.permute.xlu1 %5177  ;;  %v5189_v52 = vadd.f32 %v5180_v36, %v5127_v45 }
 0x71b   : > { %v5188_v43 = vadd.f32 %v5178_v26, %v5126_v27 }
 0x71d   : > { %v5202_v15 = vpop.permute.xlu0 %5201 }
 0x71e   : > { %v5182_v35 = vpop.permute.xlu1 %5181  ;;  %v5213_v5 = vadd.f32 %v5202_v15, %v5135_v61 }
 0x71f   : > { %v5190_v34 = vadd.f32 %v5182_v35, %v5128_v33 }
 0x721   : > { %v5206_v41 = vpop.permute.xlu0 %5205 }
 0x722   : > { %v5204_v63 = vpop.permute.xlu1 %5203  ;;  %v5215_v44 = vadd.f32 %v5206_v41, %v5137_v42 }
 0x723   : > { %v5214_v23 = vadd.f32 %v5204_v63, %v5136_v32 }
 0x725   : > { %v5228_v0 = vpop.permute.xlu0 %5227 }
 0x726   : > { %v5208_v50 = vpop.permute.xlu1 %5207  ;;  %v5239_v31 = vadd.f32 %v5228_v0, %v5161_v20 }
 0x727   : > { %v5216_v28 = vadd.f32 %v5208_v50, %v5138_v40  ;;  %v5486_v50 = vstv %s5485_s9  ;;  %s6195_s9 = scalar_lea.vmem %s6194_s23, 3072 }
 0x728   : > { %v5305_v7 = vadd.f32 %v5301_v4, %v5239_v31  ;;  %p6197_p3 = scmp.lt.s32.totalorder %s6195_s9, %s6189_s29 }
 0x729   : > { %v5232_v3 = vpop.permute.xlu0 %5231 }
 0x72a   : > { %v5230_v56 = vpop.permute.xlu1 %5229  ;;  %v5241_v18 = vadd.f32 %v5232_v3, %v5163_v17  ;;  %p6198_p4 = por %p6197_p3, %p6196_p2 }
 0x72b   : > { %v5240_v24 = vadd.f32 %v5230_v56, %v5162_v25 }
 0x72c   : > { %v5307_v38 = vadd.f32 %v5303_v55, %v5241_v18  ;;  %p6199_p9 = pnand %p6198_p4, %p6192_p1 }
 0x72d   : > { %v5306_v51 = vadd.f32 %v5302_v10, %v5240_v24  ;;  %v5254_v45 = vpop.permute.xlu0 %5253 }
 0x72e   : > { %v5234_v27 = vpop.permute.xlu1 %5233  ;;  %v5265_v48 = vadd.f32 %v5254_v45, %v5187_v59  ;;  %v5322_v59 = vmul.f32 %v5320_v46, %v9526_v62 }
 0x72f   : > { %v5242_v16 = vadd.f32 %v5234_v27, %v5164_v2 }
 0x730   : > { %v5315_v57 = vadd.f32 %v5311_v29, %v5265_v48 }
 0x731   : > { %v5308_v11 = vadd.f32 %v5304_v21, %v5242_v16  ;;  %v5258_v61 = vpop.permute.xlu0 %5257 }
 0x732   : > { %v5256_v33 = vpop.permute.xlu1 %5255  ;;  %v5267_v54 = vadd.f32 %v5258_v61, %v5189_v52 }
 0x733   : > { %v5266_v12 = vadd.f32 %v5256_v33, %v5188_v43  ;;  %v5324_v43 = vmul.f32 %v5320_v46, %v9540_v6 }
 0x734   : > { %v9630_v1 = vadd.f32 %v5313_v13, %v5267_v54 }
 0x735   : > { %v9632_v42 = vadd.f32 %v5312_v53, %v5266_v12  ;;  %v5280_v32 = vpop.permute.xlu0 %5279 }
 0x736   : > { %v5260_v9 = vpop.permute.xlu1 %5259  ;;  %v5291_v19 = vadd.f32 %v5280_v32, %v5213_v5 }
 0x737   : > { %v5268_v20 = vadd.f32 %v5260_v9, %v5190_v34 }
 0x738   : > { %v9636_v40 = vadd.f32 %v5321_v14, %v5291_v19 }
 0x739   : > { %v9638_v60 = vadd.f32 %v5314_v22, %v5268_v20  ;;  %v5284_v30 = vpop.permute.xlu0 %5283  ;;  %v5516_v22 = vstv %s5883_s16 }
 0x73a   : > { %v5282_v17 = vpop.permute.xlu1 %5281  ;;  %v5293_v25 = vadd.f32 %v5284_v30, %v5215_v44 }
 0x73b   : > { %v5292_v49 = vadd.f32 %v5282_v17, %v5214_v23 }
 0x73c   : > { %v9642_v2 = vadd.f32 %v5323_v8, %v5293_v25 }
 0x73d   : > { %v9644_v36 = vadd.f32 %v5322_v59, %v5292_v49  ;;  %v5340_v26 = vpop.permute.xlu0 %5339 }
 0x73e   : > { %v5286_v37 = vpop.permute.xlu1 %5285  ;;  %v5351_v0 = vadd.f32 %v5340_v26, %v5305_v7 }
 0x73f   : > { %v5294_v52 = vadd.f32 %v5286_v37, %v5216_v28 }
 0x741   : > { %v9647_v15 = vadd.f32 %v5324_v43, %v5294_v52  ;;  %v5344_v35 = vpop.permute.xlu0 %5343 }
 0x742   : > { %v5342_v5 = vpop.permute.xlu1 %5341  ;;  %v5353_v4 = vadd.f32 %v5344_v35, %v5307_v38  ;;  %v5501_v38 = vstv %s5878_s17 }
 0x743   : > { %v5352_v3 = vadd.f32 %v5342_v5, %v5306_v51 }
 0x745   : > { %v5366_v34 = vpop.permute.xlu0 %5365 }
 0x746   : > { %v5346_v41 = vpop.permute.xlu1 %5345  ;;  %v5377_v45 = vadd.f32 %v5366_v34, %v5315_v57 }
 0x747   : > { %v5354_v27 = vadd.f32 %v5346_v41, %v5308_v11 }
 0x749   : > { %v5370_v47 = vpop.permute.xlu0 %5369 }
 0x74a   : > { %v5368_v63 = vpop.permute.xlu1 %5367  ;;  %v5379_v57 = vadd.f32 %v5370_v47, %v9630_v1 }
 0x74b   : > { %v5378_v11 = vadd.f32 %v5368_v63, %v9632_v42 }
 0x74d   : > { %v5392_v62 = vpop.permute.xlu0 %5391 }
 0x74e   : > { %v5372_v44 = vpop.permute.xlu1 %5371  ;;  %v5403_v20 = vadd.f32 %v5392_v62, %v9636_v40 }
 0x74f   : > { %v5380_v1 = vadd.f32 %v5372_v44, %v9638_v60 }
 0x751   : > { %v5396_v23 = vpop.permute.xlu0 %5395 }
 0x752   : > { %v5394_v58 = vpop.permute.xlu1 %5393  ;;  %v5405_v40 = vadd.f32 %v5396_v23, %v9642_v2 }
 0x753   : > { %v5404_v26 = vadd.f32 %v5394_v58, %v9644_v36 }
 0x755   : > { %v5418_v31 = vpop.permute.xlu0 %5417 }
 0x756   : > { %v9652_v6 = vpop.permute.xlu1 %5397  ;;  %v5429_v28 = vadd.f32 %v5418_v31, %v5351_v0 }
 0x757   : > { %v5406_v2 = vadd.f32 %v9652_v6, %v9647_v15 }
 0x758   : > { %v5487_v56 = vadd.f32 %v5486_v50, %v5429_v28 }
 0x759   : > { %v5422_v18 = vpop.permute.xlu0 %5421 }
 0x75a   : > { %v5420_v24 = vpop.permute.xlu1 %5419  ;;  %v5491_v55 = vmax.f32 %v5487_v56, 0.0  ;;  %v5431_v10 = vadd.f32 %v5422_v18, %v5353_v4 }
 0x75b   : > { %v5430_v39 = vadd.f32 %v5420_v24, %v5352_v3 }
 0x75c   : > { %5496 = vst.msk [vmem:[%s9654_s18] sm:$0xff] %vm5495_vm15, %v5491_v55  ;;  %v5489_v7 = vadd.f32 %v5486_v50, %v5431_v10 }
 0x75d   : > { %v5488_v48 = vadd.f32 %v5486_v50, %v5430_v39  ;;  %v5444_v51 = vpop.permute.xlu0 %5443 }
 0x75e   : > { %v5424_v16 = vpop.permute.xlu1 %5423  ;;  %v5493_v29 = vmax.f32 %v5489_v7, 0.0  ;;  %v5455_v61 = vadd.f32 %v5444_v51, %v5377_v45 }
 0x75f   : > { %v5492_v21 = vmax.f32 %v5488_v48, 0.0  ;;  %v5432_v33 = vadd.f32 %v5424_v16, %v5354_v27 }
 0x760   : > { %5498 = vst.msk [vmem:[%s9654_s18 + $0x10] sm:$0xff] %vm5495_vm15, %v5493_v29  ;;  %v5502_v54 = vadd.f32 %v5501_v38, %v5455_v61 }
 0x761   : > { %5497 = vst.msk [vmem:[%s9654_s18 + $0x8] sm:$0xff] %vm5495_vm15, %v5492_v21  ;;  %v5490_v12 = vadd.f32 %v5486_v50, %v5432_v33  ;;  %v5448_v13 = vpop.permute.xlu0 %5447 }
 0x762   : > { %v5446_v53 = vpop.permute.xlu1 %5445  ;;  %v5506_v46 = vmax.f32 %v5502_v54, 0.0  ;;  %v5457_v9 = vadd.f32 %v5448_v13, %v5379_v57 }
 0x763   : > { %v5494_v32 = vmax.f32 %v5490_v12, 0.0  ;;  %v5456_v19 = vadd.f32 %v5446_v53, %v5378_v11 }
 0x764   : > { %5879 = vst.msk [vmem:[%s9654_s18 + $0x20] sm:$0xff] %vm5495_vm15, %v5506_v46  ;;  %v5504_v42 = vadd.f32 %v5501_v38, %v5457_v9 }
 0x765   : > { %5499 = vst.msk [vmem:[%s9654_s18 + $0x18] sm:$0xff] %vm5495_vm15, %v5494_v32  ;;  %v5503_v14 = vadd.f32 %v5501_v38, %v5456_v19  ;;  %v5470_v30 = vpop.permute.xlu0 %5469 }
 0x766   : > { %v5450_v17 = vpop.permute.xlu1 %5449  ;;  %v5508_v25 = vmax.f32 %v5504_v42, 0.0  ;;  %v5481_v8 = vadd.f32 %v5470_v30, %v5403_v20 }
 0x767   : > { %v5507_v49 = vmax.f32 %v5503_v14, 0.0  ;;  %v5458_v59 = vadd.f32 %v5450_v17, %v5380_v1 }
 0x768   : > { %5881 = vst.msk [vmem:[%s9654_s18 + $0x30] sm:$0xff] %vm5495_vm15, %v5508_v25  ;;  %v5517_v60 = vadd.f32 %v5516_v22, %v5481_v8 }
 0x769   : > { %5880 = vst.msk [vmem:[%s9654_s18 + $0x28] sm:$0xff] %vm5495_vm15, %v5507_v49  ;;  %v5505_v37 = vadd.f32 %v5501_v38, %v5458_v59  ;;  %v5474_v52 = vpop.permute.xlu0 %5473 }
 0x76a   : > { %v5472_v43 = vpop.permute.xlu1 %5471  ;;  %v5521_v35 = vmax.f32 %v5517_v60, 0.0  ;;  %v5483_v34 = vadd.f32 %v5474_v52, %v5405_v40 }
 0x76b   : > { %v5509_v5 = vmax.f32 %v5505_v37, 0.0  ;;  %v5482_v41 = vadd.f32 %v5472_v43, %v5404_v26 }
 0x76c   : > { %5884 = vst.msk [vmem:[%s9654_s18 + $0x40] sm:$0xff] %vm5495_vm15, %v5521_v35  ;;  %v5519_v36 = vadd.f32 %v5516_v22, %v5483_v34 }
 0x76d   : > { %5882 = vst.msk [vmem:[%s9654_s18 + $0x38] sm:$0xff] %vm5495_vm15, %v5509_v5  ;;  %v5518_v47 = vadd.f32 %v5516_v22, %v5482_v41 }
 0x76e   : > { %v5476_v63 = vpop.permute.xlu1 %5475  ;;  %v5523_v62 = vmax.f32 %v5519_v36, 0.0 }
 0x76f   : > { %v5522_v44 = vmax.f32 %v5518_v47, 0.0  ;;  %v5484_v23 = vadd.f32 %v5476_v63, %v5406_v2 }
 0x770   : > { %5886 = vst.msk [vmem:[%s9654_s18 + $0x50] sm:$0xff] %vm5495_vm15, %v5523_v62 }
 0x771   : > { %5885 = vst.msk [vmem:[%s9654_s18 + $0x48] sm:$0xff] %vm5495_vm15, %v5522_v44  ;;  %v5520_v15 = vadd.f32 %v5516_v22, %v5484_v23 }
 0x773   : > { %v5524_v58 = vmax.f32 %v5520_v15, 0.0 }
 0x775   : > { %5887 = vst.msk [vmem:[%s9654_s18 + $0x58] sm:$0xff] %vm5495_vm15, %v5524_v58 }
 0x776   : > { %6202 = shalt.err (!%p6199_p9)
}
 0x777   : > { %s6203_s14 = scalar_lea.hbm %s9693_s13, 1536  ;;  %s6207_s18 = scalar_lea.hbm %s9747_s7, 3072 }
 0x778   : > { %p6204_p7 = scmp.ne.s32.totalorder %s9693_s13, %s6203_s14  ;;  %p6208_p6 = scmp.lt.u32.totalorder %s9693_s13, %s9747_s7 }
 0x779   : > { %p6209_p12 = scmp.lt.u32.totalorder %s6207_s18, %s6203_s14  ;;  %p6211_p8 = scmp.lt.u32.totalorder %s6203_s14, %s9693_s13 }
 0x77a   : > { %p6205_p0 = pnand %p6204_p7, %p9879_p11 }
 0x77b   : > { %p6210_p10 = por %p6209_p12, %p6208_p6 }
 0x77c   : > { %p6206_p5 = pneg %p6205_p0 }
 0x77d   : > { %p6212_p13 = por %p6211_p8, %p6210_p10 }
 0x77f   : > { %p6213_p1 = pnand %p6212_p13, %p6206_p5 }
 0x781   : > { %6216 = shalt.err (!%p6213_p1)
}
 0x782   : > { %s6275_s19 = smov 128   ;;  %s6276_s8 = smov 8  }
 0x783   : > { %6058 = dma.vmem_to_hbm [thread:$0]  (%p9879_p11), %s9688_s22, 1536, %s9693_s13, %s9699_s28, %s6275_s19, %s6275_s19, %s6276_s8  }
 0x784 PF: > { %p6085_p2 = scmp.ge.s32.totalorder %s6263_s27, 2  ;;  %s5559_s29 = sand.u32 1, %s6251_s24  }
 0x785   : > { %p9880_p3 = scmp.ne.s32.totalorder %s9796_s12, 0  ;;  %s5560_s20 = scalar_lea.sflag [#allocation5], %s5559_s29 }
 0x787   : > { %p6074_p4 = pnand %p6085_p2, %p9880_p3 }
 0x789   : > { %6246 = dma.done.wait (!%p6074_p4), %s5560_s20, 1536  }
 0x78a   : > { %6248 = vsyncadd (!%p6074_p4), %s5560_s20, 4294965760  ;;  %p20_p9 = scmp.ge.s32.totalorder %s6342_s30, 4   ;;  %s9881_s24 = smov %s6255_s25 }
 0x78b   : > { %s9882_s25 = smov %s6259_s26  ;;  %s9883_s26 = smov %s6353_s10 }
 0x78c   : > { %s9884_s27 = smov %s6342_s30  ;;  %22 = sbr.rel (!%p20_p9) target bundleno = 6 (0x6), region = 107 }
 0x793   :  { %5565 = vsyncpa [#allocation5], 1 }
 0x794   :  { %5567 = vsyncpa [#allocation5 + $0x1], 1 }
 0x795   :  { %5568 = vsyncpa [#allocation6], 1 }
 0x796   :  { %5570 = vsyncpa [#allocation6 + $0x1], 1 }
 0x797   :  { %5571 = vsyncpa [#allocation8], 1 }
 0x798   :  { %5572 = vsyncpa [#allocation11], 1 }

</bundles_post_ra>
